<compile_context>
chip_gen: v7x
topology: tpu7x:2x2x1
jax: 0.10.0
libtpu: 0.0.40
codegen_flags: <defaults>
</compile_context>

<pallas_src>
import jax
import jax.numpy as jnp
from jax.experimental import pallas as pl
from jax.experimental.pallas import tpu as pltpu


# ----------------------------- in-kernel conv-as-GEMM helper ---------------------------

def _implicit_gemm(wins, w_ref, M, c):
    """Contract the 9 shifted bf16 windows with the (9*c, cout) filter (f32 acc).

    Lane-aligned channel count (c % 128 == 0): concatenate the taps along
    channels and do ONE deep-K MXU pass (fills the 256-deep v6e/v7x MXU,
    avoids 9 short result-FIFO drains).  Otherwise: 9 shallower dots split
    over two accumulators to keep the f32 add chain off the critical path.
    """
    cout = w_ref.shape[-1]
    if c % 128 == 0:
        patches = jnp.concatenate(wins, axis=-1).reshape(M, 9 * c)
        return jnp.dot(patches, w_ref[...], preferred_element_type=jnp.float32)
    acc_a = jnp.zeros((M, cout), jnp.float32)
    acc_b = jnp.zeros((M, cout), jnp.float32)
    for t in range(9):
        d = jnp.dot(wins[t].reshape(M, c), w_ref[pl.ds(t * c, c), :],
                    preferred_element_type=jnp.float32)
        if t % 2 == 0:
            acc_a = acc_a + d
        else:
            acc_b = acc_b + d
    return acc_a + acc_b


# ----------------------------- fused BasicBlock kernel ---------------------------------

def _make_basic_block_kernel(stride, Hq, Wq, Ho, Wo, Bc, has_downsample):
    """Build the fused BasicBlock kernel for static (stride, shapes, Bc, variant)."""
    s = stride
    M = Bc * Ho * Wo

    # Padded-input row r = t*s + i lives at phase (i % s), in-phase index t + i//s
    # of the phase-split layout produced by the wrapper.
    def h_start(i):
        return (i % s) * Hq + i // s

    def w_start(j):
        return (j % s) * Wq + j // s

    def kernel(*refs):
        if has_downsample:
            (x_ref, w1_ref, s1_ref, b1_ref, w2_ref, s2_ref, b2_ref,
             ws_ref, ss_ref, bs_ref, o_ref, y1p_ref) = refs
        else:
            (x_ref, w1_ref, s1_ref, b1_ref, w2_ref, s2_ref, b2_ref,
             o_ref, y1p_ref) = refs

        cin = x_ref.shape[-1]
        planes = o_ref.shape[-1]

        # ---- conv1 (3x3, stride s, pad 1) + bn1 + relu --------------------------------
        wins1 = [x_ref[:, pl.ds(h_start(i), Ho), pl.ds(w_start(j), Wo), :]
                 for i in range(3) for j in range(3)]          # 9 x (Bc, Ho, Wo, cin) bf16
        acc1 = _implicit_gemm(wins1, w1_ref, M, cin)
        y1 = jnp.maximum(acc1 * s1_ref[...] + b1_ref[...], 0.0)

        # Stage conv1 output (zero halo for conv2's pad=1) in bf16 VMEM scratch.
        # Halo is re-zeroed every step: scratch is per-TensorCore, so gating the
        # zero on program_id==0 would be wrong when the "parallel" axis is split
        # across cores.  The fill is tiny relative to the batched GEMMs.
        y1p_ref[...] = jnp.zeros(y1p_ref.shape, y1p_ref.dtype)
        y1p_ref[:, pl.ds(1, Ho), pl.ds(1, Wo), :] = (
            y1.astype(y1p_ref.dtype).reshape(Bc, Ho, Wo, planes))

        # ---- conv2 (3x3, stride 1, pad 1) + bn2 ---------------------------------------
        wins2 = [y1p_ref[:, pl.ds(i, Ho), pl.ds(j, Wo), :]
                 for i in range(3) for j in range(3)]          # 9 x (Bc, Ho, Wo, planes) bf16
        acc2 = _implicit_gemm(wins2, w2_ref, M, planes)
        y2 = acc2 * s2_ref[...] + b2_ref[...]

        # ---- shortcut (1x1 conv + bn, stride s)  OR  identity -------------------------
        centre = wins1[4]                       # reuse conv1 centre-tap window
        if has_downsample:
            sc = (jnp.dot(centre.reshape(M, cin), ws_ref[...],
                          preferred_element_type=jnp.float32)
                  * ss_ref[...] + bs_ref[...])
        else:
            sc = centre.reshape(M, planes).astype(jnp.float32)

        out = jnp.maximum(y2 + sc, 0.0)
        o_ref[...] = out.reshape(Bc, Ho, Wo, planes)

    return kernel


# ----------------------------- wrappers -------------------------------------------------

def _choose_bc(B, m_spatial, target=512):
    """Largest divisor of B with Bc * Ho*Wo <= target, keeping >= 2 grid steps
    when B >= 2 so both v7x TensorCores get work (no effect on v5e/v6e)."""
    best = 1
    for bc in range(1, B + 1):
        if B % bc:
            continue
        if bc * m_spatial > target:
            break
        if B >= 2 and B // bc < 2:
            continue
        best = bc
    return best


def basic_block_forward_nhwc(x, params):
    """x: (B, H, W, Cin) NHWC float -> (B, Ho, Wo, planes) NHWC f32."""
    B, H, W, Cin = x.shape
    s = int(params["stride"])
    planes = params["w1"].shape[-1]
    has_ds = "ws" in params

    Ho = (H + 2 - 3) // s + 1
    Wo = (W + 2 - 3) // s + 1
    Bc = _choose_bc(B, Ho * Wo)

    # bf16 activations in HBM (halves DMA bytes), conv zero-pad of 1, and a
    # phase split for stride > 1 so strided taps become contiguous windows.
    xp = jnp.pad(x.astype(jnp.bfloat16), ((0, 0), (1, 1), (1, 1), (0, 0)))
    Hp, Wp = H + 2, W + 2
    Hq, Wq = -(-Hp // s), -(-Wp // s)
    if s > 1:
        xp = jnp.pad(xp, ((0, 0), (0, Hq * s - Hp), (0, Wq * s - Wp), (0, 0)))
        # xph[b, p*Hq + hq, q*Wq + wq, c] == xp[b, hq*s + p, wq*s + q, c]
        xph = (xp.reshape(B, Hq, s, Wq, s, Cin)
                 .transpose(0, 2, 1, 4, 3, 5)
                 .reshape(B, s * Hq, s * Wq, Cin))
    else:
        xph = xp

    kernel = _make_basic_block_kernel(s, Hq, Wq, Ho, Wo, Bc, has_ds)

    inputs = [xph, params["w1"], params["s1"], params["b1"],
              params["w2"], params["s2"], params["b2"]]
    in_specs = [
        pl.BlockSpec((Bc, s * Hq, s * Wq, Cin), lambda b: (b, 0, 0, 0)),
        pl.BlockSpec((9 * Cin, planes), lambda b: (0, 0)),
        pl.BlockSpec((1, planes), lambda b: (0, 0)),
        pl.BlockSpec((1, planes), lambda b: (0, 0)),
        pl.BlockSpec((9 * planes, planes), lambda b: (0, 0)),
        pl.BlockSpec((1, planes), lambda b: (0, 0)),
        pl.BlockSpec((1, planes), lambda b: (0, 0)),
    ]
    if has_ds:
        inputs += [params["ws"], params["ss"], params["bs"]]
        in_specs += [
            pl.BlockSpec((Cin, planes), lambda b: (0, 0)),
            pl.BlockSpec((1, planes), lambda b: (0, 0)),
            pl.BlockSpec((1, planes), lambda b: (0, 0)),
        ]

    # Per-step VMEM footprint is ~1-2 MiB for these sizes -- far below every
    # generation's default scoped limit (incl. v7x's 64 MiB physical VMEM), so
    # no explicit vmem_limit_bytes is set.
    return pl.pallas_call(
        kernel,
        grid=(B // Bc,),
        in_specs=in_specs,
        out_specs=pl.BlockSpec((Bc, Ho, Wo, planes), lambda b: (b, 0, 0, 0)),
        out_shape=jax.ShapeDtypeStruct((B, Ho, Wo, planes), jnp.float32),
        scratch_shapes=[pltpu.VMEM((Bc, Ho + 2, Wo + 2, planes), jnp.bfloat16)],
        compiler_params=pltpu.CompilerParams(dimension_semantics=("parallel",)),
    )(*inputs)


def basic_block_forward(x, params):
    """PyTorch-layout wrapper: (B, Cin, H, W) f32 NCHW -> (B, planes, Ho, Wo) f32 NCHW."""
    y = basic_block_forward_nhwc(x.transpose(0, 2, 3, 1), params)
    return y.transpose(0, 3, 1, 2)


# ----------------------------- parameters (eval-mode BN folded) ------------------------

def fold_bn(gamma, beta, mean, var, eps=1e-5):
    scale = gamma / jnp.sqrt(var + eps)
    return (scale.reshape(1, -1).astype(jnp.float32),
            (beta - mean * scale).reshape(1, -1).astype(jnp.float32))


def init_bn(key, c):
    k1, k2, k3, k4 = jax.random.split(key, 4)
    gamma = jax.random.uniform(k1, (c,), jnp.float32, 0.5, 1.5)
    beta = jax.random.normal(k2, (c,), jnp.float32) * 0.1
    mean = jax.random.normal(k3, (c,), jnp.float32) * 0.1
    var = jax.random.uniform(k4, (c,), jnp.float32, 0.5, 1.5)
    return fold_bn(gamma, beta, mean, var)


def init_conv3x3(key, cin, cout):
    # PyTorch (cout, cin, 3, 3) -> kernel layout (9*cin, cout), bf16 for the MXU.
    w = jax.random.normal(key, (cout, cin, 3, 3), jnp.float32) * 0.05
    return w.transpose(2, 3, 1, 0).reshape(9 * cin, cout).astype(jnp.bfloat16)


def init_conv1x1(key, cin, cout):
    w = jax.random.normal(key, (cout, cin, 1, 1), jnp.float32) * 0.05
    return w.reshape(cout, cin).T.astype(jnp.bfloat16)


def init_basic_block(key, in_planes, planes, stride=1):
    ks = jax.random.split(key, 6)
    p = {"stride": stride, "w1": init_conv3x3(ks[0], in_planes, planes)}
    p["s1"], p["b1"] = init_bn(ks[1], planes)
    p["w2"] = init_conv3x3(ks[2], planes, planes)
    p["s2"], p["b2"] = init_bn(ks[3], planes)
    if stride != 1 or in_planes != planes:            # same condition as PyTorch
        p["ws"] = init_conv1x1(ks[4], in_planes, planes)
        p["ss"], p["bs"] = init_bn(ks[5], planes)
    return p


# ----------------------------- pure-JAX reference (for a sanity check) -----------------

def _ref_conv(x, w_hwio, stride, pad):
    return jax.lax.conv_general_dilated(
        x, w_hwio.astype(jnp.float32), window_strides=(stride, stride),
        padding=((pad, pad), (pad, pad)),
        dimension_numbers=("NCHW", "HWIO", "NCHW"),
        precision=jax.lax.Precision.HIGHEST)


def basic_block_reference(x, p):
    s = p["stride"]
    cin = x.shape[1]
    planes = p["w1"].shape[-1]

    def bn(t, sc, bi):
        return t * sc.reshape(1, -1, 1, 1) + bi.reshape(1, -1, 1, 1)

    o = jnp.maximum(bn(_ref_conv(x, p["w1"].reshape(3, 3, cin, planes), s, 1),
                       p["s1"], p["b1"]), 0.0)
    o = bn(_ref_conv(o, p["w2"].reshape(3, 3, planes, planes), 1, 1),
           p["s2"], p["b2"])
    if "ws" in p:
        sc = bn(_ref_conv(x, p["ws"].reshape(1, 1, cin, planes), s, 0),
                p["ss"], p["bs"])
    else:
        sc = x
    return jnp.maximum(o + sc, 0.0)


# ----------------------------- demo ----------------------------------------------------

if __name__ == "__main__":
    key = jax.random.PRNGKey(0)
    kx, k1, k2 = jax.random.split(key, 3)

    # BasicBlock(in_planes=64, planes=128, stride=2): exercises the 1x1-conv
    # shortcut and the unaligned (Cin=64) conv1 fallback path.  B=8 so batch
    # folding (Bc=4 -> GEMM M=256) and the 2-step "parallel" grid are exercised.
    x = jax.random.normal(kx, (8, 64, 16, 16), jnp.float32)
    blk_ds = init_basic_block(k1, 64, 128, stride=2)
    y = jax.block_until_ready(basic_block_forward(x, blk_ds))
    assert y.shape == (8, 128, 8, 8), y.shape
    assert y.dtype == jnp.float32
    y_ref = basic_block_reference(x, blk_ds)
    assert bool(jnp.allclose(y, y_ref, rtol=5e-2, atol=5e-2)), \
        float(jnp.max(jnp.abs(y - y_ref)))

    # BasicBlock(128, 128, stride=1): identity shortcut + the single deep-K
    # (K = 9*128) GEMM path; chained in NHWC to skip inter-block transposes.
    blk_id = init_basic_block(k2, 128, 128, stride=1)
    z_nhwc = jax.block_until_ready(
        basic_block_forward_nhwc(y.transpose(0, 2, 3, 1), blk_id))
    z = z_nhwc.transpose(0, 3, 1, 2)
    assert z.shape == (8, 128, 8, 8), z.shape
    z_ref = basic_block_reference(y, blk_id)
    assert bool(jnp.allclose(z, z_ref, rtol=5e-2, atol=5e-2)), \
        float(jnp.max(jnp.abs(z - z_ref)))

    assert bool(jnp.all(jnp.isfinite(z)))
    print("KERNEL_OK")
</pallas_src>

<mosaic_0001>
module attributes {stable_mosaic.version = 11 : i64} {
  func.func @kernel(%arg0: i32, %arg1: memref<4x18x18x64xbf16, #tpu.memory_space<vmem>>, %arg2: memref<576x128xbf16, #tpu.memory_space<vmem>>, %arg3: memref<1x128xf32, #tpu.memory_space<vmem>>, %arg4: memref<1x128xf32, #tpu.memory_space<vmem>>, %arg5: memref<1152x128xbf16, #tpu.memory_space<vmem>>, %arg6: memref<1x128xf32, #tpu.memory_space<vmem>>, %arg7: memref<1x128xf32, #tpu.memory_space<vmem>>, %arg8: memref<64x128xbf16, #tpu.memory_space<vmem>>, %arg9: memref<1x128xf32, #tpu.memory_space<vmem>>, %arg10: memref<1x128xf32, #tpu.memory_space<vmem>>, %arg11: memref<4x8x8x128xf32, #tpu.memory_space<vmem>>, %arg12: memref<4x10x10x128xbf16, #tpu.memory_space<vmem>>) attributes {dimension_semantics = [#tpu.dimension_semantics<parallel>], iteration_bounds = array<i64: 2>, scalar_prefetch = 0 : i64, scratch_operands = 1 : i64, tpu.core_type = #tpu.core_type<tc>, window_params = [{transform_indices = @transform_0, window_bounds = array<i64: 4, 18, 18, 64>}, {pipeline_mode = #tpu.pipeline_mode<synchronous>, transform_indices = @transform_1, window_bounds = array<i64: 576, 128>}, {pipeline_mode = #tpu.pipeline_mode<synchronous>, transform_indices = @transform_2, window_bounds = array<i64: 1, 128>}, {pipeline_mode = #tpu.pipeline_mode<synchronous>, transform_indices = @transform_3, window_bounds = array<i64: 1, 128>}, {pipeline_mode = #tpu.pipeline_mode<synchronous>, transform_indices = @transform_4, window_bounds = array<i64: 1152, 128>}, {pipeline_mode = #tpu.pipeline_mode<synchronous>, transform_indices = @transform_5, window_bounds = array<i64: 1, 128>}, {pipeline_mode = #tpu.pipeline_mode<synchronous>, transform_indices = @transform_6, window_bounds = array<i64: 1, 128>}, {pipeline_mode = #tpu.pipeline_mode<synchronous>, transform_indices = @transform_7, window_bounds = array<i64: 64, 128>}, {pipeline_mode = #tpu.pipeline_mode<synchronous>, transform_indices = @transform_8, window_bounds = array<i64: 1, 128>}, {pipeline_mode = #tpu.pipeline_mode<synchronous>, transform_indices = @transform_9, window_bounds = array<i64: 1, 128>}, {transform_indices = @transform_10, window_bounds = array<i64: 4, 8, 8, 128>}]} {
    %c0 = arith.constant 0 : index
    %c0_0 = arith.constant 0 : index
    %c0_1 = arith.constant 0 : index
    %c0_2 = arith.constant 0 : index
    %0 = vector.load %arg1[%c0, %c0_0, %c0_1, %c0_2] : memref<4x18x18x64xbf16, #tpu.memory_space<vmem>>, vector<4x8x8x64xbf16>
    %c0_3 = arith.constant 0 : index
    %c0_4 = arith.constant 0 : index
    %c9 = arith.constant 9 : index
    %c0_5 = arith.constant 0 : index
    %1 = vector.load %arg1[%c0_3, %c0_4, %c9, %c0_5] : memref<4x18x18x64xbf16, #tpu.memory_space<vmem>>, vector<4x8x8x64xbf16>
    %c0_6 = arith.constant 0 : index
    %c0_7 = arith.constant 0 : index
    %c1 = arith.constant 1 : index
    %c0_8 = arith.constant 0 : index
    %2 = vector.load %arg1[%c0_6, %c0_7, %c1, %c0_8] : memref<4x18x18x64xbf16, #tpu.memory_space<vmem>>, vector<4x8x8x64xbf16>
    %c0_9 = arith.constant 0 : index
    %c9_10 = arith.constant 9 : index
    %c0_11 = arith.constant 0 : index
    %c0_12 = arith.constant 0 : index
    %3 = vector.load %arg1[%c0_9, %c9_10, %c0_11, %c0_12] : memref<4x18x18x64xbf16, #tpu.memory_space<vmem>>, vector<4x8x8x64xbf16>
    %c0_13 = arith.constant 0 : index
    %c9_14 = arith.constant 9 : index
    %c9_15 = arith.constant 9 : index
    %c0_16 = arith.constant 0 : index
    %4 = vector.load %arg1[%c0_13, %c9_14, %c9_15, %c0_16] : memref<4x18x18x64xbf16, #tpu.memory_space<vmem>>, vector<4x8x8x64xbf16>
    %c0_17 = arith.constant 0 : index
    %c9_18 = arith.constant 9 : index
    %c1_19 = arith.constant 1 : index
    %c0_20 = arith.constant 0 : index
    %5 = vector.load %arg1[%c0_17, %c9_18, %c1_19, %c0_20] : memref<4x18x18x64xbf16, #tpu.memory_space<vmem>>, vector<4x8x8x64xbf16>
    %c0_21 = arith.constant 0 : index
    %c1_22 = arith.constant 1 : index
    %c0_23 = arith.constant 0 : index
    %c0_24 = arith.constant 0 : index
    %6 = vector.load %arg1[%c0_21, %c1_22, %c0_23, %c0_24] : memref<4x18x18x64xbf16, #tpu.memory_space<vmem>>, vector<4x8x8x64xbf16>
    %c0_25 = arith.constant 0 : index
    %c1_26 = arith.constant 1 : index
    %c9_27 = arith.constant 9 : index
    %c0_28 = arith.constant 0 : index
    %7 = vector.load %arg1[%c0_25, %c1_26, %c9_27, %c0_28] : memref<4x18x18x64xbf16, #tpu.memory_space<vmem>>, vector<4x8x8x64xbf16>
    %c0_29 = arith.constant 0 : index
    %c1_30 = arith.constant 1 : index
    %c1_31 = arith.constant 1 : index
    %c0_32 = arith.constant 0 : index
    %8 = vector.load %arg1[%c0_29, %c1_30, %c1_31, %c0_32] : memref<4x18x18x64xbf16, #tpu.memory_space<vmem>>, vector<4x8x8x64xbf16>
    %cst = arith.constant 0.000000e+00 : f32
    %9 = vector.broadcast %cst : f32 to vector<256x128xf32>
    %cst_33 = arith.constant 0.000000e+00 : f32
    %10 = vector.broadcast %cst_33 : f32 to vector<256x128xf32>
    %11 = vector.shape_cast %0 : vector<4x8x8x64xbf16> to vector<256x64xbf16>
    %c0_34 = arith.constant 0 : index
    %c0_35 = arith.constant 0 : index
    %12 = vector.load %arg2[%c0_34, %c0_35] : memref<576x128xbf16, #tpu.memory_space<vmem>>, vector<64x128xbf16>
    %cst_36 = arith.constant dense<0.000000e+00> : vector<256x128xf32>
    %13 = tpu.matmul %11, %12, %cst_36 {dimension_numbers = #tpu.dot_dimension_numbers<[1], [0], [0], [1], [0, 0, 1, 1], [], []>} : vector<256x64xbf16>, vector<64x128xbf16>, vector<256x128xf32> -> vector<256x128xf32>
    %14 = arith.addf %9, %13 : vector<256x128xf32>
    %15 = vector.shape_cast %1 : vector<4x8x8x64xbf16> to vector<256x64xbf16>
    %c64 = arith.constant 64 : index
    %c0_37 = arith.constant 0 : index
    %16 = vector.load %arg2[%c64, %c0_37] : memref<576x128xbf16, #tpu.memory_space<vmem>>, vector<64x128xbf16>
    %cst_38 = arith.constant dense<0.000000e+00> : vector<256x128xf32>
    %17 = tpu.matmul %15, %16, %cst_38 {dimension_numbers = #tpu.dot_dimension_numbers<[1], [0], [0], [1], [0, 0, 1, 1], [], []>} : vector<256x64xbf16>, vector<64x128xbf16>, vector<256x128xf32> -> vector<256x128xf32>
    %18 = arith.addf %10, %17 : vector<256x128xf32>
    %19 = vector.shape_cast %2 : vector<4x8x8x64xbf16> to vector<256x64xbf16>
    %c128 = arith.constant 128 : index
    %c0_39 = arith.constant 0 : index
    %20 = vector.load %arg2[%c128, %c0_39] : memref<576x128xbf16, #tpu.memory_space<vmem>>, vector<64x128xbf16>
    %cst_40 = arith.constant dense<0.000000e+00> : vector<256x128xf32>
    %21 = tpu.matmul %19, %20, %cst_40 {dimension_numbers = #tpu.dot_dimension_numbers<[1], [0], [0], [1], [0, 0, 1, 1], [], []>} : vector<256x64xbf16>, vector<64x128xbf16>, vector<256x128xf32> -> vector<256x128xf32>
    %22 = arith.addf %14, %21 : vector<256x128xf32>
    %23 = vector.shape_cast %3 : vector<4x8x8x64xbf16> to vector<256x64xbf16>
    %c192 = arith.constant 192 : index
    %c0_41 = arith.constant 0 : index
    %24 = vector.load %arg2[%c192, %c0_41] : memref<576x128xbf16, #tpu.memory_space<vmem>>, vector<64x128xbf16>
    %cst_42 = arith.constant dense<0.000000e+00> : vector<256x128xf32>
    %25 = tpu.matmul %23, %24, %cst_42 {dimension_numbers = #tpu.dot_dimension_numbers<[1], [0], [0], [1], [0, 0, 1, 1], [], []>} : vector<256x64xbf16>, vector<64x128xbf16>, vector<256x128xf32> -> vector<256x128xf32>
    %26 = arith.addf %18, %25 : vector<256x128xf32>
    %27 = vector.shape_cast %4 : vector<4x8x8x64xbf16> to vector<256x64xbf16>
    %c256 = arith.constant 256 : index
    %c0_43 = arith.constant 0 : index
    %28 = vector.load %arg2[%c256, %c0_43] : memref<576x128xbf16, #tpu.memory_space<vmem>>, vector<64x128xbf16>
    %cst_44 = arith.constant dense<0.000000e+00> : vector<256x128xf32>
    %29 = tpu.matmul %27, %28, %cst_44 {dimension_numbers = #tpu.dot_dimension_numbers<[1], [0], [0], [1], [0, 0, 1, 1], [], []>} : vector<256x64xbf16>, vector<64x128xbf16>, vector<256x128xf32> -> vector<256x128xf32>
    %30 = arith.addf %22, %29 : vector<256x128xf32>
    %31 = vector.shape_cast %5 : vector<4x8x8x64xbf16> to vector<256x64xbf16>
    %c320 = arith.constant 320 : index
    %c0_45 = arith.constant 0 : index
    %32 = vector.load %arg2[%c320, %c0_45] : memref<576x128xbf16, #tpu.memory_space<vmem>>, vector<64x128xbf16>
    %cst_46 = arith.constant dense<0.000000e+00> : vector<256x128xf32>
    %33 = tpu.matmul %31, %32, %cst_46 {dimension_numbers = #tpu.dot_dimension_numbers<[1], [0], [0], [1], [0, 0, 1, 1], [], []>} : vector<256x64xbf16>, vector<64x128xbf16>, vector<256x128xf32> -> vector<256x128xf32>
    %34 = arith.addf %26, %33 : vector<256x128xf32>
    %35 = vector.shape_cast %6 : vector<4x8x8x64xbf16> to vector<256x64xbf16>
    %c384 = arith.constant 384 : index
    %c0_47 = arith.constant 0 : index
    %36 = vector.load %arg2[%c384, %c0_47] : memref<576x128xbf16, #tpu.memory_space<vmem>>, vector<64x128xbf16>
    %cst_48 = arith.constant dense<0.000000e+00> : vector<256x128xf32>
    %37 = tpu.matmul %35, %36, %cst_48 {dimension_numbers = #tpu.dot_dimension_numbers<[1], [0], [0], [1], [0, 0, 1, 1], [], []>} : vector<256x64xbf16>, vector<64x128xbf16>, vector<256x128xf32> -> vector<256x128xf32>
    %38 = arith.addf %30, %37 : vector<256x128xf32>
    %39 = vector.shape_cast %7 : vector<4x8x8x64xbf16> to vector<256x64xbf16>
    %c448 = arith.constant 448 : index
    %c0_49 = arith.constant 0 : index
    %40 = vector.load %arg2[%c448, %c0_49] : memref<576x128xbf16, #tpu.memory_space<vmem>>, vector<64x128xbf16>
    %cst_50 = arith.constant dense<0.000000e+00> : vector<256x128xf32>
    %41 = tpu.matmul %39, %40, %cst_50 {dimension_numbers = #tpu.dot_dimension_numbers<[1], [0], [0], [1], [0, 0, 1, 1], [], []>} : vector<256x64xbf16>, vector<64x128xbf16>, vector<256x128xf32> -> vector<256x128xf32>
    %42 = arith.addf %34, %41 : vector<256x128xf32>
    %43 = vector.shape_cast %8 : vector<4x8x8x64xbf16> to vector<256x64xbf16>
    %c512 = arith.constant 512 : index
    %c0_51 = arith.constant 0 : index
    %44 = vector.load %arg2[%c512, %c0_51] : memref<576x128xbf16, #tpu.memory_space<vmem>>, vector<64x128xbf16>
    %cst_52 = arith.constant dense<0.000000e+00> : vector<256x128xf32>
    %45 = tpu.matmul %43, %44, %cst_52 {dimension_numbers = #tpu.dot_dimension_numbers<[1], [0], [0], [1], [0, 0, 1, 1], [], []>} : vector<256x64xbf16>, vector<64x128xbf16>, vector<256x128xf32> -> vector<256x128xf32>
    %46 = arith.addf %38, %45 : vector<256x128xf32>
    %47 = arith.addf %46, %42 : vector<256x128xf32>
    %c0_53 = arith.constant 0 : index
    %c0_54 = arith.constant 0 : index
    %48 = vector.load %arg3[%c0_53, %c0_54] : memref<1x128xf32, #tpu.memory_space<vmem>>, vector<1x128xf32>
    %49 = vector.broadcast %48 : vector<1x128xf32> to vector<256x128xf32>
    %50 = arith.mulf %47, %49 : vector<256x128xf32>
    %c0_55 = arith.constant 0 : index
    %c0_56 = arith.constant 0 : index
    %51 = vector.load %arg4[%c0_55, %c0_56] : memref<1x128xf32, #tpu.memory_space<vmem>>, vector<1x128xf32>
    %52 = vector.broadcast %51 : vector<1x128xf32> to vector<256x128xf32>
    %53 = arith.addf %50, %52 : vector<256x128xf32>
    %cst_57 = arith.constant 0.000000e+00 : f32
    %54 = vector.broadcast %cst_57 : f32 to vector<256x128xf32>
    %55 = arith.maximumf %53, %54 : vector<256x128xf32>
    %cst_58 = arith.constant 0.000000e+00 : bf16
    %56 = vector.broadcast %cst_58 : bf16 to vector<4x10x10x128xbf16>
    %c0_59 = arith.constant 0 : index
    %c0_60 = arith.constant 0 : index
    %c0_61 = arith.constant 0 : index
    %c0_62 = arith.constant 0 : index
    %57 = vector.load %arg12[%c0_59, %c0_60, %c0_61, %c0_62] : memref<4x10x10x128xbf16, #tpu.memory_space<vmem>>, vector<4x10x10x128xbf16>
    tpu.vector_store %arg12[%c0_59, %c0_60, %c0_61, %c0_62], %56 {strides = array<i32>} : memref<4x10x10x128xbf16, #tpu.memory_space<vmem>>, vector<4x10x10x128xbf16>,
    %58 = arith.truncf %55 : vector<256x128xf32> to vector<256x128xbf16>
    %59 = vector.shape_cast %58 : vector<256x128xbf16> to vector<4x8x8x128xbf16>
    %c0_63 = arith.constant 0 : index
    %c1_64 = arith.constant 1 : index
    %c1_65 = arith.constant 1 : index
    %c0_66 = arith.constant 0 : index
    %60 = vector.load %arg12[%c0_63, %c1_64, %c1_65, %c0_66] : memref<4x10x10x128xbf16, #tpu.memory_space<vmem>>, vector<4x8x8x128xbf16>
    tpu.vector_store %arg12[%c0_63, %c1_64, %c1_65, %c0_66], %59 {strides = array<i32>} : memref<4x10x10x128xbf16, #tpu.memory_space<vmem>>, vector<4x8x8x128xbf16>,
    %c0_67 = arith.constant 0 : index
    %c0_68 = arith.constant 0 : index
    %c0_69 = arith.constant 0 : index
    %c0_70 = arith.constant 0 : index
    %61 = vector.load %arg12[%c0_67, %c0_68, %c0_69, %c0_70] : memref<4x10x10x128xbf16, #tpu.memory_space<vmem>>, vector<4x8x8x128xbf16>
    %c0_71 = arith.constant 0 : index
    %c0_72 = arith.constant 0 : index
    %c1_73 = arith.constant 1 : index
    %c0_74 = arith.constant 0 : index
    %62 = vector.load %arg12[%c0_71, %c0_72, %c1_73, %c0_74] : memref<4x10x10x128xbf16, #tpu.memory_space<vmem>>, vector<4x8x8x128xbf16>
    %c0_75 = arith.constant 0 : index
    %c0_76 = arith.constant 0 : index
    %c2 = arith.constant 2 : index
    %c0_77 = arith.constant 0 : index
    %63 = vector.load %arg12[%c0_75, %c0_76, %c2, %c0_77] : memref<4x10x10x128xbf16, #tpu.memory_space<vmem>>, vector<4x8x8x128xbf16>
    %c0_78 = arith.constant 0 : index
    %c1_79 = arith.constant 1 : index
    %c0_80 = arith.constant 0 : index
    %c0_81 = arith.constant 0 : index
    %64 = vector.load %arg12[%c0_78, %c1_79, %c0_80, %c0_81] : memref<4x10x10x128xbf16, #tpu.memory_space<vmem>>, vector<4x8x8x128xbf16>
    %c0_82 = arith.constant 0 : index
    %c1_83 = arith.constant 1 : index
    %c1_84 = arith.constant 1 : index
    %c0_85 = arith.constant 0 : index
    %65 = vector.load %arg12[%c0_82, %c1_83, %c1_84, %c0_85] : memref<4x10x10x128xbf16, #tpu.memory_space<vmem>>, vector<4x8x8x128xbf16>
    %c0_86 = arith.constant 0 : index
    %c1_87 = arith.constant 1 : index
    %c2_88 = arith.constant 2 : index
    %c0_89 = arith.constant 0 : index
    %66 = vector.load %arg12[%c0_86, %c1_87, %c2_88, %c0_89] : memref<4x10x10x128xbf16, #tpu.memory_space<vmem>>, vector<4x8x8x128xbf16>
    %c0_90 = arith.constant 0 : index
    %c2_91 = arith.constant 2 : index
    %c0_92 = arith.constant 0 : index
    %c0_93 = arith.constant 0 : index
    %67 = vector.load %arg12[%c0_90, %c2_91, %c0_92, %c0_93] : memref<4x10x10x128xbf16, #tpu.memory_space<vmem>>, vector<4x8x8x128xbf16>
    %c0_94 = arith.constant 0 : index
    %c2_95 = arith.constant 2 : index
    %c1_96 = arith.constant 1 : index
    %c0_97 = arith.constant 0 : index
    %68 = vector.load %arg12[%c0_94, %c2_95, %c1_96, %c0_97] : memref<4x10x10x128xbf16, #tpu.memory_space<vmem>>, vector<4x8x8x128xbf16>
    %c0_98 = arith.constant 0 : index
    %c2_99 = arith.constant 2 : index
    %c2_100 = arith.constant 2 : index
    %c0_101 = arith.constant 0 : index
    %69 = vector.load %arg12[%c0_98, %c2_99, %c2_100, %c0_101] : memref<4x10x10x128xbf16, #tpu.memory_space<vmem>>, vector<4x8x8x128xbf16>
    %70 = tpu.concatenate %61, %62, %63, %64, %65, %66, %67, %68, %69 in 3 : vector<4x8x8x128xbf16>, vector<4x8x8x128xbf16>, vector<4x8x8x128xbf16>, vector<4x8x8x128xbf16>, vector<4x8x8x128xbf16>, vector<4x8x8x128xbf16>, vector<4x8x8x128xbf16>, vector<4x8x8x128xbf16>, vector<4x8x8x128xbf16> -> vector<4x8x8x1152xbf16>
    %71 = vector.shape_cast %70 : vector<4x8x8x1152xbf16> to vector<256x1152xbf16>
    %c0_102 = arith.constant 0 : index
    %c0_103 = arith.constant 0 : index
    %72 = vector.load %arg5[%c0_102, %c0_103] : memref<1152x128xbf16, #tpu.memory_space<vmem>>, vector<1152x128xbf16>
    %cst_104 = arith.constant dense<0.000000e+00> : vector<256x128xf32>
    %73 = tpu.matmul %71, %72, %cst_104 {dimension_numbers = #tpu.dot_dimension_numbers<[1], [0], [0], [1], [0, 0, 1, 1], [], []>} : vector<256x1152xbf16>, vector<1152x128xbf16>, vector<256x128xf32> -> vector<256x128xf32>
    %c0_105 = arith.constant 0 : index
    %c0_106 = arith.constant 0 : index
    %74 = vector.load %arg6[%c0_105, %c0_106] : memref<1x128xf32, #tpu.memory_space<vmem>>, vector<1x128xf32>
    %75 = vector.broadcast %74 : vector<1x128xf32> to vector<256x128xf32>
    %76 = arith.mulf %73, %75 : vector<256x128xf32>
    %c0_107 = arith.constant 0 : index
    %c0_108 = arith.constant 0 : index
    %77 = vector.load %arg7[%c0_107, %c0_108] : memref<1x128xf32, #tpu.memory_space<vmem>>, vector<1x128xf32>
    %78 = vector.broadcast %77 : vector<1x128xf32> to vector<256x128xf32>
    %79 = arith.addf %76, %78 : vector<256x128xf32>
    %80 = vector.shape_cast %4 : vector<4x8x8x64xbf16> to vector<256x64xbf16>
    %c0_109 = arith.constant 0 : index
    %c0_110 = arith.constant 0 : index
    %81 = vector.load %arg8[%c0_109, %c0_110] : memref<64x128xbf16, #tpu.memory_space<vmem>>, vector<64x128xbf16>
    %cst_111 = arith.constant dense<0.000000e+00> : vector<256x128xf32>
    %82 = tpu.matmul %80, %81, %cst_111 {dimension_numbers = #tpu.dot_dimension_numbers<[1], [0], [0], [1], [0, 0, 1, 1], [], []>} : vector<256x64xbf16>, vector<64x128xbf16>, vector<256x128xf32> -> vector<256x128xf32>
    %c0_112 = arith.constant 0 : index
    %c0_113 = arith.constant 0 : index
    %83 = vector.load %arg9[%c0_112, %c0_113] : memref<1x128xf32, #tpu.memory_space<vmem>>, vector<1x128xf32>
    %84 = vector.broadcast %83 : vector<1x128xf32> to vector<256x128xf32>
    %85 = arith.mulf %82, %84 : vector<256x128xf32>
    %c0_114 = arith.constant 0 : index
    %c0_115 = arith.constant 0 : index
    %86 = vector.load %arg10[%c0_114, %c0_115] : memref<1x128xf32, #tpu.memory_space<vmem>>, vector<1x128xf32>
    %87 = vector.broadcast %86 : vector<1x128xf32> to vector<256x128xf32>
    %88 = arith.addf %85, %87 : vector<256x128xf32>
    %89 = arith.addf %79, %88 : vector<256x128xf32>
    %cst_116 = arith.constant 0.000000e+00 : f32
    %90 = vector.broadcast %cst_116 : f32 to vector<256x128xf32>
    %91 = arith.maximumf %89, %90 : vector<256x128xf32>
    %92 = vector.shape_cast %91 : vector<256x128xf32> to vector<4x8x8x128xf32>
    %c0_117 = arith.constant 0 : index
    %c0_118 = arith.constant 0 : index
    %c0_119 = arith.constant 0 : index
    %c0_120 = arith.constant 0 : index
    %93 = vector.load %arg11[%c0_117, %c0_118, %c0_119, %c0_120] : memref<4x8x8x128xf32, #tpu.memory_space<vmem>>, vector<4x8x8x128xf32>
    tpu.vector_store %arg11[%c0_117, %c0_118, %c0_119, %c0_120], %92 {strides = array<i32>} : memref<4x8x8x128xf32, #tpu.memory_space<vmem>>, vector<4x8x8x128xf32>,
    return
  }
  func.func @transform_0(%arg0: i32) -> (i32, i32, i32, i32) {
    %c0_i32 = arith.constant 0 : i32
    %c0_i32_0 = arith.constant 0 : i32
    %c0_i32_1 = arith.constant 0 : i32
    %c0_i32_2 = arith.constant 0 : i32
    return %arg0, %c0_i32, %c0_i32_0, %c0_i32_1 : i32, i32, i32, i32
  }
  func.func @transform_1(%arg0: i32) -> (i32, i32) {
    %c0_i32 = arith.constant 0 : i32
    %c0_i32_0 = arith.constant 0 : i32
    %c0_i32_1 = arith.constant 0 : i32
    return %c0_i32, %c0_i32_0 : i32, i32
  }
  func.func @transform_2(%arg0: i32) -> (i32, i32) {
    %c0_i32 = arith.constant 0 : i32
    %c0_i32_0 = arith.constant 0 : i32
    %c0_i32_1 = arith.constant 0 : i32
    return %c0_i32, %c0_i32_0 : i32, i32
  }
  func.func @transform_3(%arg0: i32) -> (i32, i32) {
    %c0_i32 = arith.constant 0 : i32
    %c0_i32_0 = arith.constant 0 : i32
    %c0_i32_1 = arith.constant 0 : i32
    return %c0_i32, %c0_i32_0 : i32, i32
  }
  func.func @transform_4(%arg0: i32) -> (i32, i32) {
    %c0_i32 = arith.constant 0 : i32
    %c0_i32_0 = arith.constant 0 : i32
    %c0_i32_1 = arith.constant 0 : i32
    return %c0_i32, %c0_i32_0 : i32, i32
  }
  func.func @transform_5(%arg0: i32) -> (i32, i32) {
    %c0_i32 = arith.constant 0 : i32
    %c0_i32_0 = arith.constant 0 : i32
    %c0_i32_1 = arith.constant 0 : i32
    return %c0_i32, %c0_i32_0 : i32, i32
  }
  func.func @transform_6(%arg0: i32) -> (i32, i32) {
    %c0_i32 = arith.constant 0 : i32
    %c0_i32_0 = arith.constant 0 : i32
    %c0_i32_1 = arith.constant 0 : i32
    return %c0_i32, %c0_i32_0 : i32, i32
  }
  func.func @transform_7(%arg0: i32) -> (i32, i32) {
    %c0_i32 = arith.constant 0 : i32
    %c0_i32_0 = arith.constant 0 : i32
    %c0_i32_1 = arith.constant 0 : i32
    return %c0_i32, %c0_i32_0 : i32, i32
  }
  func.func @transform_8(%arg0: i32) -> (i32, i32) {
    %c0_i32 = arith.constant 0 : i32
    %c0_i32_0 = arith.constant 0 : i32
    %c0_i32_1 = arith.constant 0 : i32
    return %c0_i32, %c0_i32_0 : i32, i32
  }
  func.func @transform_9(%arg0: i32) -> (i32, i32) {
    %c0_i32 = arith.constant 0 : i32
    %c0_i32_0 = arith.constant 0 : i32
    %c0_i32_1 = arith.constant 0 : i32
    return %c0_i32, %c0_i32_0 : i32, i32
  }
  func.func @transform_10(%arg0: i32) -> (i32, i32, i32, i32) {
    %c0_i32 = arith.constant 0 : i32
    %c0_i32_0 = arith.constant 0 : i32
    %c0_i32_1 = arith.constant 0 : i32
    %c0_i32_2 = arith.constant 0 : i32
    return %arg0, %c0_i32, %c0_i32_0, %c0_i32_1 : i32, i32, i32, i32
  }
}

</mosaic_0001>

<bundles_post_ra>
// kernel: tpu_custom_call.1
= control target key start
LH: loop header
LB: loop body
LE: loop exit
PB: predicated region body
PF: predicated region fallthrough
CT: control target
= control target key end

     0   :  { %15 = vsyncpa [#allocation4], 0  ;;  %s19643_s0 = inlined_call_operand.vmem [shape: bf16[8,18,18,64], index: 0, kind: input, shape index: {}]   ;;  %s19644_s1 = inlined_call_operand.vmem [shape: bf16[576,128], index: 1, kind: input, shape index: {}]   ;;  %s19645_s2 = inlined_call_operand.vmem [shape: f32[1,128], index: 2, kind: input, shape index: {}]   ;;  %s19646_s3 = inlined_call_operand.vmem [shape: f32[1,128], index: 3, kind: input, shape index: {}]   ;;  %s19647_s4 = inlined_call_operand.vmem [shape: bf16[1152,128], index: 4, kind: input, shape index: {}]   ;;  %s19648_s5 = inlined_call_operand.vmem [shape: f32[1,128], index: 5, kind: input, shape index: {}]   ;;  %s19649_s6 = inlined_call_operand.vmem [shape: f32[1,128], index: 6, kind: input, shape index: {}]   ;;  %s19650_s7 = inlined_call_operand.vmem [shape: bf16[64,128], index: 7, kind: input, shape index: {}]   ;;  %s19651_s8 = inlined_call_operand.vmem [shape: f32[1,128], index: 8, kind: input, shape index: {}]   ;;  %s19652_s9 = inlined_call_operand.vmem [shape: f32[1,128], index: 9, kind: input, shape index: {}]   ;;  %s19653_s10 = inlined_call_operand.hbm [shape: f32[8,8,8,128], index: 10, kind: output, shape index: {}]  }
   0x1   :  { %17 = vsyncpa [#allocation4 + $0x1], 0  ;;  %s14470_s13 = smov 0   ;;  %s14472_s14 = smov 0  }
   0x2   :  { %s14474_s15 = smov 0   ;;  %s14476_s16 = smov 0  }
   0x3 LB: > { %s14491_s17 = sadd.s32 4294967295, %s14409_s16   ;;  %s11345_s18 = sadd.s32 4294967294, %s14409_s16   ;;  %s14409_s16 = sphi %s14476_s16, %s20459_s16   ;;  %s14405_s15 = sphi %s14474_s15, %s20458_s15   ;;  %s14401_s14 = sphi %s14472_s14, %s20457_s14   ;;  %s14397_s13 = sphi %s14470_s13, %s20456_s13  }
   0x4   : > { %s14495_s19 = sadd.s32 1, %s14409_s16   ;;  %s245_s20 = sadd.s32 1, %s14405_s15 }
   0x5   : > { %s242_s21 = ssub.s32 %s14409_s16, %s14495_s19  ;;  %p255_p0 = scmp.ne.s32.totalorder %s14405_s15, %s14401_s14 }
   0x6   : > { %p243_p1 = scmp.eq.s32.totalorder %s242_s21, 0  ;;  %p256_p2 = scmp.eq.s32.totalorder %s14491_s17, 1 }
   0x7   : > { %p261_p3 = scmp.ne.s32.totalorder %s14401_s14, %s14397_s13  ;;  %p262_p4 = scmp.eq.s32.totalorder %s11345_s18, 1 }
   0x8   : > { %s14506_s22 = scalar_select %p243_p1, %s14405_s15, %s245_s20  }
   0x9   : > { %p14508_p5 = por %p256_p2, %p255_p0  ;;  %p14512_p6 = por %p262_p4, %p261_p3 }
   0xa   : > { %p11348_p7 = scmp.ge.s32.totalorder %s14409_s16, 1  ;;  %p317_p8 = scmp.lt.s32.totalorder %s14409_s16, 3 }
   0xc   : > { %p318_p9 = pnand %p11348_p7, %p317_p8 }
   0xe   : > { %321 = sbr.rel (%p318_p9) target bundleno = 1650 (0x672), region = 60 }
  0x15   : > { %v13865_v0 = vld [vmem:[%s19644_s1 + $0x40] sm:$0xff]   ;;  %s11350_s27 = sshll.u32 %s14491_s17, 2  ;;  %v13866_v1 = vld [vmem:[%s19644_s1 + $0x48] sm:$0xff]   ;;  %v13867_v2 = vld [vmem:[%s19644_s1 + $0x50] sm:$0xff]   ;;  %vm759_vm0 = vsmask.f32 3328 }
  0x16   : > { %p357_p10 = scmp.lt.s32.totalorder %s11350_s27, 7  ;;  %13110 = vmatprep.subr.bf16.mxu0 %v13865_v0  ;;  %13558 = vmatprep.subr.bf16.mxu1 %v13865_v0  ;;  %v13868_v3 = vld [vmem:[%s19644_s1 + $0x58] sm:$0xff]   ;;  %vm760_vm1 = vsmask.f32 7440  ;;  %vm1746_vm2 = vcmask 523264   ;;  %v14551_v14 = vld [vmem:[%s19644_s1] sm:$0xff]  }
  0x17   : > { %13111 = vmatpush3.bf16.msra.mxu0 %v13865_v0  ;;  %13562 = vmatpush3.bf16.msra.mxu1 %v13865_v0  ;;  %vm14570_vm3 = vmor %vm759_vm0, %vm760_vm1  ;;  %vm6939_vm4 = vcmask 1043456   ;;  %vm6940_vm5 = vsmask.f32 7938  ;;  %vm6945_vm6 = vcmask 1040384   ;;  %vm6946_vm7 = vsmask.f32 256 }
  0x18   : > { %s20461_s27 = smov (!%p357_p10, %s11350_s27), 7  ;;  %13112 = vmatprep.subr.bf16.mxu0 %v13866_v1  ;;  %13559 = vmatprep.subr.bf16.mxu1 %v13866_v1  ;;  %vm17399_vm8 = vmand %vm6939_vm4, %vm6940_vm5  ;;  %s353_s11 = sand.u32 1, %s14401_s14  }
  0x19   : > { %s13822_s12 = smul.u32 216, %s20461_s27  ;;  %vm17406_vm9 = vmand %vm6945_vm6, %vm6946_vm7  ;;  %s11349_s20 = sshll.u32 %s353_s11, 8 }
  0x1a   : > { %s19398_s21 = scalar_lea.vmem [#allocation3], %s11349_s20  ;;  %s12437_s25 = sshll.u32 %s14491_s17, 12 }
  0x1b   : > { %13113 = vmatpush3.bf16.msra.mxu0 %v13866_v1  ;;  %s14534_s26 = scalar_lea.vmem %s19643_s0, %s13822_s12  ;;  %13563 = vmatpush3.bf16.msra.mxu1 %v13866_v1  ;;  %s11283_s27 = sshll.u32 %s19398_s21, 4  ;;  %s19595_s27 = int_to_ptr.vmem [resolvable:$true] %s11283_s27 }
  0x1c   : > { %13114 = vmatprep.subr.bf16.mxu0 %v13867_v2  ;;  %v14537_v4 = vld [vmem:[%s14534_s26] sm:$0xf]  ;;  %v14540_v5 = vld [vmem:[%s14534_s26 + $0xc] sm:$0xf]  ;;  %v461_v6 = vld [vmem:[%s14534_s26 + $0x4] sm:$0x1]  ;;  %13560 = vmatprep.subr.bf16.mxu1 %v13867_v2  ;;  %s19593_s30 = scalar_lea.hbm %s19653_s10, %s12437_s25 }
  0x1d   : > { %v462_v7 = vld [vmem:[%s14534_s26 + $0x10] sm:$0x1]  ;;  %v1219_v8 = vshrl.u32 %v14537_v4, 16  ;;  %v1222_v9 = vshll.u32 %v14537_v4, 16  ;;  %v1228_v10 = vshll.u32 %v461_v6, 16  ;;  %v1233_v11 = vshrl.u32 %v14540_v5, 16 }
  0x1e   : > { %v1236_v12 = vshll.u32 %v14540_v5, 16  ;;  %v1242_v13 = vshll.u32 %v462_v7, 16  ;;  %v14554_v15 = vld [vmem:[%s14534_s26 + $0x18] sm:$0xf]  ;;  %v14557_v16 = vld [vmem:[%s14534_s26 + $0x24] sm:$0xf] }
  0x1f   : > { %13115 = vmatpush3.bf16.msra.mxu0 %v13867_v2  ;;  %v1221_v17 = vrot.slane %v1219_v8, 4  ;;  %v1224_v18 = vrot.slane %v1222_v9, 5  ;;  %v1230_v19 = vrot.slane %v1228_v10, 5  ;;  %v1235_v20 = vrot.slane %v1233_v11, 4  ;;  %v463_v21 = vld [vmem:[%s14534_s26 + $0x1c] sm:$0x1]  ;;  %13564 = vmatpush3.bf16.msra.mxu1 %v13867_v2 }
  0x20   : > { %13116 = vmatprep.subr.bf16.mxu0 %v13868_v3  ;;  %v1238_v22 = vrot.slane %v1236_v12, 5  ;;  %v1244_v23 = vrot.slane %v1242_v13, 5  ;;  %v464_v24 = vld [vmem:[%s14534_s26 + $0x28] sm:$0x1]  ;;  %v1247_v25 = vshrl.u32 %v14554_v15, 16  ;;  %v1250_v26 = vshll.u32 %v14554_v15, 16  ;;  %13561 = vmatprep.subr.bf16.mxu1 %v13868_v3 }
  0x21   : > { %v1225_v27 = vor.u32 %v1224_v18, %v1221_v17  ;;  %v1256_v28 = vshll.u32 %v463_v21, 16  ;;  %v1261_v29 = vshrl.u32 %v14557_v16, 16  ;;  %v1264_v30 = vshll.u32 %v14557_v16, 16  ;;  %v14566_v31 = vld [vmem:[%s14534_s26 + $0x30] sm:$0xf]  ;;  %v13870_v13 = vld [vmem:[%s19644_s1 + $0x8] sm:$0xff]  }
  0x22   : > { %v1239_v33 = vor.u32 %v1238_v22, %v1235_v20  ;;  %v1249_v34 = vrot.slane %v1247_v25, 4  ;;  %v1252_v35 = vrot.slane %v1250_v26, 5  ;;  %v1270_v36 = vshll.u32 %v464_v24, 16  ;;  %v14575_v37 = vld [vmem:[%s14534_s26 + $0x3c] sm:$0xf]  ;;  %s19602_s17 = scalar_lea.sflag [#allocation4], %s353_s11 }
  0x23   : > { %13117 = vmatpush3.bf16.msra.mxu0 %v13868_v3  ;;  %v1226_v38 = vrot.slane %v1225_v27, 4  ;;  %v1258_v39 = vrot.slane %v1256_v28, 5  ;;  %v1263_v40 = vrot.slane %v1261_v29, 4  ;;  %v1266_v41 = vrot.slane %v1264_v30, 5  ;;  %v465_v42 = vld [vmem:[%s14534_s26 + $0x34] sm:$0x1]  ;;  %13565 = vmatpush3.bf16.msra.mxu1 %v13868_v3 }
  0x24   : > { %v1240_v43 = vrot.slane %v1239_v33, 4  ;;  %13150 = vmatprep.subr.bf16.mxu0 %v14551_v14  ;;  %v1253_v44 = vor.u32 %v1252_v35, %v1249_v34  ;;  %v1272_v45 = vrot.slane %v1270_v36, 5  ;;  %v1275_v46 = vshrl.u32 %v14566_v31, 16  ;;  %v466_v49 = vld [vmem:[%s14534_s26 + $0x40] sm:$0x1]  ;;  %v13871_v35 = vld [vmem:[%s19644_s1 + $0x10] sm:$0xff]  }
  0x25   : > { %v1231_v47 = vsel %vm14570_vm3, %v1226_v38, %v1230_v19  ;;  %v1267_v48 = vor.u32 %v1266_v41, %v1263_v40  ;;  %v1278_v50 = vshll.u32 %v14566_v31, 16  ;;  %v1284_v51 = vshll.u32 %v465_v42, 16  ;;  %v14588_v56 = vld [vmem:[%s14534_s26 + $0x48] sm:$0xf]  ;;  %v467_v61 = vld [vmem:[%s14534_s26 + $0x4c] sm:$0x1] }
  0x26   : > { %v1245_v52 = vsel %vm14570_vm3, %v1240_v43, %v1244_v23  ;;  %v1254_v53 = vrot.slane %v1253_v44, 4  ;;  %v1277_v54 = vrot.slane %v1275_v46, 4  ;;  %v1289_v55 = vshrl.u32 %v14575_v37, 16  ;;  %v14595_v2 = vld [vmem:[%s14534_s26 + $0x54] sm:$0xf]  ;;  %s14412_s12 = smov [#allocation3]  }
  0x27   : > { %v11608_v57 = vcombine.low %v1231_v47, %v1245_v52  ;;  %v1268_v58 = vrot.slane %v1267_v48, 4  ;;  %v1280_v59 = vrot.slane %v1278_v50, 5  ;;  %v1286_v60 = vrot.slane %v1284_v51, 5  ;;  %v468_v7 = vld [vmem:[%s14534_s26 + $0x58] sm:$0x1]  ;;  %s14351_s18 = sshll.u32 %s14412_s12, 4  ;;  %s14352_s18 = int_to_ptr.vmem [resolvable:$false] %s14351_s18 }
  0x28   : > { %v1259_v62 = vsel %vm14570_vm3, %v1254_v53, %v1258_v39  ;;  %v1291_v63 = vrot.slane %v1289_v55, 4  ;;  %v1292_v0 = vshll.u32 %v14575_v37, 16  ;;  %v1298_v1 = vshll.u32 %v466_v49, 16  ;;  %v14607_v18 = vld [vmem:[%s14534_s26 + $0xd8] sm:$0xf]  ;;  %s14353_s20 = scalar_lea.vmem %s14352_s18, 8192  ;;  %p14354_p0 = scmp.lt.s32.totalorder %s19595_s27, %s14352_s18 }
  0x29   : > { %13118 = vmatprep.mubr.msk.bf16.mxu0 %vm1746_vm2, %v11608_v57  ;;  %v1273_v3 = vsel %vm14570_vm3, %v1268_v58, %v1272_v45  ;;  %v1281_v6 = vor.u32 %v1280_v59, %v1277_v54  ;;  %v1303_v8 = vshrl.u32 %v14588_v56, 16  ;;  %v1306_v9 = vshll.u32 %v14588_v56, 16  ;;  %v14611_v23 = vld [vmem:[%s14534_s26 + $0xe4] sm:$0xf]  ;;  %v469_v28 = vld [vmem:[%s14534_s26 + $0xdc] sm:$0x1] }
  0x2a   : > { %v11609_v10 = vcombine.low %v1259_v62, %v1273_v3  ;;  %v1294_v11 = vrot.slane %v1292_v0, 5  ;;  %v1300_v12 = vrot.slane %v1298_v1, 5  ;;  %v1312_v17 = vshll.u32 %v467_v61, 16  ;;  %v470_v40 = vld [vmem:[%s14534_s26 + $0xe8] sm:$0x1]  ;;  %v13872_v62 = vld [vmem:[%s19644_s1 + $0x18] sm:$0xff]  }
  0x2b   : > { %v1282_v19 = vrot.slane %v1281_v6, 4  ;;  %v1305_v20 = vrot.slane %v1303_v8, 4  ;;  %v1308_v21 = vrot.slane %v1306_v9, 5  ;;  %v1317_v22 = vshrl.u32 %v14595_v2, 16  ;;  %v14627_v45 = vld [vmem:[%s14534_s26 + $0xf0] sm:$0xf] }
  0x2c   : > { %13119 = vmatmul.mubr.msk.bf16.vlgmr.msra.gmra.mrb[0].mxu0 %vm1746_vm2, %v11609_v10  ;;  %v1295_v24 = vor.u32 %v1294_v11, %v1291_v63  ;;  %v1314_v25 = vrot.slane %v1312_v17, 5  ;;  %v1320_v26 = vshll.u32 %v14595_v2, 16  ;;  %v1326_v27 = vshll.u32 %v468_v7, 16  ;;  %v14633_v50 = vld [vmem:[%s14534_s26 + $0xfc] sm:$0xf] }
  0x2d   : > { %13151 = vmatpush3.bf16.msra.mxu0 %v14551_v14  ;;  %v1287_v29 = vsel %vm14570_vm3, %v1282_v19, %v1286_v60  ;;  %v1309_v30 = vor.u32 %v1308_v21, %v1305_v20  ;;  %v1319_v33 = vrot.slane %v1317_v22, 4  ;;  %v1331_v34 = vshrl.u32 %v14607_v18, 16  ;;  %v471_v51 = vld [vmem:[%s14534_s26 + $0xf4] sm:$0x1]  ;;  %v472_v61 = vld [vmem:[%s14534_s26 + $0x100] sm:$0x1] }
  0x2e   : > { %v1296_v36 = vrot.slane %v1295_v24, 4  ;;  %13152 = vmatprep.subr.bf16.mxu0 %v13870_v13  ;;  %v1322_v38 = vrot.slane %v1320_v26, 5  ;;  %v1328_v39 = vrot.slane %v1326_v27, 5  ;;  %v1334_v14 = vshll.u32 %v14607_v18, 16  ;;  %v14647_v6 = vld [vmem:[%s14534_s26 + $0x108] sm:$0xf] }
  0x2f   : > { %v1310_v41 = vrot.slane %v1309_v30, 4  ;;  %v1333_v42 = vrot.slane %v1331_v34, 4  ;;  %v1340_v43 = vshll.u32 %v469_v28, 16  ;;  %v1345_v44 = vshrl.u32 %v14611_v23, 16  ;;  %v14652_v11 = vld [vmem:[%s14534_s26 + $0x114] sm:$0xf] }
  0x30   : > { %v1301_v46 = vsel %vm14570_vm3, %v1296_v36, %v1300_v12  ;;  %v1323_v47 = vor.u32 %v1322_v38, %v1319_v33  ;;  %v1336_v48 = vrot.slane %v1334_v14, 5  ;;  %v1348_v49 = vshll.u32 %v14611_v23, 16  ;;  %v473_v12 = vld [vmem:[%s14534_s26 + $0x10c] sm:$0x1]  ;;  %v474_v26 = vld [vmem:[%s14534_s26 + $0x118] sm:$0x1] }
  0x31   : > { %v11610_v52 = vcombine.low %v1287_v29, %v1301_v46  ;;  %v1315_v53 = vsel %vm14570_vm3, %v1310_v41, %v1314_v25  ;;  %13153 = vmatpush3.bf16.msra.mxu0 %v13870_v13  ;;  %v1342_v54 = vrot.slane %v1340_v43, 5  ;;  %v1347_v55 = vrot.slane %v1345_v44, 4  ;;  %v14660_v27 = vld [vmem:[%s14534_s26 + $0x120] sm:$0xf] }
  0x32   : > { %v1324_v57 = vrot.slane %v1323_v47, 4  ;;  %v1337_v58 = vor.u32 %v1336_v48, %v1333_v42  ;;  %v1350_v59 = vrot.slane %v1348_v49, 5  ;;  %v1354_v60 = vshll.u32 %v470_v40, 16  ;;  %13154 = vmatprep.subr.bf16.mxu0 %v13871_v35  ;;  %v14665_v28 = vld [vmem:[%s19644_s1 + $0x60] sm:$0xff]   ;;  %v14674_v42 = vld [vmem:[%s14534_s26 + $0x12c] sm:$0xf] }
  0x33   : > { %13122 = vmatprep.mubr.msk.bf16.mxu0 %vm1746_vm2, %v11610_v52  ;;  %v1359_v63 = vshrl.u32 %v14627_v45, 16  ;;  %v1362_v0 = vshll.u32 %v14627_v45, 16  ;;  %v1368_v1 = vshll.u32 %v471_v51, 16  ;;  %v1373_v3 = vshrl.u32 %v14633_v50, 16  ;;  %v475_v48 = vld [vmem:[%s14534_s26 + $0x124] sm:$0x1] }
  0x34   : > { %v1329_v7 = vsel %vm14570_vm3, %v1324_v57, %v1328_v39  ;;  %v1338_v8 = vrot.slane %v1337_v58, 4  ;;  %v1351_v9 = vor.u32 %v1350_v59, %v1347_v55  ;;  %v1356_v10 = vrot.slane %v1354_v60, 5  ;;  %v476_v60 = vld [vmem:[%s14534_s26 + $0x130] sm:$0x1] }
  0x35   : > { %v11611_v13 = vcombine.low %v1315_v53, %v1329_v7  ;;  %v1361_v17 = vrot.slane %v1359_v63, 4  ;;  %v1364_v19 = vrot.slane %v1362_v0, 5  ;;  %v1370_v20 = vrot.slane %v1368_v1, 5  ;;  %13155 = vmatpush3.bf16.msra.mxu0 %v13871_v35 }
  0x36   : > { %v1343_v21 = vsel %vm14570_vm3, %v1338_v8, %v1342_v54  ;;  %v1352_v22 = vrot.slane %v1351_v9, 4  ;;  %v1375_v24 = vrot.slane %v1373_v3, 4  ;;  %v1376_v25 = vshll.u32 %v14633_v50, 16  ;;  %13156 = vmatprep.subr.bf16.mxu0 %v13872_v62 }
  0x37   : > { %13123 = vmatmul.mubr.msk.bf16.gmra.mrb[4].mxu0 %vm1746_vm2, %v11611_v13  ;;  %v1365_v29 = vor.u32 %v1364_v19, %v1361_v17  ;;  %v1382_v30 = vshll.u32 %v472_v61, 16  ;;  %v1387_v33 = vshrl.u32 %v14647_v6, 16  ;;  %v1390_v34 = vshll.u32 %v14647_v6, 16 }
  0x38   : > { %v1357_v35 = vsel %vm14570_vm3, %v1352_v22, %v1356_v10  ;;  %v1378_v36 = vrot.slane %v1376_v25, 5  ;;  %v1396_v38 = vshll.u32 %v473_v12, 16  ;;  %v1401_v39 = vshrl.u32 %v14652_v11, 16 }
  0x39   : > { %v11612_v40 = vcombine.low %v1343_v21, %v1357_v35  ;;  %v1366_v14 = vrot.slane %v1365_v29, 4  ;;  %v1389_v41 = vrot.slane %v1387_v33, 4  ;;  %13157 = vmatpush3.bf16.msra.mxu0 %v13872_v62  ;;  %v1384_v44 = vrot.slane %v1382_v30, 5 }
  0x3a   : > { %v1379_v43 = vor.u32 %v1378_v36, %v1375_v24  ;;  %v1392_v46 = vrot.slane %v1390_v34, 5  ;;  %v1398_v47 = vrot.slane %v1396_v38, 5  ;;  %13190 = vmatprep.subr.bf16.mxu0 %v14665_v28  ;;  %v1403_v49 = vrot.slane %v1401_v39, 4 }
  0x3b   : > { %13126 = vmatprep.mubr.msk.bf16.mxu0 %vm1746_vm2, %v11612_v40  ;;  %v1404_v51 = vshll.u32 %v14652_v11, 16  ;;  %v1410_v52 = vshll.u32 %v474_v26, 16  ;;  %v1415_v53 = vshrl.u32 %v14660_v27, 16  ;;  %v1371_v54 = vsel %vm14570_vm3, %v1366_v14, %v1370_v20  ;;  %v13879_v14 = vld [vmem:[%s19644_s1 + $0x68] sm:$0xff]  }
  0x3c   : > { %v1380_v55 = vrot.slane %v1379_v43, 4  ;;  %v1393_v57 = vor.u32 %v1392_v46, %v1389_v41  ;;  %v1418_v58 = vshll.u32 %v14660_v27, 16  ;;  %v1424_v62 = vshll.u32 %v475_v48, 16  ;;  %v14711_v41 = vld [vmem:[%s14534_s26 + $0x1b0] sm:$0xf] }
  0x3d   : > { %v1406_v59 = vrot.slane %v1404_v51, 5  ;;  %v1417_v61 = vrot.slane %v1415_v53, 4  ;;  %v1429_v63 = vshrl.u32 %v14674_v42, 16  ;;  %v1412_v3 = vrot.slane %v1410_v52, 5  ;;  %v14714_v43 = vld [vmem:[%s14534_s26 + $0x1bc] sm:$0xf] }
  0x3e   : > { %v1385_v0 = vsel %vm14570_vm3, %v1380_v55, %v1384_v44  ;;  %v1394_v1 = vrot.slane %v1393_v57, 4  ;;  %v1420_v7 = vrot.slane %v1418_v58, 5  ;;  %v1432_v12 = vshll.u32 %v14674_v42, 16  ;;  %v14729_v44 = vld [vmem:[%s14534_s26 + $0x1e0] sm:$0xf] }
  0x3f   : > { %v11613_v8 = vcombine.low %v1371_v54, %v1385_v0  ;;  %v1407_v9 = vor.u32 %v1406_v59, %v1403_v49  ;;  %v1431_v10 = vrot.slane %v1429_v63, 4  ;;  %v1438_v17 = vshll.u32 %v476_v60, 16  ;;  %v14734_v48 = vld [vmem:[%s14534_s26 + $0x1ec] sm:$0xf]  ;;  %v14746_v57 = vld [vmem:[%s14534_s26 + $0x1f8] sm:$0xf] }
  0x40   : > { %v1421_v13 = vor.u32 %v1420_v7, %v1417_v61  ;;  %v1399_v19 = vsel %vm14570_vm3, %v1394_v1, %v1398_v47  ;;  %v1426_v21 = vrot.slane %v1424_v62, 5  ;;  %v1434_v22 = vrot.slane %v1432_v12, 5  ;;  %v14749_v58 = vld [vmem:[%s14534_s26 + $0x204] sm:$0xf]  ;;  %v14758_v63 = vld [vmem:[%s14534_s26 + $0x288] sm:$0xf] }
  0x41   : > { %13127 = vmatmul.mubr.msk.bf16.gmra.mrb[8].mxu0 %vm1746_vm2, %v11613_v8  ;;  %v1408_v20 = vrot.slane %v1407_v9, 4  ;;  %v1440_v29 = vrot.slane %v1438_v17, 5  ;;  %v11644_v36 = vcombine.low %v14537_v4, %v14540_v5  ;;  %v11645_v39 = vcombine.low %v14554_v15, %v14557_v16  ;;  %v14717_v4 = vld [vmem:[%s14534_s26 + $0x1c8] sm:$0xf]  ;;  %v14724_v16 = vld [vmem:[%s14534_s26 + $0x1d4] sm:$0xf] }
  0x42   : > { %v1422_v24 = vrot.slane %v1421_v13, 4  ;;  %v1435_v26 = vor.u32 %v1434_v22, %v1431_v10  ;;  %v11646_v40 = vcombine.low %v14566_v31, %v14575_v37  ;;  %v11647_v5 = vcombine.low %v14588_v56, %v14595_v2  ;;  %19768 = vst [vmem:[#allocation6_spill] sm:$0xff] %v14749_v58  ;;  %19769 = vst [vmem:[#allocation7_spill] sm:$0xff] %v14758_v63  ;;  %v14761_v0 = vld [vmem:[%s14534_s26 + $0x294] sm:$0xf] }
  0x43   : > { %v1413_v25 = vsel %vm14570_vm3, %v1408_v20, %v1412_v3  ;;  %v11648_v15 = vcombine.low %v14607_v18, %v14611_v23  ;;  %v1471_v31 = vshrl.u32 %v14717_v4, 16  ;;  %v1474_v37 = vshll.u32 %v14717_v4, 16  ;;  %v13884_v1 = vld [vmem:[%s19644_s1 + $0x70] sm:$0xff]   ;;  %v14776_v10 = vld [vmem:[%s14534_s26 + $0x2a0] sm:$0xf] }
  0x44   : > { %v11614_v30 = vcombine.low %v1399_v19, %v1413_v25  ;;  %v1427_v33 = vsel %vm14570_vm3, %v1422_v24, %v1426_v21  ;;  %v1436_v34 = vrot.slane %v1435_v26, 4  ;;  %v1485_v46 = vshrl.u32 %v14724_v16, 16  ;;  %v14790_v20 = vld [vmem:[%s14534_s26 + $0x2b8] sm:$0xf]  ;;  %v14793_v21 = vld [vmem:[%s14534_s26 + $0x2c4] sm:$0xf] }
  0x45   : > { %v1488_v47 = vshll.u32 %v14724_v16, 16  ;;  %v1499_v49 = vshrl.u32 %v14729_v44, 16  ;;  %v1502_v51 = vshll.u32 %v14729_v44, 16  ;;  %v1513_v55 = vshrl.u32 %v14734_v48, 16  ;;  %v14796_v22 = vld [vmem:[%s14534_s26 + $0x2d0] sm:$0xf] }
  0x46   : > { %13130 = vmatprep.mubr.msk.bf16.mxu0 %vm1746_vm2, %v11614_v30  ;;  %v1441_v35 = vsel %vm14570_vm3, %v1436_v34, %v1440_v29  ;;  %v1516_v60 = vshll.u32 %v14734_v48, 16  ;;  %v1527_v61 = vshrl.u32 %v14746_v57, 16  ;;  %v1530_v62 = vshll.u32 %v14746_v57, 16  ;;  %v14799_v24 = vld [vmem:[%s14534_s26 + $0x2dc] sm:$0xf] }
  0x47   : > { %v11615_v38 = vcombine.low %v1427_v33, %v1441_v35  ;;  %v14768_v3 = vrot.slane %v1471_v31, 4  ;;  %v14770_v7 = vrot.slane %v1474_v37, 5  ;;  %v1541_v9 = vshrl.u32 %v14749_v58, 16  ;;  %v14809_v33 = vld [vmem:[%s14534_s26 + $0x6c] sm:$0xf] }
  0x48   : > { %v14781_v12 = vrot.slane %v1485_v46, 4  ;;  %v14783_v13 = vrot.slane %v1488_v47, 5  ;;  %v14785_v17 = vrot.slane %v1499_v49, 4  ;;  %v14787_v19 = vrot.slane %v1502_v51, 5  ;;  %v14812_v34 = vld [vmem:[%s14534_s26 + $0x78] sm:$0xf] }
  0x49   : > { %13131 = vmatmul.mubr.msk.bf16.gmra.mrb[12].mxu0 %vm1746_vm2, %v11615_v38  ;;  %19770 = vst [vmem:[#allocation8_spill] sm:$0xff] %v14768_v3  ;;  %19771 = vst [vmem:[#allocation9_spill] sm:$0xff] %v14770_v7  ;;  %v14801_v25 = vrot.slane %v1513_v55, 4  ;;  %v14814_v35 = vrot.slane %v1516_v60, 5  ;;  %v14818_v38 = vrot.slane %v1530_v62, 5  ;;  %v14824_v31 = vrot.slane %v1541_v9, 4 }
  0x4a   : > { %13158 = vmatprep.mubr.msk.bf16.mxu0 %vm1746_vm2, %v11644_v36  ;;  %19772 = vst [vmem:[#allocation10_spill] sm:$0xff] %v14781_v12  ;;  %19773 = vst [vmem:[#allocation11_spill] sm:$0xff] %v14783_v13  ;;  %v14816_v36 = vrot.slane %v1527_v61, 4  ;;  %v3641_v46 = vshrl.u32 %v14809_v33, 16  ;;  %v3644_v47 = vshll.u32 %v14809_v33, 16  ;;  %v13889_v51 = vld [vmem:[%s19644_s1 + $0x78] sm:$0xff]  }
  0x4b   : > { %19774 = vst [vmem:[#allocation12_spill] sm:$0xff] %v14785_v17  ;;  %19775 = vst [vmem:[#allocation13_spill] sm:$0xff] %v14787_v19  ;;  %v14831_v49 = vld [vmem:[%s14534_s26 + $0x90] sm:$0xf]  ;;  %v3655_v55 = vshrl.u32 %v14812_v34, 16  ;;  %v3658_v60 = vshll.u32 %v14812_v34, 16 }
  0x4c   : > { %19776 = vst [vmem:[#allocation14_spill] sm:$0xff] %v14801_v25  ;;  %19777 = vst [vmem:[#allocation15_spill] sm:$0xff] %v14814_v35  ;;  %v3683_v29 = vshrl.u32 %v14831_v49, 16  ;;  %v14848_v37 = vld [vmem:[%s14534_s26 + $0x9c] sm:$0xf]  ;;  %v14862_v9 = vld [vmem:[%s19644_s1 + $0x20] sm:$0xff]  }
  0x4d   : > { %19778 = vst [vmem:[#allocation16_spill] sm:$0xff] %v14816_v36  ;;  %19779 = vst [vmem:[#allocation17_spill] sm:$0xff] %v14818_v38  ;;  %v3686_v26 = vshll.u32 %v14831_v49, 16  ;;  %v3697_v8 = vshrl.u32 %v14848_v37, 16  ;;  %v14869_v59 = vld [vmem:[%s14534_s26 + $0xb4] sm:$0xf] }
  0x4e   : > { %19780 = vst [vmem:[#allocation18_spill] sm:$0xff] %v14824_v31  ;;  %v14872_v56 = vld [vmem:[%s14534_s26 + $0xc0] sm:$0xf]  ;;  %v14878_v2 = vrot.slane %v3641_v46, 4  ;;  %v3700_v62 = vshll.u32 %v14848_v37, 16  ;;  %v14884_v54 = vrot.slane %v3655_v55, 4 }
  0x4f   : > { %v14886_v53 = vrot.slane %v3658_v60, 5  ;;  %v3728_v46 = vshll.u32 %v14869_v59, 16  ;;  %v14900_v31 = vrot.slane %v3686_v26, 5  ;;  %v14904_v60 = vrot.slane %v3697_v8, 4  ;;  %v14918_v35 = vld [vmem:[%s14534_s26 + $0x15c] sm:$0xf] }
  0x50   : > { %19781 = vst [vmem:[#allocation19_spill] sm:$0xff] %v14878_v2  ;;  %19783 = vst [vmem:[#allocation21_spill] sm:$0xff] %v14884_v54  ;;  %v3742_v36 = vshll.u32 %v14872_v56, 16  ;;  %v3781_v17 = vshrl.u32 %v14918_v35, 16  ;;  %v14936_v13 = vld [vmem:[%s14534_s26 + $0x174] sm:$0xf]  ;;  %v19851_v54 = vcombine.low %v14746_v57, %v14749_v58 }
  0x51   : > { %13159 = vmatmul.mubr.msk.bf16.vlgmr.msra.gmra.mrb[0].mxu0 %vm1746_vm2, %v11645_v39  ;;  %19784 = vst [vmem:[#allocation22_spill] sm:$0xff] %v14886_v53  ;;  %19788 = vst [vmem:[#allocation26_spill] sm:$0xff] %v14900_v31  ;;  %v14931_v26 = vrot.slane %v3728_v46, 5  ;;  %v3784_v46 = vshll.u32 %v14918_v35, 16  ;;  %v14949_v3 = vld [vmem:[%s14534_s26 + $0x180] sm:$0xf] }
  0x52   : > { %13191 = vmatpush3.bf16.msra.mxu0 %v14665_v28  ;;  %13162 = vmatprep.mubr.msk.bf16.mxu0 %vm1746_vm2, %v11646_v40  ;;  %v14779_v28 = vld [vmem:[%s14534_s26 + $0x2ac] sm:$0xf]  ;;  %v14822_v40 = vld [vmem:[%s14534_s26 + $0x84] sm:$0xf]  ;;  %19789 = vst [vmem:[#allocation27_spill] sm:$0xff] %v14904_v60 }
  0x53   : > { %13192 = vmatprep.subr.bf16.mxu0 %v13879_v14  ;;  %v3669_v61 = vshrl.u32 %v14822_v40, 16  ;;  %v3672_v39 = vshll.u32 %v14822_v40, 16  ;;  %19794 = vst [vmem:[#allocation32_spill] sm:$0xff] %v14931_v26  ;;  %v19797_v26 = vcombine.low %v14647_v6, %v14652_v11  ;;  %v3812_v6 = vshll.u32 %v14936_v13, 16  ;;  %v14972_v11 = vld [vmem:[%s14534_s26 + $0x198] sm:$0xf] }
  0x54   : > { %v15087_v31 = vld [vmem:[%s14534_s26 + $0x30c] sm:$0xf]  ;;  %v405_v2 = vld [vmem:[%s14534_s26 + $0x34] sm:$0xf] }
  0x55   : > { %v14888_v52 = vrot.slane %v3669_v61, 4  ;;  %v14891_v23 = vrot.slane %v3672_v39, 5  ;;  %v3739_v61 = vshrl.u32 %v14872_v56, 16  ;;  %v14908_v39 = vld [vmem:[%s14534_s26 + $0x150] sm:$0xf]  ;;  %19827 = vst [vmem:[#allocation61_spill] sm:$0xff] %v15087_v31 }
  0x56   : > { %13193 = vmatpush3.bf16.msra.mxu0 %v13879_v14  ;;  %v14851_v14 = vld [vmem:[%s14534_s26 + $0xa8] sm:$0xf]  ;;  %v3770_v19 = vshll.u32 %v14908_v39, 16 }
  0x57   : > { %13194 = vmatprep.subr.bf16.mxu0 %v13884_v1  ;;  %v3711_v30 = vshrl.u32 %v14851_v14, 16  ;;  %19785 = vst [vmem:[#allocation23_spill] sm:$0xff] %v14888_v52  ;;  %v3714_v18 = vshll.u32 %v14851_v14, 16  ;;  %19786 = vst [vmem:[#allocation24_spill] sm:$0xff] %v14891_v23  ;;  %v14942_v12 = vrot.slane %v3739_v61, 4 }
  0x58   : > { %v398_v52 = vld [vmem:[%s14534_s26 + $0x8] sm:$0x1] }
  0x59   : > { %13163 = vmatmul.mubr.msk.bf16.gmra.mrb[4].mxu0 %vm1746_vm2, %v11647_v5  ;;  %v14880_v5 = vrot.slane %v3644_v47, 5  ;;  %v14898_v47 = vld [vmem:[%s14534_s26 + $0x144] sm:$0xf]  ;;  %v14912_v38 = vrot.slane %v3711_v30, 4  ;;  %v14921_v8 = vrot.slane %v3714_v18, 5  ;;  %v19795_v18 = vcombine.low %v14627_v45, %v14633_v50  ;;  %19796 = vst [vmem:[#allocation33_spill] sm:$0xff] %v14942_v12 }
  0x5a   : > { %13166 = vmatprep.mubr.msk.bf16.mxu0 %vm1746_vm2, %v11648_v15  ;;  %13195 = vmatpush3.bf16.msra.mxu0 %v13884_v1  ;;  %v14893_v15 = vrot.slane %v3683_v29, 4  ;;  %v3725_v1 = vshrl.u32 %v14869_v59, 16  ;;  %v14910_v29 = vrot.slane %v3700_v62, 5  ;;  %v3753_v55 = vshrl.u32 %v14898_v47, 16  ;;  %v14927_v30 = vld [vmem:[%s14534_s26 + $0x168] sm:$0xf] }
  0x5b   : > { %19782 = vst [vmem:[#allocation20_spill] sm:$0xff] %v14880_v5  ;;  %13196 = vmatprep.subr.bf16.mxu0 %v13889_v51  ;;  %19791 = vst [vmem:[#allocation29_spill] sm:$0xff] %v14912_v38  ;;  %v3767_v62 = vshrl.u32 %v14908_v39, 16  ;;  %v3795_v7 = vshrl.u32 %v14927_v30, 16  ;;  %v14955_v45 = vrot.slane %v3742_v36, 5  ;;  %v3798_v61 = vshll.u32 %v14927_v30, 16 }
  0x5c   : > { %19787 = vst [vmem:[#allocation25_spill] sm:$0xff] %v14893_v15  ;;  %19790 = vst [vmem:[#allocation28_spill] sm:$0xff] %v14910_v29  ;;  %v14929_v25 = vrot.slane %v3725_v1, 4  ;;  %v14962_v1 = vld [vmem:[%s14534_s26 + $0x18c] sm:$0xf]  ;;  %v14964_v12 = vrot.slane %v3753_v55, 4  ;;  %v19813_v38 = vcombine.low %v14711_v41, %v14714_v43 }
  0x5d   : > { %19792 = vst [vmem:[#allocation30_spill] sm:$0xff] %v14921_v8  ;;  %19798 = vst [vmem:[#allocation34_spill] sm:$0xff] %v14955_v45  ;;  %v14968_v8 = vrot.slane %v3767_v62, 4  ;;  %v14974_v36 = vrot.slane %v3770_v19, 5  ;;  %v3823_v50 = vshrl.u32 %v14949_v3, 16  ;;  %v3826_v45 = vshll.u32 %v14949_v3, 16 }
  0x5e   : > { %13197 = vmatpush3.bf16.msra.mxu0 %v13889_v51  ;;  %v3756_v51 = vshll.u32 %v14898_v47, 16  ;;  %19793 = vst [vmem:[#allocation31_spill] sm:$0xff] %v14929_v25  ;;  %19799 = vst [vmem:[#allocation35_spill] sm:$0xff] %v14964_v12  ;;  %v14981_v55 = vld [vmem:[%s14534_s26 + $0x21c] sm:$0xf]  ;;  %v14985_v62 = vrot.slane %v3795_v7, 4  ;;  %v19811_v7 = vcombine.low %v14660_v27, %v14674_v42 }
  0x5f   : > { %13230 = vmatprep.subr.bf16.mxu0 %v14862_v9  ;;  %19801 = vst [vmem:[#allocation37_spill] sm:$0xff] %v14968_v8  ;;  %19802 = vst [vmem:[#allocation38_spill] sm:$0xff] %v14974_v36  ;;  %v3837_v19 = vshrl.u32 %v14962_v1, 16  ;;  %v14990_v36 = vrot.slane %v3798_v61, 5  ;;  %v14997_v12 = vld [vmem:[%s14534_s26 + $0x228] sm:$0xf] }
  0x60   : > { %v14966_v25 = vrot.slane %v3756_v51, 5  ;;  %v14983_v51 = vrot.slane %v3784_v46, 5  ;;  %19805 = vst [vmem:[#allocation41_spill] sm:$0xff] %v14985_v62  ;;  %v14999_v46 = vrot.slane %v3812_v6, 5  ;;  %v3854_v8 = vshll.u32 %v14972_v11, 16 }
  0x61   : > { %13167 = vmatmul.mubr.msk.bf16.gmra.mrb[8].mxu0 %vm1746_vm2, %v19795_v18  ;;  %v3809_v18 = vshrl.u32 %v14936_v13, 16  ;;  %19806 = vst [vmem:[#allocation42_spill] sm:$0xff] %v14990_v36  ;;  %v3865_v62 = vshrl.u32 %v14981_v55, 16  ;;  %v15006_v61 = vld [vmem:[%s14534_s26 + $0x234] sm:$0xf]  ;;  %v3868_v36 = vshll.u32 %v14981_v55, 16 }
  0x62   : > { %13170 = vmatprep.mubr.msk.bf16.mxu0 %vm1746_vm2, %v19797_v26  ;;  %19800 = vst [vmem:[#allocation36_spill] sm:$0xff] %v14966_v25  ;;  %v14976_v26 = vrot.slane %v3781_v17, 4  ;;  %19804 = vst [vmem:[#allocation40_spill] sm:$0xff] %v14983_v51  ;;  %v3851_v25 = vshrl.u32 %v14972_v11, 16  ;;  %v3879_v51 = vshrl.u32 %v14997_v12, 16 }
  0x63   : > { %v14992_v17 = vrot.slane %v3809_v18, 4  ;;  %19808 = vst [vmem:[#allocation44_spill] sm:$0xff] %v14999_v46  ;;  %v15008_v18 = vrot.slane %v3823_v50, 4  ;;  %v15015_v6 = vld [vmem:[%s14534_s26 + $0x240] sm:$0xf]  ;;  %v15021_v46 = vrot.slane %v3837_v19, 4 }
  0x64   : > { %19803 = vst [vmem:[#allocation39_spill] sm:$0xff] %v14976_v26  ;;  %v3840_v26 = vshll.u32 %v14962_v1, 16  ;;  %v15036_v42 = vrot.slane %v3851_v25, 4  ;;  %v3896_v19 = vshll.u32 %v15006_v61, 16  ;;  %v15041_v50 = vld [vmem:[%s14534_s26 + $0x258] sm:$0xf] }
  0x65   : > { %19807 = vst [vmem:[#allocation43_spill] sm:$0xff] %v14992_v17  ;;  %19809 = vst [vmem:[#allocation45_spill] sm:$0xff] %v15008_v18  ;;  %v15010_v17 = vrot.slane %v3826_v45, 5  ;;  %v3882_v45 = vshll.u32 %v14997_v12, 16  ;;  %v15028_v18 = vld [vmem:[%s14534_s26 + $0x24c] sm:$0xf] }
  0x66   : > { %19812 = vst [vmem:[#allocation47_spill] sm:$0xff] %v15021_v46  ;;  %v15034_v27 = vrot.slane %v3840_v26, 5  ;;  %19815 = vst [vmem:[#allocation49_spill] sm:$0xff] %v15036_v42  ;;  %v15043_v46 = vrot.slane %v3854_v8, 5  ;;  %v15045_v29 = vrot.slane %v3865_v62, 4  ;;  %v3910_v43 = vshll.u32 %v15015_v6, 16 }
  0x67   : > { %19810 = vst [vmem:[#allocation46_spill] sm:$0xff] %v15010_v17  ;;  %v3893_v17 = vshrl.u32 %v15006_v61, 16  ;;  %v15053_v25 = vrot.slane %v3868_v36, 5  ;;  %v15055_v26 = vrot.slane %v3879_v51, 4  ;;  %v3921_v42 = vshrl.u32 %v15028_v18, 16 }
  0x68   : > { %19814 = vst [vmem:[#allocation48_spill] sm:$0xff] %v15034_v27  ;;  %19816 = vst [vmem:[#allocation50_spill] sm:$0xff] %v15043_v46  ;;  %v3924_v27 = vshll.u32 %v15028_v18, 16  ;;  %v15060_v8 = vld [vmem:[%s14534_s26 + $0x270] sm:$0xf]  ;;  %v15062_v62 = vrot.slane %v3882_v45, 5 }
  0x69   : > { %13171 = vmatmul.mubr.msk.bf16.gmra.mrb[12].mxu0 %vm1746_vm2, %v19811_v7  ;;  %v3907_v7 = vshrl.u32 %v15015_v6, 16  ;;  %19817 = vst [vmem:[#allocation51_spill] sm:$0xff] %v15045_v29  ;;  %19818 = vst [vmem:[#allocation52_spill] sm:$0xff] %v15053_v25  ;;  %v15064_v29 = vrot.slane %v3893_v17, 4  ;;  %v3935_v46 = vshrl.u32 %v15041_v50, 16  ;;  %v15072_v51 = vrot.slane %v3896_v19, 5 }
  0x6a   : > { %13174 = vmatprep.mubr.msk.bf16.mxu0 %vm1746_vm2, %v19813_v38  ;;  %v15051_v38 = vld [vmem:[%s14534_s26 + $0x264] sm:$0xf]  ;;  %19819 = vst [vmem:[#allocation53_spill] sm:$0xff] %v15055_v26  ;;  %19820 = vst [vmem:[#allocation54_spill] sm:$0xff] %v15062_v62  ;;  %v15070_v36 = vld [vmem:[%s14534_s26 + $0x2f4] sm:$0xf] }
  0x6b   : > { %19821 = vst [vmem:[#allocation55_spill] sm:$0xff] %v15064_v29  ;;  %19822 = vst [vmem:[#allocation56_spill] sm:$0xff] %v15070_v36  ;;  %v15074_v26 = vrot.slane %v3907_v7, 4  ;;  %v3938_v25 = vshll.u32 %v15041_v50, 16  ;;  %v3949_v60 = vshrl.u32 %v15051_v38, 16  ;;  %v15081_v17 = vrot.slane %v3910_v43, 5 }
  0x6c   : > { %19823 = vst [vmem:[#allocation57_spill] sm:$0xff] %v15072_v51  ;;  %v15079_v45 = vld [vmem:[%s14534_s26 + $0x300] sm:$0xf]  ;;  %v3952_v29 = vshll.u32 %v15051_v38, 16  ;;  %v3963_v41 = vshrl.u32 %v15060_v8, 16  ;;  %v3966_v62 = vshll.u32 %v15060_v8, 16 }
  0x6d   : > { %19824 = vst [vmem:[#allocation58_spill] sm:$0xff] %v15074_v26  ;;  %19825 = vst [vmem:[#allocation59_spill] sm:$0xff] %v15079_v45  ;;  %v15089_v19 = vrot.slane %v3921_v42, 4  ;;  %v15091_v7 = vrot.slane %v3924_v27, 5  ;;  %v3977_v51 = vshrl.u32 %v15070_v36, 16  ;;  %v15103_v15 = vrot.slane %v3935_v46, 4 }
  0x6e   : > { %19826 = vst [vmem:[#allocation60_spill] sm:$0xff] %v15081_v17  ;;  %v15097_v43 = vld [vmem:[%s14534_s26 + $0x318] sm:$0xf]  ;;  %v19831_v17 = vcombine.low %v14717_v4, %v14724_v16  ;;  %v3980_v42 = vshll.u32 %v15070_v36, 16  ;;  %v3991_v27 = vshrl.u32 %v15079_v45, 16  ;;  %v19833_v26 = vcombine.low %v14729_v44, %v14734_v48 }
  0x6f   : > { %19828 = vst [vmem:[#allocation62_spill] sm:$0xff] %v15089_v19  ;;  %19829 = vst [vmem:[#allocation63_spill] sm:$0xff] %v15091_v7  ;;  %v3994_v7 = vshll.u32 %v15079_v45, 16  ;;  %v15112_v19 = vrot.slane %v3938_v25, 5  ;;  %v15114_v4 = vrot.slane %v3949_v60, 4  ;;  %v4005_v46 = vshrl.u32 %v15087_v31, 16 }
  0x70   : > { %19830 = vst [vmem:[#allocation64_spill] sm:$0xff] %v15097_v43  ;;  %19832 = vst [vmem:[#allocation65_spill] sm:$0xff] %v15103_v15  ;;  %v15122_v15 = vrot.slane %v3952_v29, 5  ;;  %v15124_v23 = vrot.slane %v3963_v41, 4  ;;  %v15126_v44 = vrot.slane %v3966_v62, 5  ;;  %v4008_v48 = vshll.u32 %v15087_v31, 16 }
  0x71   : > { %13175 = vmatmul.mubr.msk.bf16.gmra.mrb[16].mxu0 %vm1746_vm2, %v19831_v17  ;;  %19834 = vst [vmem:[#allocation66_spill] sm:$0xff] %v15112_v19  ;;  %19835 = vst [vmem:[#allocation67_spill] sm:$0xff] %v15114_v4  ;;  %v15120_v17 = vld [vmem:[%s14534_s26 + $0x324] sm:$0xf]  ;;  %v15130_v25 = vld [vmem:[%s14534_s26 + $0x330] sm:$0xf] }
  0x72   : > { %13178 = vmatprep.mubr.msk.bf16.mxu0 %vm1746_vm2, %v19833_v26  ;;  %19836 = vst [vmem:[#allocation68_spill] sm:$0xff] %v15120_v17  ;;  %19837 = vst [vmem:[#allocation69_spill] sm:$0xff] %v15122_v15  ;;  %v15132_v60 = vrot.slane %v3977_v51, 4  ;;  %v4019_v26 = vshrl.u32 %v15097_v43, 16  ;;  %v4022_v16 = vshll.u32 %v15097_v43, 16  ;;  %v4033_v4 = vshrl.u32 %v15120_v17, 16 }
  0x73   : > { %19838 = vst [vmem:[#allocation70_spill] sm:$0xff] %v15124_v23  ;;  %19839 = vst [vmem:[#allocation71_spill] sm:$0xff] %v15126_v44  ;;  %v397_v29 = vld [vmem:[%s14534_s26 + $0x4] sm:$0xf]  ;;  %v15138_v15 = vrot.slane %v3980_v42, 5  ;;  %v15140_v41 = vrot.slane %v3991_v27, 4 }
  0x74   : > { %19840 = vst [vmem:[#allocation72_spill] sm:$0xff] %v15130_v25  ;;  %19841 = vst [vmem:[#allocation73_spill] sm:$0xff] %v15132_v60  ;;  %v15142_v62 = vrot.slane %v3994_v7, 5  ;;  %v399_v51 = vld [vmem:[%s14534_s26 + $0x10] sm:$0xf]  ;;  %v15147_v60 = vrot.slane %v4005_v46, 4 }
  0x75   : > { %19842 = vst [vmem:[#allocation74_spill] sm:$0xff] %v15138_v15  ;;  %19843 = vst [vmem:[#allocation75_spill] sm:$0xff] %v15140_v41  ;;  %v4036_v19 = vshll.u32 %v15120_v17, 16  ;;  %v4047_v42 = vshrl.u32 %v15130_v25, 16  ;;  %v15154_v15 = vld [vmem:[%s14534_s26 + $0x33c] sm:$0xf] }
  0x76   : > { %19844 = vst [vmem:[#allocation76_spill] sm:$0xff] %v15142_v62  ;;  %19845 = vst [vmem:[#allocation77_spill] sm:$0xff] %v15147_v60  ;;  %v15156_v27 = vrot.slane %v4008_v48, 5  ;;  %v4050_v7 = vshll.u32 %v15130_v25, 16  ;;  %v763_v62 = vshrl.u32 %v397_v29, 16  ;;  %v766_v44 = vshll.u32 %v397_v29, 16 }
  0x77   : > { %19846 = vst [vmem:[#allocation78_spill] sm:$0xff] %v15154_v15  ;;  %v401_v41 = vld [vmem:[%s14534_s26 + $0x1c] sm:$0xf]  ;;  %v15160_v46 = vrot.slane %v4019_v26, 4  ;;  %v15162_v60 = vrot.slane %v4022_v16, 5  ;;  %v15164_v23 = vrot.slane %v4033_v4, 4  ;;  %v19852_v4 = vcombine.low %v14758_v63, %v14761_v0 }
  0x78   : > { %19847 = vst [vmem:[#allocation79_spill] sm:$0xff] %v15156_v27  ;;  %v777_v53 = vshrl.u32 %v399_v51, 16  ;;  %v15172_v48 = vld [vmem:[%s14534_s26 + $0x348] sm:$0xf]  ;;  %v4061_v29 = vshrl.u32 %v15154_v15, 16  ;;  %v765_v27 = vrot.slane %v763_v62, 4 }
  0x79   : > { %19848 = vst [vmem:[#allocation80_spill] sm:$0xff] %v15160_v46  ;;  %19849 = vst [vmem:[#allocation81_spill] sm:$0xff] %v15162_v60  ;;  %13179 = vmatmul.mubr.msk.bf16.gmra.mrb[20].mxu0 %vm1746_vm2, %v19851_v54  ;;  %v768_v5 = vrot.slane %v766_v44, 5  ;;  %v780_v26 = vshll.u32 %v399_v51, 16  ;;  %v403_v16 = vld [vmem:[%s14534_s26 + $0x28] sm:$0xf] }
  0x7a   : > { %19850 = vst [vmem:[#allocation82_spill] sm:$0xff] %v15164_v23  ;;  %13182 = vmatprep.mubr.msk.bf16.mxu0 %vm1746_vm2, %v19852_v4  ;;  %v15180_v23 = vrot.slane %v4036_v19, 5  ;;  %v15182_v57 = vrot.slane %v4047_v42, 4  ;;  %v400_v54 = vld [vmem:[%s14534_s26 + $0x14] sm:$0x1]  ;;  %v779_v58 = vrot.slane %v777_v53, 4 }
  0x7b   : > { %v791_v60 = vshrl.u32 %v401_v41, 16  ;;  %v15185_v46 = vrot.slane %v4050_v7, 5  ;;  %v4064_v44 = vshll.u32 %v15154_v15, 16  ;;  %v782_v62 = vrot.slane %v780_v26, 5  ;;  %v402_v4 = vld [vmem:[%s14534_s26 + $0x20] sm:$0x1] }
  0x7c   : > { %19853 = vst [vmem:[#allocation83_spill] sm:$0xff] %v15180_v23  ;;  %19854 = vst [vmem:[#allocation84_spill] sm:$0xff] %v15182_v57  ;;  %v794_v51 = vshll.u32 %v401_v41, 16  ;;  %v769_v0 = vor.u32 %v768_v5, %v765_v27  ;;  %v772_v63 = vshll.u32 %v398_v52, 16  ;;  %v805_v19 = vshrl.u32 %v403_v16, 16 }
  0x7d   : > { %19855 = vst [vmem:[#allocation85_spill] sm:$0xff] %v15185_v46  ;;  %v808_v42 = vshll.u32 %v403_v16, 16  ;;  %v15190_v57 = vrot.slane %v4061_v29, 4  ;;  %v4075_v53 = vshrl.u32 %v15172_v48, 16  ;;  %v404_v23 = vld [vmem:[%s14534_s26 + $0x2c] sm:$0x1]  ;;  %v783_v41 = vor.u32 %v782_v62, %v779_v58 }
  0x7e   : > { %v793_v7 = vrot.slane %v791_v60, 4  ;;  %v796_v46 = vrot.slane %v794_v51, 5  ;;  %v786_v25 = vshll.u32 %v400_v54, 16  ;;  %v406_v17 = vld [vmem:[%s14534_s26 + $0x38] sm:$0x1]  ;;  %v819_v52 = vshrl.u32 %v405_v2, 16 }
  0x7f   : > { %19856 = vst [vmem:[#allocation86_spill] sm:$0xff] %v15190_v57  ;;  %v407_v5 = vld [vmem:[%s14534_s26 + $0x40] sm:$0xf]  ;;  %v4078_v27 = vshll.u32 %v15172_v48, 16  ;;  %v807_v43 = vrot.slane %v805_v19, 4  ;;  %v810_v16 = vrot.slane %v808_v42, 5  ;;  %v19857_v26 = vcombine.low %v14776_v10, %v14779_v28 }
  0x80   : > { %v408_v29 = vld [vmem:[%s14534_s26 + $0x44] sm:$0x1]  ;;  %v822_v57 = vshll.u32 %v405_v2, 16  ;;  %v770_v31 = vrot.slane %v769_v0, 4  ;;  %v774_v45 = vrot.slane %v772_v63, 5  ;;  %v800_v36 = vshll.u32 %v402_v4, 16 }
  0x81   : > { %v821_v60 = vrot.slane %v819_v52, 4  ;;  %v409_v51 = vld [vmem:[%s14534_s26 + $0x4c] sm:$0xf]  ;;  %13183 = vmatmul.mubr.msk.bf16.gmra.mrb[24].mxu0 %vm1746_vm2, %v19857_v26  ;;  %v797_v58 = vor.u32 %v796_v46, %v793_v7  ;;  %v814_v54 = vshll.u32 %v404_v23, 16  ;;  %v833_v15 = vshrl.u32 %v407_v5, 16 }
  0x82   : > { %v824_v62 = vrot.slane %v822_v57, 5  ;;  %v19858_v19 = vcombine.low %v14790_v20, %v14793_v21  ;;  %v15209_v2 = vrot.slane %v4064_v44, 5  ;;  %v784_v63 = vrot.slane %v783_v41, 4  ;;  %v411_v46 = vld [vmem:[%s14534_s26 + $0x58] sm:$0xf] }
  0x83   : > { %v788_v0 = vrot.slane %v786_v25, 5  ;;  %v836_v4 = vshll.u32 %v407_v5, 16  ;;  %v811_v42 = vor.u32 %v810_v16, %v807_v43  ;;  %v828_v28 = vshll.u32 %v406_v17, 16  ;;  %v410_v5 = vld [vmem:[%s14534_s26 + $0x50] sm:$0x1] }
  0x84   : > { %13186 = vmatprep.mubr.msk.bf16.mxu0 %vm1746_vm2, %v19858_v19  ;;  %v825_v10 = vor.u32 %v824_v62, %v821_v60  ;;  %v835_v26 = vrot.slane %v833_v15, 4  ;;  %v842_v57 = vshll.u32 %v408_v29, 16  ;;  %v847_v7 = vshrl.u32 %v409_v51, 16  ;;  %v413_v19 = vld [vmem:[%s14534_s26 + $0xdc] sm:$0xf] }
  0x85   : > { %v838_v23 = vrot.slane %v836_v4, 5  ;;  %v850_v52 = vshll.u32 %v409_v51, 16  ;;  %v775_v20 = vsel %vm14570_vm3, %v770_v31, %v774_v45  ;;  %v798_v21 = vrot.slane %v797_v58, 4  ;;  %v415_v4 = vld [vmem:[%s14534_s26 + $0xe8] sm:$0xf] }
  0x86   : > { %v802_v44 = vrot.slane %v800_v36, 5  ;;  %v816_v41 = vrot.slane %v814_v54, 5  ;;  %v849_v43 = vrot.slane %v847_v7, 4  ;;  %v861_v17 = vshrl.u32 %v411_v46, 16 }
  0x87   : > { %v839_v25 = vor.u32 %v838_v23, %v835_v26  ;;  %v852_v16 = vrot.slane %v850_v52, 5  ;;  %v812_v15 = vrot.slane %v811_v42, 4  ;;  %v826_v60 = vrot.slane %v825_v10, 4  ;;  %v412_v42 = vld [vmem:[%s14534_s26 + $0x5c] sm:$0x1] }
  0x88   : > { %v830_v62 = vrot.slane %v828_v28, 5  ;;  %v864_v29 = vshll.u32 %v411_v46, 16  ;;  %v789_v51 = vsel %vm14570_vm3, %v784_v63, %v788_v0  ;;  %v844_v45 = vrot.slane %v842_v57, 5 }
  0x89   : > { %v840_v31 = vrot.slane %v839_v25, 4  ;;  %v875_v36 = vshrl.u32 %v413_v19, 16  ;;  %v19859_v58 = vcombine.low %v14796_v22, %v14799_v24  ;;  %v15223_v54 = vrot.slane %v4075_v53, 4  ;;  %v417_v24 = vld [vmem:[%s14534_s26 + $0xf4] sm:$0xf] }
  0x8a   : > { %v863_v10 = vrot.slane %v861_v17, 4  ;;  %v866_v28 = vrot.slane %v864_v29, 5  ;;  %v878_v26 = vshll.u32 %v413_v19, 16  ;;  %v19861_v46 = vcombine.low %v14809_v33, %v14812_v34  ;;  %v414_v34 = vld [vmem:[%s14534_s26 + $0xe0] sm:$0x1] }
  0x8b   : > { %13187 = vmatmul.mubr.msk.bf16.gmra.mrb[28].mxu0 %vm1746_vm2, %v19859_v58  ;;  %19860 = vst [vmem:[#allocation87_spill] sm:$0xff] %v15223_v54  ;;  %v15230_v63 = vrot.slane %v4078_v27, 5  ;;  %v853_v0 = vor.u32 %v852_v16, %v849_v43  ;;  %v856_v23 = vshll.u32 %v410_v5, 16  ;;  %v889_v22 = vshrl.u32 %v415_v4, 16  ;;  %v416_v19 = vld [vmem:[%s14534_s26 + $0xec] sm:$0x1] }
  0x8c   : > { %13198 = vmatprep.mubr.msk.bf16.mxu0 %vm1746_vm2, %v19861_v46  ;;  %v15233_v57 = vcombine.low %v775_v20, %v789_v51  ;;  %v803_v53 = vsel %vm14570_vm3, %v798_v21, %v802_v44  ;;  %v817_v7 = vsel %vm14570_vm3, %v812_v15, %v816_v41  ;;  %v831_v33 = vsel %vm14570_vm3, %v826_v60, %v830_v62  ;;  %v13899_v20 = vld [vmem:[%s19644_s1 + $0x28] sm:$0xff]   ;;  %v419_v41 = vld [vmem:[%s14534_s26 + $0x100] sm:$0xf]  ;;  %v418_v29 = vld [vmem:[%s14534_s26 + $0xf8] sm:$0x1] }
  0x8d   : > { %19862 = vst [vmem:[#allocation88_spill] sm:$0xff] %v15230_v63  ;;  %v845_v27 = vsel %vm14570_vm3, %v840_v31, %v844_v45  ;;  %v870_v52 = vshll.u32 %v412_v42, 16  ;;  %v877_v25 = vrot.slane %v875_v36, 4  ;;  %v892_v5 = vshll.u32 %v415_v4, 16  ;;  %v421_v36 = vld [vmem:[%s14534_s26 + $0x10c] sm:$0xf] }
  0x8e   : > { %v867_v21 = vor.u32 %v866_v28, %v863_v10  ;;  %v880_v44 = vrot.slane %v878_v26, 5  ;;  %v903_v43 = vshrl.u32 %v417_v24, 16  ;;  %v906_v16 = vshll.u32 %v417_v24, 16  ;;  %v423_v26 = vld [vmem:[%s14534_s26 + $0x118] sm:$0xf] }
  0x8f   : > { %v15249_v17 = vrot.slane %v853_v0, 4  ;;  %v15251_v15 = vrot.slane %v856_v23, 5  ;;  %v884_v60 = vshll.u32 %v414_v34, 16  ;;  %v891_v62 = vrot.slane %v889_v22, 4  ;;  %v431_v63 = vld [vmem:[%s14534_s26 + $0x1c0] sm:$0xf] }
  0x90   : > { %v894_v51 = vrot.slane %v892_v5, 5  ;;  %v898_v4 = vshll.u32 %v416_v19, 16  ;;  %v905_v31 = vrot.slane %v903_v43, 4  ;;  %v908_v45 = vrot.slane %v906_v16, 5  ;;  %v427_v43 = vld [vmem:[%s14534_s26 + $0x130] sm:$0xf] }
  0x91   : > { %v15255_v58 = vcombine.low %v803_v53, %v817_v7  ;;  %v15257_v42 = vcombine.low %v831_v33, %v845_v27  ;;  %v15259_v10 = vrot.slane %v870_v52, 5  ;;  %v917_v28 = vshrl.u32 %v419_v41, 16  ;;  %v420_v33 = vld [vmem:[%s14534_s26 + $0x104] sm:$0x1]  ;;  %v422_v52 = vld [vmem:[%s14534_s26 + $0x110] sm:$0x1] }
  0x92   : > { %v19863_v46 = vcombine.low %v14822_v40, %v14831_v49  ;;  %v15266_v0 = vrot.slane %v867_v21, 4  ;;  %v881_v23 = vor.u32 %v880_v44, %v877_v25  ;;  %v912_v22 = vshll.u32 %v418_v29, 16  ;;  %v13904_v40 = vld [vmem:[%s19644_s1 + $0x30] sm:$0xff]   ;;  %v425_v25 = vld [vmem:[%s14534_s26 + $0x124] sm:$0xf] }
  0x93   : > { %v920_v24 = vshll.u32 %v419_v41, 16  ;;  %v19864_v53 = vcombine.low %v14848_v37, %v14851_v14  ;;  %v15280_v7 = vrot.slane %v884_v60, 5  ;;  %v931_v34 = vshrl.u32 %v421_v36, 16 }
  0x94   : > { %13199 = vmatmul.mubr.msk.bf16.vlgmr.msra.gmra.mrb[0].mxu0 %vm1746_vm2, %v19863_v46  ;;  %v895_v37 = vor.u32 %v894_v51, %v891_v62  ;;  %v15283_v14 = vrot.slane %v898_v4, 5  ;;  %v909_v27 = vor.u32 %v908_v45, %v905_v31  ;;  %v945_v19 = vshrl.u32 %v423_v26, 16  ;;  %v424_v51 = vld [vmem:[%s14534_s26 + $0x11c] sm:$0x1] }
  0x95   : > { %13231 = vmatpush3.bf16.msra.mxu0 %v14862_v9  ;;  %13202 = vmatprep.mubr.msk.bf16.mxu0 %vm1746_vm2, %v19864_v53  ;;  %v934_v9 = vshll.u32 %v421_v36, 16  ;;  %v919_v5 = vrot.slane %v917_v28, 4  ;;  %v922_v21 = vrot.slane %v920_v24, 5  ;;  %v933_v44 = vrot.slane %v931_v34, 4  ;;  %v426_v36 = vld [vmem:[%s14534_s26 + $0x128] sm:$0x1] }
  0x96   : > { %13232 = vmatprep.subr.bf16.mxu0 %v13899_v20  ;;  %v15292_v60 = vrot.slane %v881_v23, 4  ;;  %v15294_v62 = vrot.slane %v912_v22, 5  ;;  %v926_v29 = vshll.u32 %v420_v33, 16  ;;  %v940_v4 = vshll.u32 %v422_v52, 16  ;;  %v13909_v46 = vld [vmem:[%s19644_s1 + $0x38] sm:$0xff]  }
  0x97   : > { %v936_v41 = vrot.slane %v934_v9, 5  ;;  %v947_v31 = vrot.slane %v945_v19, 4  ;;  %v948_v45 = vshll.u32 %v423_v26, 16  ;;  %v959_v28 = vshrl.u32 %v425_v25, 16  ;;  %v428_v9 = vld [vmem:[%s14534_s26 + $0x134] sm:$0x1] }
  0x98   : > { %v15301_v23 = vrot.slane %v895_v37, 4  ;;  %v15303_v22 = vrot.slane %v909_v27, 4  ;;  %v962_v24 = vshll.u32 %v425_v25, 16  ;;  %v973_v53 = vshrl.u32 %v427_v43, 16  ;;  %v429_v26 = vld [vmem:[%s14534_s26 + $0x1b4] sm:$0xf] }
  0x99   : > { %13233 = vmatpush3.bf16.msra.mxu0 %v13899_v20  ;;  %v923_v33 = vor.u32 %v922_v21, %v919_v5  ;;  %v937_v20 = vor.u32 %v936_v41, %v933_v44  ;;  %v950_v34 = vrot.slane %v948_v45, 5  ;;  %v961_v52 = vrot.slane %v959_v28, 4 }
  0x9a   : > { %13234 = vmatprep.subr.bf16.mxu0 %v13904_v40  ;;  %v19865_v19 = vcombine.low %v14869_v59, %v14872_v56  ;;  %v15311_v49 = vrot.slane %v926_v29, 5  ;;  %v954_v37 = vshll.u32 %v424_v51, 16  ;;  %v964_v16 = vrot.slane %v962_v24, 5  ;;  %v15323_v56 = vld [vmem:[%s19644_s1 + $0x80] sm:$0xff]   ;;  %v430_v51 = vld [vmem:[%s14534_s26 + $0x1b8] sm:$0x1] }
  0x9b   : > { %v968_v27 = vshll.u32 %v426_v36, 16  ;;  %v19866_v25 = vcombine.low %v14898_v47, %v14908_v39  ;;  %v15318_v5 = vrot.slane %v940_v4, 5  ;;  %v951_v21 = vor.u32 %v950_v34, %v947_v31 }
  0x9c   : > { %13203 = vmatmul.mubr.msk.bf16.gmra.mrb[4].mxu0 %vm1746_vm2, %v19865_v19  ;;  %v975_v44 = vrot.slane %v973_v53, 4  ;;  %v976_v59 = vshll.u32 %v427_v43, 16  ;;  %v965_v41 = vor.u32 %v964_v16, %v961_v52  ;;  %v982_v29 = vshll.u32 %v428_v9, 16  ;;  %v433_v53 = vld [vmem:[%s14534_s26 + $0x1cc] sm:$0xf] }
  0x9d   : > { %13206 = vmatprep.mubr.msk.bf16.mxu0 %vm1746_vm2, %v19866_v25  ;;  %13235 = vmatpush3.bf16.msra.mxu0 %v13904_v40  ;;  %v987_v45 = vshrl.u32 %v429_v26, 16  ;;  %v990_v47 = vshll.u32 %v429_v26, 16  ;;  %v924_v39 = vrot.slane %v923_v33, 4  ;;  %v938_v36 = vrot.slane %v937_v20, 4  ;;  %v432_v26 = vld [vmem:[%s14534_s26 + $0x1c4] sm:$0x1] }
  0x9e   : > { %13236 = vmatprep.subr.bf16.mxu0 %v13909_v46  ;;  %v978_v40 = vrot.slane %v976_v59, 5  ;;  %v1001_v4 = vshrl.u32 %v431_v63, 16  ;;  %v956_v28 = vrot.slane %v954_v37, 5  ;;  %v970_v31 = vrot.slane %v968_v27, 5  ;;  %v435_v59 = vld [vmem:[%s14534_s26 + $0x1d8] sm:$0xf] }
  0x9f   : > { %v989_v43 = vrot.slane %v987_v45, 4  ;;  %v992_v24 = vrot.slane %v990_v47, 5  ;;  %v952_v34 = vrot.slane %v951_v21, 4  ;;  %v966_v19 = vrot.slane %v965_v41, 4 }
  0xa0   : > { %v979_v25 = vor.u32 %v978_v40, %v975_v44  ;;  %v996_v54 = vshll.u32 %v430_v51, 16  ;;  %v887_v16 = vsel %vm14570_vm3, %v15292_v60, %v15280_v7  ;;  %v984_v33 = vrot.slane %v982_v29, 5  ;;  %v439_v51 = vld [vmem:[%s14534_s26 + $0x1f0] sm:$0xf] }
  0xa1   : > { %13237 = vmatpush3.bf16.msra.mxu0 %v13909_v46  ;;  %v993_v20 = vor.u32 %v992_v24, %v989_v43  ;;  %v1004_v9 = vshll.u32 %v431_v63, 16  ;;  %v1003_v46 = vrot.slane %v1001_v4, 4  ;;  %v1015_v37 = vshrl.u32 %v433_v53, 16 }
  0xa2   : > { %13270 = vmatprep.subr.bf16.mxu0 %v15323_v56  ;;  %v980_v52 = vrot.slane %v979_v25, 4  ;;  %v1018_v27 = vshll.u32 %v433_v53, 16  ;;  %v19867_v21 = vcombine.low %v14918_v35, %v14927_v30  ;;  %v901_v7 = vsel %vm14570_vm3, %v15301_v23, %v15283_v14 }
  0xa3   : > { %v915_v63 = vsel %vm14570_vm3, %v15303_v22, %v15294_v62  ;;  %v929_v60 = vsel %vm14570_vm3, %v924_v39, %v15311_v49  ;;  %v1006_v44 = vrot.slane %v1004_v9, 5  ;;  %v19868_v35 = vcombine.low %v14936_v13, %v14949_v3  ;;  %v434_v49 = vld [vmem:[%s14534_s26 + $0x1d0] sm:$0x1]  ;;  %v437_v22 = vld [vmem:[%s14534_s26 + $0x1e4] sm:$0xf] }
  0xa4   : > { %13207 = vmatmul.mubr.msk.bf16.gmra.mrb[8].mxu0 %vm1746_vm2, %v19867_v21  ;;  %v943_v30 = vsel %vm14570_vm3, %v938_v36, %v15318_v5  ;;  %v957_v14 = vsel %vm14570_vm3, %v952_v34, %v956_v28  ;;  %v971_v62 = vsel %vm14570_vm3, %v966_v19, %v970_v31  ;;  %v15360_v23 = vrot.slane %v996_v54, 5  ;;  %v436_v28 = vld [vmem:[%s14534_s26 + $0x1dc] sm:$0x1] }
  0xa5   : > { %13210 = vmatprep.mubr.msk.bf16.mxu0 %vm1746_vm2, %v19868_v35  ;;  %v15364_v41 = vrot.slane %v993_v20, 4  ;;  %v1010_v3 = vshll.u32 %v432_v26, 16  ;;  %v1017_v13 = vrot.slane %v1015_v37, 4  ;;  %v1020_v29 = vrot.slane %v1018_v27, 5  ;;  %v438_v26 = vld [vmem:[%s14534_s26 + $0x1e8] sm:$0x1] }
  0xa6   : > { %v985_v5 = vsel %vm14570_vm3, %v980_v52, %v984_v33  ;;  %v1007_v45 = vor.u32 %v1006_v44, %v1003_v46  ;;  %v1029_v47 = vshrl.u32 %v435_v59, 16  ;;  %v1032_v39 = vshll.u32 %v435_v59, 16  ;;  %v440_v37 = vld [vmem:[%s14534_s26 + $0x1f4] sm:$0x1]  ;;  %v442_v35 = vld [vmem:[%s14534_s26 + $0x200] sm:$0x1] }
  0xa7   : > { %v19869_v54 = vsel %vm14570_vm3, %v15266_v0, %v15259_v10  ;;  %v19870_v36 = vsel %vm14570_vm3, %v15249_v17, %v15251_v15  ;;  %v15381_v4 = vcombine.low %v887_v16, %v901_v7  ;;  %v1043_v31 = vshrl.u32 %v437_v22, 16  ;;  %v441_v0 = vld [vmem:[%s14534_s26 + $0x1fc] sm:$0xf]  ;;  %v443_v16 = vld [vmem:[%s14534_s26 + $0x208] sm:$0xf] }
  0xa8   : > { %v15379_v40 = vcombine.low %v19870_v36, %v19869_v54  ;;  %v1046_v43 = vshll.u32 %v437_v22, 16  ;;  %v15384_v24 = vcombine.low %v915_v63, %v929_v60  ;;  %v15386_v53 = vcombine.low %v943_v30, %v957_v14 }
  0xa9   : > { %v1024_v34 = vshll.u32 %v434_v49, 16  ;;  %v1057_v10 = vshrl.u32 %v439_v51, 16  ;;  %v15389_v19 = vcombine.low %v971_v62, %v985_v5  ;;  %v999_v17 = vsel %vm14570_vm3, %v15364_v41, %v15360_v23  ;;  %v445_v49 = vld [vmem:[%s14534_s26 + $0x28c] sm:$0xf] }
  0xaa   : > { %v1012_v15 = vrot.slane %v1010_v3, 5  ;;  %v1021_v25 = vor.u32 %v1020_v29, %v1017_v13  ;;  %v1008_v33 = vrot.slane %v1007_v45, 4  ;;  %v1031_v20 = vrot.slane %v1029_v47, 4  ;;  %v447_v3 = vld [vmem:[%s14534_s26 + $0x298] sm:$0xf] }
  0xab   : > { %v1034_v9 = vrot.slane %v1032_v39, 5  ;;  %v1038_v52 = vshll.u32 %v436_v28, 16  ;;  %v19871_v46 = vcombine.low %v14962_v1, %v14972_v11  ;;  %v1045_v27 = vrot.slane %v1043_v31, 4  ;;  %v444_v47 = vld [vmem:[%s14534_s26 + $0x20c] sm:$0x1] }
  0xac   : > { %v1048_v21 = vrot.slane %v1046_v43, 5  ;;  %v1060_v7 = vshll.u32 %v439_v51, 16  ;;  %v1071_v63 = vshrl.u32 %v441_v0, 16  ;;  %v19872_v60 = vcombine.low %v14981_v55, %v14997_v12 }
  0xad   : > { %13211 = vmatmul.mubr.msk.bf16.gmra.mrb[12].mxu0 %vm1746_vm2, %v19871_v46  ;;  %v15406_v44 = vrot.slane %v1024_v34, 5  ;;  %v1059_v59 = vrot.slane %v1057_v10, 4  ;;  %v1074_v30 = vshll.u32 %v441_v0, 16  ;;  %v1085_v1 = vshrl.u32 %v443_v16, 16  ;;  %v446_v34 = vld [vmem:[%s14534_s26 + $0x290] sm:$0x1] }
  0xae   : > { %13214 = vmatprep.mubr.msk.bf16.mxu0 %vm1746_vm2, %v19872_v60  ;;  %v15409_v11 = vrot.slane %v1021_v25, 4  ;;  %v1052_v14 = vshll.u32 %v438_v26, 16  ;;  %v1062_v62 = vrot.slane %v1060_v7, 5  ;;  %v1073_v23 = vrot.slane %v1071_v63, 4  ;;  %v451_v63 = vld [vmem:[%s14534_s26 + $0x2b0] sm:$0xf] }
  0xaf   : > { %v1035_v22 = vor.u32 %v1034_v9, %v1031_v20  ;;  %v15412_v41 = vrot.slane %v1038_v52, 5  ;;  %v1066_v12 = vshll.u32 %v440_v37, 16  ;;  %v1076_v55 = vrot.slane %v1074_v30, 5  ;;  %v449_v20 = vld [vmem:[%s14534_s26 + $0x2a4] sm:$0xf] }
  0xb0   : > { %v1013_v13 = vsel %vm14570_vm3, %v1008_v33, %v1012_v15  ;;  %v1049_v29 = vor.u32 %v1048_v21, %v1045_v27  ;;  %v1087_v51 = vrot.slane %v1085_v1, 4  ;;  %v1088_v5 = vshll.u32 %v443_v16, 16 }
  0xb1   : > { %v1063_v45 = vor.u32 %v1062_v62, %v1059_v59  ;;  %v1080_v39 = vshll.u32 %v442_v35, 16  ;;  %v1099_v54 = vshrl.u32 %v445_v49, 16  ;;  %v1102_v36 = vshll.u32 %v445_v49, 16 }
  0xb2   : > { %v15418_v28 = vrot.slane %v1052_v14, 5  ;;  %v1077_v31 = vor.u32 %v1076_v55, %v1073_v23  ;;  %v1090_v43 = vrot.slane %v1088_v5, 5  ;;  %v1113_v10 = vshrl.u32 %v447_v3, 16  ;;  %v450_v14 = vld [vmem:[%s14534_s26 + $0x2a8] sm:$0x1] }
  0xb3   : > { %v15421_v0 = vcombine.low %v999_v17, %v1013_v13  ;;  %v1036_v25 = vrot.slane %v1035_v22, 4  ;;  %v1101_v15 = vrot.slane %v1099_v54, 4  ;;  %v1104_v33 = vrot.slane %v1102_v36, 5  ;;  %v455_v13 = vld [vmem:[%s14534_s26 + $0x2c8] sm:$0xf] }
  0xb4   : > { %v19873_v16 = vcombine.low %v15006_v61, %v15015_v6  ;;  %v1050_v9 = vrot.slane %v1049_v29, 4  ;;  %v1068_v52 = vrot.slane %v1066_v12, 5  ;;  %v1091_v26 = vor.u32 %v1090_v43, %v1087_v51  ;;  %v448_v61 = vld [vmem:[%s14534_s26 + $0x29c] sm:$0x1]  ;;  %v452_v5 = vld [vmem:[%s14534_s26 + $0x2b4] sm:$0x1] }
  0xb5   : > { %v1094_v46 = vshll.u32 %v444_v47, 16  ;;  %v19874_v37 = vcombine.low %v15028_v18, %v15041_v50  ;;  %v1064_v17 = vrot.slane %v1063_v45, 4  ;;  %v1082_v27 = vrot.slane %v1080_v39, 5  ;;  %v453_v12 = vld [vmem:[%s14534_s26 + $0x2bc] sm:$0xf] }
  0xb6   : > { %13215 = vmatmul.mubr.msk.bf16.gmra.mrb[16].mxu0 %vm1746_vm2, %v19873_v16  ;;  %v1115_v21 = vrot.slane %v1113_v10, 4  ;;  %v1116_v7 = vshll.u32 %v447_v3, 16  ;;  %v1078_v60 = vrot.slane %v1077_v31, 4  ;;  %v1108_v6 = vshll.u32 %v446_v34, 16  ;;  %v454_v54 = vld [vmem:[%s14534_s26 + $0x2c0] sm:$0x1] }
  0xb7   : > { %13218 = vmatprep.mubr.msk.bf16.mxu0 %vm1746_vm2, %v19874_v37  ;;  %v1127_v59 = vshrl.u32 %v449_v20, 16  ;;  %v1130_v35 = vshll.u32 %v449_v20, 16  ;;  %v1027_v18 = vsel %vm14570_vm3, %v15409_v11, %v15406_v44  ;;  %v1041_v50 = vsel %vm14570_vm3, %v1036_v25, %v15412_v41  ;;  %v19877_v20 = vld [vmem:[#allocation59_spill] sm:$0xff] }
  0xb8   : > { %v1105_v30 = vor.u32 %v1104_v33, %v1101_v15  ;;  %v1118_v1 = vrot.slane %v1116_v7, 5  ;;  %v1055_v62 = vsel %vm14570_vm3, %v1050_v9, %v15418_v28  ;;  %v1092_v23 = vrot.slane %v1091_v26, 4  ;;  %v457_v15 = vld [vmem:[%s14534_s26 + $0x2d4] sm:$0xf]  ;;  %v456_v7 = vld [vmem:[%s14534_s26 + $0x2cc] sm:$0x1] }
  0xb9   : > { %v1096_v49 = vrot.slane %v1094_v46, 5  ;;  %v1141_v22 = vshrl.u32 %v451_v63, 16  ;;  %v1122_v3 = vshll.u32 %v448_v61, 16  ;;  %v1129_v44 = vrot.slane %v1127_v59, 4  ;;  %v19876_v33 = vld [vmem:[#allocation56_spill] sm:$0xff] }
  0xba   : > { %v1119_v55 = vor.u32 %v1118_v1, %v1115_v21  ;;  %v1132_v11 = vrot.slane %v1130_v35, 5  ;;  %v1069_v41 = vsel %vm14570_vm3, %v1064_v17, %v1068_v52  ;;  %v1083_v29 = vsel %vm14570_vm3, %v1078_v60, %v1082_v27 }
  0xbb   : > { %v1110_v51 = vrot.slane %v1108_v6, 5  ;;  %v1144_v45 = vshll.u32 %v451_v63, 16  ;;  %v1106_v47 = vrot.slane %v1105_v30, 4  ;;  %v1136_v39 = vshll.u32 %v450_v14, 16 }
  0xbc   : > { %v1155_v36 = vshrl.u32 %v453_v12, 16  ;;  %v1158_v28 = vshll.u32 %v453_v12, 16  ;;  %v19875_v31 = vcombine.low %v15051_v38, %v15060_v8  ;;  %v1097_v43 = vsel %vm14570_vm3, %v1092_v23, %v1096_v49  ;;  %v459_v38 = vld [vmem:[%s14534_s26 + $0x2e0] sm:$0xf] }
  0xbd   : > { %v1143_v34 = vrot.slane %v1141_v22, 4  ;;  %v1146_v10 = vrot.slane %v1144_v45, 5  ;;  %v1169_v25 = vshrl.u32 %v455_v13, 16  ;;  %v19878_v16 = vcombine.low %v19876_v33, %v19877_v20 }
  0xbe   : > { %13219 = vmatmul.mubr.msk.bf16.gmra.mrb[20].mxu0 %vm1746_vm2, %v19875_v31  ;;  %v1120_v9 = vrot.slane %v1119_v55, 4  ;;  %v1124_v52 = vrot.slane %v1122_v3, 5  ;;  %v1133_v26 = vor.u32 %v1132_v11, %v1129_v44  ;;  %v1150_v46 = vshll.u32 %v452_v5, 16  ;;  %v11386_v55 = vld [vmem:[%s14534_s26 + $0x7c] sm:$0xf]  ;;  %v19883_v31 = vld [vmem:[#allocation72_spill] sm:$0xff] }
  0xbf   : > { %13222 = vmatprep.mubr.msk.bf16.mxu0 %vm1746_vm2, %v19878_v16  ;;  %v15465_v8 = vcombine.low %v1027_v18, %v1041_v50  ;;  %v15467_v37 = vcombine.low %v1055_v62, %v1069_v41  ;;  %v1157_v17 = vrot.slane %v1155_v36, 4  ;;  %v1160_v27 = vrot.slane %v1158_v28, 5  ;;  %v11384_v62 = vld [vmem:[%s14534_s26 + $0x70] sm:$0xf]  ;;  %v458_v44 = vld [vmem:[%s14534_s26 + $0x2d8] sm:$0x1] }
  0xc0   : > { %v15469_v21 = vcombine.low %v1083_v29, %v1097_v43  ;;  %v1171_v63 = vrot.slane %v1169_v25, 4  ;;  %v1172_v60 = vshll.u32 %v455_v13, 16  ;;  %v1183_v61 = vshrl.u32 %v457_v15, 16  ;;  %v19879_v29 = vld [vmem:[#allocation61_spill] sm:$0xff]  ;;  %v19882_v28 = vld [vmem:[#allocation68_spill] sm:$0xff] }
  0xc1   : > { %v1111_v6 = vsel %vm14570_vm3, %v1106_v47, %v1110_v51  ;;  %v1147_v59 = vor.u32 %v1146_v10, %v1143_v34  ;;  %v1164_v35 = vshll.u32 %v454_v54, 16  ;;  %v1186_v18 = vshll.u32 %v457_v15, 16  ;;  %v19880_v51 = vld [vmem:[#allocation64_spill] sm:$0xff] }
  0xc2   : > { %v1134_v50 = vrot.slane %v1133_v26, 4  ;;  %v1138_v30 = vrot.slane %v1136_v39, 5  ;;  %v1174_v1 = vrot.slane %v1172_v60, 5  ;;  %v1197_v14 = vshrl.u32 %v459_v38, 16  ;;  %v460_v39 = vld [vmem:[%s14534_s26 + $0x2e4] sm:$0x1] }
  0xc3   : > { %v1125_v23 = vsel %vm14570_vm3, %v1120_v9, %v1124_v52  ;;  %v1152_v49 = vrot.slane %v1150_v46, 5  ;;  %v1161_v22 = vor.u32 %v1160_v27, %v1157_v17  ;;  %v1178_v12 = vshll.u32 %v456_v7, 16  ;;  %v11385_v15 = vld [vmem:[%s14534_s26 + $0x74] sm:$0x1]  ;;  %v11388_v26 = vld [vmem:[%s14534_s26 + $0x88] sm:$0xf] }
  0xc4   : > { %v1175_v3 = vor.u32 %v1174_v1, %v1171_v63  ;;  %v1185_v11 = vrot.slane %v1183_v61, 4  ;;  %v1188_v13 = vrot.slane %v1186_v18, 5  ;;  %v1200_v41 = vshll.u32 %v459_v38, 16  ;;  %v11390_v7 = vld [vmem:[%s14534_s26 + $0x94] sm:$0xf] }
  0xc5   : > { %v19881_v5 = vcombine.low %v19879_v29, %v19880_v51  ;;  %v1148_v45 = vrot.slane %v1147_v59, 4  ;;  %v1166_v47 = vrot.slane %v1164_v35, 5  ;;  %v2872_v54 = vshrl.u32 %v11384_v62, 16  ;;  %v11387_v61 = vld [vmem:[%s14534_s26 + $0x80] sm:$0x1] }
  0xc6   : > { %v2875_v36 = vshll.u32 %v11384_v62, 16  ;;  %v19884_v43 = vcombine.low %v19882_v28, %v19883_v31  ;;  %v15488_v34 = vcombine.low %v1111_v6, %v1125_v23  ;;  %v1199_v10 = vrot.slane %v1197_v14, 4  ;;  %v11389_v23 = vld [vmem:[%s14534_s26 + $0x8c] sm:$0x1]  ;;  %v11391_v31 = vld [vmem:[%s14534_s26 + $0x98] sm:$0x1] }
  0xc7   : > { %13223 = vmatmul.mubr.msk.bf16.gmra.mrb[24].mxu0 %vm1746_vm2, %v19881_v5  ;;  %v1202_v25 = vrot.slane %v1200_v41, 5  ;;  %v2886_v33 = vshrl.u32 %v11386_v55, 16  ;;  %v1139_v20 = vsel %vm14570_vm3, %v1134_v50, %v1138_v30  ;;  %v1162_v16 = vrot.slane %v1161_v22, 4 }
  0xc8   : > { %13226 = vmatprep.mubr.msk.bf16.mxu0 %vm1746_vm2, %v19884_v43  ;;  %v1180_v9 = vrot.slane %v1178_v12, 5  ;;  %v1192_v52 = vshll.u32 %v458_v44, 16  ;;  %v1176_v46 = vrot.slane %v1175_v3, 4  ;;  %v1189_v38 = vor.u32 %v1188_v13, %v1185_v11  ;;  %v11392_v44 = vld [vmem:[%s14534_s26 + $0xa0] sm:$0xf] }
  0xc9   : > { %v2874_v17 = vrot.slane %v2872_v54, 4  ;;  %v2877_v27 = vrot.slane %v2875_v36, 5  ;;  %v1153_v63 = vsel %vm14570_vm3, %v1148_v45, %v1152_v49  ;;  %v1206_v60 = vshll.u32 %v460_v39, 16  ;;  %v11394_v11 = vld [vmem:[%s14534_s26 + $0xac] sm:$0xf]  ;;  %v19885_v13 = vld [vmem:[#allocation78_spill] sm:$0xff] }
  0xca   : > { %v2888_v6 = vrot.slane %v2886_v33, 4  ;;  %v2889_v59 = vshll.u32 %v11386_v55, 16  ;;  %v1203_v35 = vor.u32 %v1202_v25, %v1199_v10  ;;  %v2881_v18 = vshll.u32 %v11385_v15, 16 }
  0xcb   : > { %v2900_v50 = vshrl.u32 %v11388_v26, 16  ;;  %v2903_v30 = vshll.u32 %v11388_v26, 16  ;;  %v1167_v1 = vsel %vm14570_vm3, %v1162_v16, %v1166_v47  ;;  %v15500_v14 = vrot.slane %v1192_v52, 5  ;;  %v11396_v16 = vld [vmem:[%s14534_s26 + $0xb8] sm:$0xf] }
  0xcc   : > { %v2891_v62 = vrot.slane %v2889_v59, 5  ;;  %v2914_v22 = vshrl.u32 %v11390_v7, 16  ;;  %v1181_v49 = vsel %vm14570_vm3, %v1176_v46, %v1180_v9  ;;  %v15505_v12 = vrot.slane %v1189_v38, 4  ;;  %v11398_v46 = vld [vmem:[%s14534_s26 + $0xc4] sm:$0xf] }
  0xcd   : > { %v2878_v3 = vor.u32 %v2877_v27, %v2874_v17  ;;  %v2895_v55 = vshll.u32 %v11387_v61, 16  ;;  %v19886_v41 = vcombine.low %v19885_v13, %v15172_v48  ;;  %v15513_v29 = vcombine.low %v1139_v20, %v1153_v63  ;;  %v11393_v27 = vld [vmem:[%s14534_s26 + $0xa4] sm:$0x1] }
  0xce   : > { %v2892_v51 = vor.u32 %v2891_v62, %v2888_v6  ;;  %v2902_v5 = vrot.slane %v2900_v50, 4  ;;  %v2905_v45 = vrot.slane %v2903_v30, 5  ;;  %v1204_v47 = vrot.slane %v1203_v35, 4  ;;  %v11395_v6 = vld [vmem:[%s14534_s26 + $0xb0] sm:$0x1] }
  0xcf   : > { %13227 = vmatmul.mubr.msk.bf16.gmra.mrb[28].mxu0 %vm1746_vm2, %v19886_v41  ;;  %v1208_v39 = vrot.slane %v1206_v60, 5  ;;  %v2883_v54 = vrot.slane %v2881_v18, 5  ;;  %v2917_v36 = vshll.u32 %v11390_v7, 16  ;;  %v15517_v28 = vcombine.low %v1167_v1, %v1181_v49  ;;  %v13914_v60 = vld [vmem:[%s19644_s1 + $0x88] sm:$0xff]  }
  0xd0   : > { %13238 = vmatprep.mubr.msk.bf16.mxu0 %vm1746_vm2, %v15233_v57  ;;  %v2916_v48 = vrot.slane %v2914_v22, 4  ;;  %v2928_v43 = vshrl.u32 %v11392_v44, 16  ;;  %v2931_v10 = vshll.u32 %v11392_v44, 16  ;;  %v2879_v25 = vrot.slane %v2878_v3, 4  ;;  %v11397_v44 = vld [vmem:[%s14534_s26 + $0xbc] sm:$0x1] }
  0xd1   : > { %v2909_v15 = vshll.u32 %v11389_v23, 16  ;;  %v2919_v33 = vrot.slane %v2917_v36, 5  ;;  %v2942_v20 = vshrl.u32 %v11394_v11, 16  ;;  %v1195_v57 = vsel %vm14570_vm3, %v15505_v12, %v15500_v14  ;;  %v11400_v12 = vld [vmem:[%s14534_s26 + $0x148] sm:$0xf] }
  0xd2   : > { %v2893_v9 = vrot.slane %v2892_v51, 4  ;;  %v2897_v52 = vrot.slane %v2895_v55, 5  ;;  %v2906_v26 = vor.u32 %v2905_v45, %v2902_v5  ;;  %v1209_v38 = vsel %vm14570_vm3, %v1204_v47, %v1208_v39  ;;  %v11399_v45 = vld [vmem:[%s14534_s26 + $0xc8] sm:$0x1]  ;;  %v11402_v39 = vld [vmem:[%s14534_s26 + $0x154] sm:$0xf] }
  0xd3   : > { %v2923_v17 = vshll.u32 %v11391_v31, 16  ;;  %v2930_v7 = vrot.slane %v2928_v43, 4  ;;  %v2933_v63 = vrot.slane %v2931_v10, 5  ;;  %v2920_v61 = vor.u32 %v2919_v33, %v2916_v48 }
  0xd4   : > { %v2944_v59 = vrot.slane %v2942_v20, 4  ;;  %v2945_v35 = vshll.u32 %v11394_v11, 16  ;;  %v2956_v18 = vshrl.u32 %v11396_v16, 16  ;;  %v2884_v50 = vsel %vm14570_vm3, %v2879_v25, %v2883_v54  ;;  %v11401_v25 = vld [vmem:[%s14534_s26 + $0x14c] sm:$0x1] }
  0xd5   : > { %v2911_v30 = vrot.slane %v2909_v15, 5  ;;  %v2959_v1 = vshll.u32 %v11396_v16, 16  ;;  %v2970_v14 = vshrl.u32 %v11398_v46, 16  ;;  %v2898_v62 = vsel %vm14570_vm3, %v2893_v9, %v2897_v52  ;;  %v11406_v9 = vld [vmem:[%s14534_s26 + $0x16c] sm:$0xf]  ;;  %v13916_v52 = vld [vmem:[%s19644_s1 + $0x98] sm:$0xff]  }
  0xd6   : > { %v2907_v23 = vrot.slane %v2906_v26, 4  ;;  %v2937_v22 = vshll.u32 %v11393_v27, 16  ;;  %v2947_v49 = vrot.slane %v2945_v35, 5  ;;  %v2934_v3 = vor.u32 %v2933_v63, %v2930_v7 }
  0xd7   : > { %13239 = vmatmul.mubr.msk.bf16.vlgmr.msra.gmra.mrb[0].mxu0 %vm1746_vm2, %v15255_v58  ;;  %v2951_v55 = vshll.u32 %v11395_v6, 16  ;;  %v2958_v11 = vrot.slane %v2956_v18, 4  ;;  %v2961_v13 = vrot.slane %v2959_v1, 5  ;;  %v13915_v58 = vld [vmem:[%s19644_s1 + $0x90] sm:$0xff]   ;;  %v2921_v41 = vrot.slane %v2920_v61, 4 }
  0xd8   : > { %13271 = vmatpush3.bf16.msra.mxu0 %v15323_v56  ;;  %13242 = vmatprep.mubr.msk.bf16.mxu0 %vm1746_vm2, %v15257_v42  ;;  %v2925_v51 = vrot.slane %v2923_v17, 5  ;;  %v2948_v5 = vor.u32 %v2947_v49, %v2944_v59  ;;  %v2973_v56 = vshll.u32 %v11398_v46, 16  ;;  %v15548_v47 = vcombine.low %v1195_v57, %v1209_v38  ;;  %v11404_v57 = vld [vmem:[%s14534_s26 + $0x160] sm:$0xf]  ;;  %v11403_v1 = vld [vmem:[%s14534_s26 + $0x158] sm:$0x1] }
  0xd9   : > { %13272 = vmatprep.subr.bf16.mxu0 %v13914_v60  ;;  %v2972_v42 = vrot.slane %v2970_v14, 4  ;;  %v2984_v54 = vshrl.u32 %v11400_v12, 16  ;;  %v2987_v36 = vshll.u32 %v11400_v12, 16  ;;  %v15551_v31 = vcombine.low %v2884_v50, %v2898_v62  ;;  %v15580_v62 = vld [vmem:[%s19644_s1 + $0xa0] sm:$0xff]   ;;  %v11408_v12 = vld [vmem:[%s14534_s26 + $0x178] sm:$0xf] }
  0xda   : > { %v2939_v48 = vrot.slane %v2937_v22, 5  ;;  %v2965_v43 = vshll.u32 %v11397_v44, 16  ;;  %v2975_v10 = vrot.slane %v2973_v56, 5  ;;  %v2912_v15 = vsel %vm14570_vm3, %v2907_v23, %v2911_v30 }
  0xdb   : > { %19887 = vst [vmem:[#allocation56_spill] sm:$0xff] %v15551_v31  ;;  %v2935_v33 = vrot.slane %v2934_v3, 4  ;;  %v2953_v20 = vrot.slane %v2951_v55, 5  ;;  %v2962_v16 = vor.u32 %v2961_v13, %v2958_v11  ;;  %v2926_v26 = vsel %vm14570_vm3, %v2921_v41, %v2925_v51  ;;  %v11410_v13 = vld [vmem:[%s14534_s26 + $0x184] sm:$0xf] }
  0xdc   : > { %13273 = vmatpush3.bf16.msra.mxu0 %v13914_v60  ;;  %v2949_v46 = vrot.slane %v2948_v5, 4  ;;  %v2979_v38 = vshll.u32 %v11399_v45, 16  ;;  %v2998_v17 = vshrl.u32 %v11402_v39, 16  ;;  %v2976_v27 = vor.u32 %v2975_v10, %v2972_v42  ;;  %v11407_v51 = vld [vmem:[%s14534_s26 + $0x170] sm:$0x1] }
  0xdd   : > { %13274 = vmatprep.subr.bf16.mxu0 %v13915_v58  ;;  %v2986_v7 = vrot.slane %v2984_v54, 4  ;;  %v2989_v63 = vrot.slane %v2987_v36, 5  ;;  %v3001_v60 = vshll.u32 %v11402_v39, 16  ;;  %v15565_v61 = vrot.slane %v2965_v43, 5 }
  0xde   : > { %v2993_v6 = vshll.u32 %v11401_v25, 16  ;;  %v3012_v59 = vshrl.u32 %v11404_v57, 16  ;;  %v3015_v35 = vshll.u32 %v11404_v57, 16  ;;  %v15569_v18 = vcombine.low %v2912_v15, %v2926_v26  ;;  %v11412_v25 = vld [vmem:[%s14534_s26 + $0x190] sm:$0xf] }
  0xdf   : > { %13243 = vmatmul.mubr.msk.bf16.gmra.mrb[4].mxu0 %vm1746_vm2, %v15379_v40  ;;  %v2940_v50 = vsel %vm14570_vm3, %v2935_v33, %v2939_v48  ;;  %v15573_v30 = vrot.slane %v2962_v16, 4  ;;  %v11405_v40 = vld [vmem:[%s14534_s26 + $0x164] sm:$0x1]  ;;  %v3026_v14 = vshrl.u32 %v11406_v9, 16  ;;  %v15584_v23 = vrot.slane %v2979_v38, 5 }
  0xe0   : > { %13246 = vmatprep.mubr.msk.bf16.mxu0 %vm1746_vm2, %v15381_v4  ;;  %13275 = vmatpush3.bf16.msra.mxu0 %v13915_v58  ;;  %19888 = vst [vmem:[#allocation59_spill] sm:$0xff] %v15569_v18  ;;  %v2954_v4 = vsel %vm14570_vm3, %v2949_v46, %v2953_v20  ;;  %v3000_v22 = vrot.slane %v2998_v17, 4  ;;  %v3003_v49 = vrot.slane %v3001_v60, 5  ;;  %v15587_v3 = vrot.slane %v2976_v27, 4  ;;  %v11409_v57 = vld [vmem:[%s14534_s26 + $0x17c] sm:$0x1] }
  0xe1   : > { %13276 = vmatprep.subr.bf16.mxu0 %v13916_v52  ;;  %v2990_v55 = vor.u32 %v2989_v63, %v2986_v7  ;;  %v3014_v44 = vrot.slane %v3012_v59, 4  ;;  %v3017_v11 = vrot.slane %v3015_v35, 5  ;;  %v15590_v58 = vrot.slane %v2993_v6, 5  ;;  %v11411_v46 = vld [vmem:[%s14534_s26 + $0x188] sm:$0x1] }
  0xe2   : > { %v3007_v41 = vshll.u32 %v11403_v1, 16  ;;  %v3028_v5 = vrot.slane %v3026_v14, 4  ;;  %v3029_v45 = vshll.u32 %v11406_v9, 16  ;;  %v15593_v56 = vcombine.low %v2940_v50, %v2954_v4  ;;  %v11414_v9 = vld [vmem:[%s14534_s26 + $0x19c] sm:$0xf] }
  0xe3   : > { %v3021_v42 = vshll.u32 %v11405_v40, 16  ;;  %v3040_v39 = vshrl.u32 %v11408_v12, 16  ;;  %v3043_v54 = vshll.u32 %v11408_v12, 16  ;;  %v2968_v36 = vsel %vm14570_vm3, %v15573_v30, %v15565_v61  ;;  %v11413_v60 = vld [vmem:[%s14534_s26 + $0x194] sm:$0x1] }
  0xe4   : > { %13277 = vmatpush3.bf16.msra.mxu0 %v13916_v52  ;;  %19889 = vst [vmem:[#allocation61_spill] sm:$0xff] %v15593_v56  ;;  %v3004_v48 = vor.u32 %v3003_v49, %v3000_v22  ;;  %v3031_v43 = vrot.slane %v3029_v45, 5  ;;  %v3054_v10 = vshrl.u32 %v11410_v13, 16  ;;  %v2982_v15 = vsel %vm14570_vm3, %v15587_v3, %v15584_v23  ;;  %v11421_v3 = vld [vmem:[%s14534_s26 + $0x23c] sm:$0x1] }
  0xe5   : > { %13310 = vmatprep.subr.bf16.mxu0 %v15580_v62  ;;  %v15605_v33 = vrot.slane %v2990_v55, 4  ;;  %v3018_v20 = vor.u32 %v3017_v11, %v3014_v44  ;;  %v3035_v16 = vshll.u32 %v11407_v51, 16  ;;  %v3009_v52 = vrot.slane %v3007_v41, 5 }
  0xe6   : > { %v3032_v26 = vor.u32 %v3031_v43, %v3028_v5  ;;  %v3042_v38 = vrot.slane %v3040_v39, 4  ;;  %v3045_v17 = vrot.slane %v3043_v54, 5  ;;  %v3023_v27 = vrot.slane %v3021_v42, 5 }
  0xe7   : > { %13247 = vmatmul.mubr.msk.bf16.gmra.mrb[8].mxu0 %vm1746_vm2, %v15384_v24  ;;  %v3056_v7 = vrot.slane %v3054_v10, 4  ;;  %v3057_v63 = vshll.u32 %v11410_v13, 16  ;;  %v3068_v6 = vshrl.u32 %v11412_v25, 16  ;;  %v3005_v59 = vrot.slane %v3004_v48, 4  ;;  %v11416_v24 = vld [vmem:[%s14534_s26 + $0x220] sm:$0xf] }
  0xe8   : > { %13250 = vmatprep.mubr.msk.bf16.mxu0 %vm1746_vm2, %v15386_v53  ;;  %v3049_v35 = vshll.u32 %v11409_v57, 16  ;;  %v3071_v50 = vshll.u32 %v11412_v25, 16  ;;  %v3082_v1 = vshrl.u32 %v11414_v9, 16  ;;  %v3019_v40 = vrot.slane %v3018_v20, 4  ;;  %v11415_v13 = vld [vmem:[%s14534_s26 + $0x1a0] sm:$0x1] }
  0xe9   : > { %v3037_v14 = vrot.slane %v3035_v16, 5  ;;  %v3059_v4 = vrot.slane %v3057_v63, 5  ;;  %v3070_v22 = vrot.slane %v3068_v6, 4  ;;  %v3033_v49 = vrot.slane %v3032_v26, 4  ;;  %v11418_v25 = vld [vmem:[%s14534_s26 + $0x22c] sm:$0xf] }
  0xea   : > { %v3046_v12 = vor.u32 %v3045_v17, %v3042_v38  ;;  %v3063_v55 = vshll.u32 %v11411_v46, 16  ;;  %v3073_v53 = vrot.slane %v3071_v50, 5  ;;  %v2996_v44 = vsel %vm14570_vm3, %v15605_v33, %v15590_v58  ;;  %v11417_v58 = vld [vmem:[%s14534_s26 + $0x224] sm:$0x1]  ;;  %v11419_v46 = vld [vmem:[%s14534_s26 + $0x230] sm:$0x1] }
  0xeb   : > { %v3060_v11 = vor.u32 %v3059_v4, %v3056_v7  ;;  %v3084_v41 = vrot.slane %v3082_v1, 4  ;;  %v3085_v51 = vshll.u32 %v11414_v9, 16  ;;  %v3077_v45 = vshll.u32 %v11413_v60, 16  ;;  %v11420_v9 = vld [vmem:[%s14534_s26 + $0x238] sm:$0xf] }
  0xec   : > { %v3074_v5 = vor.u32 %v3073_v53, %v3070_v22  ;;  %v3096_v42 = vshrl.u32 %v11416_v24, 16  ;;  %v3099_v39 = vshll.u32 %v11416_v24, 16  ;;  %v3010_v54 = vsel %vm14570_vm3, %v3005_v59, %v3009_v52  ;;  %v11423_v53 = vld [vmem:[%s14534_s26 + $0x248] sm:$0x1] }
  0xed   : > { %v3024_v48 = vsel %vm14570_vm3, %v3019_v40, %v3023_v27  ;;  %v3051_v43 = vrot.slane %v3049_v35, 5  ;;  %v3087_v10 = vrot.slane %v3085_v51, 5  ;;  %v3038_v33 = vsel %vm14570_vm3, %v3033_v49, %v3037_v14  ;;  %v11422_v27 = vld [vmem:[%s14534_s26 + $0x244] sm:$0xf] }
  0xee   : > { %v3047_v20 = vrot.slane %v3046_v12, 4  ;;  %v3065_v16 = vrot.slane %v3063_v55, 5  ;;  %v3091_v57 = vshll.u32 %v11415_v13, 16  ;;  %v3061_v52 = vrot.slane %v3060_v11, 4  ;;  %v11426_v12 = vld [vmem:[%s14534_s26 + $0x25c] sm:$0xf] }
  0xef   : > { %13251 = vmatmul.mubr.msk.bf16.gmra.mrb[12].mxu0 %vm1746_vm2, %v15389_v19  ;;  %v3088_v26 = vor.u32 %v3087_v10, %v3084_v41  ;;  %v3098_v38 = vrot.slane %v3096_v42, 4  ;;  %v3101_v17 = vrot.slane %v3099_v39, 5  ;;  %v3075_v7 = vrot.slane %v3074_v5, 4  ;;  %v11425_v5 = vld [vmem:[%s14534_s26 + $0x254] sm:$0x1] }
  0xf0   : > { %13254 = vmatprep.mubr.msk.bf16.mxu0 %vm1746_vm2, %v15421_v0  ;;  %v3079_v63 = vrot.slane %v3077_v45, 5  ;;  %v3105_v19 = vshll.u32 %v11417_v58, 16  ;;  %v3110_v60 = vshrl.u32 %v11418_v25, 16  ;;  %v15646_v0 = vcombine.low %v2968_v36, %v2982_v15  ;;  %v11424_v36 = vld [vmem:[%s14534_s26 + $0x250] sm:$0xf] }
  0xf1   : > { %v3113_v6 = vshll.u32 %v11418_v25, 16  ;;  %v3124_v59 = vshrl.u32 %v11420_v9, 16  ;;  %v3127_v35 = vshll.u32 %v11420_v9, 16  ;;  %v15648_v50 = vcombine.low %v2996_v44, %v3010_v54  ;;  %v11428_v58 = vld [vmem:[%s14534_s26 + $0x268] sm:$0xf] }
  0xf2   : > { %19890 = vst [vmem:[#allocation64_spill] sm:$0xff] %v15646_v0  ;;  %v3089_v1 = vrot.slane %v3088_v26, 4  ;;  %v3093_v24 = vrot.slane %v3091_v57, 5  ;;  %v3138_v40 = vshrl.u32 %v11422_v27, 16  ;;  %v15650_v14 = vcombine.low %v3024_v48, %v3038_v33 }
  0xf3   : > { %19891 = vst [vmem:[#allocation68_spill] sm:$0xff] %v15648_v50  ;;  %v3052_v23 = vsel %vm14570_vm3, %v3047_v20, %v3051_v43  ;;  %v3066_v61 = vsel %vm14570_vm3, %v3061_v52, %v3065_v16  ;;  %v3102_v30 = vor.u32 %v3101_v17, %v3098_v38  ;;  %v3080_v15 = vsel %vm14570_vm3, %v3075_v7, %v3079_v63  ;;  %v11427_v43 = vld [vmem:[%s14534_s26 + $0x260] sm:$0x1]  ;;  %v11430_v16 = vld [vmem:[%s14534_s26 + $0x274] sm:$0xf] }
  0xf4   : > { %19892 = vst [vmem:[#allocation72_spill] sm:$0xff] %v15650_v14  ;;  %v15660_v4 = vrot.slane %v3105_v19, 5  ;;  %v3112_v22 = vrot.slane %v3110_v60, 4  ;;  %v3119_v49 = vshll.u32 %v11419_v46, 16  ;;  %v3115_v55 = vrot.slane %v3113_v6, 5 }
  0xf5   : > { %v3126_v44 = vrot.slane %v3124_v59, 4  ;;  %v3129_v11 = vrot.slane %v3127_v35, 5  ;;  %v3141_v13 = vshll.u32 %v11422_v27, 16  ;;  %v3094_v41 = vsel %vm14570_vm3, %v3089_v1, %v3093_v24  ;;  %v11432_v1 = vld [vmem:[%s14534_s26 + $0x2f8] sm:$0xf] }
  0xf6   : > { %v3140_v51 = vrot.slane %v3138_v40, 4  ;;  %v3152_v45 = vshrl.u32 %v11424_v36, 16  ;;  %v3155_v42 = vshll.u32 %v11424_v36, 16  ;;  %v15671_v39 = vcombine.low %v3052_v23, %v3066_v61  ;;  %v11429_v23 = vld [vmem:[%s14534_s26 + $0x26c] sm:$0x1] }
  0xf7   : > { %13255 = vmatmul.mubr.msk.bf16.gmra.mrb[16].mxu0 %vm1746_vm2, %v15465_v8  ;;  %v15673_v54 = vrot.slane %v3102_v30, 4  ;;  %v3143_v48 = vrot.slane %v3141_v13, 5  ;;  %v3166_v10 = vshrl.u32 %v11426_v12, 16  ;;  %v15677_v8 = vrot.slane %v3119_v49, 5  ;;  %v11433_v49 = vld [vmem:[%s14534_s26 + $0x2fc] sm:$0x1] }
  0xf8   : > { %13258 = vmatprep.mubr.msk.bf16.mxu0 %vm1746_vm2, %v15467_v37  ;;  %19893 = vst [vmem:[#allocation78_spill] sm:$0xff] %v15671_v39  ;;  %v3133_v25 = vshll.u32 %v11421_v3, 16  ;;  %v3154_v33 = vrot.slane %v3152_v45, 4  ;;  %v3157_v20 = vrot.slane %v3155_v42, 5  ;;  %v15680_v57 = vcombine.low %v3080_v15, %v3094_v41 }
  0xf9   : > { %v3116_v9 = vor.u32 %v3115_v55, %v3112_v22  ;;  %v3130_v52 = vor.u32 %v3129_v11, %v3126_v44  ;;  %v3147_v37 = vshll.u32 %v11423_v53, 16  ;;  %v3144_v26 = vor.u32 %v3143_v48, %v3140_v51  ;;  %v11434_v53 = vld [vmem:[%s14534_s26 + $0x304] sm:$0xf] }
  0xfa   : > { %19894 = vst [vmem:[#allocation89_spill] sm:$0xff] %v15680_v57  ;;  %v3168_v46 = vrot.slane %v3166_v10, 4  ;;  %v3169_v38 = vshll.u32 %v11426_v12, 16  ;;  %v3180_v17 = vshrl.u32 %v11428_v58, 16  ;;  %v3108_v27 = vsel %vm14570_vm3, %v15673_v54, %v15660_v4  ;;  %v11431_v4 = vld [vmem:[%s14534_s26 + $0x278] sm:$0x1] }
  0xfb   : > { %v3161_v7 = vshll.u32 %v11425_v5, 16  ;;  %v3183_v63 = vshll.u32 %v11428_v58, 16  ;;  %v3194_v19 = vshrl.u32 %v11430_v16, 16  ;;  %v3135_v60 = vrot.slane %v3133_v25, 5  ;;  %v11436_v5 = vld [vmem:[%s14534_s26 + $0x310] sm:$0xf] }
  0xfc   : > { %v3158_v6 = vor.u32 %v3157_v20, %v3154_v33  ;;  %v3171_v59 = vrot.slane %v3169_v38, 5  ;;  %v3175_v35 = vshll.u32 %v11427_v43, 16  ;;  %v3117_v24 = vrot.slane %v3116_v9, 4 }
  0xfd   : > { %v3131_v40 = vrot.slane %v3130_v52, 4  ;;  %v3182_v61 = vrot.slane %v3180_v17, 4  ;;  %v3185_v30 = vrot.slane %v3183_v63, 5  ;;  %v3145_v3 = vrot.slane %v3144_v26, 4 }
  0xfe   : > { %v3149_v36 = vrot.slane %v3147_v37, 5  ;;  %v3172_v15 = vor.u32 %v3171_v59, %v3168_v46  ;;  %v3197_v22 = vshll.u32 %v11430_v16, 16  ;;  %v3163_v12 = vrot.slane %v3161_v7, 5  ;;  %v11435_v7 = vld [vmem:[%s14534_s26 + $0x308] sm:$0x1] }
  0xff   : > { %13259 = vmatmul.mubr.msk.bf16.gmra.mrb[20].mxu0 %vm1746_vm2, %v15469_v21  ;;  %v3196_v55 = vrot.slane %v3194_v19, 4  ;;  %v3208_v44 = vshrl.u32 %v11432_v1, 16  ;;  %v3211_v11 = vshll.u32 %v11432_v1, 16  ;;  %v3159_v13 = vrot.slane %v3158_v6, 4 }
 0x100   : > { %13262 = vmatprep.mubr.msk.bf16.mxu0 %vm1746_vm2, %v15488_v34  ;;  %v3173_v41 = vrot.slane %v3172_v15, 4  ;;  %v3177_v51 = vrot.slane %v3175_v35, 5  ;;  %v3199_v21 = vrot.slane %v3197_v22, 5  ;;  %v3122_v45 = vsel %vm14570_vm3, %v3117_v24, %v15677_v8  ;;  %v11438_v34 = vld [vmem:[%s14534_s26 + $0x31c] sm:$0xf] }
 0x101   : > { %v3136_v42 = vsel %vm14570_vm3, %v3131_v40, %v3135_v60  ;;  %v3186_v54 = vor.u32 %v3185_v30, %v3182_v61  ;;  %v3189_v48 = vshll.u32 %v11429_v23, 16  ;;  %v3150_v43 = vsel %vm14570_vm3, %v3145_v3, %v3149_v36  ;;  %v11440_v35 = vld [vmem:[%s14534_s26 + $0x328] sm:$0xf]  ;;  %v11441_v61 = vld [vmem:[%s14534_s26 + $0x32c] sm:$0x1] }
 0x102   : > { %v3210_v10 = vrot.slane %v3208_v44, 4  ;;  %v3213_v58 = vrot.slane %v3211_v11, 5  ;;  %v3222_v25 = vshrl.u32 %v11434_v53, 16  ;;  %v3200_v33 = vor.u32 %v3199_v21, %v3196_v55  ;;  %v11442_v30 = vld [vmem:[%s14534_s26 + $0x334] sm:$0xf] }
 0x103   : > { %v3203_v20 = vshll.u32 %v11431_v4, 16  ;;  %v3217_v16 = vshll.u32 %v11433_v49, 16  ;;  %v3225_v9 = vshll.u32 %v11434_v53, 16  ;;  %v3164_v8 = vsel %vm14570_vm3, %v3159_v13, %v3163_v12  ;;  %v11443_v22 = vld [vmem:[%s14534_s26 + $0x338] sm:$0x1] }
 0x104   : > { %v3178_v52 = vsel %vm14570_vm3, %v3173_v41, %v3177_v51  ;;  %v3236_v37 = vshrl.u32 %v11436_v5, 16  ;;  %v3239_v26 = vshll.u32 %v11436_v5, 16  ;;  %v15708_v46 = vcombine.low %v3108_v27, %v3122_v45  ;;  %v11437_v27 = vld [vmem:[%s14534_s26 + $0x314] sm:$0x1]  ;;  %v11444_v49 = vld [vmem:[%s14534_s26 + $0x340] sm:$0xf] }
 0x105   : > { %v15710_v38 = vrot.slane %v3186_v54, 4  ;;  %v15712_v17 = vrot.slane %v3189_v48, 5  ;;  %v3250_v63 = vshrl.u32 %v11438_v34, 16  ;;  %v15717_v19 = vcombine.low %v3136_v42, %v3150_v43  ;;  %v15741_v51 = vld [vmem:[%s14534_s26 + $0x34c] sm:$0xf] }
 0x106   : > { %19895 = vst [vmem:[#allocation90_spill] sm:$0xff] %v15708_v46  ;;  %v3214_v60 = vor.u32 %v3213_v58, %v3210_v10  ;;  %v3224_v6 = vrot.slane %v3222_v25, 4  ;;  %v3227_v59 = vrot.slane %v3225_v9, 5  ;;  %v15723_v1 = vcombine.low %v3164_v8, %v3178_v52  ;;  %v15753_v8 = vld [vmem:[%s14534_s26 + $0x344] sm:$0x1] }
 0x107   : > { %13263 = vmatmul.mubr.msk.bf16.gmra.mrb[24].mxu0 %vm1746_vm2, %v15513_v29  ;;  %19896 = vst [vmem:[#allocation91_spill] sm:$0xff] %v15717_v19  ;;  %v15725_v24 = vrot.slane %v3200_v33, 4  ;;  %v15727_v40 = vrot.slane %v3203_v20, 5  ;;  %v15729_v23 = vrot.slane %v3217_v16, 5  ;;  %v11439_v29 = vld [vmem:[%s14534_s26 + $0x320] sm:$0x1] }
 0x108   : > { %13266 = vmatprep.mubr.msk.bf16.mxu0 %vm1746_vm2, %v15517_v28  ;;  %19897 = vst [vmem:[#allocation92_spill] sm:$0xff] %v15723_v1  ;;  %v3238_v3 = vrot.slane %v3236_v37, 4  ;;  %v3241_v36 = vrot.slane %v3239_v26, 5  ;;  %v3252_v15 = vrot.slane %v3250_v63, 4  ;;  %v3253_v4 = vshll.u32 %v11438_v34, 16 }
 0x109   : > { %v3192_v28 = vsel %vm14570_vm3, %v15710_v38, %v15712_v17  ;;  %v3231_v12 = vshll.u32 %v11435_v7, 16  ;;  %v3264_v55 = vshrl.u32 %v11440_v35, 16  ;;  %v3267_v53 = vshll.u32 %v11440_v35, 16  ;;  %v15760_v17 = vld [vmem:[%s14534_s26 + $0x350] sm:$0x1] }
 0x10a   : > { %v3215_v44 = vrot.slane %v3214_v60, 4  ;;  %v3228_v11 = vor.u32 %v3227_v59, %v3224_v6  ;;  %v3245_v13 = vshll.u32 %v11437_v27, 16  ;;  %v3255_v41 = vrot.slane %v3253_v4, 5  ;;  %v11448_v7 = vld [vmem:[%s14534_s26 + $0x70] sm:$0x1] }
 0x10b   : > { %v3206_v21 = vsel %vm14570_vm3, %v15725_v24, %v15727_v40  ;;  %v3266_v5 = vrot.slane %v3264_v55, 4  ;;  %v3269_v45 = vrot.slane %v3267_v53, 5  ;;  %v3278_v42 = vshrl.u32 %v11442_v30, 16  ;;  %v11449_v27 = vld [vmem:[%s14534_s26 + $0x7c] sm:$0x1]  ;;  %v19901_v53 = vld [vmem:[#allocation22_spill] sm:$0xff] }
 0x10c   : > { %v3242_v54 = vor.u32 %v3241_v36, %v3238_v3  ;;  %v3256_v48 = vor.u32 %v3255_v41, %v3252_v15  ;;  %v3259_v34 = vshll.u32 %v11439_v29, 16  ;;  %v3273_v43 = vshll.u32 %v11441_v61, 16  ;;  %v13918_v29 = vld [vmem:[%s19644_s1 + $0xa8] sm:$0xff]   ;;  %v19899_v36 = vld [vmem:[#allocation20_spill] sm:$0xff]  ;;  %v19900_v55 = vld [vmem:[#allocation21_spill] sm:$0xff] }
 0x10d   : > { %v3270_v10 = vor.u32 %v3269_v45, %v3266_v5  ;;  %v3281_v58 = vshll.u32 %v11442_v30, 16  ;;  %v3287_v25 = vshll.u32 %v11443_v22, 16  ;;  %v3292_v33 = vshrl.u32 %v11444_v49, 16  ;;  %v19898_v3 = vld [vmem:[#allocation19_spill] sm:$0xff] }
 0x10e   : > { %v3220_v20 = vsel %vm14570_vm3, %v3215_v44, %v15729_v23  ;;  %v3229_v16 = vrot.slane %v3228_v11, 4  ;;  %v3233_v9 = vrot.slane %v3231_v12, 5  ;;  %v3295_v52 = vshll.u32 %v11444_v49, 16  ;;  %v11450_v22 = vld [vmem:[%s14534_s26 + $0x88] sm:$0x1] }
 0x10f   : > { %13267 = vmatmul.mubr.msk.bf16.gmra.mrb[28].mxu0 %vm1746_vm2, %v15548_v47  ;;  %v15757_v37 = vrot.slane %v3245_v13, 5  ;;  %v3280_v26 = vrot.slane %v3278_v42, 4  ;;  %v3283_v38 = vrot.slane %v3281_v58, 5  ;;  %v3306_v47 = vshrl.u32 %v15741_v51, 16  ;;  %v11451_v13 = vld [vmem:[%s14534_s26 + $0x94] sm:$0x1] }
 0x110   : > { %13278 = vmatprep.mubr.msk.bf16.mxu0 %vm1746_vm2, %v15551_v31  ;;  %v15764_v63 = vrot.slane %v3242_v54, 4  ;;  %v15766_v60 = vrot.slane %v3256_v48, 4  ;;  %v15768_v6 = vrot.slane %v3259_v34, 5  ;;  %v15770_v59 = vrot.slane %v3273_v43, 5  ;;  %v11452_v54 = vld [vmem:[%s14534_s26 + $0xa0] sm:$0x1] }
 0x111   : > { %v15773_v35 = vrot.slane %v3270_v10, 4  ;;  %v15775_v24 = vrot.slane %v3287_v25, 5  ;;  %v15777_v40 = vrot.slane %v3292_v33, 4  ;;  %v3234_v61 = vsel %vm14570_vm3, %v3229_v16, %v3233_v9  ;;  %v19905_v25 = vld [vmem:[#allocation24_spill] sm:$0xff] }
 0x112   : > { %v15785_v30 = vrot.slane %v3295_v52, 5  ;;  %v3647_v15 = vor.u32 %v19899_v36, %v19898_v3  ;;  %v3650_v4 = vshll.u32 %v11448_v7, 16  ;;  %v3284_v49 = vor.u32 %v3283_v38, %v3280_v26  ;;  %v19906_v26 = vld [vmem:[#allocation25_spill] sm:$0xff]  ;;  %v19907_v38 = vld [vmem:[#allocation26_spill] sm:$0xff]  ;;  %v19908_v3 = vld [vmem:[#allocation27_spill] sm:$0xff] }
 0x113   : > { %v15790_v12 = vrot.slane %v3306_v47, 4  ;;  %v3661_v44 = vor.u32 %v19901_v53, %v19900_v55  ;;  %v3664_v11 = vshll.u32 %v11449_v27, 16  ;;  %v3309_v41 = vshll.u32 %v15741_v51, 16  ;;  %v19909_v36 = vld [vmem:[#allocation28_spill] sm:$0xff] }
 0x114   : > { %v3648_v45 = vrot.slane %v3647_v15, 4  ;;  %v3652_v42 = vrot.slane %v3650_v4, 5  ;;  %v15798_v48 = vcombine.low %v3192_v28, %v3206_v21  ;;  %v15800_v34 = vcombine.low %v3220_v20, %v3234_v61  ;;  %v19904_v21 = vld [vmem:[#allocation23_spill] sm:$0xff]  ;;  %v13919_v20 = vld [vmem:[%s19644_s1 + $0xb0] sm:$0xff]   ;;  %v11454_v4 = vld [vmem:[%s14534_s26 + $0xb8] sm:$0x1] }
 0x115   : > { %v3662_v43 = vrot.slane %v3661_v44, 4  ;;  %v3666_v10 = vrot.slane %v3664_v11, 5  ;;  %v3675_v33 = vor.u32 %v19905_v25, %v19904_v21  ;;  %v15822_v16 = vrot.slane %v3284_v49, 4  ;;  %v11453_v61 = vld [vmem:[%s14534_s26 + $0xac] sm:$0x1]  ;;  %v13920_v11 = vld [vmem:[%s19644_s1 + $0xb8] sm:$0xff]  }
 0x116   : > { %19902 = vst [vmem:[#allocation19_spill] sm:$0xff] %v15798_v48  ;;  %19903 = vst [vmem:[#allocation20_spill] sm:$0xff] %v15800_v34  ;;  %v3653_v28 = vsel %vm14570_vm3, %v3648_v45, %v3652_v42  ;;  %v3678_v52 = vshll.u32 %v11450_v22, 16  ;;  %v3689_v47 = vor.u32 %v19907_v38, %v19906_v26  ;;  %v3692_v27 = vshll.u32 %v11451_v13, 16  ;;  %v11455_v44 = vld [vmem:[%s14534_s26 + $0xc4] sm:$0x1] }
 0x117   : > { %13279 = vmatmul.mubr.msk.bf16.vlgmr.msra.gmra.mrb[0].mxu0 %vm1746_vm2, %v15569_v18  ;;  %v3667_v9 = vsel %vm14570_vm3, %v3662_v43, %v3666_v10  ;;  %v3703_v15 = vor.u32 %v19909_v36, %v19908_v3  ;;  %v15834_v49 = vrot.slane %v3309_v41, 5  ;;  %v3706_v22 = vshll.u32 %v11452_v54, 16  ;;  %v19910_v43 = vld [vmem:[#allocation29_spill] sm:$0xff]  ;;  %v19911_v10 = vld [vmem:[#allocation30_spill] sm:$0xff]  ;;  %v11456_v21 = vld [vmem:[%s14534_s26 + $0x148] sm:$0x1] }
 0x118   : > { %13311 = vmatpush3.bf16.msra.mxu0 %v15580_v62  ;;  %13282 = vmatprep.mubr.msk.bf16.mxu0 %vm1746_vm2, %v15593_v56  ;;  %v15828_v7 = vcombine.low %v3653_v28, %v3667_v9  ;;  %v3676_v62 = vrot.slane %v3675_v33, 4  ;;  %v3680_v55 = vrot.slane %v3678_v52, 5  ;;  %v3690_v53 = vrot.slane %v3689_v47, 4  ;;  %v11457_v25 = vld [vmem:[%s14534_s26 + $0x154] sm:$0x1]  ;;  %v19912_v9 = vld [vmem:[#allocation31_spill] sm:$0xff] }
 0x119   : > { %13312 = vmatprep.subr.bf16.mxu0 %v13918_v29  ;;  %v3694_v42 = vrot.slane %v3692_v27, 5  ;;  %v3704_v13 = vrot.slane %v3703_v15, 4  ;;  %v3717_v28 = vor.u32 %v19911_v10, %v19910_v43  ;;  %v3708_v54 = vrot.slane %v3706_v22, 5  ;;  %v19913_v52 = vld [vmem:[#allocation32_spill] sm:$0xff]  ;;  %v19914_v3 = vld [vmem:[#allocation33_spill] sm:$0xff]  ;;  %v19915_v36 = vld [vmem:[#allocation34_spill] sm:$0xff] }
 0x11a   : > { %v3681_v41 = vsel %vm14570_vm3, %v3676_v62, %v3680_v55  ;;  %v3720_v33 = vshll.u32 %v11453_v61, 16  ;;  %v3731_v26 = vor.u32 %v19913_v52, %v19912_v9  ;;  %v3734_v27 = vshll.u32 %v11454_v4, 16  ;;  %v15863_v55 = vld [vmem:[%s19644_s1 + $0xc0] sm:$0xff]   ;;  %v19917_v10 = vld [vmem:[#allocation36_spill] sm:$0xff] }
 0x11b   : > { %v3695_v38 = vsel %vm14570_vm3, %v3690_v53, %v3694_v42  ;;  %v3718_v47 = vrot.slane %v3717_v28, 4  ;;  %v3745_v15 = vor.u32 %v19915_v36, %v19914_v3  ;;  %v3748_v22 = vshll.u32 %v11455_v44, 16  ;;  %v19916_v42 = vld [vmem:[#allocation35_spill] sm:$0xff] }
 0x11c   : > { %13313 = vmatpush3.bf16.msra.mxu0 %v13918_v29  ;;  %v15854_v43 = vcombine.low %v3681_v41, %v3695_v38  ;;  %v3709_v29 = vsel %vm14570_vm3, %v3704_v13, %v3708_v54  ;;  %v3722_v62 = vrot.slane %v3720_v33, 5  ;;  %v3732_v61 = vrot.slane %v3731_v26, 4  ;;  %v19918_v54 = vld [vmem:[#allocation37_spill] sm:$0xff]  ;;  %v19919_v33 = vld [vmem:[#allocation38_spill] sm:$0xff]  ;;  %v11459_v38 = vld [vmem:[%s14534_s26 + $0x16c] sm:$0x1] }
 0x11d   : > { %13314 = vmatprep.subr.bf16.mxu0 %v13919_v20  ;;  %v3736_v4 = vrot.slane %v3734_v27, 5  ;;  %v3746_v53 = vrot.slane %v3745_v15, 4  ;;  %v3759_v28 = vor.u32 %v19917_v10, %v19916_v42  ;;  %v3762_v41 = vshll.u32 %v11456_v21, 16  ;;  %v11458_v26 = vld [vmem:[%s14534_s26 + $0x160] sm:$0x1]  ;;  %v19921_v10 = vld [vmem:[#allocation40_spill] sm:$0xff] }
 0x11e   : > { %v3723_v13 = vsel %vm14570_vm3, %v3718_v47, %v3722_v62  ;;  %v3773_v9 = vor.u32 %v19919_v33, %v19918_v54  ;;  %v3776_v52 = vshll.u32 %v11457_v25, 16  ;;  %v3750_v3 = vrot.slane %v3748_v22, 5  ;;  %v11461_v15 = vld [vmem:[%s14534_s26 + $0x184] sm:$0x1]  ;;  %v19920_v62 = vld [vmem:[#allocation39_spill] sm:$0xff] }
 0x11f   : > { %13283 = vmatmul.mubr.msk.bf16.gmra.mrb[4].mxu0 %vm1746_vm2, %v15646_v0  ;;  %v15875_v44 = vcombine.low %v3709_v29, %v3723_v13  ;;  %v3737_v27 = vsel %vm14570_vm3, %v3732_v61, %v3736_v4  ;;  %v3760_v36 = vrot.slane %v3759_v28, 4  ;;  %v3764_v42 = vrot.slane %v3762_v41, 5  ;;  %v11462_v54 = vld [vmem:[%s14534_s26 + $0x190] sm:$0x1]  ;;  %v19922_v29 = vld [vmem:[#allocation41_spill] sm:$0xff]  ;;  %v19923_v13 = vld [vmem:[#allocation42_spill] sm:$0xff] }
 0x120   : > { %13286 = vmatprep.mubr.msk.bf16.mxu0 %vm1746_vm2, %v15648_v50  ;;  %13315 = vmatpush3.bf16.msra.mxu0 %v13919_v20  ;;  %v11460_v20 = vld [vmem:[%s14534_s26 + $0x178] sm:$0x1]  ;;  %v3774_v47 = vrot.slane %v3773_v9, 4  ;;  %v3778_v21 = vrot.slane %v3776_v52, 5  ;;  %v3787_v5 = vor.u32 %v19921_v10, %v19920_v62  ;;  %v3751_v25 = vsel %vm14570_vm3, %v3746_v53, %v3750_v3  ;;  %v19927_v62 = vld [vmem:[#allocation46_spill] sm:$0xff] }
 0x121   : > { %13316 = vmatprep.subr.bf16.mxu0 %v13920_v11  ;;  %v3790_v33 = vshll.u32 %v11458_v26, 16  ;;  %v3801_v23 = vor.u32 %v19923_v13, %v19922_v29  ;;  %v3804_v45 = vshll.u32 %v11459_v38, 16  ;;  %v15888_v61 = vcombine.low %v3737_v27, %v3751_v25  ;;  %v19924_v26 = vld [vmem:[#allocation43_spill] sm:$0xff]  ;;  %v19926_v3 = vld [vmem:[#allocation45_spill] sm:$0xff]  ;;  %v11464_v25 = vld [vmem:[%s14534_s26 + $0x220] sm:$0x1] }
 0x122   : > { %v3765_v4 = vsel %vm14570_vm3, %v3760_v36, %v3764_v42  ;;  %v3779_v22 = vsel %vm14570_vm3, %v3774_v47, %v3778_v21  ;;  %v3788_v28 = vrot.slane %v3787_v5, 4  ;;  %v3818_v27 = vshll.u32 %v11460_v20, 16  ;;  %v19928_v47 = vld [vmem:[#allocation47_spill] sm:$0xff]  ;;  %v19929_v21 = vld [vmem:[#allocation48_spill] sm:$0xff] }
 0x123   : > { %v15895_v53 = vcombine.low %v3765_v4, %v3779_v22  ;;  %v3792_v41 = vrot.slane %v3790_v33, 5  ;;  %v3802_v9 = vrot.slane %v3801_v23, 4  ;;  %v3806_v52 = vrot.slane %v3804_v45, 5  ;;  %v11463_v45 = vld [vmem:[%s14534_s26 + $0x19c] sm:$0x1] }
 0x124   : > { %13317 = vmatpush3.bf16.msra.mxu0 %v13920_v11  ;;  %v19925_v11 = vld [vmem:[#allocation44_spill] sm:$0xff]  ;;  %v3829_v36 = vor.u32 %v19927_v62, %v19926_v3  ;;  %v3832_v42 = vshll.u32 %v11461_v15, 16  ;;  %v3843_v10 = vor.u32 %v19929_v21, %v19928_v47  ;;  %v3846_v20 = vshll.u32 %v11462_v54, 16  ;;  %v11465_v4 = vld [vmem:[%s14534_s26 + $0x22c] sm:$0x1]  ;;  %v19934_v21 = vld [vmem:[#allocation53_spill] sm:$0xff] }
 0x125   : > { %13350 = vmatprep.subr.bf16.mxu0 %v15863_v55  ;;  %v3815_v38 = vor.u32 %v19925_v11, %v19924_v26  ;;  %v3793_v5 = vsel %vm14570_vm3, %v3788_v28, %v3792_v41  ;;  %v3807_v23 = vsel %vm14570_vm3, %v3802_v9, %v3806_v52  ;;  %v3820_v29 = vrot.slane %v3818_v27, 5  ;;  %v11466_v22 = vld [vmem:[%s14534_s26 + $0x238] sm:$0x1]  ;;  %v19931_v26 = vld [vmem:[#allocation50_spill] sm:$0xff] }
 0x126   : > { %v15913_v15 = vcombine.low %v3793_v5, %v3807_v23  ;;  %v3830_v13 = vrot.slane %v3829_v36, 4  ;;  %v3834_v28 = vrot.slane %v3832_v42, 5  ;;  %v3844_v41 = vrot.slane %v3843_v10, 4  ;;  %v19930_v52 = vld [vmem:[#allocation49_spill] sm:$0xff]  ;;  %v11467_v54 = vld [vmem:[%s14534_s26 + $0x244] sm:$0x1] }
 0x127   : > { %13287 = vmatmul.mubr.msk.bf16.gmra.mrb[8].mxu0 %vm1746_vm2, %v15650_v14  ;;  %v3816_v33 = vrot.slane %v3815_v38, 4  ;;  %v3848_v9 = vrot.slane %v3846_v20, 5  ;;  %v3857_v11 = vor.u32 %v19931_v26, %v19930_v52  ;;  %v3860_v62 = vshll.u32 %v11463_v45, 16  ;;  %v19932_v5 = vld [vmem:[#allocation51_spill] sm:$0xff]  ;;  %v19933_v23 = vld [vmem:[#allocation52_spill] sm:$0xff]  ;;  %v19935_v10 = vld [vmem:[#allocation54_spill] sm:$0xff] }
 0x128   : > { %13290 = vmatprep.mubr.msk.bf16.mxu0 %vm1746_vm2, %v15671_v39  ;;  %v3871_v38 = vor.u32 %v19933_v23, %v19932_v5  ;;  %v3874_v27 = vshll.u32 %v11464_v25, 16  ;;  %v3835_v36 = vsel %vm14570_vm3, %v3830_v13, %v3834_v28  ;;  %v3885_v20 = vor.u32 %v19935_v10, %v19934_v21  ;;  %v11468_v52 = vld [vmem:[%s14534_s26 + $0x250] sm:$0x1]  ;;  %v19936_v25 = vld [vmem:[#allocation55_spill] sm:$0xff]  ;;  %v19937_v23 = vld [vmem:[#allocation57_spill] sm:$0xff] }
 0x129   : > { %v3821_v3 = vsel %vm14570_vm3, %v3816_v33, %v3820_v29  ;;  %v3849_v42 = vsel %vm14570_vm3, %v3844_v41, %v3848_v9  ;;  %v3858_v47 = vrot.slane %v3857_v11, 4  ;;  %v3862_v51 = vrot.slane %v3860_v62, 5  ;;  %v11469_v29 = vld [vmem:[%s14534_s26 + $0x25c] sm:$0x1]  ;;  %v19938_v9 = vld [vmem:[#allocation58_spill] sm:$0xff]  ;;  %v19939_v11 = vld [vmem:[#allocation60_spill] sm:$0xff] }
 0x12a   : > { %v15931_v26 = vcombine.low %v3821_v3, %v3835_v36  ;;  %v3872_v33 = vrot.slane %v3871_v38, 4  ;;  %v3876_v45 = vrot.slane %v3874_v27, 5  ;;  %v3886_v58 = vrot.slane %v3885_v20, 4  ;;  %v19941_v21 = vld [vmem:[#allocation63_spill] sm:$0xff] }
 0x12b   : > { %v3888_v5 = vshll.u32 %v11465_v4, 16  ;;  %v3899_v39 = vor.u32 %v19937_v23, %v19936_v25  ;;  %v3902_v13 = vshll.u32 %v11466_v22, 16  ;;  %v3863_v28 = vsel %vm14570_vm3, %v3858_v47, %v3862_v51  ;;  %v19940_v47 = vld [vmem:[#allocation62_spill] sm:$0xff]  ;;  %v11470_v20 = vld [vmem:[%s14534_s26 + $0x268] sm:$0x1] }
 0x12c   : > { %v3877_v41 = vsel %vm14570_vm3, %v3872_v33, %v3876_v45  ;;  %v3913_v3 = vor.u32 %v19939_v11, %v19938_v9  ;;  %v3916_v62 = vshll.u32 %v11467_v54, 16  ;;  %v15944_v4 = vcombine.low %v3849_v42, %v3863_v28  ;;  %v19943_v45 = vld [vmem:[#allocation66_spill] sm:$0xff]  ;;  %v11471_v23 = vld [vmem:[%s14534_s26 + $0x274] sm:$0x1] }
 0x12d   : > { %v3890_v38 = vrot.slane %v3888_v5, 5  ;;  %v3900_v27 = vrot.slane %v3899_v39, 4  ;;  %v3904_v22 = vrot.slane %v3902_v13, 5  ;;  %v3927_v10 = vor.u32 %v19941_v21, %v19940_v47  ;;  %v19942_v39 = vld [vmem:[#allocation65_spill] sm:$0xff]  ;;  %v19944_v47 = vld [vmem:[#allocation67_spill] sm:$0xff] }
 0x12e   : > { %v3914_v51 = vrot.slane %v3913_v3, 4  ;;  %v3918_v36 = vrot.slane %v3916_v62, 5  ;;  %v3930_v54 = vshll.u32 %v11468_v52, 16  ;;  %v3941_v5 = vor.u32 %v19943_v45, %v19942_v39  ;;  %v11472_v13 = vld [vmem:[%s14534_s26 + $0x2f8] sm:$0x1] }
 0x12f   : > { %13291 = vmatmul.mubr.msk.bf16.gmra.mrb[12].mxu0 %vm1746_vm2, %v15680_v57  ;;  %v3891_v33 = vsel %vm14570_vm3, %v3886_v58, %v3890_v38  ;;  %v3905_v42 = vsel %vm14570_vm3, %v3900_v27, %v3904_v22  ;;  %v3944_v25 = vshll.u32 %v11469_v29, 16  ;;  %v3928_v52 = vrot.slane %v3927_v10, 4  ;;  %v11473_v3 = vld [vmem:[%s14534_s26 + $0x304] sm:$0x1]  ;;  %v19945_v27 = vld [vmem:[#allocation69_spill] sm:$0xff] }
 0x130   : > { %13294 = vmatprep.mubr.msk.bf16.mxu0 %vm1746_vm2, %v15708_v46  ;;  %v15959_v28 = vcombine.low %v3877_v41, %v3891_v33  ;;  %v3919_v9 = vsel %vm14570_vm3, %v3914_v51, %v3918_v36  ;;  %v3932_v11 = vrot.slane %v3930_v54, 5  ;;  %v3942_v58 = vrot.slane %v3941_v5, 4  ;;  %v11474_v21 = vld [vmem:[%s14534_s26 + $0x310] sm:$0x1]  ;;  %v19946_v41 = vld [vmem:[#allocation70_spill] sm:$0xff]  ;;  %v19947_v33 = vld [vmem:[#allocation71_spill] sm:$0xff] }
 0x131   : > { %v15964_v62 = vcombine.low %v3905_v42, %v3919_v9  ;;  %v3946_v38 = vrot.slane %v3944_v25, 5  ;;  %v3955_v22 = vor.u32 %v19945_v27, %v19944_v47  ;;  %v3958_v39 = vshll.u32 %v11470_v20, 16  ;;  %v19948_v54 = vld [vmem:[#allocation73_spill] sm:$0xff]  ;;  %v19949_v42 = vld [vmem:[#allocation74_spill] sm:$0xff]  ;;  %v19950_v27 = vld [vmem:[#allocation75_spill] sm:$0xff] }
 0x132   : > { %v3933_v29 = vsel %vm14570_vm3, %v3928_v52, %v3932_v11  ;;  %v3969_v45 = vor.u32 %v19947_v33, %v19946_v41  ;;  %v3972_v51 = vshll.u32 %v11471_v23, 16  ;;  %v3983_v5 = vor.u32 %v19949_v42, %v19948_v54  ;;  %v11475_v41 = vld [vmem:[%s14534_s26 + $0x31c] sm:$0x1]  ;;  %v19953_v33 = vld [vmem:[#allocation79_spill] sm:$0xff]  ;;  %v11477_v54 = vld [vmem:[%s14534_s26 + $0x334] sm:$0x1] }
 0x133   : > { %v3947_v36 = vsel %vm14570_vm3, %v3942_v58, %v3946_v38  ;;  %v3956_v10 = vrot.slane %v3955_v22, 4  ;;  %v3986_v25 = vshll.u32 %v11472_v13, 16  ;;  %v3960_v47 = vrot.slane %v3958_v39, 5  ;;  %v19951_v58 = vld [vmem:[#allocation76_spill] sm:$0xff]  ;;  %v19952_v39 = vld [vmem:[#allocation77_spill] sm:$0xff] }
 0x134   : > { %v15977_v9 = vcombine.low %v3933_v29, %v3947_v36  ;;  %v3970_v52 = vrot.slane %v3969_v45, 4  ;;  %v3974_v20 = vrot.slane %v3972_v51, 5  ;;  %v3984_v11 = vrot.slane %v3983_v5, 4  ;;  %v11476_v36 = vld [vmem:[%s14534_s26 + $0x328] sm:$0x1]  ;;  %v19958_v46 = vld [vmem:[#allocation84_spill] sm:$0xff] }
 0x135   : > { %v3988_v23 = vrot.slane %v3986_v25, 5  ;;  %v3997_v38 = vor.u32 %v19951_v58, %v19950_v27  ;;  %v4000_v22 = vshll.u32 %v11473_v3, 16  ;;  %v3961_v13 = vsel %vm14570_vm3, %v3956_v10, %v3960_v47  ;;  %v11478_v27 = vld [vmem:[%s14534_s26 + $0x340] sm:$0x1]  ;;  %v19954_v10 = vld [vmem:[#allocation80_spill] sm:$0xff]  ;;  %v19955_v47 = vld [vmem:[#allocation81_spill] sm:$0xff] }
 0x136   : > { %v3975_v29 = vsel %vm14570_vm3, %v3970_v52, %v3974_v20  ;;  %v4011_v45 = vor.u32 %v19953_v33, %v19952_v39  ;;  %v4014_v51 = vshll.u32 %v11474_v21, 16  ;;  %v4028_v52 = vshll.u32 %v11475_v41, 16  ;;  %v11479_v20 = vld [vmem:[%s14534_s26 + $0x34c] sm:$0x1]  ;;  %v19956_v39 = vld [vmem:[#allocation82_spill] sm:$0xff]  ;;  %v19959_v57 = vld [vmem:[#allocation85_spill] sm:$0xff] }
 0x137   : > { %13295 = vmatmul.mubr.msk.bf16.gmra.mrb[16].mxu0 %vm1746_vm2, %v15717_v19  ;;  %v15994_v42 = vcombine.low %v3961_v13, %v3975_v29  ;;  %v3989_v3 = vsel %vm14570_vm3, %v3984_v11, %v3988_v23  ;;  %v3998_v5 = vrot.slane %v3997_v38, 4  ;;  %v4002_v25 = vrot.slane %v4000_v22, 5  ;;  %v19957_v33 = vld [vmem:[#allocation83_spill] sm:$0xff] }
 0x138   : > { %13298 = vmatprep.mubr.msk.bf16.mxu0 %vm1746_vm2, %v15723_v1  ;;  %v4012_v58 = vrot.slane %v4011_v45, 4  ;;  %v4016_v1 = vrot.slane %v4014_v51, 5  ;;  %v4025_v19 = vor.u32 %v19955_v47, %v19954_v10  ;;  %v4039_v13 = vor.u32 %v19957_v33, %v19956_v39  ;;  %v19961_v33 = vld [vmem:[#allocation87_spill] sm:$0xff] }
 0x139   : > { %v4003_v21 = vsel %vm14570_vm3, %v3998_v5, %v4002_v25  ;;  %v4042_v29 = vshll.u32 %v11476_v36, 16  ;;  %v4053_v11 = vor.u32 %v19959_v57, %v19958_v46  ;;  %v4030_v45 = vrot.slane %v4028_v52, 5  ;;  %v19960_v25 = vld [vmem:[#allocation86_spill] sm:$0xff]  ;;  %v19962_v57 = vld [vmem:[#allocation88_spill] sm:$0xff] }
 0x13a   : > { %v16008_v23 = vcombine.low %v3989_v3, %v4003_v21  ;;  %v4017_v38 = vsel %vm14570_vm3, %v4012_v58, %v4016_v1  ;;  %v4026_v22 = vrot.slane %v4025_v19, 4  ;;  %v4040_v51 = vrot.slane %v4039_v13, 4 }
 0x13b   : > { %v4044_v41 = vrot.slane %v4042_v29, 5  ;;  %v4054_v10 = vrot.slane %v4053_v11, 4  ;;  %v4056_v47 = vshll.u32 %v11477_v54, 16  ;;  %v4067_v36 = vor.u32 %v15209_v2, %v19960_v25  ;;  %v14265_v11 = vld [vmem:[%s14534_s26 + $0x288] sm:$0xf] }
 0x13c   : > { %v4031_v5 = vsel %vm14570_vm3, %v4026_v22, %v4030_v45  ;;  %v4070_v39 = vshll.u32 %v11478_v27, 16  ;;  %v4081_v46 = vor.u32 %v19962_v57, %v19961_v33  ;;  %v4084_v3 = vshll.u32 %v11479_v20, 16  ;;  %v19970_v33 = vld [vmem:[#allocation6_spill] sm:$0xff] }
 0x13d   : > { %v16020_v19 = vcombine.low %v4017_v38, %v4031_v5  ;;  %v4045_v1 = vsel %vm14570_vm3, %v4040_v51, %v4044_v41  ;;  %v4058_v54 = vrot.slane %v4056_v47, 5  ;;  %v3312_v2 = vor.u32 %v15834_v49, %v15790_v12  ;;  %v14266_v49 = vld [vmem:[%s14534_s26 + $0x294] sm:$0xf] }
 0x13e   : > { %v4068_v27 = vrot.slane %v4067_v36, 4  ;;  %v4072_v58 = vrot.slane %v4070_v39, 5  ;;  %v4082_v52 = vrot.slane %v4081_v46, 4  ;;  %v3276_v21 = vsel %vm14570_vm3, %v15773_v35, %v15770_v59  ;;  %v14267_v36 = vld [vmem:[%s14534_s26 + $0x2a0] sm:$0xf] }
 0x13f   : > { %13299 = vmatmul.mubr.msk.bf16.gmra.mrb[20].mxu0 %vm1746_vm2, %v15798_v48  ;;  %v3290_v13 = vsel %vm14570_vm3, %v15822_v16, %v15775_v24  ;;  %v4059_v20 = vsel %vm14570_vm3, %v4054_v10, %v4058_v54  ;;  %v4086_v29 = vrot.slane %v4084_v3, 5  ;;  %v1558_v12 = vshll.u32 %v14265_v11, 16  ;;  %v14271_v11 = vld [vmem:[%s14534_s26 + $0x2d0] sm:$0xf] }
 0x140   : > { %13302 = vmatprep.mubr.msk.bf16.mxu0 %vm1746_vm2, %v15800_v34  ;;  %v1569_v38 = vshrl.u32 %v14266_v49, 16  ;;  %v16040_v22 = vcombine.low %v4045_v1, %v4059_v20  ;;  %v4073_v59 = vsel %vm14570_vm3, %v4068_v27, %v4072_v58  ;;  %v19963_v35 = vsel %vm14570_vm3, %v15766_v60, %v15768_v6  ;;  %v19973_v1 = vld [vmem:[#allocation7_spill] sm:$0xff]  ;;  %v14269_v58 = vld [vmem:[%s14534_s26 + $0x2b8] sm:$0xf] }
 0x141   : > { %v19964_v24 = vsel %vm14570_vm3, %v15764_v63, %v15757_v37  ;;  %v19966_v45 = vor.u32 %v15785_v30, %v15777_v40  ;;  %v19967_v41 = vshll.u32 %v15753_v8, 16  ;;  %v4087_v47 = vsel %vm14570_vm3, %v4082_v52, %v4086_v29  ;;  %v14268_v8 = vld [vmem:[%s14534_s26 + $0x2ac] sm:$0xf] }
 0x142   : > { %v16054_v16 = vcombine.low %v19964_v24, %v19963_v35  ;;  %v16063_v5 = vcombine.low %v3276_v21, %v3290_v13  ;;  %v3313_v60 = vrot.slane %v3312_v2, 4  ;;  %v19969_v6 = vshll.u32 %v15760_v17, 16  ;;  %v14270_v13 = vld [vmem:[%s14534_s26 + $0x2c4] sm:$0xf] }
 0x143   : > { %v3299_v51 = vrot.slane %v19966_v45, 4  ;;  %v3303_v10 = vrot.slane %v19967_v41, 5  ;;  %v16067_v37 = vcombine.low %v4073_v59, %v4087_v47  ;;  %v1572_v63 = vshll.u32 %v14266_v49, 16 }
 0x144   : > { %19965 = vst [vmem:[#allocation21_spill] sm:$0xff] %v16054_v16  ;;  %19968 = vst [vmem:[#allocation22_spill] sm:$0xff] %v16063_v5  ;;  %v3317_v25 = vrot.slane %v19969_v6, 5  ;;  %v1583_v40 = vshrl.u32 %v14267_v36, 16  ;;  %v1586_v30 = vshll.u32 %v14267_v36, 16  ;;  %v1597_v39 = vshrl.u32 %v14268_v8, 16 }
 0x145   : > { %v19971_v57 = vshll.u32 %v19970_v33, 16  ;;  %v19974_v54 = vshrl.u32 %v19973_v1, 16  ;;  %v16079_v17 = vrot.slane %v1558_v12, 5  ;;  %v1600_v2 = vshll.u32 %v14268_v8, 16  ;;  %v14272_v6 = vld [vmem:[%s14534_s26 + $0x2dc] sm:$0xf] }
 0x146   : > { %v16081_v27 = vrot.slane %v1569_v38, 4  ;;  %v1611_v52 = vshrl.u32 %v14269_v58, 16  ;;  %v1614_v21 = vshll.u32 %v14269_v58, 16  ;;  %v1625_v20 = vshrl.u32 %v14270_v13, 16  ;;  %v16122_v33 = vld [vmem:[%s14534_s26 + $0x18] sm:$0xf] }
 0x147   : > { %v16073_v46 = vrot.slane %v19971_v57, 5  ;;  %v16077_v3 = vrot.slane %v19974_v54, 4  ;;  %19976 = vst [vmem:[#allocation25_spill] sm:$0xff] %v16079_v17  ;;  %13303 = vmatmul.mubr.msk.bf16.gmra.mrb[24].mxu0 %vm1746_vm2, %v16054_v16  ;;  %v1628_v29 = vshll.u32 %v14270_v13, 16  ;;  %v1639_v49 = vshrl.u32 %v14271_v11, 16 }
 0x148   : > { %19977 = vst [vmem:[#allocation26_spill] sm:$0xff] %v16081_v27  ;;  %13306 = vmatprep.mubr.msk.bf16.mxu0 %vm1746_vm2, %v16063_v5  ;;  %v3304_v12 = vsel %vm14570_vm3, %v3299_v51, %v3303_v10  ;;  %v3318_v38 = vsel %vm14570_vm3, %v3313_v60, %v3317_v25  ;;  %v16094_v59 = vrot.slane %v1572_v63, 5  ;;  %v16096_v35 = vrot.slane %v1583_v40, 4  ;;  %v16106_v10 = vld [vmem:[%s14534_s26 + $0xc] sm:$0xf] }
 0x149   : > { %19972 = vst [vmem:[#allocation23_spill] sm:$0xff] %v16073_v46  ;;  %19975 = vst [vmem:[#allocation24_spill] sm:$0xff] %v16077_v3  ;;  %v16098_v24 = vrot.slane %v1586_v30, 5  ;;  %v16100_v45 = vrot.slane %v1597_v39, 4  ;;  %v16102_v41 = vrot.slane %v1600_v2, 5  ;;  %v1642_v47 = vshll.u32 %v14271_v11, 16 }
 0x14a   : > { %19978 = vst [vmem:[#allocation27_spill] sm:$0xff] %v16094_v59  ;;  %19979 = vst [vmem:[#allocation28_spill] sm:$0xff] %v16096_v35  ;;  %v1653_v36 = vshrl.u32 %v14272_v6, 16  ;;  %v1656_v51 = vshll.u32 %v14272_v6, 16  ;;  %v16108_v60 = vrot.slane %v1611_v52, 4  ;;  %v16110_v25 = vrot.slane %v1614_v21, 5 }
 0x14b   : > { %19980 = vst [vmem:[#allocation29_spill] sm:$0xff] %v16098_v24  ;;  %19981 = vst [vmem:[#allocation30_spill] sm:$0xff] %v16100_v45  ;;  %v16112_v63 = vcombine.low %v3304_v12, %v3318_v38  ;;  %v5532_v40 = vshrl.u32 %v16106_v10, 16  ;;  %v16115_v30 = vrot.slane %v1625_v20, 4  ;;  %v16117_v8 = vrot.slane %v1628_v29, 5 }
 0x14c   : > { %19982 = vst [vmem:[#allocation31_spill] sm:$0xff] %v16102_v41  ;;  %19983 = vst [vmem:[#allocation32_spill] sm:$0xff] %v16108_v60  ;;  %v16119_v39 = vrot.slane %v1639_v49, 4  ;;  %v5535_v57 = vshll.u32 %v16106_v10, 16  ;;  %v5546_v1 = vshrl.u32 %v16122_v33, 16  ;;  %v5549_v54 = vshll.u32 %v16122_v33, 16 }
 0x14d   : > { %19984 = vst [vmem:[#allocation33_spill] sm:$0xff] %v16110_v25  ;;  %19985 = vst [vmem:[#allocation34_spill] sm:$0xff] %v16112_v63  ;;  %v16128_v2 = vld [vmem:[%s14534_s26 + $0x24] sm:$0xf]  ;;  %v16131_v58 = vld [vmem:[%s14534_s26 + $0x30] sm:$0xf] }
 0x14e   : > { %19986 = vst [vmem:[#allocation35_spill] sm:$0xff] %v16115_v30  ;;  %19987 = vst [vmem:[#allocation36_spill] sm:$0xff] %v16117_v8  ;;  %v16133_v52 = vrot.slane %v1642_v47, 5  ;;  %v16135_v21 = vrot.slane %v1653_v36, 4  ;;  %v16137_v13 = vrot.slane %v1656_v51, 5  ;;  %v5560_v20 = vshrl.u32 %v16128_v2, 16 }
 0x14f   : > { %19988 = vst [vmem:[#allocation37_spill] sm:$0xff] %v16119_v39  ;;  %v16141_v29 = vld [vmem:[%s14534_s26 + $0x3c] sm:$0xf]  ;;  %13307 = vmatmul.mubr.msk.bf16.gmra.mrb[28].mxu0 %vm1746_vm2, %v16112_v63  ;;  %v16147_v49 = vrot.slane %v5532_v40, 4  ;;  %v5563_v12 = vshll.u32 %v16128_v2, 16  ;;  %v5574_v38 = vshrl.u32 %v16131_v58, 16 }
 0x150   : > { %19989 = vst [vmem:[#allocation38_spill] sm:$0xff] %v16133_v52  ;;  %19990 = vst [vmem:[#allocation39_spill] sm:$0xff] %v16135_v21  ;;  %v16152_v47 = vld [vmem:[%s14534_s26 + $0x48] sm:$0xf]  ;;  %13318 = vmatprep.mubr.msk.bf16.mxu0 %vm1746_vm2, %v15828_v7  ;;  %v16156_v6 = vrot.slane %v5535_v57, 5  ;;  %v5577_v51 = vshll.u32 %v16131_v58, 16 }
 0x151   : > { %19991 = vst [vmem:[#allocation40_spill] sm:$0xff] %v16137_v13  ;;  %v5588_v40 = vshrl.u32 %v16141_v29, 16  ;;  %v16163_v11 = vld [vmem:[%s14534_s26 + $0x54] sm:$0xf]  ;;  %v16165_v63 = vrot.slane %v5546_v1, 4  ;;  %v16167_v5 = vrot.slane %v5549_v54, 5 }
 0x152   : > { %v5591_v16 = vshll.u32 %v16141_v29, 16  ;;  %v5602_v7 = vshrl.u32 %v16152_v47, 16  ;;  %v16172_v57 = vld [vmem:[%s14534_s26 + $0x60] sm:$0xf]  ;;  %v16174_v34 = vrot.slane %v5560_v20, 4  ;;  %v5605_v48 = vshll.u32 %v16152_v47, 16 }
 0x153   : > { %v5616_v14 = vshrl.u32 %v16163_v11, 16  ;;  %v16181_v1 = vld [vmem:[%s14534_s26 + $0xe4] sm:$0xf]  ;;  %v16183_v54 = vrot.slane %v5563_v12, 5  ;;  %v16185_v50 = vrot.slane %v5574_v38, 4  ;;  %v5619_v0 = vshll.u32 %v16163_v11, 16 }
 0x154   : > { %v5630_v56 = vshrl.u32 %v16172_v57, 16  ;;  %v16190_v20 = vld [vmem:[%s14534_s26 + $0xf0] sm:$0xf]  ;;  %v16192_v18 = vrot.slane %v5577_v51, 5  ;;  %v16194_v36 = vrot.slane %v5588_v40, 4  ;;  %v5633_v31 = vshll.u32 %v16172_v57, 16 }
 0x155   : > { %19992 = vst [vmem:[#allocation41_spill] sm:$0xff] %v16183_v54  ;;  %19993 = vst [vmem:[#allocation42_spill] sm:$0xff] %v16185_v50  ;;  %v5644_v13 = vshrl.u32 %v16181_v1, 16  ;;  %v13922_v12 = vld [vmem:[%s19644_s1 + $0xc8] sm:$0xff]   ;;  %v16201_v38 = vrot.slane %v5591_v16, 5  ;;  %v16203_v21 = vrot.slane %v5602_v7, 4 }
 0x156   : > { %19994 = vst [vmem:[#allocation43_spill] sm:$0xff] %v16192_v18  ;;  %19995 = vst [vmem:[#allocation44_spill] sm:$0xff] %v16194_v36  ;;  %v5647_v51 = vshll.u32 %v16181_v1, 16  ;;  %v16209_v40 = vld [vmem:[%s14534_s26 + $0xfc] sm:$0xf]  ;;  %v16211_v39 = vrot.slane %v5605_v48, 5 }
 0x157   : > { %19996 = vst [vmem:[#allocation45_spill] sm:$0xff] %v16201_v38  ;;  %19997 = vst [vmem:[#allocation46_spill] sm:$0xff] %v16203_v21  ;;  %v16213_v8 = vrot.slane %v5616_v14, 4  ;;  %v5658_v16 = vshrl.u32 %v16190_v20, 16  ;;  %v16219_v25 = vld [vmem:[%s14534_s26 + $0x108] sm:$0xf]  ;;  %13319 = vmatmul.mubr.msk.bf16.vlgmr.msra.gmra.mrb[0].mxu0 %vm1746_vm2, %v15854_v43 }
 0x158   : > { %19998 = vst [vmem:[#allocation47_spill] sm:$0xff] %v16211_v39  ;;  %v13923_v7 = vld [vmem:[%s19644_s1 + $0xd0] sm:$0xff]   ;;  %v16226_v52 = vrot.slane %v5619_v0, 5  ;;  %v16228_v48 = vrot.slane %v5630_v56, 4  ;;  %v5661_v14 = vshll.u32 %v16190_v20, 16  ;;  %v5672_v30 = vshrl.u32 %v16209_v40, 16  ;;  %13351 = vmatpush3.bf16.msra.mxu0 %v15863_v55  ;;  %13322 = vmatprep.mubr.msk.bf16.mxu0 %vm1746_vm2, %v15875_v44 }
 0x159   : > { %19999 = vst [vmem:[#allocation48_spill] sm:$0xff] %v16213_v8  ;;  %v16233_v60 = vld [vmem:[%s14534_s26 + $0x114] sm:$0xf]  ;;  %v16238_v43 = vrot.slane %v5633_v31, 5  ;;  %v16240_v41 = vrot.slane %v5644_v13, 4  ;;  %v5675_v56 = vshll.u32 %v16209_v40, 16  ;;  %13352 = vmatprep.subr.bf16.mxu0 %v13922_v12 }
 0x15a   : > { %20000 = vst [vmem:[#allocation49_spill] sm:$0xff] %v16226_v52  ;;  %20001 = vst [vmem:[#allocation50_spill] sm:$0xff] %v16228_v48  ;;  %v5686_v0 = vshrl.u32 %v16219_v25, 16  ;;  %v16245_v45 = vld [vmem:[%s14534_s26 + $0x120] sm:$0xf]  ;;  %v16247_v24 = vrot.slane %v5647_v51, 5 }
 0x15b   : > { %20002 = vst [vmem:[#allocation51_spill] sm:$0xff] %v16238_v43  ;;  %20003 = vst [vmem:[#allocation52_spill] sm:$0xff] %v16240_v41  ;;  %v5689_v55 = vshll.u32 %v16219_v25, 16  ;;  %v5700_v35 = vshrl.u32 %v16233_v60, 16  ;;  %v5703_v44 = vshll.u32 %v16233_v60, 16  ;;  %v16255_v13 = vrot.slane %v5658_v16, 4 }
 0x15c   : > { %20004 = vst [vmem:[#allocation53_spill] sm:$0xff] %v16247_v24  ;;  %v16253_v31 = vld [vmem:[%s14534_s26 + $0x12c] sm:$0xf]  ;;  %v5714_v27 = vshrl.u32 %v16245_v45, 16  ;;  %v5717_v17 = vshll.u32 %v16245_v45, 16  ;;  %v16264_v3 = vrot.slane %v5661_v14, 5  ;;  %13353 = vmatpush3.bf16.msra.mxu0 %v13922_v12 }
 0x15d   : > { %20005 = vst [vmem:[#allocation54_spill] sm:$0xff] %v16255_v13  ;;  %v16262_v51 = vld [vmem:[%s14534_s26 + $0x138] sm:$0xf]  ;;  %v16266_v46 = vrot.slane %v5672_v30, 4  ;;  %v5728_v16 = vshrl.u32 %v16253_v31, 16  ;;  %v16274_v59 = vrot.slane %v5675_v56, 5  ;;  %13354 = vmatprep.subr.bf16.mxu0 %v13923_v7 }
 0x15e   : > { %20006 = vst [vmem:[#allocation55_spill] sm:$0xff] %v16264_v3  ;;  %v16272_v13 = vld [vmem:[%s14534_s26 + $0x1bc] sm:$0xf]  ;;  %v16276_v41 = vrot.slane %v5686_v0, 4  ;;  %v5731_v43 = vshll.u32 %v16253_v31, 16  ;;  %v5742_v14 = vshrl.u32 %v16262_v51, 16 }
 0x15f   : > { %20007 = vst [vmem:[#allocation57_spill] sm:$0xff] %v16266_v46  ;;  %20008 = vst [vmem:[#allocation58_spill] sm:$0xff] %v16274_v59  ;;  %v16281_v30 = vld [vmem:[%s14534_s26 + $0x1c8] sm:$0xf]  ;;  %v13924_v24 = vld [vmem:[%s19644_s1 + $0xd8] sm:$0xff]   ;;  %v16286_v46 = vrot.slane %v5689_v55, 5  ;;  %13323 = vmatmul.mubr.msk.bf16.gmra.mrb[4].mxu0 %vm1746_vm2, %v15888_v61 }
 0x160   : > { %20009 = vst [vmem:[#allocation60_spill] sm:$0xff] %v16276_v41  ;;  %v16288_v12 = vrot.slane %v5700_v35, 4  ;;  %v16290_v56 = vrot.slane %v5703_v44, 5  ;;  %v16295_v41 = vld [vmem:[%s14534_s26 + $0x1d4] sm:$0xf]  ;;  %v16297_v59 = vrot.slane %v5714_v27, 4  ;;  %13326 = vmatprep.mubr.msk.bf16.mxu0 %vm1746_vm2, %v15895_v53  ;;  %13355 = vmatpush3.bf16.msra.mxu0 %v13923_v7 }
 0x161   : > { %20010 = vst [vmem:[#allocation62_spill] sm:$0xff] %v16286_v46  ;;  %20013 = vst [vmem:[#allocation66_spill] sm:$0xff] %v16295_v41  ;;  %v16299_v3 = vrot.slane %v5717_v17, 5  ;;  %v5745_v48 = vshll.u32 %v16262_v51, 16  ;;  %v5756_v52 = vshrl.u32 %v16272_v13, 16  ;;  %v16308_v35 = vrot.slane %v5728_v16, 4  ;;  %13356 = vmatprep.subr.bf16.mxu0 %v13924_v24 }
 0x162   : > { %20011 = vst [vmem:[#allocation63_spill] sm:$0xff] %v16288_v12  ;;  %20012 = vst [vmem:[#allocation65_spill] sm:$0xff] %v16290_v56  ;;  %v16304_v55 = vld [vmem:[%s14534_s26 + $0x1e0] sm:$0xf]  ;;  %v5759_v44 = vshll.u32 %v16272_v13, 16  ;;  %v5770_v0 = vshrl.u32 %v16281_v30, 16 }
 0x163   : > { %20014 = vst [vmem:[#allocation67_spill] sm:$0xff] %v16297_v59  ;;  %20015 = vst [vmem:[#allocation69_spill] sm:$0xff] %v16299_v3  ;;  %v5773_v17 = vshll.u32 %v16281_v30, 16  ;;  %v16314_v27 = vld [vmem:[%s14534_s26 + $0x1ec] sm:$0xf]  ;;  %v16321_v3 = vld [vmem:[%s19644_s1 + $0xe0] sm:$0xff]  }
 0x164   : > { %20016 = vst [vmem:[#allocation70_spill] sm:$0xff] %v16304_v55  ;;  %20017 = vst [vmem:[#allocation71_spill] sm:$0xff] %v16308_v35  ;;  %v16323_v61 = vrot.slane %v5731_v43, 5  ;;  %v16325_v16 = vrot.slane %v5742_v14, 4  ;;  %v5784_v59 = vshrl.u32 %v16295_v41, 16  ;;  %v5787_v53 = vshll.u32 %v16295_v41, 16  ;;  %13357 = vmatpush3.bf16.msra.mxu0 %v13924_v24 }
 0x165   : > { %20018 = vst [vmem:[#allocation73_spill] sm:$0xff] %v16314_v27  ;;  %v16331_v56 = vld [vmem:[%s14534_s26 + $0x1f8] sm:$0xf]  ;;  %v5798_v7 = vshrl.u32 %v16304_v55, 16  ;;  %v5801_v12 = vshll.u32 %v16304_v55, 16  ;;  %v5812_v43 = vshrl.u32 %v16314_v27, 16  ;;  %13390 = vmatprep.subr.bf16.mxu0 %v16321_v3 }
 0x166   : > { %20019 = vst [vmem:[#allocation74_spill] sm:$0xff] %v16323_v61  ;;  %20020 = vst [vmem:[#allocation75_spill] sm:$0xff] %v16325_v16  ;;  %v16338_v61 = vld [vmem:[%s14534_s26 + $0x204] sm:$0xf]  ;;  %v16340_v14 = vrot.slane %v5745_v48, 5  ;;  %v16342_v35 = vrot.slane %v5756_v52, 4 }
 0x167   : > { %20021 = vst [vmem:[#allocation76_spill] sm:$0xff] %v16331_v56  ;;  %20022 = vst [vmem:[#allocation77_spill] sm:$0xff] %v16338_v61  ;;  %v5815_v46 = vshll.u32 %v16314_v27, 16  ;;  %v16348_v8 = vld [vmem:[%s14534_s26 + $0x210] sm:$0xf]  ;;  %v16350_v39 = vrot.slane %v5759_v44, 5  ;;  %13327 = vmatmul.mubr.msk.bf16.gmra.mrb[8].mxu0 %vm1746_vm2, %v15913_v15 }
 0x168   : > { %20023 = vst [vmem:[#allocation79_spill] sm:$0xff] %v16340_v14  ;;  %20024 = vst [vmem:[#allocation80_spill] sm:$0xff] %v16342_v35  ;;  %v16352_v21 = vrot.slane %v5770_v0, 4  ;;  %v16354_v38 = vrot.slane %v5773_v17, 5  ;;  %v5826_v36 = vshrl.u32 %v16331_v56, 16  ;;  %v16360_v52 = vrot.slane %v5784_v59, 4  ;;  %13330 = vmatprep.mubr.msk.bf16.mxu0 %vm1746_vm2, %v15931_v26 }
 0x169   : > { %20025 = vst [vmem:[#allocation81_spill] sm:$0xff] %v16348_v8  ;;  %20026 = vst [vmem:[#allocation82_spill] sm:$0xff] %v16350_v39  ;;  %v16358_v48 = vld [vmem:[%s14534_s26 + $0x294] sm:$0xf]  ;;  %v5829_v35 = vshll.u32 %v16331_v56, 16  ;;  %v5840_v44 = vshrl.u32 %v16338_v61, 16 }
 0x16a   : > { %20027 = vst [vmem:[#allocation83_spill] sm:$0xff] %v16352_v21  ;;  %20028 = vst [vmem:[#allocation84_spill] sm:$0xff] %v16354_v38  ;;  %v16367_v39 = vld [vmem:[%s14534_s26 + $0x2a0] sm:$0xf]  ;;  %v16370_v0 = vrot.slane %v5787_v53, 5  ;;  %v16372_v17 = vrot.slane %v5798_v7, 4 }
 0x16b   : > { %20029 = vst [vmem:[#allocation85_spill] sm:$0xff] %v16358_v48  ;;  %20030 = vst [vmem:[#allocation86_spill] sm:$0xff] %v16360_v52  ;;  %v16374_v24 = vrot.slane %v5801_v12, 5  ;;  %v16376_v59 = vrot.slane %v5812_v43, 4  ;;  %v11512_v52 = vld [vmem:[%s14534_s26 + $0x10] sm:$0xf] }
 0x16c   : > { %20031 = vst [vmem:[#allocation87_spill] sm:$0xff] %v16367_v39  ;;  %20032 = vst [vmem:[#allocation88_spill] sm:$0xff] %v16370_v0  ;;  %v16379_v38 = vrot.slane %v5815_v46, 5  ;;  %v5843_v16 = vshll.u32 %v16338_v61, 16  ;;  %v5854_v21 = vshrl.u32 %v16348_v8, 16  ;;  %v5857_v14 = vshll.u32 %v16348_v8, 16 }
 0x16d   : > { %20033 = vst [vmem:[#allocation6_spill] sm:$0xff] %v16372_v17  ;;  %20034 = vst [vmem:[#allocation7_spill] sm:$0xff] %v16374_v24  ;;  %v11514_v56 = vld [vmem:[%s14534_s26 + $0x1c] sm:$0xf]  ;;  %v16387_v53 = vrot.slane %v5826_v36, 4  ;;  %v5868_v46 = vshrl.u32 %v16358_v48, 16 }
 0x16e   : > { %20035 = vst [vmem:[#allocation93_spill] sm:$0xff] %v16376_v59  ;;  %20036 = vst [vmem:[#allocation94_spill] sm:$0xff] %v16379_v38  ;;  %v5871_v7 = vshll.u32 %v16358_v48, 16  ;;  %v16394_v43 = vld [vmem:[%s14534_s26 + $0x2ac] sm:$0xf]  ;;  %v16398_v38 = vrot.slane %v5829_v35, 5 }
 0x16f   : > { %20037 = vst [vmem:[#allocation95_spill] sm:$0xff] %v16387_v53  ;;  %20038 = vst [vmem:[#allocation96_spill] sm:$0xff] %v16394_v43  ;;  %v16400_v59 = vrot.slane %v5840_v44, 4  ;;  %v5882_v36 = vshrl.u32 %v16367_v39, 16  ;;  %v16406_v12 = vld [vmem:[%s14534_s26 + $0x2b8] sm:$0xf]  ;;  %13331 = vmatmul.mubr.msk.bf16.gmra.mrb[12].mxu0 %vm1746_vm2, %v15944_v4 }
 0x170   : > { %20039 = vst [vmem:[#allocation97_spill] sm:$0xff] %v16398_v38  ;;  %20041 = vst [vmem:[#allocation99_spill] sm:$0xff] %v16406_v12  ;;  %v16409_v53 = vld [vmem:[%s14534_s26 + $0x2c4] sm:$0xf]  ;;  %v4763_v24 = vshrl.u32 %v11512_v52, 16  ;;  %v4766_v17 = vshll.u32 %v11512_v52, 16  ;;  %13334 = vmatprep.mubr.msk.bf16.mxu0 %vm1746_vm2, %v15959_v28 }
 0x171   : > { %20040 = vst [vmem:[#allocation98_spill] sm:$0xff] %v16400_v59  ;;  %20042 = vst [vmem:[#allocation100_spill] sm:$0xff] %v16409_v53  ;;  %v4777_v0 = vshrl.u32 %v11514_v56, 16  ;;  %v4780_v8 = vshll.u32 %v11514_v56, 16  ;;  %v16411_v26 = vrot.slane %v5843_v16, 5  ;;  %v16413_v35 = vrot.slane %v5854_v21, 4 }
 0x172   : > { %v16415_v44 = vrot.slane %v5857_v14, 5  ;;  %v5885_v15 = vshll.u32 %v16367_v39, 16  ;;  %v16419_v59 = vld [vmem:[%s14534_s26 + $0x2d0] sm:$0xf]  ;;  %v16421_v38 = vrot.slane %v5868_v46, 4  ;;  %v16423_v48 = vrot.slane %v5871_v7, 5 }
 0x173   : > { %20043 = vst [vmem:[#allocation101_spill] sm:$0xff] %v16411_v26  ;;  %20044 = vst [vmem:[#allocation102_spill] sm:$0xff] %v16413_v35  ;;  %v5896_v56 = vshrl.u32 %v16394_v43, 16  ;;  %v11516_v16 = vld [vmem:[%s14534_s26 + $0x28] sm:$0xf]  ;;  %v16429_v26 = vrot.slane %v5882_v36, 4 }
 0x174   : > { %20045 = vst [vmem:[#allocation103_spill] sm:$0xff] %v16415_v44  ;;  %20046 = vst [vmem:[#allocation104_spill] sm:$0xff] %v16419_v59  ;;  %v5899_v21 = vshll.u32 %v16394_v43, 16  ;;  %v5910_v14 = vshrl.u32 %v16406_v12, 16  ;;  %v5913_v44 = vshll.u32 %v16406_v12, 16  ;;  %v4768_v7 = vrot.slane %v4766_v17, 5 }
 0x175   : > { %20047 = vst [vmem:[#allocation105_spill] sm:$0xff] %v16421_v38  ;;  %20048 = vst [vmem:[#allocation106_spill] sm:$0xff] %v16423_v48  ;;  %v11518_v35 = vld [vmem:[%s14534_s26 + $0x34] sm:$0xf]  ;;  %v4765_v38 = vrot.slane %v4763_v24, 4  ;;  %v4779_v48 = vrot.slane %v4777_v0, 4 }
 0x176   : > { %20049 = vst [vmem:[#allocation107_spill] sm:$0xff] %v16429_v26  ;;  %v11513_v46 = vld [vmem:[%s14534_s26 + $0x14] sm:$0x1]  ;;  %v4782_v39 = vrot.slane %v4780_v8, 5  ;;  %v16436_v61 = vrot.slane %v5885_v15, 5  ;;  %v4791_v26 = vshrl.u32 %v11516_v16, 16 }
 0x177   : > { %v11515_v36 = vld [vmem:[%s14534_s26 + $0x20] sm:$0x1]  ;;  %v4794_v27 = vshll.u32 %v11516_v16, 16  ;;  %v16443_v12 = vrot.slane %v5896_v56, 4  ;;  %v5924_v24 = vshrl.u32 %v16409_v53, 16  ;;  %v4805_v0 = vshrl.u32 %v11518_v35, 16  ;;  %13335 = vmatmul.mubr.msk.bf16.gmra.mrb[16].mxu0 %vm1746_vm2, %v15964_v62 }
 0x178   : > { %20050 = vst [vmem:[#allocation108_spill] sm:$0xff] %v16436_v61  ;;  %v4808_v8 = vshll.u32 %v11518_v35, 16  ;;  %v16448_v17 = vrot.slane %v5899_v21, 5  ;;  %v16450_v15 = vrot.slane %v5910_v14, 4  ;;  %v16452_v16 = vrot.slane %v5913_v44, 5  ;;  %13338 = vmatprep.mubr.msk.bf16.mxu0 %vm1746_vm2, %v15977_v9 }
 0x179   : > { %20051 = vst [vmem:[#allocation109_spill] sm:$0xff] %v16443_v12  ;;  %v5927_v52 = vshll.u32 %v16409_v53, 16  ;;  %v16456_v4 = vld [vmem:[%s14534_s26 + $0x2dc] sm:$0xf]  ;;  %v4769_v56 = vor.u32 %v4768_v7, %v4765_v38  ;;  %v4772_v12 = vshll.u32 %v11513_v46, 16  ;;  %v4783_v61 = vor.u32 %v4782_v39, %v4779_v48 }
 0x17a   : > { %20052 = vst [vmem:[#allocation110_spill] sm:$0xff] %v16448_v17  ;;  %20053 = vst [vmem:[#allocation111_spill] sm:$0xff] %v16450_v15  ;;  %v4786_v43 = vshll.u32 %v11515_v36, 16  ;;  %v11520_v35 = vld [vmem:[%s14534_s26 + $0x40] sm:$0xf]  ;;  %v5938_v55 = vshrl.u32 %v16419_v59, 16 }
 0x17b   : > { %20054 = vst [vmem:[#allocation112_spill] sm:$0xff] %v16452_v16  ;;  %20055 = vst [vmem:[#allocation113_spill] sm:$0xff] %v16456_v4  ;;  %v5941_v28 = vshll.u32 %v16419_v59, 16  ;;  %v16462_v21 = vld [vmem:[%s14534_s26 + $0x2e8] sm:$0xf]  ;;  %v4793_v14 = vrot.slane %v4791_v26, 4 }
 0x17c   : > { %20056 = vst [vmem:[#allocation114_spill] sm:$0xff] %v16462_v21  ;;  %v4796_v15 = vrot.slane %v4794_v27, 5  ;;  %v16464_v44 = vrot.slane %v5924_v24, 4  ;;  %v5952_v16 = vshrl.u32 %v16456_v4, 16  ;;  %v11517_v17 = vld [vmem:[%s14534_s26 + $0x2c] sm:$0x1] }
 0x17d   : > { %v4807_v53 = vrot.slane %v4805_v0, 4  ;;  %v4810_v38 = vrot.slane %v4808_v8, 5  ;;  %v5955_v46 = vshll.u32 %v16456_v4, 16  ;;  %v5966_v39 = vshrl.u32 %v16462_v21, 16  ;;  %v11519_v48 = vld [vmem:[%s14534_s26 + $0x38] sm:$0x1] }
 0x17e   : > { %20057 = vst [vmem:[#allocation115_spill] sm:$0xff] %v16464_v44  ;;  %v4819_v7 = vshrl.u32 %v11520_v35, 16  ;;  %v4822_v36 = vshll.u32 %v11520_v35, 16  ;;  %v4770_v59 = vrot.slane %v4769_v56, 4  ;;  %v4774_v41 = vrot.slane %v4772_v12, 5 }
 0x17f   : > { %v4784_v26 = vrot.slane %v4783_v61, 4  ;;  %v4788_v27 = vrot.slane %v4786_v43, 5  ;;  %v16471_v24 = vrot.slane %v5927_v52, 5  ;;  %v5969_v44 = vshll.u32 %v16462_v21, 16  ;;  %v11521_v61 = vld [vmem:[%s14534_s26 + $0x44] sm:$0x1]  ;;  %13339 = vmatmul.mubr.msk.bf16.gmra.mrb[20].mxu0 %vm1746_vm2, %v15994_v42 }
 0x180   : > { %v4797_v0 = vor.u32 %v4796_v15, %v4793_v14  ;;  %v4800_v8 = vshll.u32 %v11517_v17, 16  ;;  %v16476_v18 = vrot.slane %v5938_v55, 4  ;;  %v4811_v56 = vor.u32 %v4810_v38, %v4807_v53  ;;  %v11522_v43 = vld [vmem:[%s14534_s26 + $0x4c] sm:$0xf]  ;;  %v11524_v55 = vld [vmem:[%s14534_s26 + $0x58] sm:$0xf]  ;;  %13342 = vmatprep.mubr.msk.bf16.mxu0 %vm1746_vm2, %v16008_v23 }
 0x181   : > { %20058 = vst [vmem:[#allocation116_spill] sm:$0xff] %v16471_v24  ;;  %v4814_v12 = vshll.u32 %v11519_v48, 16  ;;  %v16484_v52 = vrot.slane %v5941_v28, 5  ;;  %v16486_v17 = vrot.slane %v5952_v16, 4  ;;  %v4821_v15 = vrot.slane %v4819_v7, 4 }
 0x182   : > { %20059 = vst [vmem:[#allocation117_spill] sm:$0xff] %v16476_v18  ;;  %v4824_v62 = vrot.slane %v4822_v36, 5  ;;  %v16489_v14 = vrot.slane %v5955_v46, 5  ;;  %v16491_v35 = vrot.slane %v5966_v39, 4  ;;  %v4775_v53 = vsel %vm14570_vm3, %v4770_v59, %v4774_v41  ;;  %v11526_v9 = vld [vmem:[%s14534_s26 + $0x64] sm:$0xf] }
 0x183   : > { %20060 = vst [vmem:[#allocation118_spill] sm:$0xff] %v16484_v52  ;;  %20061 = vst [vmem:[#allocation119_spill] sm:$0xff] %v16486_v17  ;;  %v4789_v38 = vsel %vm14570_vm3, %v4784_v26, %v4788_v27  ;;  %v16498_v28 = vrot.slane %v5969_v44, 5  ;;  %v4798_v16 = vrot.slane %v4797_v0, 4  ;;  %v4802_v48 = vrot.slane %v4800_v8, 5 }
 0x184   : > { %20062 = vst [vmem:[#allocation120_spill] sm:$0xff] %v16489_v14  ;;  %20063 = vst [vmem:[#allocation121_spill] sm:$0xff] %v16491_v35  ;;  %v4828_v7 = vshll.u32 %v11521_v61, 16  ;;  %v11528_v36 = vld [vmem:[%s14534_s26 + $0xe8] sm:$0xf]  ;;  %v4812_v17 = vrot.slane %v4811_v56, 4  ;;  %v16502_v52 = vcombine.low %v4775_v53, %v4789_v38  ;;  %v4825_v59 = vor.u32 %v4824_v62, %v4821_v15 }
 0x185   : > { %20064 = vst [vmem:[#allocation122_spill] sm:$0xff] %v16498_v28  ;;  %v4816_v46 = vrot.slane %v4814_v12, 5  ;;  %v4833_v14 = vshrl.u32 %v11522_v43, 16  ;;  %v4836_v39 = vshll.u32 %v11522_v43, 16  ;;  %v11530_v35 = vld [vmem:[%s14534_s26 + $0xf4] sm:$0xf]  ;;  %v4803_v56 = vsel %vm14570_vm3, %v4798_v16, %v4802_v48 }
 0x186   : > { %20065 = vst [vmem:[#allocation123_spill] sm:$0xff] %v16502_v52  ;;  %v11523_v41 = vld [vmem:[%s14534_s26 + $0x50] sm:$0x1]  ;;  %v4847_v18 = vshrl.u32 %v11524_v55, 16  ;;  %v4850_v26 = vshll.u32 %v11524_v55, 16  ;;  %v4861_v44 = vshrl.u32 %v11526_v9, 16 }
 0x187   : > { %v11525_v27 = vld [vmem:[%s14534_s26 + $0x5c] sm:$0x1]  ;;  %v4864_v0 = vshll.u32 %v11526_v9, 16  ;;  %v4875_v8 = vshrl.u32 %v11528_v36, 16  ;;  %v4878_v61 = vshll.u32 %v11528_v36, 16  ;;  %v16508_v12 = vrot.slane %v4828_v7, 5  ;;  %13343 = vmatmul.mubr.msk.bf16.gmra.mrb[24].mxu0 %vm1746_vm2, %v16020_v19 }
 0x188   : > { %v11527_v43 = vld [vmem:[%s14534_s26 + $0x68] sm:$0x1]  ;;  %v4889_v53 = vshrl.u32 %v11530_v35, 16  ;;  %v4892_v38 = vshll.u32 %v11530_v35, 16  ;;  %v4817_v15 = vsel %vm14570_vm3, %v4812_v17, %v4816_v46  ;;  %v4835_v62 = vrot.slane %v4833_v14, 4  ;;  %13346 = vmatprep.mubr.msk.bf16.mxu0 %vm1746_vm2, %v16040_v22 }
 0x189   : > { %v4838_v55 = vrot.slane %v4836_v39, 5  ;;  %v4842_v9 = vshll.u32 %v11523_v41, 16  ;;  %v11529_v36 = vld [vmem:[%s14534_s26 + $0xec] sm:$0x1]  ;;  %v11532_v28 = vld [vmem:[%s14534_s26 + $0x100] sm:$0xf]  ;;  %v16523_v50 = vcombine.low %v4803_v56, %v4817_v15 }
 0x18a   : > { %v16519_v16 = vrot.slane %v4825_v59, 4  ;;  %v4849_v48 = vrot.slane %v4847_v18, 4  ;;  %v4852_v7 = vrot.slane %v4850_v26, 5  ;;  %v4856_v35 = vshll.u32 %v11525_v27, 16  ;;  %v11534_v24 = vld [vmem:[%s14534_s26 + $0x10c] sm:$0xf] }
 0x18b   : > { %v4863_v52 = vrot.slane %v4861_v44, 4  ;;  %v4866_v42 = vrot.slane %v4864_v0, 5  ;;  %v4877_v21 = vrot.slane %v4875_v8, 4  ;;  %v4880_v17 = vrot.slane %v4878_v61, 5  ;;  %v11531_v46 = vld [vmem:[%s14534_s26 + $0xf8] sm:$0x1] }
 0x18c   : > { %v4891_v14 = vrot.slane %v4889_v53, 4  ;;  %v4894_v39 = vrot.slane %v4892_v38, 5  ;;  %v4903_v41 = vshrl.u32 %v11532_v28, 16  ;;  %v4906_v4 = vshll.u32 %v11532_v28, 16  ;;  %20066 = vst [vmem:[#allocation124_spill] sm:$0xff] %v16523_v50 }
 0x18d   : > { %v4839_v23 = vor.u32 %v4838_v55, %v4835_v62  ;;  %v16525_v59 = vrot.slane %v4842_v9, 5  ;;  %v4870_v18 = vshll.u32 %v11527_v43, 16  ;;  %v4853_v26 = vor.u32 %v4852_v7, %v4849_v48  ;;  %v11536_v8 = vld [vmem:[%s14534_s26 + $0x118] sm:$0xf]  ;;  %v11533_v62 = vld [vmem:[%s14534_s26 + $0x104] sm:$0x1] }
 0x18e   : > { %v4884_v27 = vshll.u32 %v11529_v36, 16  ;;  %v4917_v44 = vshrl.u32 %v11534_v24, 16  ;;  %v4920_v0 = vshll.u32 %v11534_v24, 16  ;;  %v4831_v61 = vsel %vm14570_vm3, %v16519_v16, %v16508_v12  ;;  %v11535_v36 = vld [vmem:[%s14534_s26 + $0x110] sm:$0x1] }
 0x18f   : > { %v4867_v28 = vor.u32 %v4866_v42, %v4863_v52  ;;  %v4881_v53 = vor.u32 %v4880_v17, %v4877_v21  ;;  %v4898_v56 = vshll.u32 %v11531_v46, 16  ;;  %v4858_v38 = vrot.slane %v4856_v35, 5  ;;  %v11538_v48 = vld [vmem:[%s14534_s26 + $0x124] sm:$0xf]  ;;  %v11537_v42 = vld [vmem:[%s14534_s26 + $0x11c] sm:$0x1]  ;;  %13347 = vmatmul.mubr.msk.bf16.gmra.mrb[28].mxu0 %vm1746_vm2, %v16067_v37 }
 0x190   : > { %v4895_v15 = vor.u32 %v4894_v39, %v4891_v14  ;;  %v4905_v43 = vrot.slane %v4903_v41, 4  ;;  %v4908_v55 = vrot.slane %v4906_v4, 5  ;;  %v4840_v24 = vrot.slane %v4839_v23, 4  ;;  %v11540_v4 = vld [vmem:[%s14534_s26 + $0x130] sm:$0xf] }
 0x191   : > { %v4872_v9 = vrot.slane %v4870_v18, 5  ;;  %v4931_v7 = vshrl.u32 %v11536_v8, 16  ;;  %v4934_v12 = vshll.u32 %v11536_v8, 16  ;;  %v4854_v21 = vrot.slane %v4853_v26, 4  ;;  %v11539_v23 = vld [vmem:[%s14534_s26 + $0x128] sm:$0x1] }
 0x192   : > { %v4886_v52 = vrot.slane %v4884_v27, 5  ;;  %v4919_v16 = vrot.slane %v4917_v44, 4  ;;  %v4922_v35 = vrot.slane %v4920_v0, 5  ;;  %v4868_v17 = vrot.slane %v4867_v28, 4  ;;  %v11542_v22 = vld [vmem:[%s14534_s26 + $0x13c] sm:$0xf] }
 0x193   : > { %v4882_v46 = vrot.slane %v4881_v53, 4  ;;  %v4900_v19 = vrot.slane %v4898_v56, 5  ;;  %v4912_v14 = vshll.u32 %v11533_v62, 16  ;;  %v4896_v39 = vrot.slane %v4895_v15, 4  ;;  %v11543_v37 = vld [vmem:[%s14534_s26 + $0x140] sm:$0x1] }
 0x194   : > { %v4909_v41 = vor.u32 %v4908_v55, %v4905_v43  ;;  %v4945_v18 = vshrl.u32 %v11538_v48, 16  ;;  %v4948_v50 = vshll.u32 %v11538_v48, 16  ;;  %v4933_v8 = vrot.slane %v4931_v7, 4  ;;  %v11541_v48 = vld [vmem:[%s14534_s26 + $0x134] sm:$0x1] }
 0x195   : > { %v4936_v54 = vrot.slane %v4934_v12, 5  ;;  %v4959_v26 = vshrl.u32 %v11540_v4, 16  ;;  %v4962_v27 = vshll.u32 %v11540_v4, 16  ;;  %v4845_v44 = vsel %vm14570_vm3, %v4840_v24, %v16525_v59 }
 0x196   : > { %v4859_v0 = vsel %vm14570_vm3, %v4854_v21, %v4858_v38  ;;  %v4923_v28 = vor.u32 %v4922_v35, %v4919_v16  ;;  %v4926_v53 = vshll.u32 %v11535_v36, 16  ;;  %v4873_v56 = vsel %vm14570_vm3, %v4868_v17, %v4872_v9  ;;  %v11544_v21 = vld [vmem:[%s14534_s26 + $0x1c0] sm:$0xf] }
 0x197   : > { %v4887_v15 = vsel %vm14570_vm3, %v4882_v46, %v4886_v52  ;;  %v16552_v62 = vrot.slane %v4912_v14, 5  ;;  %v4940_v43 = vshll.u32 %v11537_v42, 16  ;;  %v4901_v55 = vsel %vm14570_vm3, %v4896_v39, %v4900_v19  ;;  %v11546_v42 = vld [vmem:[%s14534_s26 + $0x1cc] sm:$0xf]  ;;  %v11545_v14 = vld [vmem:[%s14534_s26 + $0x1c4] sm:$0x1] }
 0x198   : > { %v16556_v59 = vrot.slane %v4909_v41, 4  ;;  %v4947_v38 = vrot.slane %v4945_v18, 4  ;;  %v4950_v24 = vrot.slane %v4948_v50, 5  ;;  %v4937_v9 = vor.u32 %v4936_v54, %v4933_v8 }
 0x199   : > { %v4954_v36 = vshll.u32 %v11539_v23, 16  ;;  %v4961_v7 = vrot.slane %v4959_v26, 4  ;;  %v4964_v12 = vrot.slane %v4962_v27, 5  ;;  %v20067_v52 = vcombine.low %v16106_v10, %v16122_v33  ;;  %v11548_v33 = vld [vmem:[%s14534_s26 + $0x1d8] sm:$0xf] }
 0x19a   : > { %v16566_v16 = vcombine.low %v4831_v61, %v4845_v44  ;;  %v16568_v50 = vrot.slane %v4923_v28, 4  ;;  %v16570_v35 = vrot.slane %v4926_v53, 5  ;;  %v4973_v54 = vshrl.u32 %v11542_v22, 16  ;;  %v11550_v23 = vld [vmem:[%s14534_s26 + $0x1e4] sm:$0xf] }
 0x19b   : > { %13358 = vmatprep.mubr.msk.bf16.mxu0 %vm1746_vm2, %v20067_v52  ;;  %v16574_v4 = vcombine.low %v4859_v0, %v4873_v56  ;;  %v16576_v17 = vcombine.low %v4887_v15, %v4901_v55  ;;  %v16578_v46 = vrot.slane %v4940_v43, 5  ;;  %v4976_v10 = vshll.u32 %v11542_v22, 16  ;;  %v11552_v44 = vld [vmem:[%s14534_s26 + $0x1f0] sm:$0xf]  ;;  %v13931_v22 = vld [vmem:[%s19644_s1 + $0xe8] sm:$0xff]  }
 0x19c   : > { %v4951_v19 = vor.u32 %v4950_v24, %v4947_v38  ;;  %v4968_v61 = vshll.u32 %v11541_v48, 16  ;;  %v4987_v39 = vshrl.u32 %v11544_v21, 16  ;;  %v4990_v41 = vshll.u32 %v11544_v21, 16 }
 0x19d   : > { %20068 = vst [vmem:[#allocation125_spill] sm:$0xff] %v16576_v17  ;;  %v16587_v8 = vrot.slane %v4937_v9, 4  ;;  %v16589_v26 = vrot.slane %v4954_v36, 5  ;;  %v4965_v27 = vor.u32 %v4964_v12, %v4961_v7  ;;  %v4975_v28 = vrot.slane %v4973_v54, 4  ;;  %v11547_v9 = vld [vmem:[%s14534_s26 + $0x1d0] sm:$0x1] }
 0x19e   : > { %v5001_v53 = vshrl.u32 %v11546_v42, 16  ;;  %v5004_v56 = vshll.u32 %v11546_v42, 16  ;;  %v4978_v15 = vrot.slane %v4976_v10, 5  ;;  %v4982_v43 = vshll.u32 %v11543_v37, 16  ;;  %v11549_v54 = vld [vmem:[%s14534_s26 + $0x1dc] sm:$0x1] }
 0x19f   : > { %v5015_v55 = vshrl.u32 %v11548_v33, 16  ;;  %v5018_v38 = vshll.u32 %v11548_v33, 16  ;;  %v16599_v24 = vrot.slane %v4951_v19, 4  ;;  %v16601_v48 = vrot.slane %v4968_v61, 5  ;;  %v11554_v10 = vld [vmem:[%s14534_s26 + $0x1fc] sm:$0xf] }
 0x1a0   : > { %v4989_v36 = vrot.slane %v4987_v39, 4  ;;  %v4992_v7 = vrot.slane %v4990_v41, 5  ;;  %v20069_v12 = vcombine.low %v16128_v2, %v16131_v58  ;;  %v16608_v21 = vrot.slane %v4965_v27, 4  ;;  %v11556_v39 = vld [vmem:[%s14534_s26 + $0x208] sm:$0xf] }
 0x1a1   : > { %v4996_v52 = vshll.u32 %v11545_v14, 16  ;;  %v5029_v37 = vshrl.u32 %v11550_v23, 16  ;;  %v5032_v42 = vshll.u32 %v11550_v23, 16  ;;  %v20070_v33 = vcombine.low %v16141_v29, %v16152_v47  ;;  %v13936_v14 = vld [vmem:[%s19644_s1 + $0xf0] sm:$0xff]   ;;  %v11559_v17 = vld [vmem:[%s14534_s26 + $0x218] sm:$0x1] }
 0x1a2   : > { %13359 = vmatmul.mubr.msk.bf16.vlgmr.msra.gmra.mrb[0].mxu0 %vm1746_vm2, %v20069_v12  ;;  %v5003_v19 = vrot.slane %v5001_v53, 4  ;;  %v5006_v2 = vrot.slane %v5004_v56, 5  ;;  %v5043_v58 = vshrl.u32 %v11552_v44, 16  ;;  %v5046_v61 = vshll.u32 %v11552_v44, 16  ;;  %v11551_v12 = vld [vmem:[%s14534_s26 + $0x1e8] sm:$0x1] }
 0x1a3   : > { %13391 = vmatpush3.bf16.msra.mxu0 %v16321_v3  ;;  %13362 = vmatprep.mubr.msk.bf16.mxu0 %vm1746_vm2, %v20070_v33  ;;  %v4979_v41 = vor.u32 %v4978_v15, %v4975_v28  ;;  %v16621_v23 = vrot.slane %v4982_v43, 5  ;;  %v5017_v3 = vrot.slane %v5015_v55, 4  ;;  %v5020_v27 = vrot.slane %v5018_v38, 5  ;;  %v11553_v53 = vld [vmem:[%s14534_s26 + $0x1f4] sm:$0x1] }
 0x1a4   : > { %13392 = vmatprep.subr.bf16.mxu0 %v13931_v22  ;;  %v4993_v29 = vor.u32 %v4992_v7, %v4989_v36  ;;  %v5010_v47 = vshll.u32 %v11547_v9, 16  ;;  %v5057_v56 = vshrl.u32 %v11554_v10, 16  ;;  %v5060_v33 = vshll.u32 %v11554_v10, 16  ;;  %v11555_v55 = vld [vmem:[%s14534_s26 + $0x200] sm:$0x1] }
 0x1a5   : > { %v4943_v44 = vsel %vm14570_vm3, %v16587_v8, %v16578_v46  ;;  %v4957_v28 = vsel %vm14570_vm3, %v16599_v24, %v16589_v26  ;;  %v5031_v15 = vrot.slane %v5029_v37, 4  ;;  %v5034_v43 = vrot.slane %v5032_v42, 5  ;;  %v11558_v10 = vld [vmem:[%s14534_s26 + $0x214] sm:$0xf]  ;;  %v13941_v46 = vld [vmem:[%s19644_s1 + $0xf8] sm:$0xff]  }
 0x1a6   : > { %v5007_v38 = vor.u32 %v5006_v2, %v5003_v19  ;;  %v5024_v9 = vshll.u32 %v11549_v54, 16  ;;  %v5045_v36 = vrot.slane %v5043_v58, 4  ;;  %v5048_v7 = vrot.slane %v5046_v61, 5  ;;  %v11557_v19 = vld [vmem:[%s14534_s26 + $0x20c] sm:$0x1] }
 0x1a7   : > { %13393 = vmatpush3.bf16.msra.mxu0 %v13931_v22  ;;  %v16638_v8 = vrot.slane %v4996_v52, 5  ;;  %v5021_v18 = vor.u32 %v5020_v27, %v5017_v3  ;;  %v5071_v26 = vshrl.u32 %v11556_v39, 16  ;;  %v5074_v24 = vshll.u32 %v11556_v39, 16  ;;  %v11560_v27 = vld [vmem:[%s14534_s26 + $0x298] sm:$0xf] }
 0x1a8   : > { %13394 = vmatprep.subr.bf16.mxu0 %v13936_v14  ;;  %v16640_v37 = vrot.slane %v4979_v41, 4  ;;  %v16642_v22 = vrot.slane %v4993_v29, 4  ;;  %v5059_v42 = vrot.slane %v5057_v56, 4  ;;  %v5062_v54 = vrot.slane %v5060_v33, 5  ;;  %v16659_v41 = vld [vmem:[%s19644_s1 + $0x100] sm:$0xff]  }
 0x1a9   : > { %v20071_v2 = vcombine.low %v16163_v11, %v16172_v57  ;;  %v16649_v58 = vrot.slane %v5010_v47, 5  ;;  %v5035_v52 = vor.u32 %v5034_v43, %v5031_v15  ;;  %v5038_v61 = vshll.u32 %v11551_v12, 16  ;;  %v11562_v56 = vld [vmem:[%s14534_s26 + $0x2a4] sm:$0xf] }
 0x1aa   : > { %v5052_v3 = vshll.u32 %v11553_v53, 16  ;;  %v20072_v39 = vcombine.low %v16181_v1, %v16190_v20  ;;  %v5008_v11 = vrot.slane %v5007_v38, 4  ;;  %v5026_v57 = vrot.slane %v5024_v9, 5 }
 0x1ab   : > { %13363 = vmatmul.mubr.msk.bf16.gmra.mrb[4].mxu0 %vm1746_vm2, %v20071_v2  ;;  %v5049_v29 = vor.u32 %v5048_v7, %v5045_v36  ;;  %v5066_v47 = vshll.u32 %v11555_v55, 16  ;;  %v5022_v12 = vrot.slane %v5021_v18, 4  ;;  %v5073_v53 = vrot.slane %v5071_v26, 4 }
 0x1ac   : > { %13366 = vmatprep.mubr.msk.bf16.mxu0 %vm1746_vm2, %v20072_v39  ;;  %13395 = vmatpush3.bf16.msra.mxu0 %v13936_v14  ;;  %v5076_v33 = vrot.slane %v5074_v24, 5  ;;  %v5085_v15 = vshrl.u32 %v11558_v10, 16  ;;  %v5063_v1 = vor.u32 %v5062_v54, %v5059_v42  ;;  %v5088_v20 = vshll.u32 %v11558_v10, 16 }
 0x1ad   : > { %13396 = vmatprep.subr.bf16.mxu0 %v13941_v46  ;;  %v5099_v43 = vshrl.u32 %v11560_v27, 16  ;;  %v5102_v14 = vshll.u32 %v11560_v27, 16  ;;  %v5036_v2 = vrot.slane %v5035_v52, 4  ;;  %v5040_v39 = vrot.slane %v5038_v61, 5 }
 0x1ae   : > { %v5054_v0 = vrot.slane %v5052_v3, 5  ;;  %v5080_v38 = vshll.u32 %v11557_v19, 16  ;;  %v20073_v55 = vsel %vm14570_vm3, %v16568_v50, %v16570_v35  ;;  %v20074_v18 = vsel %vm14570_vm3, %v16556_v59, %v16552_v62  ;;  %v11561_v35 = vld [vmem:[%s14534_s26 + $0x29c] sm:$0x1] }
 0x1af   : > { %v16673_v9 = vcombine.low %v20074_v18, %v20073_v55  ;;  %v16675_v36 = vcombine.low %v4943_v44, %v4957_v28  ;;  %v5050_v7 = vrot.slane %v5049_v29, 4  ;;  %v5068_v10 = vrot.slane %v5066_v47, 5  ;;  %v16718_v47 = vld [vmem:[%s14534_s26 + $0x2b4] sm:$0x1] }
 0x1b0   : > { %13397 = vmatpush3.bf16.msra.mxu0 %v13941_v46  ;;  %v5077_v46 = vor.u32 %v5076_v33, %v5073_v53  ;;  %v5087_v26 = vrot.slane %v5085_v15, 4  ;;  %v5113_v24 = vshrl.u32 %v11562_v56, 16  ;;  %v5116_v42 = vshll.u32 %v11562_v56, 16  ;;  %v11576_v33 = vld [vmem:[%s14534_s26 + $0x10] sm:$0x1] }
 0x1b1   : > { %13430 = vmatprep.subr.bf16.mxu0 %v16659_v41  ;;  %v5064_v54 = vrot.slane %v5063_v1, 4  ;;  %v5090_v50 = vrot.slane %v5088_v20, 5  ;;  %v5101_v19 = vrot.slane %v5099_v43, 4  ;;  %v5104_v62 = vrot.slane %v5102_v14, 5 }
 0x1b2   : > { %v20075_v59 = vcombine.low %v16209_v40, %v16219_v25  ;;  %v4971_v44 = vsel %vm14570_vm3, %v16608_v21, %v16601_v48  ;;  %v4985_v28 = vsel %vm14570_vm3, %v16640_v37, %v16621_v23  ;;  %v4999_v52 = vsel %vm14570_vm3, %v16642_v22, %v16638_v8  ;;  %v11564_v40 = vld [vmem:[%s14534_s26 + $0x2b0] sm:$0xf]  ;;  %v11563_v37 = vld [vmem:[%s14534_s26 + $0x2a8] sm:$0x1]  ;;  %v11566_v22 = vld [vmem:[%s14534_s26 + $0x2bc] sm:$0xf] }
 0x1b3   : > { %v5013_v25 = vsel %vm14570_vm3, %v5008_v11, %v16649_v58  ;;  %v20076_v61 = vcombine.low %v16233_v60, %v16245_v45  ;;  %v5027_v48 = vsel %vm14570_vm3, %v5022_v12, %v5026_v57  ;;  %v5041_v21 = vsel %vm14570_vm3, %v5036_v2, %v5040_v39 }
 0x1b4   : > { %13367 = vmatmul.mubr.msk.bf16.gmra.mrb[8].mxu0 %vm1746_vm2, %v20075_v59  ;;  %v16707_v23 = vrot.slane %v5080_v38, 5  ;;  %v5094_v8 = vshll.u32 %v11559_v17, 16  ;;  %v16711_v58 = vrot.slane %v5077_v46, 4  ;;  %v5108_v3 = vshll.u32 %v11561_v35, 16  ;;  %v11577_v38 = vld [vmem:[%s14534_s26 + $0x1c] sm:$0x1] }
 0x1b5   : > { %13370 = vmatprep.mubr.msk.bf16.mxu0 %vm1746_vm2, %v20076_v61  ;;  %v5115_v27 = vrot.slane %v5113_v24, 4  ;;  %v5118_v45 = vrot.slane %v5116_v42, 5  ;;  %v5055_v60 = vsel %vm14570_vm3, %v5050_v7, %v5054_v0  ;;  %v5069_v11 = vsel %vm14570_vm3, %v5064_v54, %v5068_v10  ;;  %v16744_v46 = vld [vmem:[%s14534_s26 + $0x2c8] sm:$0xf]  ;;  %v16755_v54 = vld [vmem:[%s14534_s26 + $0x2d4] sm:$0xf] }
 0x1b6   : > { %v5091_v57 = vor.u32 %v5090_v50, %v5087_v26  ;;  %v5105_v29 = vor.u32 %v5104_v62, %v5101_v19  ;;  %v16720_v17 = vcombine.low %v4971_v44, %v4985_v28  ;;  %v16722_v56 = vcombine.low %v4999_v52, %v5013_v25  ;;  %v11578_v44 = vld [vmem:[%s14534_s26 + $0x28] sm:$0x1]  ;;  %v11594_v7 = vld [vmem:[%s14534_s26 + $0x1d8] sm:$0x1] }
 0x1b7   : > { %v5122_v12 = vshll.u32 %v11563_v37, 16  ;;  %v5127_v53 = vshrl.u32 %v11564_v40, 16  ;;  %v16725_v15 = vcombine.low %v5027_v48, %v5041_v21  ;;  %v16727_v1 = vrot.slane %v5094_v8, 5  ;;  %v11580_v48 = vld [vmem:[%s14534_s26 + $0x40] sm:$0x1]  ;;  %v20079_v8 = vld [vmem:[#allocation41_spill] sm:$0xff] }
 0x1b8   : > { %v5130_v0 = vshll.u32 %v11564_v40, 16  ;;  %v5141_v20 = vshrl.u32 %v11566_v22, 16  ;;  %v16729_v43 = vcombine.low %v5055_v60, %v5069_v11  ;;  %v16735_v2 = vrot.slane %v5108_v3, 5  ;;  %v20080_v60 = vld [vmem:[#allocation42_spill] sm:$0xff]  ;;  %v20081_v11 = vld [vmem:[#allocation43_spill] sm:$0xff] }
 0x1b9   : > { %v5119_v39 = vor.u32 %v5118_v45, %v5115_v27  ;;  %v16738_v55 = vrot.slane %v5091_v57, 4  ;;  %v16740_v18 = vrot.slane %v5105_v29, 4  ;;  %v5144_v10 = vshll.u32 %v11566_v22, 16  ;;  %v11581_v22 = vld [vmem:[%s14534_s26 + $0x4c] sm:$0x1] }
 0x1ba   : > { %v20077_v26 = vcombine.low %v16253_v31, %v16262_v51  ;;  %v16750_v24 = vrot.slane %v5122_v12, 5  ;;  %v16752_v42 = vrot.slane %v5127_v53, 4  ;;  %v5538_v50 = vor.u32 %v16156_v6, %v16147_v49  ;;  %v11596_v3 = vld [vmem:[%s14534_s26 + $0x1f0] sm:$0x1] }
 0x1bb   : > { %v5541_v35 = vshll.u32 %v11576_v33, 16  ;;  %v20078_v19 = vcombine.low %v16272_v13, %v16281_v30  ;;  %v16763_v31 = vrot.slane %v5130_v0, 5  ;;  %v16765_v51 = vrot.slane %v5141_v20, 4  ;;  %v11579_v13 = vld [vmem:[%s14534_s26 + $0x34] sm:$0x1]  ;;  %v20083_v0 = vld [vmem:[#allocation45_spill] sm:$0xff] }
 0x1bc   : > { %13371 = vmatmul.mubr.msk.bf16.gmra.mrb[12].mxu0 %vm1746_vm2, %v20077_v26  ;;  %v5552_v62 = vor.u32 %v16167_v5, %v16165_v63  ;;  %v5555_v59 = vshll.u32 %v11577_v38, 16  ;;  %v16770_v28 = vrot.slane %v5119_v39, 4  ;;  %v5155_v49 = vshrl.u32 %v16744_v46, 16  ;;  %v20082_v33 = vld [vmem:[#allocation44_spill] sm:$0xff]  ;;  %v11582_v26 = vld [vmem:[%s14534_s26 + $0x58] sm:$0x1] }
 0x1bd   : > { %13374 = vmatprep.mubr.msk.bf16.mxu0 %vm1746_vm2, %v20078_v19  ;;  %v5539_v6 = vrot.slane %v5538_v50, 4  ;;  %v5543_v52 = vrot.slane %v5541_v35, 5  ;;  %v16774_v30 = vrot.slane %v5144_v10, 5  ;;  %v5566_v37 = vor.u32 %v20079_v8, %v16174_v34  ;;  %v20084_v50 = vld [vmem:[#allocation66_spill] sm:$0xff]  ;;  %v20127_v5 = vld [vmem:[#allocation83_spill] sm:$0xff] }
 0x1be   : > { %v5553_v40 = vrot.slane %v5552_v62, 4  ;;  %v5557_v61 = vrot.slane %v5555_v59, 5  ;;  %v5569_v45 = vshll.u32 %v11578_v44, 16  ;;  %v5580_v57 = vor.u32 %v20081_v11, %v20080_v60  ;;  %v20085_v35 = vld [vmem:[#allocation70_spill] sm:$0xff]  ;;  %v20133_v62 = vld [vmem:[#allocation113_spill] sm:$0xff] }
 0x1bf   : > { %v5544_v21 = vsel %vm14570_vm3, %v5539_v6, %v5543_v52  ;;  %v5567_v12 = vrot.slane %v5566_v37, 4  ;;  %v5583_v53 = vshll.u32 %v11579_v13, 16  ;;  %v5594_v20 = vor.u32 %v20083_v0, %v20082_v33  ;;  %v20087_v6 = vld [vmem:[#allocation46_spill] sm:$0xff]  ;;  %v20088_v52 = vld [vmem:[#allocation47_spill] sm:$0xff] }
 0x1c0   : > { %v5558_v27 = vsel %vm14570_vm3, %v5553_v40, %v5557_v61  ;;  %v16800_v39 = vrot.slane %v5155_v49, 4  ;;  %v5571_v34 = vrot.slane %v5569_v45, 5  ;;  %v5581_v38 = vrot.slane %v5580_v57, 4  ;;  %v20089_v49 = vld [vmem:[#allocation73_spill] sm:$0xff]  ;;  %v20090_v40 = vld [vmem:[#allocation76_spill] sm:$0xff]  ;;  %v20094_v33 = vld [vmem:[#allocation50_spill] sm:$0xff] }
 0x1c1   : > { %v16796_v29 = vcombine.low %v5544_v21, %v5558_v27  ;;  %v5597_v10 = vshll.u32 %v11580_v48, 16  ;;  %v20086_v19 = vcombine.low %v20084_v50, %v20085_v35  ;;  %v5585_v59 = vrot.slane %v5583_v53, 5  ;;  %v11583_v37 = vld [vmem:[%s14534_s26 + $0x64] sm:$0x1]  ;;  %v20092_v27 = vld [vmem:[#allocation48_spill] sm:$0xff]  ;;  %v20093_v45 = vld [vmem:[#allocation49_spill] sm:$0xff] }
 0x1c2   : > { %v5595_v44 = vrot.slane %v5594_v20, 4  ;;  %v5608_v13 = vor.u32 %v20088_v52, %v20087_v6  ;;  %v20091_v61 = vcombine.low %v20089_v49, %v20090_v40  ;;  %v5572_v48 = vsel %vm14570_vm3, %v5567_v12, %v5571_v34  ;;  %v20095_v0 = vld [vmem:[#allocation51_spill] sm:$0xff]  ;;  %v11585_v35 = vld [vmem:[%s14534_s26 + $0xf4] sm:$0x1] }
 0x1c3   : > { %v5599_v21 = vrot.slane %v5597_v10, 5  ;;  %v5611_v8 = vshll.u32 %v11581_v22, 16  ;;  %v5622_v60 = vor.u32 %v20093_v45, %v20092_v27  ;;  %v5586_v11 = vsel %vm14570_vm3, %v5581_v38, %v5585_v59  ;;  %v11584_v50 = vld [vmem:[%s14534_s26 + $0xe8] sm:$0x1]  ;;  %v11586_v10 = vld [vmem:[%s14534_s26 + $0x100] sm:$0x1] }
 0x1c4   : > { %13375 = vmatmul.mubr.msk.bf16.gmra.mrb[16].mxu0 %vm1746_vm2, %v20086_v19  ;;  %v5609_v57 = vrot.slane %v5608_v13, 4  ;;  %v5625_v53 = vshll.u32 %v11582_v26, 16  ;;  %v5636_v20 = vor.u32 %v20095_v0, %v20094_v33  ;;  %v16825_v19 = vcombine.low %v5572_v48, %v5586_v11  ;;  %v11587_v6 = vld [vmem:[%s14534_s26 + $0x10c] sm:$0x1]  ;;  %v20096_v38 = vld [vmem:[#allocation52_spill] sm:$0xff]  ;;  %v20097_v59 = vld [vmem:[#allocation53_spill] sm:$0xff] }
 0x1c5   : > { %13378 = vmatprep.mubr.msk.bf16.mxu0 %vm1746_vm2, %v20091_v61  ;;  %v5600_v12 = vsel %vm14570_vm3, %v5595_v44, %v5599_v21  ;;  %v5613_v22 = vrot.slane %v5611_v8, 5  ;;  %v5623_v34 = vrot.slane %v5622_v60, 4  ;;  %v5639_v40 = vshll.u32 %v11583_v37, 16  ;;  %v20098_v27 = vld [vmem:[#allocation54_spill] sm:$0xff]  ;;  %v20099_v48 = vld [vmem:[#allocation55_spill] sm:$0xff]  ;;  %v20100_v0 = vld [vmem:[#allocation57_spill] sm:$0xff] }
 0x1c6   : > { %v5627_v52 = vrot.slane %v5625_v53, 5  ;;  %v5637_v49 = vrot.slane %v5636_v20, 4  ;;  %v5650_v26 = vor.u32 %v20097_v59, %v20096_v38  ;;  %v5653_v61 = vshll.u32 %v11584_v50, 16  ;;  %v20102_v50 = vld [vmem:[#allocation77_spill] sm:$0xff]  ;;  %v20105_v59 = vld [vmem:[#allocation60_spill] sm:$0xff] }
 0x1c7   : > { %v5614_v13 = vsel %vm14570_vm3, %v5609_v57, %v5613_v22  ;;  %v5664_v45 = vor.u32 %v20099_v48, %v20098_v27  ;;  %v5667_v44 = vshll.u32 %v11585_v35, 16  ;;  %v5641_v60 = vrot.slane %v5639_v40, 5  ;;  %v20101_v57 = vld [vmem:[#allocation58_spill] sm:$0xff]  ;;  %v20103_v22 = vld [vmem:[#allocation81_spill] sm:$0xff]  ;;  %v20108_v27 = vld [vmem:[#allocation87_spill] sm:$0xff] }
 0x1c8   : > { %v16837_v21 = vcombine.low %v5600_v12, %v5614_v13  ;;  %v5628_v8 = vsel %vm14570_vm3, %v5623_v34, %v5627_v52  ;;  %v5651_v37 = vrot.slane %v5650_v26, 4  ;;  %v5655_v11 = vrot.slane %v5653_v61, 5  ;;  %v20106_v34 = vld [vmem:[#allocation62_spill] sm:$0xff]  ;;  %v11588_v26 = vld [vmem:[%s14534_s26 + $0x118] sm:$0x1] }
 0x1c9   : > { %v5665_v53 = vrot.slane %v5664_v45, 4  ;;  %v5669_v33 = vrot.slane %v5667_v44, 5  ;;  %v5678_v20 = vor.u32 %v20101_v57, %v20100_v0  ;;  %v20104_v38 = vcombine.low %v20102_v50, %v20103_v22  ;;  %v11589_v13 = vld [vmem:[%s14534_s26 + $0x124] sm:$0x1]  ;;  %v20107_v61 = vld [vmem:[#allocation85_spill] sm:$0xff]  ;;  %v20110_v22 = vld [vmem:[#allocation63_spill] sm:$0xff] }
 0x1ca   : > { %v5642_v35 = vsel %vm14570_vm3, %v5637_v49, %v5641_v60  ;;  %v5681_v12 = vshll.u32 %v11586_v10, 16  ;;  %v5692_v52 = vor.u32 %v20106_v34, %v20105_v59  ;;  %v5695_v40 = vshll.u32 %v11587_v6, 16  ;;  %v11590_v60 = vld [vmem:[%s14534_s26 + $0x130] sm:$0x1] }
 0x1cb   : > { %v20109_v48 = vcombine.low %v20107_v61, %v20108_v27  ;;  %v16857_v45 = vcombine.low %v5628_v8, %v5642_v35  ;;  %v5656_v44 = vsel %vm14570_vm3, %v5651_v37, %v5655_v11  ;;  %v5670_v10 = vsel %vm14570_vm3, %v5665_v53, %v5669_v33  ;;  %v20112_v61 = vld [vmem:[#allocation67_spill] sm:$0xff]  ;;  %v20113_v8 = vld [vmem:[#allocation69_spill] sm:$0xff]  ;;  %v477_v37 = vld [vmem:[%s14534_s26 + $0x1b4] sm:$0x1] }
 0x1cc   : > { %13379 = vmatmul.mubr.msk.bf16.gmra.mrb[20].mxu0 %vm1746_vm2, %v20104_v38  ;;  %v5679_v49 = vrot.slane %v5678_v20, 4  ;;  %v16864_v6 = vcombine.low %v5656_v44, %v5670_v10  ;;  %v5683_v0 = vrot.slane %v5681_v12, 5  ;;  %v5693_v57 = vrot.slane %v5692_v52, 4  ;;  %v20111_v38 = vld [vmem:[#allocation65_spill] sm:$0xff]  ;;  %v20114_v33 = vld [vmem:[#allocation71_spill] sm:$0xff]  ;;  %v20115_v20 = vld [vmem:[#allocation74_spill] sm:$0xff] }
 0x1cd   : > { %13382 = vmatprep.mubr.msk.bf16.mxu0 %vm1746_vm2, %v20109_v48  ;;  %v5697_v50 = vrot.slane %v5695_v40, 5  ;;  %v5706_v59 = vor.u32 %v20111_v38, %v20110_v22  ;;  %v5709_v34 = vshll.u32 %v11588_v26, 16  ;;  %v5720_v35 = vor.u32 %v20113_v8, %v20112_v61  ;;  %v11591_v48 = vld [vmem:[%s14534_s26 + $0x13c] sm:$0x1]  ;;  %v20116_v61 = vld [vmem:[#allocation75_spill] sm:$0xff] }
 0x1ce   : > { %v5723_v27 = vshll.u32 %v11589_v13, 16  ;;  %v5684_v11 = vsel %vm14570_vm3, %v5679_v49, %v5683_v0  ;;  %v5734_v12 = vor.u32 %v20115_v20, %v20114_v33  ;;  %v5737_v52 = vshll.u32 %v11590_v60, 16  ;;  %v20117_v8 = vld [vmem:[#allocation79_spill] sm:$0xff] }
 0x1cf   : > { %v5698_v53 = vsel %vm14570_vm3, %v5693_v57, %v5697_v50  ;;  %v5707_v26 = vrot.slane %v5706_v59, 4  ;;  %v5711_v44 = vrot.slane %v5709_v34, 5  ;;  %v5721_v10 = vrot.slane %v5720_v35, 4  ;;  %v478_v57 = vld [vmem:[%s14534_s26 + $0x1c0] sm:$0x1]  ;;  %v20119_v59 = vld [vmem:[#allocation99_spill] sm:$0xff] }
 0x1d0   : > { %v16878_v40 = vcombine.low %v5684_v11, %v5698_v53  ;;  %v5725_v13 = vrot.slane %v5723_v27, 5  ;;  %v5735_v22 = vrot.slane %v5734_v12, 4  ;;  %v5739_v38 = vrot.slane %v5737_v52, 5  ;;  %v14273_v50 = vld [vmem:[%s14534_s26 + $0x1b0] sm:$0xf] }
 0x1d1   : > { %v5748_v63 = vor.u32 %v20117_v8, %v20116_v61  ;;  %v5712_v49 = vsel %vm14570_vm3, %v5707_v26, %v5711_v44  ;;  %v5751_v0 = vshll.u32 %v11591_v48, 16  ;;  %v1443_v60 = vshrl.u32 %v14273_v50, 16  ;;  %v20118_v53 = vld [vmem:[#allocation96_spill] sm:$0xff]  ;;  %v11592_v48 = vld [vmem:[%s14534_s26 + $0x1c0] sm:$0x1] }
 0x1d2   : > { %v1446_v11 = vshll.u32 %v14273_v50, 16  ;;  %v20120_v34 = vcombine.low %v20118_v53, %v20119_v59  ;;  %v5726_v35 = vsel %vm14570_vm3, %v5721_v10, %v5725_v13  ;;  %v5740_v27 = vsel %vm14570_vm3, %v5735_v22, %v5739_v38  ;;  %v20121_v12 = vld [vmem:[#allocation100_spill] sm:$0xff]  ;;  %v14274_v13 = vld [vmem:[%s14534_s26 + $0x1bc] sm:$0xf]  ;;  %v11593_v59 = vld [vmem:[%s14534_s26 + $0x1cc] sm:$0x1] }
 0x1d3   : > { %v5749_v33 = vrot.slane %v5748_v63, 4  ;;  %v1452_v20 = vshll.u32 %v477_v37, 16  ;;  %v20122_v52 = vld [vmem:[#allocation104_spill] sm:$0xff]  ;;  %v16899_v44 = vcombine.low %v5712_v49, %v5726_v35  ;;  %v5753_v61 = vrot.slane %v5751_v0, 5  ;;  %v479_v35 = vld [vmem:[%s14534_s26 + $0x1cc] sm:$0x1] }
 0x1d4   : > { %13383 = vmatmul.mubr.msk.bf16.gmra.mrb[24].mxu0 %vm1746_vm2, %v20120_v34  ;;  %v20123_v26 = vcombine.low %v20121_v12, %v20122_v52  ;;  %v1445_v8 = vrot.slane %v1443_v60, 4  ;;  %v1448_v50 = vrot.slane %v1446_v11, 5  ;;  %v1457_v22 = vshrl.u32 %v14274_v13, 16  ;;  %v20124_v34 = vld [vmem:[#allocation80_spill] sm:$0xff]  ;;  %v20125_v12 = vld [vmem:[#allocation82_spill] sm:$0xff] }
 0x1d5   : > { %v1454_v10 = vrot.slane %v1452_v20, 5  ;;  %v1460_v38 = vshll.u32 %v14274_v13, 16  ;;  %v1466_v63 = vshll.u32 %v478_v57, 16  ;;  %v5754_v37 = vsel %vm14570_vm3, %v5749_v33, %v5753_v61  ;;  %v20128_v33 = vld [vmem:[#allocation84_spill] sm:$0xff] }
 0x1d6   : > { %13386 = vmatprep.mubr.msk.bf16.mxu0 %vm1746_vm2, %v20123_v26  ;;  %v1449_v53 = vor.u32 %v1448_v50, %v1445_v8  ;;  %v5762_v52 = vor.u32 %v20125_v12, %v20124_v34  ;;  %v5765_v49 = vshll.u32 %v11592_v48, 16  ;;  %v16908_v0 = vcombine.low %v5740_v27, %v5754_v37  ;;  %v480_v26 = vld [vmem:[%s14534_s26 + $0x1d8] sm:$0x1]  ;;  %v20129_v48 = vld [vmem:[#allocation8_spill] sm:$0xff]  ;;  %v20132_v12 = vld [vmem:[#allocation11_spill] sm:$0xff] }
 0x1d7   : > { %v1459_v60 = vrot.slane %v1457_v22, 4  ;;  %v1462_v11 = vrot.slane %v1460_v38, 5  ;;  %v1468_v20 = vrot.slane %v1466_v63, 5  ;;  %v5776_v61 = vor.u32 %v20128_v33, %v20127_v5  ;;  %v20130_v34 = vld [vmem:[#allocation9_spill] sm:$0xff]  ;;  %v20134_v5 = vld [vmem:[#allocation114_spill] sm:$0xff] }
 0x1d8   : > { %20126 = vst [vmem:[#allocation41_spill] sm:$0xff] %v16908_v0  ;;  %v1450_v13 = vrot.slane %v1449_v53, 4  ;;  %v5763_v57 = vrot.slane %v5762_v52, 4  ;;  %v5767_v14 = vrot.slane %v5765_v49, 5  ;;  %v5779_v50 = vshll.u32 %v11593_v59, 16  ;;  %v20131_v53 = vld [vmem:[#allocation10_spill] sm:$0xff] }
 0x1d9   : > { %v1463_v8 = vor.u32 %v1462_v11, %v1459_v60  ;;  %v1477_v27 = vor.u32 %v20130_v34, %v20129_v48  ;;  %v1480_v37 = vshll.u32 %v479_v35, 16  ;;  %v5777_v63 = vrot.slane %v5776_v61, 4  ;;  %v11595_v49 = vld [vmem:[%s14534_s26 + $0x1e4] sm:$0x1]  ;;  %v20138_v34 = vld [vmem:[#allocation88_spill] sm:$0xff] }
 0x1da   : > { %v1455_v22 = vsel %vm14570_vm3, %v1450_v13, %v1454_v10  ;;  %v5768_v38 = vsel %vm14570_vm3, %v5763_v57, %v5767_v14  ;;  %v1491_v52 = vor.u32 %v20132_v12, %v20131_v53  ;;  %v20135_v33 = vcombine.low %v20133_v62, %v20134_v5  ;;  %v481_v48 = vld [vmem:[%s14534_s26 + $0x1e4] sm:$0x1]  ;;  %v482_v10 = vld [vmem:[%s14534_s26 + $0x1f0] sm:$0x1]  ;;  %v20136_v13 = vld [vmem:[#allocation123_spill] sm:$0xff] }
 0x1db   : > { %v1464_v59 = vrot.slane %v1463_v8, 4  ;;  %v5781_v60 = vrot.slane %v5779_v50, 5  ;;  %v1478_v11 = vrot.slane %v1477_v27, 4  ;;  %v1482_v35 = vrot.slane %v1480_v37, 5  ;;  %v20137_v61 = vld [vmem:[#allocation86_spill] sm:$0xff]  ;;  %v20140_v37 = vld [vmem:[#allocation7_spill] sm:$0xff] }
 0x1dc   : > { %13387 = vmatmul.mubr.msk.bf16.gmra.mrb[28].mxu0 %vm1746_vm2, %v20135_v33  ;;  %v1492_v14 = vrot.slane %v1491_v52, 4  ;;  %v1494_v57 = vshll.u32 %v480_v26, 16  ;;  %v5790_v53 = vor.u32 %v20138_v34, %v20137_v61  ;;  %v5793_v12 = vshll.u32 %v11594_v7, 16  ;;  %v20139_v27 = vld [vmem:[#allocation6_spill] sm:$0xff]  ;;  %v11597_v7 = vld [vmem:[%s14534_s26 + $0x1fc] sm:$0x1] }
 0x1dd   : > { %13398 = vmatprep.mubr.msk.bf16.mxu0 %vm1746_vm2, %v20136_v13  ;;  %v1469_v62 = vsel %vm14570_vm3, %v1464_v59, %v1468_v20  ;;  %v5782_v8 = vsel %vm14570_vm3, %v5777_v63, %v5781_v60  ;;  %v1483_v50 = vsel %vm14570_vm3, %v1478_v11, %v1482_v35  ;;  %v5804_v5 = vor.u32 %v20140_v37, %v20139_v27  ;;  %v13946_v20 = vld [vmem:[%s19644_s1 + $0x108] sm:$0xff]   ;;  %v20142_v11 = vld [vmem:[#allocation12_spill] sm:$0xff]  ;;  %v20143_v35 = vld [vmem:[#allocation13_spill] sm:$0xff] }
 0x1de   : > { %v11616_v33 = vcombine.low %v1455_v22, %v1469_v62  ;;  %v16941_v13 = vcombine.low %v5768_v38, %v5782_v8  ;;  %v1496_v26 = vrot.slane %v1494_v57, 5  ;;  %v5791_v52 = vrot.slane %v5790_v53, 4  ;;  %v20144_v57 = vld [vmem:[#allocation14_spill] sm:$0xff]  ;;  %v20145_v34 = vld [vmem:[#allocation15_spill] sm:$0xff]  ;;  %v483_v37 = vld [vmem:[%s14534_s26 + $0x1fc] sm:$0x1] }
 0x1df   : > { %v5795_v63 = vrot.slane %v5793_v12, 5  ;;  %v5805_v59 = vrot.slane %v5804_v5, 4  ;;  %v5807_v60 = vshll.u32 %v11595_v49, 16  ;;  %v1505_v61 = vor.u32 %v20143_v35, %v20142_v11  ;;  %v484_v5 = vld [vmem:[%s14534_s26 + $0x208] sm:$0x1]  ;;  %v20199_v32 = vld [vmem:[#allocation41_spill] sm:$0xff] }
 0x1e0   : > { %20141 = vst [vmem:[#allocation42_spill] sm:$0xff] %v16941_v13  ;;  %13134 = vmatprep.mubr.msk.bf16.mxu1 %vm1746_vm2, %v11616_v33  ;;  %v1497_v22 = vsel %vm14570_vm3, %v1492_v14, %v1496_v26  ;;  %v1508_v38 = vshll.u32 %v481_v48, 16  ;;  %v1519_v53 = vor.u32 %v20145_v34, %v20144_v57  ;;  %v1522_v62 = vshll.u32 %v482_v10, 16  ;;  %v20146_v33 = vld [vmem:[#allocation93_spill] sm:$0xff]  ;;  %v20147_v13 = vld [vmem:[#allocation94_spill] sm:$0xff]  ;;  %v20148_v48 = vld [vmem:[#allocation124_spill] sm:$0xff] }
 0x1e1   : > { %v11617_v8 = vcombine.low %v1483_v50, %v1497_v22  ;;  %v5796_v12 = vsel %vm14570_vm3, %v5791_v52, %v5795_v63  ;;  %v5809_v27 = vrot.slane %v5807_v60, 5  ;;  %v1506_v49 = vrot.slane %v1505_v61, 4  ;;  %v11598_v14 = vld [vmem:[%s14534_s26 + $0x208] sm:$0x1]  ;;  %v20150_v52 = vld [vmem:[#allocation97_spill] sm:$0xff] }
 0x1e2   : > { %v1510_v11 = vrot.slane %v1508_v38, 5  ;;  %v1520_v35 = vrot.slane %v1519_v53, 4  ;;  %v1524_v25 = vrot.slane %v1522_v62, 5  ;;  %v5818_v0 = vor.u32 %v20147_v13, %v20146_v33  ;;  %v20149_v26 = vld [vmem:[#allocation95_spill] sm:$0xff]  ;;  %v11599_v34 = vld [vmem:[%s14534_s26 + $0x214] sm:$0x1] }
 0x1e3   : > { %13135 = vmatmul.mubr.msk.bf16.vlgmr.msra.gmra.mrb[0].mxu1 %vm1746_vm2, %v11617_v8  ;;  %v5810_v10 = vsel %vm14570_vm3, %v5805_v59, %v5809_v27  ;;  %v5821_v50 = vshll.u32 %v11596_v3, 16  ;;  %v5832_v63 = vor.u32 %v20150_v52, %v20149_v26  ;;  %v5835_v60 = vshll.u32 %v11597_v7, 16  ;;  %v13947_v3 = vld [vmem:[%s19644_s1 + $0x110] sm:$0xff]   ;;  %v20152_v62 = vld [vmem:[#allocation17_spill] sm:$0xff]  ;;  %v20153_v27 = vld [vmem:[#allocation18_spill] sm:$0xff] }
 0x1e4   : > { %13399 = vmatmul.mubr.msk.bf16.vlgmr.msra.gmra.mrb[0].mxu0 %vm1746_vm2, %v20148_v48  ;;  %v16972_v13 = vcombine.low %v5796_v12, %v5810_v10  ;;  %v1511_v61 = vsel %vm14570_vm3, %v1506_v49, %v1510_v11  ;;  %v1525_v59 = vsel %vm14570_vm3, %v1520_v35, %v1524_v25  ;;  %v5819_v22 = vrot.slane %v5818_v0, 4  ;;  %v20151_v53 = vld [vmem:[#allocation16_spill] sm:$0xff]  ;;  %v20154_v25 = vld [vmem:[#allocation23_spill] sm:$0xff]  ;;  %v20155_v33 = vld [vmem:[#allocation98_spill] sm:$0xff] }
 0x1e5   : > { %13431 = vmatpush3.bf16.msra.mxu0 %v16659_v41  ;;  %13402 = vmatprep.mubr.msk.bf16.mxu0 %vm1746_vm2, %v16566_v16  ;;  %v11618_v7 = vcombine.low %v1511_v61, %v1525_v59  ;;  %v5823_v38 = vrot.slane %v5821_v50, 5  ;;  %v5833_v41 = vrot.slane %v5832_v63, 4  ;;  %v5837_v57 = vrot.slane %v5835_v60, 5  ;;  %v485_v16 = vld [vmem:[%s14534_s26 + $0x28c] sm:$0x1]  ;;  %v20156_v48 = vld [vmem:[#allocation101_spill] sm:$0xff] }
 0x1e6   : > { %13432 = vmatprep.subr.bf16.mxu0 %v13946_v20  ;;  %v1533_v8 = vor.u32 %v20152_v62, %v20151_v53  ;;  %v1536_v12 = vshll.u32 %v483_v37, 16  ;;  %v1547_v0 = vor.u32 %v20154_v25, %v20153_v27  ;;  %v1550_v49 = vshll.u32 %v484_v5, 16  ;;  %v486_v5 = vld [vmem:[%s14534_s26 + $0x298] sm:$0x1]  ;;  %v20159_v62 = vld [vmem:[#allocation24_spill] sm:$0xff] }
 0x1e7   : > { %13138 = vmatprep.mubr.msk.bf16.mxu1 %vm1746_vm2, %v11618_v7  ;;  %v5824_v11 = vsel %vm14570_vm3, %v5819_v22, %v5823_v38  ;;  %v5838_v35 = vsel %vm14570_vm3, %v5833_v41, %v5837_v57  ;;  %v5846_v10 = vor.u32 %v20156_v48, %v20155_v33  ;;  %v5849_v50 = vshll.u32 %v11598_v14, 16  ;;  %v11600_v60 = vld [vmem:[%s14534_s26 + $0x298] sm:$0x1]  ;;  %v20157_v38 = vld [vmem:[#allocation102_spill] sm:$0xff]  ;;  %v20158_v41 = vld [vmem:[#allocation103_spill] sm:$0xff] }
 0x1e8   : > { %v16994_v26 = vcombine.low %v5824_v11, %v5838_v35  ;;  %v1534_v37 = vrot.slane %v1533_v8, 4  ;;  %v1538_v52 = vrot.slane %v1536_v12, 5  ;;  %v1548_v63 = vrot.slane %v1547_v0, 4  ;;  %v13948_v61 = vld [vmem:[%s19644_s1 + $0x118] sm:$0xff]   ;;  %v20161_v11 = vld [vmem:[#allocation26_spill] sm:$0xff]  ;;  %v20162_v35 = vld [vmem:[#allocation27_spill] sm:$0xff] }
 0x1e9   : > { %13433 = vmatpush3.bf16.msra.mxu0 %v13946_v20  ;;  %v1552_v59 = vrot.slane %v1550_v49, 5  ;;  %v5847_v22 = vrot.slane %v5846_v10, 4  ;;  %v5851_v7 = vrot.slane %v5849_v50, 5  ;;  %v5860_v14 = vor.u32 %v20158_v41, %v20157_v38  ;;  %v11601_v20 = vld [vmem:[%s14534_s26 + $0x2a4] sm:$0x1]  ;;  %v20160_v8 = vld [vmem:[#allocation25_spill] sm:$0xff] }
 0x1ea   : > { %13434 = vmatprep.subr.bf16.mxu0 %v13947_v3  ;;  %v1539_v57 = vsel %vm14570_vm3, %v1534_v37, %v1538_v52  ;;  %v5863_v53 = vshll.u32 %v11599_v34, 16  ;;  %v1561_v12 = vor.u32 %v20160_v8, %v20159_v62  ;;  %v1564_v27 = vshll.u32 %v485_v16, 16  ;;  %v487_v48 = vld [vmem:[%s14534_s26 + $0x2a4] sm:$0x1]  ;;  %v20163_v10 = vld [vmem:[#allocation125_spill] sm:$0xff] }
 0x1eb   : > { %v1553_v25 = vsel %vm14570_vm3, %v1548_v63, %v1552_v59  ;;  %v5852_v0 = vsel %vm14570_vm3, %v5847_v22, %v5851_v7  ;;  %v5861_v49 = vrot.slane %v5860_v14, 4  ;;  %v1575_v33 = vor.u32 %v20162_v35, %v20161_v11  ;;  %v20164_v59 = vld [vmem:[#allocation105_spill] sm:$0xff]  ;;  %v20165_v22 = vld [vmem:[#allocation106_spill] sm:$0xff]  ;;  %v20166_v14 = vld [vmem:[#allocation107_spill] sm:$0xff] }
 0x1ec   : > { %13403 = vmatmul.mubr.msk.bf16.gmra.mrb[4].mxu0 %vm1746_vm2, %v16574_v4  ;;  %v11619_v34 = vcombine.low %v1539_v57, %v1553_v25  ;;  %v5865_v16 = vrot.slane %v5863_v53, 5  ;;  %v1562_v50 = vrot.slane %v1561_v12, 4  ;;  %v1566_v37 = vrot.slane %v1564_v27, 5  ;;  %v488_v4 = vld [vmem:[%s14534_s26 + $0x2b0] sm:$0x1] }
 0x1ed   : > { %13406 = vmatprep.mubr.msk.bf16.mxu0 %vm1746_vm2, %v20163_v10  ;;  %13435 = vmatpush3.bf16.msra.mxu0 %v13947_v3  ;;  %v1576_v52 = vrot.slane %v1575_v33, 4  ;;  %v1578_v63 = vshll.u32 %v486_v5, 16  ;;  %v5874_v7 = vor.u32 %v20165_v22, %v20164_v59  ;;  %v5877_v38 = vshll.u32 %v11600_v60, 16  ;;  %v20167_v57 = vld [vmem:[#allocation108_spill] sm:$0xff]  ;;  %v11603_v60 = vld [vmem:[%s14534_s26 + $0x2bc] sm:$0x1] }
 0x1ee   : > { %13436 = vmatprep.subr.bf16.mxu0 %v13948_v61  ;;  %13139 = vmatmul.mubr.msk.bf16.gmra.mrb[4].mxu1 %vm1746_vm2, %v11619_v34  ;;  %v5866_v3 = vsel %vm14570_vm3, %v5861_v49, %v5865_v16  ;;  %v1567_v41 = vsel %vm14570_vm3, %v1562_v50, %v1566_v37  ;;  %v5888_v53 = vor.u32 %v20167_v57, %v20166_v14  ;;  %v5891_v62 = vshll.u32 %v11601_v20, 16  ;;  %v11602_v25 = vld [vmem:[%s14534_s26 + $0x2b0] sm:$0x1]  ;;  %v20169_v49 = vld [vmem:[#allocation29_spill] sm:$0xff]  ;;  %v20170_v50 = vld [vmem:[#allocation30_spill] sm:$0xff] }
 0x1ef   : > { %v17029_v8 = vcombine.low %v5852_v0, %v5866_v3  ;;  %v1580_v5 = vrot.slane %v1578_v63, 5  ;;  %v5875_v12 = vrot.slane %v5874_v7, 4  ;;  %v5879_v27 = vrot.slane %v5877_v38, 5  ;;  %v20168_v33 = vld [vmem:[#allocation28_spill] sm:$0xff]  ;;  %v489_v16 = vld [vmem:[%s14534_s26 + $0x2bc] sm:$0x1] }
 0x1f0   : > { %v5889_v11 = vrot.slane %v5888_v53, 4  ;;  %v5893_v35 = vrot.slane %v5891_v62, 5  ;;  %v1589_v10 = vor.u32 %v20169_v49, %v20168_v33  ;;  %v1592_v34 = vshll.u32 %v487_v48, 16  ;;  %v20171_v37 = vld [vmem:[#allocation31_spill] sm:$0xff]  ;;  %v20172_v57 = vld [vmem:[#allocation109_spill] sm:$0xff]  ;;  %v20173_v53 = vld [vmem:[#allocation110_spill] sm:$0xff] }
 0x1f1   : > { %13437 = vmatpush3.bf16.msra.mxu0 %v13948_v61  ;;  %v1581_v20 = vsel %vm14570_vm3, %v1576_v52, %v1580_v5  ;;  %v5880_v0 = vsel %vm14570_vm3, %v5875_v12, %v5879_v27  ;;  %v1603_v63 = vor.u32 %v20171_v37, %v20170_v50  ;;  %v1606_v59 = vshll.u32 %v488_v4, 16  ;;  %v490_v3 = vld [vmem:[%s14534_s26 + $0x2c8] sm:$0x1]  ;;  %v20176_v49 = vld [vmem:[#allocation32_spill] sm:$0xff] }
 0x1f2   : > { %v11620_v22 = vcombine.low %v1567_v41, %v1581_v20  ;;  %v5894_v61 = vsel %vm14570_vm3, %v5889_v11, %v5893_v35  ;;  %v1590_v7 = vrot.slane %v1589_v10, 4  ;;  %v1594_v38 = vrot.slane %v1592_v34, 5  ;;  %v11604_v5 = vld [vmem:[%s14534_s26 + $0x2c8] sm:$0x1]  ;;  %v20177_v10 = vld [vmem:[#allocation33_spill] sm:$0xff] }
 0x1f3   : > { %v17047_v48 = vcombine.low %v5880_v0, %v5894_v61  ;;  %v1604_v52 = vrot.slane %v1603_v63, 4  ;;  %v1608_v14 = vrot.slane %v1606_v59, 5  ;;  %v5902_v62 = vor.u32 %v20173_v53, %v20172_v57  ;;  %v20174_v12 = vld [vmem:[#allocation111_spill] sm:$0xff] }
 0x1f4   : > { %13407 = vmatmul.mubr.msk.bf16.gmra.mrb[8].mxu0 %vm1746_vm2, %v16673_v9  ;;  %13142 = vmatprep.mubr.msk.bf16.mxu1 %vm1746_vm2, %v11620_v22  ;;  %v1595_v4 = vsel %vm14570_vm3, %v1590_v7, %v1594_v38  ;;  %v5905_v41 = vshll.u32 %v11602_v25, 16  ;;  %v20175_v9 = vld [vmem:[#allocation112_spill] sm:$0xff]  ;;  %v5919_v11 = vshll.u32 %v11603_v60, 16  ;;  %v1617_v34 = vor.u32 %v20177_v10, %v20176_v49  ;;  %v20178_v25 = vld [vmem:[#allocation35_spill] sm:$0xff]  ;;  %v492_v10 = vld [vmem:[%s14534_s26 + $0x2e0] sm:$0x1] }
 0x1f5   : > { %13410 = vmatprep.mubr.msk.bf16.mxu0 %vm1746_vm2, %v16675_v36  ;;  %v5916_v27 = vor.u32 %v20175_v9, %v20174_v12  ;;  %v1609_v35 = vsel %vm14570_vm3, %v1604_v52, %v1608_v14  ;;  %v5903_v33 = vrot.slane %v5902_v62, 4  ;;  %v1620_v36 = vshll.u32 %v489_v16, 16  ;;  %v20179_v22 = vld [vmem:[#allocation36_spill] sm:$0xff]  ;;  %v20180_v52 = vld [vmem:[#allocation115_spill] sm:$0xff] }
 0x1f6   : > { %v11621_v20 = vcombine.low %v1595_v4, %v1609_v35  ;;  %v5907_v0 = vrot.slane %v5905_v41, 5  ;;  %v5921_v37 = vrot.slane %v5919_v11, 5  ;;  %v1618_v63 = vrot.slane %v1617_v34, 4  ;;  %v11605_v60 = vld [vmem:[%s14534_s26 + $0x2d4] sm:$0x1]  ;;  %v20182_v11 = vld [vmem:[#allocation117_spill] sm:$0xff] }
 0x1f7   : > { %v5917_v50 = vrot.slane %v5916_v27, 4  ;;  %v1622_v59 = vrot.slane %v1620_v36, 5  ;;  %v1631_v61 = vor.u32 %v20179_v22, %v20178_v25  ;;  %v1634_v7 = vshll.u32 %v490_v3, 16  ;;  %v20181_v14 = vld [vmem:[#allocation116_spill] sm:$0xff]  ;;  %v20183_v35 = vld [vmem:[#allocation118_spill] sm:$0xff]  ;;  %v20184_v34 = vld [vmem:[#allocation37_spill] sm:$0xff] }
 0x1f8   : > { %13143 = vmatmul.mubr.msk.bf16.gmra.mrb[8].mxu1 %vm1746_vm2, %v11621_v20  ;;  %v5908_v38 = vsel %vm14570_vm3, %v5903_v33, %v5907_v0  ;;  %v5930_v57 = vor.u32 %v20181_v14, %v20180_v52  ;;  %v5933_v53 = vshll.u32 %v11604_v5, 16  ;;  %v491_v62 = vld [vmem:[%s14534_s26 + $0x2d4] sm:$0x1]  ;;  %v5944_v33 = vor.u32 %v20183_v35, %v20182_v11  ;;  %v20185_v36 = vld [vmem:[#allocation38_spill] sm:$0xff] }
 0x1f9   : > { %v5922_v16 = vsel %vm14570_vm3, %v5917_v50, %v5921_v37  ;;  %v1623_v3 = vsel %vm14570_vm3, %v1618_v63, %v1622_v59  ;;  %v1632_v41 = vrot.slane %v1631_v61, 4  ;;  %v1636_v12 = vrot.slane %v1634_v7, 5  ;;  %v20186_v50 = vld [vmem:[#allocation39_spill] sm:$0xff]  ;;  %v20187_v37 = vld [vmem:[#allocation40_spill] sm:$0xff]  ;;  %v11606_v59 = vld [vmem:[%s14534_s26 + $0x2e0] sm:$0x1] }
 0x1fa   : > { %v17074_v4 = vcombine.low %v5908_v38, %v5922_v16  ;;  %v5931_v9 = vrot.slane %v5930_v57, 4  ;;  %v5935_v27 = vrot.slane %v5933_v53, 5  ;;  %v5947_v49 = vshll.u32 %v11605_v60, 16  ;;  %v11607_v7 = vld [vmem:[%s14534_s26 + $0x2ec] sm:$0x1]  ;;  %v20189_v53 = vld [vmem:[#allocation120_spill] sm:$0xff] }
 0x1fb   : > { %v1637_v5 = vsel %vm14570_vm3, %v1632_v41, %v1636_v12  ;;  %v1645_v20 = vor.u32 %v20185_v36, %v20184_v34  ;;  %v1648_v0 = vshll.u32 %v491_v62, 16  ;;  %v1659_v63 = vor.u32 %v20187_v37, %v20186_v50  ;;  %v20188_v57 = vld [vmem:[#allocation119_spill] sm:$0xff]  ;;  %v20191_v41 = vld [vmem:[#allocation122_spill] sm:$0xff] }
 0x1fc   : > { %13411 = vmatmul.mubr.msk.bf16.gmra.mrb[12].mxu0 %vm1746_vm2, %v16720_v17  ;;  %v11622_v25 = vcombine.low %v1623_v3, %v1637_v5  ;;  %v5936_v22 = vsel %vm14570_vm3, %v5931_v9, %v5935_v27  ;;  %v5945_v17 = vrot.slane %v5944_v33, 4  ;;  %v5949_v61 = vrot.slane %v5947_v49, 5  ;;  %v20190_v3 = vld [vmem:[#allocation121_spill] sm:$0xff]  ;;  %v11567_v9 = vld [vmem:[%s14534_s26 + $0x2c0] sm:$0x1] }
 0x1fd   : > { %13414 = vmatprep.mubr.msk.bf16.mxu0 %vm1746_vm2, %v16722_v56  ;;  %v1646_v60 = vrot.slane %v1645_v20, 4  ;;  %v1650_v38 = vrot.slane %v1648_v0, 5  ;;  %v1660_v16 = vrot.slane %v1659_v63, 4  ;;  %v1662_v52 = vshll.u32 %v492_v10, 16  ;;  %v11572_v5 = vld [vmem:[%s14534_s26 + $0x2e0] sm:$0xf] }
 0x1fe   : > { %13146 = vmatprep.mubr.msk.bf16.mxu1 %vm1746_vm2, %v11622_v25  ;;  %v5950_v14 = vsel %vm14570_vm3, %v5945_v17, %v5949_v61  ;;  %v5958_v56 = vor.u32 %v20189_v53, %v20188_v57  ;;  %v5961_v62 = vshll.u32 %v11606_v59, 16  ;;  %v5972_v12 = vor.u32 %v20191_v41, %v20190_v3  ;;  %v11574_v59 = vld [vmem:[%s14534_s26 + $0x2ec] sm:$0xf] }
 0x1ff   : > { %v17103_v27 = vcombine.low %v5936_v22, %v5950_v14  ;;  %v1651_v11 = vsel %vm14570_vm3, %v1646_v60, %v1650_v38  ;;  %v1664_v35 = vrot.slane %v1662_v52, 5  ;;  %v5975_v33 = vshll.u32 %v11607_v7, 16  ;;  %v11569_v61 = vld [vmem:[%s14534_s26 + $0x2cc] sm:$0x1]  ;;  %v11571_v7 = vld [vmem:[%s14534_s26 + $0x2d8] sm:$0x1] }
 0x200   : > { %v20192_v49 = vshll.u32 %v16744_v46, 16  ;;  %v5959_v34 = vrot.slane %v5958_v56, 4  ;;  %v5963_v36 = vrot.slane %v5961_v62, 5  ;;  %v5973_v20 = vrot.slane %v5972_v12, 4 }
 0x201   : > { %v20193_v0 = vshrl.u32 %v16755_v54, 16  ;;  %v20194_v37 = vshll.u32 %v16755_v54, 16  ;;  %v1665_v25 = vsel %vm14570_vm3, %v1660_v16, %v1664_v35  ;;  %v5977_v22 = vrot.slane %v5975_v33, 5 }
 0x202   : > { %v5160_v10 = vrot.slane %v20192_v49, 5  ;;  %v5133_v17 = vor.u32 %v16763_v31, %v16752_v42  ;;  %v5150_v46 = vshll.u32 %v11567_v9, 16  ;;  %v11623_v60 = vcombine.low %v1651_v11, %v1665_v25 }
 0x203   : > { %v5171_v50 = vrot.slane %v20193_v0, 4  ;;  %v5174_v63 = vrot.slane %v20194_v37, 5  ;;  %v5964_v38 = vsel %vm14570_vm3, %v5959_v34, %v5963_v36  ;;  %v5125_v54 = vsel %vm14570_vm3, %v16770_v28, %v16750_v24 }
 0x204   : > { %13415 = vmatmul.mubr.msk.bf16.gmra.mrb[16].mxu0 %vm1746_vm2, %v16725_v15  ;;  %v5147_v16 = vor.u32 %v16774_v30, %v16765_v51  ;;  %v5183_v52 = vshrl.u32 %v11572_v5, 16  ;;  %v5978_v42 = vsel %vm14570_vm3, %v5973_v20, %v5977_v22  ;;  %v5186_v31 = vshll.u32 %v11572_v5, 16  ;;  %13147 = vmatmul.mubr.msk.bf16.gmra.mrb[12].mxu1 %vm1746_vm2, %v11623_v60 }
 0x205   : > { %13418 = vmatprep.mubr.msk.bf16.mxu0 %vm1746_vm2, %v16729_v43  ;;  %v5197_v14 = vshrl.u32 %v11574_v59, 16  ;;  %v5200_v57 = vshll.u32 %v11574_v59, 16  ;;  %v11911_v15 = vcombine.low %v5964_v38, %v5978_v42  ;;  %v5161_v53 = vor.u32 %v5160_v10, %v16800_v39  ;;  %v13959_v38 = vld [vmem:[%s19647_s4 + $0x68] sm:$0xff]   ;;  %v13963_v42 = vld [vmem:[%s19647_s4 + $0x78] sm:$0xff]  }
 0x206   : > { %v5164_v24 = vshll.u32 %v11569_v61, 16  ;;  %v5175_v28 = vor.u32 %v5174_v63, %v5171_v50  ;;  %v5178_v56 = vshll.u32 %v11571_v7, 16  ;;  %v20195_v51 = vsel %vm14570_vm3, %v16738_v55, %v16727_v1  ;;  %v11573_v1 = vld [vmem:[%s14534_s26 + $0x2e4] sm:$0x1] }
 0x207   : > { %v20196_v43 = vsel %vm14570_vm3, %v16711_v58, %v16707_v23  ;;  %v20197_v62 = vshll.u32 %v16718_v47, 16  ;;  %v20198_v39 = vsel %vm14570_vm3, %v16740_v18, %v16735_v2  ;;  %v5134_v12 = vrot.slane %v5133_v17, 4  ;;  %v11575_v47 = vld [vmem:[%s14534_s26 + $0x2f0] sm:$0x1]  ;;  %s14347_s26 = scalar_lea.vmem %s19595_s27, 4096 }
 0x208   : > { %v11871_v30 = vcombine.low %v20196_v43, %v20195_v51  ;;  %v11872_v41 = vcombine.low %v20198_v39, %v5125_v54  ;;  %v5148_v9 = vrot.slane %v5147_v16, 4  ;;  %v5152_v11 = vrot.slane %v5150_v46, 5  ;;  %v13960_v54 = vld [vmem:[%s19647_s4 + $0x28] sm:$0xff]   ;;  %v13961_v16 = vld [vmem:[%s19647_s4 + $0x70] sm:$0xff]   ;;  %p14348_p11 = scmp.ne.s32.totalorder %s19595_s27, %s14347_s26  ;;  %p14355_p1 = scmp.lt.s32.totalorder %s14353_s20, %s14347_s26 }
 0x209   : > { %v5138_v3 = vrot.slane %v20197_v62, 5  ;;  %v5185_v55 = vrot.slane %v5183_v52, 4  ;;  %v5188_v35 = vrot.slane %v5186_v31, 5  ;;  %v5199_v33 = vrot.slane %v5197_v14, 4  ;;  %v13962_v52 = vld [vmem:[%s19647_s4 + $0x30] sm:$0xff]   ;;  %v13964_v31 = vld [vmem:[%s19647_s4 + $0x38] sm:$0xff]  }
 0x20a   : > { %v5202_v49 = vrot.slane %v5200_v57, 5  ;;  %v5162_v23 = vrot.slane %v5161_v53, 4  ;;  %v5166_v58 = vrot.slane %v5164_v24, 5  ;;  %v5176_v10 = vrot.slane %v5175_v28, 4  ;;  %v13969_v24 = vld [vmem:[%s19647_s4 + $0xc0] sm:$0xff]   ;;  %p14349_p12 = pnand %p14348_p11, %p14508_p5  ;;  %p14356_p2 = por %p14355_p1, %p14354_p0 }
 0x20b   : > { %v5180_v5 = vrot.slane %v5178_v56, 5  ;;  %v5139_v34 = vsel %vm14570_vm3, %v5134_v12, %v5138_v3  ;;  %v5192_v2 = vshll.u32 %v11573_v1, 16  ;;  %v5153_v18 = vsel %vm14570_vm3, %v5148_v9, %v5152_v11 }
 0x20c   : > { %13419 = vmatmul.mubr.msk.bf16.gmra.mrb[20].mxu0 %vm1746_vm2, %v11871_v30  ;;  %v5189_v36 = vor.u32 %v5188_v35, %v5185_v55  ;;  %v5203_v20 = vor.u32 %v5202_v49, %v5199_v33  ;;  %v5206_v0 = vshll.u32 %v11575_v47, 16  ;;  %v5167_v50 = vsel %vm14570_vm3, %v5162_v23, %v5166_v58  ;;  %v17375_v33 = vld [vmem:[%s19645_s2] ss:$0 sm:$0xff]  ;;  %p14350_p13 = pneg %p14349_p12 }
 0x20d   : > { %13422 = vmatprep.mubr.msk.bf16.mxu0 %vm1746_vm2, %v11872_v41  ;;  %v5181_v37 = vsel %vm14570_vm3, %v5176_v10, %v5180_v5  ;;  %v11873_v63 = vcombine.low %v5139_v34, %v5153_v18  ;;  %v5194_v59 = vrot.slane %v5192_v2, 5  ;;  %v17380_v23 = vld [vmem:[%s19646_s3] ss:$0 sm:$0xff] }
 0x20e   : > { %v11874_v25 = vcombine.low %v5167_v50, %v5181_v37  ;;  %v5190_v22 = vrot.slane %v5189_v36, 4  ;;  %v5204_v17 = vrot.slane %v5203_v20, 4  ;;  %v5208_v46 = vrot.slane %v5206_v0, 5  ;;  %p14357_p3 = pnand %p14356_p2, %p14350_p13 }
 0x210   : > { %v5195_v61 = vsel %vm14570_vm3, %v5190_v22, %v5194_v59  ;;  %v5209_v7 = vsel %vm14570_vm3, %v5204_v17, %v5208_v46 }
 0x211   : > { %v11875_v60 = vcombine.low %v5195_v61, %v5209_v7 }
 0x214   : > { %13423 = vmatmul.mubr.msk.bf16.gmra.mrb[24].mxu0 %vm1746_vm2, %v11873_v63 }
 0x215   : > { %13426 = vmatprep.mubr.msk.bf16.mxu0 %vm1746_vm2, %v11874_v25 }
 0x21c   : > { %13427 = vmatmul.mubr.msk.bf16.gmra.mrb[28].mxu0 %vm1746_vm2, %v11875_v60 }
 0x21d   : > { %13438 = vmatprep.mubr.msk.bf16.mxu0 %vm1746_vm2, %v16796_v29  ;;  %v20200_v29 = vld [vmem:[#allocation42_spill] sm:$0xff] }
 0x224   : > { %13439 = vmatmul.mubr.msk.bf16.vlgmr.msra.gmra.mrb[0].mxu0 %vm1746_vm2, %v16825_v19  ;;  %v20201_v19 = vld [vmem:[#allocation56_spill] sm:$0xff] }
 0x225   : > { %13442 = vmatprep.mubr.msk.bf16.mxu0 %vm1746_vm2, %v16837_v21  ;;  %v13949_v21 = vld [vmem:[%s19647_s4 + $0x40] sm:$0xff]  }
 0x226   : > { %12618 = vmatprep.subr.bf16.mxu1 %v13949_v21 }
 0x22c   : > { %13443 = vmatmul.mubr.msk.bf16.gmra.mrb[4].mxu0 %vm1746_vm2, %v16857_v45  ;;  %v13950_v45 = vld [vmem:[%s19647_s4] sm:$0xff]  }
 0x22d   : > { %13446 = vmatprep.mubr.msk.bf16.mxu0 %vm1746_vm2, %v16864_v6  ;;  %12619 = vmatpush3.bf16.msra.mxu1 %v13950_v45  ;;  %v14411_v6 = vmov 0  }
 0x22e   : > { %6448 = vst [vmem:[#allocation2 + $0x18] sm:$0xf] %v14411_v6  ;;  %6449 = vst [vmem:[#allocation2 + $0x1c] sm:$0x1] %v14411_v6 }
 0x22f   : > { %6442 = vst [vmem:[#allocation2] sm:$0xf] %v14411_v6  ;;  %6443 = vst [vmem:[#allocation2 + $0x4] sm:$0x1] %v14411_v6 }
 0x230   : > { %6444 = vst [vmem:[#allocation2 + $0x8] sm:$0xf] %v14411_v6  ;;  %6445 = vst [vmem:[#allocation2 + $0xc] sm:$0x1] %v14411_v6 }
 0x231   : > { %6446 = vst [vmem:[#allocation2 + $0x10] sm:$0xf] %v14411_v6  ;;  %6447 = vst [vmem:[#allocation2 + $0x14] sm:$0x1] %v14411_v6 }
 0x232   : > { %6450 = vst [vmem:[#allocation2 + $0x20] sm:$0xf] %v14411_v6  ;;  %6451 = vst [vmem:[#allocation2 + $0x24] sm:$0x1] %v14411_v6 }
 0x233   : > { %6452 = vst [vmem:[#allocation2 + $0x28] sm:$0xf] %v14411_v6  ;;  %6453 = vst [vmem:[#allocation2 + $0x2c] sm:$0x1] %v14411_v6 }
 0x234   : > { %13447 = vmatmul.mubr.msk.bf16.gmra.mrb[8].mxu0 %vm1746_vm2, %v16878_v40  ;;  %6454 = vst [vmem:[#allocation2 + $0x30] sm:$0xf] %v14411_v6  ;;  %6455 = vst [vmem:[#allocation2 + $0x34] sm:$0x1] %v14411_v6  ;;  %v13951_v40 = vld [vmem:[%s19647_s4 + $0x48] sm:$0xff]  }
 0x235   : > { %13450 = vmatprep.mubr.msk.bf16.mxu0 %vm1746_vm2, %v16899_v44  ;;  %6456 = vst [vmem:[#allocation2 + $0x38] sm:$0xf] %v14411_v6  ;;  %6457 = vst [vmem:[#allocation2 + $0x3c] sm:$0x1] %v14411_v6  ;;  %12620 = vmatprep.subr.bf16.mxu1 %v13951_v40  ;;  %v13952_v44 = vld [vmem:[%s19647_s4 + $0x8] sm:$0xff]  }
 0x236   : > { %6458 = vst [vmem:[#allocation2 + $0x40] sm:$0xf] %v14411_v6  ;;  %6459 = vst [vmem:[#allocation2 + $0x44] sm:$0x1] %v14411_v6  ;;  %12621 = vmatpush3.bf16.msra.mxu1 %v13952_v44  ;;  %v17369_v1 = vld [vmem:[#allocation2] sm:$0xf] }
 0x237   : > { %6460 = vst [vmem:[#allocation2 + $0x48] sm:$0xf] %v14411_v6  ;;  %6461 = vst [vmem:[#allocation2 + $0x4c] sm:$0x1] %v14411_v6  ;;  %v7169_v55 = vld [vmem:[#allocation2 + $0x4] sm:$0x1] }
 0x238   : > { %6462 = vst [vmem:[#allocation2 + $0x50] sm:$0xf] %v14411_v6  ;;  %6463 = vst [vmem:[#allocation2 + $0x54] sm:$0x1] %v14411_v6  ;;  %v11966_v35 = vcombine.low %v17369_v1, %v7169_v55 }
 0x239   : > { %6464 = vst [vmem:[#allocation2 + $0x58] sm:$0xf] %v14411_v6  ;;  %6465 = vst [vmem:[#allocation2 + $0x5c] sm:$0x1] %v14411_v6 }
 0x23a   : > { %6466 = vst [vmem:[#allocation2 + $0x60] sm:$0xf] %v14411_v6  ;;  %6467 = vst [vmem:[#allocation2 + $0x64] sm:$0x1] %v14411_v6  ;;  %v7589_v58 = vshll.u32 %v11966_v35, 16  ;;  %v7587_v50 = vshrl.u32 %v11966_v35, 16 }
 0x23b   : > { %6468 = vst [vmem:[#allocation2 + $0x68] sm:$0xf] %v14411_v6  ;;  %6469 = vst [vmem:[#allocation2 + $0x6c] sm:$0x1] %v14411_v6 }
 0x23c   : > { %13451 = vmatmul.mubr.msk.bf16.gmra.mrb[12].mxu0 %vm1746_vm2, %v20199_v32  ;;  %6470 = vst [vmem:[#allocation2 + $0x70] sm:$0xf] %v14411_v6  ;;  %6471 = vst [vmem:[#allocation2 + $0x74] sm:$0x1] %v14411_v6  ;;  %v7591_v59 = vrot.slane %v7589_v58, 1 }
 0x23d   : > { %13454 = vmatprep.mubr.msk.bf16.mxu0 %vm1746_vm2, %v20200_v29  ;;  %6472 = vst [vmem:[#allocation2 + $0x78] sm:$0xf] %v14411_v6  ;;  %6473 = vst [vmem:[#allocation2 + $0x7c] sm:$0x1] %v14411_v6 }
 0x23e   : > { %6474 = vst [vmem:[#allocation2 + $0x80] sm:$0xf] %v14411_v6  ;;  %6475 = vst [vmem:[#allocation2 + $0x84] sm:$0x1] %v14411_v6  ;;  %v17392_v21 = vor.u32 %v7591_v59, %v7587_v50  ;;  %v6966_v59 = vld [vmem:[#allocation2 + $0x24] sm:$0x1] }
 0x23f   : > { %6476 = vst [vmem:[#allocation2 + $0x88] sm:$0xf] %v14411_v6  ;;  %6477 = vst [vmem:[#allocation2 + $0x8c] sm:$0x1] %v14411_v6  ;;  %v7145_v47 = vld [vmem:[#allocation2 + $0x50] sm:$0xf] }
 0x240   : > { %6478 = vst [vmem:[#allocation2 + $0x90] sm:$0xf] %v14411_v6  ;;  %6479 = vst [vmem:[#allocation2 + $0x94] sm:$0x1] %v14411_v6  ;;  %v7177_v34 = vld [vmem:[#allocation2 + $0x54] sm:$0x1] }
 0x241   : > { %6480 = vst [vmem:[#allocation2 + $0x98] sm:$0xf] %v14411_v6  ;;  %6481 = vst [vmem:[#allocation2 + $0x9c] sm:$0x1] %v14411_v6  ;;  %v17388_v25 = vcombine.low %v7145_v47, %v7177_v34 }
 0x242   : > { %6482 = vst [vmem:[#allocation2 + $0xa0] sm:$0xf] %v14411_v6  ;;  %6483 = vst [vmem:[#allocation2 + $0xa4] sm:$0x1] %v14411_v6 }
 0x243   : > { %6484 = vst [vmem:[#allocation2 + $0xa8] sm:$0xf] %v14411_v6  ;;  %6485 = vst [vmem:[#allocation2 + $0xac] sm:$0x1] %v14411_v6  ;;  %v7645_v45 = vshll.u32 %v17388_v25, 16 }
 0x244   : > { %13455 = vmatmul.mubr.msk.bf16.gmra.mrb[16].mxu0 %vm1746_vm2, %v16972_v13  ;;  %6486 = vst [vmem:[#allocation2 + $0xb0] sm:$0xf] %v14411_v6  ;;  %6487 = vst [vmem:[#allocation2 + $0xb4] sm:$0x1] %v14411_v6  ;;  %v13953_v13 = vld [vmem:[%s19647_s4 + $0x50] sm:$0xff]  }
 0x245   : > { %13458 = vmatprep.mubr.msk.bf16.mxu0 %vm1746_vm2, %v16994_v26  ;;  %6488 = vst [vmem:[#allocation2 + $0xb8] sm:$0xf] %v14411_v6  ;;  %6489 = vst [vmem:[#allocation2 + $0xbc] sm:$0x1] %v14411_v6  ;;  %v13954_v26 = vld [vmem:[%s19647_s4 + $0x10] sm:$0xff]   ;;  %12622 = vmatprep.subr.bf16.mxu1 %v13953_v13 }
 0x246   : > { %6490 = vst [vmem:[#allocation2 + $0xc0] sm:$0xf] %v14411_v6  ;;  %6491 = vst [vmem:[#allocation2 + $0xc4] sm:$0x1] %v14411_v6  ;;  %12623 = vmatpush3.bf16.msra.mxu1 %v13954_v26 }
 0x247   : > { %6492 = vst [vmem:[#allocation2 + $0xc8] sm:$0xf] %v14411_v6  ;;  %6493 = vst [vmem:[#allocation2 + $0xcc] sm:$0x1] %v14411_v6 }
 0x248   : > { %6494 = vst [vmem:[#allocation2 + $0xd0] sm:$0xf] %v14411_v6  ;;  %6495 = vst [vmem:[#allocation2 + $0xd4] sm:$0x1] %v14411_v6 }
 0x249   : > { %6496 = vst [vmem:[#allocation2 + $0xd8] sm:$0xf] %v14411_v6  ;;  %6497 = vst [vmem:[#allocation2 + $0xdc] sm:$0x1] %v14411_v6 }
 0x24a   : > { %6498 = vst [vmem:[#allocation2 + $0xe0] sm:$0xf] %v14411_v6  ;;  %6499 = vst [vmem:[#allocation2 + $0xe4] sm:$0x1] %v14411_v6 }
 0x24b   : > { %6500 = vst [vmem:[#allocation2 + $0xe8] sm:$0xf] %v14411_v6  ;;  %6501 = vst [vmem:[#allocation2 + $0xec] sm:$0x1] %v14411_v6 }
 0x24c   : > { %13459 = vmatmul.mubr.msk.bf16.gmra.mrb[20].mxu0 %vm1746_vm2, %v17029_v8  ;;  %6502 = vst [vmem:[#allocation2 + $0xf0] sm:$0xf] %v14411_v6  ;;  %6503 = vst [vmem:[#allocation2 + $0xf4] sm:$0x1] %v14411_v6  ;;  %v13955_v8 = vld [vmem:[%s19647_s4 + $0x58] sm:$0xff]  }
 0x24d   : > { %13462 = vmatprep.mubr.msk.bf16.mxu0 %vm1746_vm2, %v17047_v48  ;;  %6504 = vst [vmem:[#allocation2 + $0xf8] sm:$0xf] %v14411_v6  ;;  %6505 = vst [vmem:[#allocation2 + $0xfc] sm:$0x1] %v14411_v6  ;;  %v13956_v48 = vld [vmem:[%s19647_s4 + $0x18] sm:$0xff]   ;;  %12624 = vmatprep.subr.bf16.mxu1 %v13955_v8 }
 0x24e   : > { %6506 = vst [vmem:[#allocation2 + $0x100] sm:$0xf] %v14411_v6  ;;  %6507 = vst [vmem:[#allocation2 + $0x104] sm:$0x1] %v14411_v6  ;;  %12625 = vmatpush3.bf16.msra.mxu1 %v13956_v48  ;;  %v6957_v8 = vld [vmem:[#allocation2 + $0x18] sm:$0xf] }
 0x24f   : > { %6508 = vst [vmem:[#allocation2 + $0x108] sm:$0xf] %v14411_v6  ;;  %6509 = vst [vmem:[#allocation2 + $0x10c] sm:$0x1] %v14411_v6  ;;  %v6960_v48 = vld [vmem:[#allocation2 + $0x1c] sm:$0x1] }
 0x250   : > { %6510 = vst [vmem:[#allocation2 + $0x110] sm:$0xf] %v14411_v6  ;;  %6511 = vst [vmem:[#allocation2 + $0x114] sm:$0x1] %v14411_v6 }
 0x251   : > { %6512 = vst [vmem:[#allocation2 + $0x118] sm:$0xf] %v14411_v6  ;;  %6513 = vst [vmem:[#allocation2 + $0x11c] sm:$0x1] %v14411_v6 }
 0x252   : > { %6514 = vst [vmem:[#allocation2 + $0x120] sm:$0xf] %v14411_v6  ;;  %6515 = vst [vmem:[#allocation2 + $0x124] sm:$0x1] %v14411_v6 }
 0x253   : > { %6516 = vst [vmem:[#allocation2 + $0x128] sm:$0xf] %v14411_v6  ;;  %6517 = vst [vmem:[#allocation2 + $0x12c] sm:$0x1] %v14411_v6 }
 0x254   : > { %13463 = vmatmul.mubr.msk.bf16.gmra.mrb[24].mxu0 %vm1746_vm2, %v17074_v4  ;;  %6518 = vst [vmem:[#allocation2 + $0x130] sm:$0xf] %v14411_v6  ;;  %6519 = vst [vmem:[#allocation2 + $0x134] sm:$0x1] %v14411_v6  ;;  %v13957_v4 = vld [vmem:[%s19647_s4 + $0x60] sm:$0xff]  }
 0x255   : > { %13466 = vmatprep.mubr.msk.bf16.mxu0 %vm1746_vm2, %v17103_v27  ;;  %6520 = vst [vmem:[#allocation2 + $0x138] sm:$0xf] %v14411_v6  ;;  %6521 = vst [vmem:[#allocation2 + $0x13c] sm:$0x1] %v14411_v6  ;;  %v13958_v27 = vld [vmem:[%s19647_s4 + $0x20] sm:$0xff]   ;;  %12626 = vmatprep.subr.bf16.mxu1 %v13957_v4 }
 0x256   : > { %12627 = vmatpush3.bf16.msra.mxu1 %v13958_v27 }
 0x257   : > { %12628 = vmatprep.subr.bf16.mxu1 %v13959_v38 }
 0x25a   : > { %12629 = vmatpush3.bf16.msra.mxu1 %v13960_v54 }
 0x25b   : > { %12630 = vmatprep.subr.bf16.mxu1 %v13961_v16 }
 0x25c   : > { %13467 = vmatmul.mubr.msk.bf16.gmra.mrb[28].mxu0 %vm1746_vm2, %v11911_v15 }
 0x25d   : > { %13526 = vmatprep.mubr.msk.bf16.mxu0 %vm1746_vm2, %v20201_v19 }
 0x25e   : > { %12631 = vmatpush3.bf16.msra.mxu1 %v13962_v52 }
 0x25f   : > { %12632 = vmatprep.subr.bf16.mxu1 %v13963_v42 }
 0x262   : > { %12633 = vmatpush3.bf16.msra.mxu1 %v13964_v31  ;;  %v6942_v31 = vld [vmem:[#allocation2 + $0x8] sm:$0xf] }
 0x263   : > { %12730 = vmatprep.subr.bf16.mxu1 %v13969_v24 }
 0x2b6   : > { %v17334_v14 = vpop.f32.mrb[0].mxu1 }
 0x2b7   : > { %v17336_v57 = vpop.f32.mrb[1].mxu1 }
 0x2b8   : > { %v17338_v15 = vpop.f32.mrb[2].mxu1 }
 0x2b9   : > { %v17340_v53 = vpop.f32.mrb[3].mxu1 }
 0x2c1   : > { %v17345_v28 = vpop.f32.mrb[4].mxu1 }
 0x2c2   : > { %v17347_v56 = vpop.f32.mrb[5].mxu1 }
 0x2c3   : > { %v17349_v51 = vpop.f32.mrb[6].mxu1 }
 0x2c4   : > { %v17351_v43 = vpop.f32.mrb[7].mxu1 }
 0x2cb   : > { %v17353_v30 = vpop.f32.mrb[8].mxu1 }
 0x2cc   : > { %v17355_v62 = vpop.f32.mrb[9].mxu1 }
 0x2cd   : > { %v17357_v3 = vpop.f32.mrb[10].mxu1 }
 0x2ce   : > { %v17359_v39 = vpop.f32.mrb[11].mxu1 }
 0x2d7   : > { %v17361_v41 = vpop.f32.mrb[12].mxu1 }
 0x2d8   : > { %v17363_v12 = vpop.f32.mrb[13].mxu1 }
 0x2d9   : > { %v17365_v9 = vpop.f32.mrb[14].mxu1 }
 0x2da   : > { %v17367_v11 = vpop.f32.mrb[15].mxu1 }
 0x2f7   : > { %v13440_v49 = vpop.f32.mrb[0].mxu0 }
 0x2f8   : > { %v6341_v10 = vmul.f32 %v13440_v49, %v17375_v33  ;;  %v6141_v5 = vpop.f32.mrb[1].mxu0 }
 0x2f9   : > { %v6339_v2 = vmul.f32 %v17375_v33, %v6141_v5  ;;  %v13441_v18 = vpop.f32.mrb[2].mxu0  ;;  %v6948_v5 = vld [vmem:[#allocation2 + $0xc] sm:$0x1] }
 0x2fa   : > { %v6380_v36 = vadd.f32 %v17380_v23, %v6341_v10  ;;  %v6342_v20 = vmul.f32 %v13441_v18, %v17375_v33  ;;  %v6144_v0 = vpop.f32.mrb[3].mxu0 }
 0x2fb   : > { %v6378_v37 = vadd.f32 %v17380_v23, %v6339_v2  ;;  %v6340_v63 = vmul.f32 %v17375_v33, %v6144_v0  ;;  %v6963_v0 = vld [vmem:[#allocation2 + $0x20] sm:$0xf] }
 0x2fc   : > { %v6412_v22 = vmax.f32 %v6380_v36, 0.0  ;;  %v6381_v17 = vadd.f32 %v17380_v23, %v6342_v20 }
 0x2fd   : > { %v6410_v46 = vmax.f32 %v6378_v37, 0.0  ;;  %v6379_v61 = vadd.f32 %v17380_v23, %v6340_v63 }
 0x2fe   : > { %v12406_v7 = vpack.c.bf16 %v6412_v22, %v6412_v22  ;;  %v6413_v60 = vmax.f32 %v6381_v17, 0.0 }
 0x2ff   : > { %v12404_v32 = vpack.c.bf16 %v6410_v46, %v6410_v46  ;;  %v6411_v29 = vmax.f32 %v6379_v61, 0.0  ;;  %v13444_v19 = vpop.f32.mrb[4].mxu0 }
 0x300   : > { %v6635_v6 = vshrl.u32 %v12406_v7, 16  ;;  %v6638_v40 = vshll.u32 %v12406_v7, 16  ;;  %v12407_v44 = vpack.c.bf16 %v6413_v60, %v6413_v60  ;;  %v6345_v13 = vmul.f32 %v13444_v19, %v17375_v33  ;;  %v6157_v26 = vpop.f32.mrb[5].mxu0 }
 0x301   : > { %v6619_v4 = vshrl.u32 %v12404_v32, 16  ;;  %v6622_v27 = vshll.u32 %v12404_v32, 16  ;;  %v12405_v38 = vpack.c.bf16 %v6411_v29, %v6411_v29  ;;  %v6343_v54 = vmul.f32 %v17375_v33, %v6157_v26  ;;  %v13445_v16 = vpop.f32.mrb[6].mxu0  ;;  %v6951_v32 = vld [vmem:[#allocation2 + $0x10] sm:$0xf] }
 0x302   : > { %v6637_v52 = vrot.slane %v6635_v6, 7  ;;  %v6643_v24 = vshrl.u32 %v12407_v44, 16  ;;  %v6646_v55 = vshll.u32 %v12407_v44, 16  ;;  %v6384_v35 = vadd.f32 %v17380_v23, %v6345_v13  ;;  %v6160_v49 = vpop.f32.mrb[7].mxu0  ;;  %v6954_v29 = vld [vmem:[#allocation2 + $0x14] sm:$0x1] }
 0x303   : > { %v6621_v10 = vrot.slane %v6619_v4, 7  ;;  %v6627_v47 = vshrl.u32 %v12405_v38, 16  ;;  %v6630_v34 = vshll.u32 %v12405_v38, 16  ;;  %v6382_v2 = vadd.f32 %v17380_v23, %v6343_v54 }
 0x304   : > { %v6640_v18 = vor.u32 %v6638_v40, %v6637_v52  ;;  %v6641_v36 = vrot.slane %v6637_v52, 4  ;;  %v6645_v20 = vrot.slane %v6643_v24, 7  ;;  %v6416_v50 = vmax.f32 %v6384_v35, 0.0 }
 0x305   : > { %v6624_v37 = vor.u32 %v6622_v27, %v6621_v10  ;;  %v6625_v63 = vrot.slane %v6621_v10, 4  ;;  %v6629_v22 = vrot.slane %v6627_v47, 7  ;;  %v6414_v17 = vmax.f32 %v6382_v2, 0.0 }
 0x306   : > { %v6958_v46 = vsel %vm17399_vm8, %v6640_v18, %v6957_v8  ;;  %v6961_v61 = vsel %vm17406_vm9, %v6641_v36, %v6960_v48  ;;  %v6648_v7 = vor.u32 %v6646_v55, %v6645_v20  ;;  %v6649_v60 = vrot.slane %v6645_v20, 4 }
 0x307   : > { %6959 = vst [vmem:[#allocation2 + $0x18] sm:$0xf] %v6958_v46  ;;  %6962 = vst [vmem:[#allocation2 + $0x1c] sm:$0x1] %v6961_v61  ;;  %v6943_v19 = vsel %vm17399_vm8, %v6624_v37, %v6942_v31  ;;  %v6949_v6 = vsel %vm17406_vm9, %v6625_v63, %v6948_v5  ;;  %v6632_v40 = vor.u32 %v6630_v34, %v6629_v22  ;;  %v6633_v44 = vrot.slane %v6629_v22, 4  ;;  %v13448_v13 = vpop.f32.mrb[8].mxu0 }
 0x308   : > { %6944 = vst [vmem:[#allocation2 + $0x8] sm:$0xf] %v6943_v19  ;;  %6950 = vst [vmem:[#allocation2 + $0xc] sm:$0x1] %v6949_v6  ;;  %v6964_v26 = vsel %vm17399_vm8, %v6648_v7, %v6963_v0  ;;  %v6967_v8 = vsel %vm17406_vm9, %v6649_v60, %v6966_v59  ;;  %v12410_v48 = vpack.c.bf16 %v6416_v50, %v6416_v50  ;;  %v6173_v27 = vpop.f32.mrb[9].mxu0 }
 0x309   : > { %v12408_v4 = vpack.c.bf16 %v6414_v17, %v6414_v17  ;;  %6965 = vst [vmem:[#allocation2 + $0x20] sm:$0xf] %v6964_v26  ;;  %6968 = vst [vmem:[#allocation2 + $0x24] sm:$0x1] %v6967_v8  ;;  %v6952_v38 = vsel %vm17399_vm8, %v6632_v40, %v6951_v32  ;;  %v6955_v54 = vsel %vm17406_vm9, %v6633_v44, %v6954_v29  ;;  %v13449_v24 = vpop.f32.mrb[10].mxu0 }
 0x30a   : > { %v6346_v52 = vmul.f32 %v13445_v16, %v17375_v33  ;;  %v6344_v31 = vmul.f32 %v17375_v33, %v6160_v49  ;;  %6953 = vst [vmem:[#allocation2 + $0x10] sm:$0xf] %v6952_v38  ;;  %6956 = vst [vmem:[#allocation2 + $0x14] sm:$0x1] %v6955_v54  ;;  %v6667_v55 = vshrl.u32 %v12410_v48, 16  ;;  %v6670_v35 = vshll.u32 %v12410_v48, 16 }
 0x30b   : > { %v6651_v10 = vshrl.u32 %v12408_v4, 16  ;;  %v6654_v5 = vshll.u32 %v12408_v4, 16  ;;  %v6176_v47 = vpop.f32.mrb[11].mxu0  ;;  %v6349_v18 = vmul.f32 %v13448_v13, %v17375_v33  ;;  %v6347_v36 = vmul.f32 %v17375_v33, %v6173_v27  ;;  %v6981_v16 = vld [vmem:[#allocation2 + $0x38] sm:$0xf] }
 0x30c   : > { %v6385_v34 = vadd.f32 %v17380_v23, %v6346_v52  ;;  %v6383_v2 = vadd.f32 %v17380_v23, %v6344_v31  ;;  %v6669_v20 = vrot.slane %v6667_v55, 7  ;;  %v6984_v0 = vld [vmem:[#allocation2 + $0x3c] sm:$0x1]  ;;  %v6350_v50 = vmul.f32 %v13449_v24, %v17375_v33  ;;  %v6969_v63 = vld [vmem:[#allocation2 + $0x28] sm:$0xf] }
 0x30d   : > { %v6653_v49 = vrot.slane %v6651_v10, 7  ;;  %v6348_v37 = vmul.f32 %v17375_v33, %v6176_v47  ;;  %v6972_v59 = vld [vmem:[#allocation2 + $0x2c] sm:$0x1]  ;;  %v6388_v46 = vadd.f32 %v17380_v23, %v6349_v18  ;;  %v6386_v61 = vadd.f32 %v17380_v23, %v6347_v36  ;;  %v6987_v55 = vld [vmem:[#allocation2 + $0x40] sm:$0xf] }
 0x30e   : > { %v6417_v22 = vmax.f32 %v6385_v34, 0.0  ;;  %v6415_v17 = vmax.f32 %v6383_v2, 0.0  ;;  %v6672_v7 = vor.u32 %v6670_v35, %v6669_v20  ;;  %v6673_v60 = vrot.slane %v6669_v20, 4  ;;  %v6990_v18 = vld [vmem:[#allocation2 + $0x44] sm:$0x1] }
 0x30f   : > { %v6656_v32 = vor.u32 %v6654_v5, %v6653_v49  ;;  %v6657_v29 = vrot.slane %v6653_v49, 4  ;;  %v6420_v40 = vmax.f32 %v6388_v46, 0.0  ;;  %v6418_v44 = vmax.f32 %v6386_v61, 0.0  ;;  %v13452_v13 = vpop.f32.mrb[12].mxu0  ;;  %v6975_v20 = vld [vmem:[#allocation2 + $0x30] sm:$0xf] }
 0x310   : > { %v12411_v19 = vpack.c.bf16 %v6417_v22, %v6417_v22  ;;  %v12409_v6 = vpack.c.bf16 %v6415_v17, %v6415_v17  ;;  %v6982_v26 = vsel %vm17399_vm8, %v6672_v7, %v6981_v16  ;;  %v6985_v8 = vsel %vm17406_vm9, %v6673_v60, %v6984_v0  ;;  %v6189_v27 = vpop.f32.mrb[13].mxu0  ;;  %v6978_v49 = vld [vmem:[#allocation2 + $0x34] sm:$0x1]  ;;  %v7005_v60 = vld [vmem:[#allocation2 + $0x68] sm:$0xf] }
 0x311   : > { %v6970_v48 = vsel %vm17399_vm8, %v6656_v32, %v6969_v63  ;;  %v6973_v4 = vsel %vm17406_vm9, %v6657_v29, %v6972_v59  ;;  %6983 = vst [vmem:[#allocation2 + $0x38] sm:$0xf] %v6982_v26  ;;  %6986 = vst [vmem:[#allocation2 + $0x3c] sm:$0x1] %v6985_v8  ;;  %v17445_v24 = vpop.f32.mrb[14].mxu0  ;;  %v12414_v35 = vpack.c.bf16 %v6420_v40, %v6420_v40 }
 0x312   : > { %6971 = vst [vmem:[#allocation2 + $0x28] sm:$0xf] %v6970_v48  ;;  %6974 = vst [vmem:[#allocation2 + $0x2c] sm:$0x1] %v6973_v4  ;;  %v6675_v38 = vshrl.u32 %v12411_v19, 16  ;;  %v6678_v54 = vshll.u32 %v12411_v19, 16  ;;  %v12412_v10 = vpack.c.bf16 %v6418_v44, %v6418_v44  ;;  %v6389_v5 = vadd.f32 %v17380_v23, %v6350_v50 }
 0x313   : > { %v6659_v52 = vshrl.u32 %v12409_v6, 16  ;;  %v6662_v31 = vshll.u32 %v12409_v6, 16  ;;  %v6387_v47 = vadd.f32 %v17380_v23, %v6348_v37  ;;  %v6192_v34 = vpop.f32.mrb[15].mxu0  ;;  %v6353_v16 = vmul.f32 %v13452_v13, %v17375_v33  ;;  %v7008_v32 = vld [vmem:[#allocation2 + $0x6c] sm:$0x1] }
 0x314   : > { %v6677_v2 = vrot.slane %v6675_v38, 7  ;;  %v6351_v0 = vmul.f32 %v17375_v33, %v6189_v27  ;;  %v6699_v63 = vshrl.u32 %v12414_v35, 16  ;;  %v6702_v59 = vshll.u32 %v12414_v35, 16  ;;  %v6993_v8 = vld [vmem:[#allocation2 + $0x58] sm:$0xf] }
 0x315   : > { %v6661_v36 = vrot.slane %v6659_v52, 7  ;;  %v6683_v22 = vshrl.u32 %v12412_v10, 16  ;;  %v6686_v17 = vshll.u32 %v12412_v10, 16  ;;  %v6421_v19 = vmax.f32 %v6389_v5, 0.0  ;;  %v6996_v48 = vld [vmem:[#allocation2 + $0x5c] sm:$0x1] }
 0x316   : > { %v6680_v46 = vor.u32 %v6678_v54, %v6677_v2  ;;  %v6681_v61 = vrot.slane %v6677_v2, 4  ;;  %v6701_v37 = vrot.slane %v6699_v63, 7  ;;  %v6419_v6 = vmax.f32 %v6387_v47, 0.0 }
 0x317   : > { %v6664_v7 = vor.u32 %v6662_v31, %v6661_v36  ;;  %v6665_v50 = vrot.slane %v6661_v36, 4  ;;  %v6685_v29 = vrot.slane %v6683_v22, 7  ;;  %v13456_v4 = vpop.f32.mrb[16].mxu0  ;;  %v6392_v10 = vadd.f32 %v17380_v23, %v6353_v16 }
 0x318   : > { %v6988_v40 = vsel %vm17399_vm8, %v6680_v46, %v6987_v55  ;;  %v6991_v44 = vsel %vm17406_vm9, %v6681_v61, %v6990_v18  ;;  %v6704_v27 = vor.u32 %v6702_v59, %v6701_v37  ;;  %v6705_v38 = vrot.slane %v6701_v37, 4  ;;  %v6205_v31 = vpop.f32.mrb[17].mxu0 }
 0x319   : > { %v6976_v13 = vsel %vm17399_vm8, %v6664_v7, %v6975_v20  ;;  %v6979_v26 = vsel %vm17406_vm9, %v6665_v50, %v6978_v49  ;;  %6989 = vst [vmem:[#allocation2 + $0x40] sm:$0xf] %v6988_v40  ;;  %6992 = vst [vmem:[#allocation2 + $0x44] sm:$0x1] %v6991_v44  ;;  %v6688_v54 = vor.u32 %v6686_v17, %v6685_v29  ;;  %v6689_v52 = vrot.slane %v6685_v29, 4  ;;  %v13457_v47 = vpop.f32.mrb[18].mxu0 }
 0x31a   : > { %6977 = vst [vmem:[#allocation2 + $0x30] sm:$0xf] %v6976_v13  ;;  %6980 = vst [vmem:[#allocation2 + $0x34] sm:$0x1] %v6979_v26  ;;  %v12415_v55 = vpack.c.bf16 %v6421_v19, %v6421_v19  ;;  %v12413_v35 = vpack.c.bf16 %v6419_v6, %v6419_v6  ;;  %v6390_v5 = vadd.f32 %v17380_v23, %v6351_v0  ;;  %v6208_v49 = vpop.f32.mrb[19].mxu0  ;;  %v6424_v22 = vmax.f32 %v6392_v10, 0.0 }
 0x31b   : > { %v7006_v2 = vsel %vm17399_vm8, %v6704_v27, %v7005_v60  ;;  %v7009_v18 = vsel %vm17406_vm9, %v6705_v38, %v7008_v32  ;;  %v6994_v36 = vsel %vm17399_vm8, %v6688_v54, %v6993_v8  ;;  %v6997_v20 = vsel %vm17406_vm9, %v6689_v52, %v6996_v48  ;;  %v7011_v50 = vld [vmem:[#allocation2 + $0x70] sm:$0xf]  ;;  %v7014_v29 = vld [vmem:[#allocation2 + $0x74] sm:$0x1]  ;;  %v6999_v19 = vld [vmem:[#allocation2 + $0x60] sm:$0xf] }
 0x31c   : > { %7007 = vst [vmem:[#allocation2 + $0x68] sm:$0xf] %v7006_v2  ;;  %7010 = vst [vmem:[#allocation2 + $0x6c] sm:$0x1] %v7009_v18  ;;  %v6707_v16 = vshrl.u32 %v12415_v55, 16  ;;  %v6710_v0 = vshll.u32 %v12415_v55, 16  ;;  %v6354_v46 = vmul.f32 %v17445_v24, %v17375_v33  ;;  %v6352_v61 = vmul.f32 %v17375_v33, %v6192_v34 }
 0x31d   : > { %6995 = vst [vmem:[#allocation2 + $0x58] sm:$0xf] %v6994_v36  ;;  %6998 = vst [vmem:[#allocation2 + $0x5c] sm:$0x1] %v6997_v20  ;;  %v6691_v63 = vshrl.u32 %v12413_v35, 16  ;;  %v6694_v59 = vshll.u32 %v12413_v35, 16  ;;  %v13566_v37 = vadd.f32 %v13456_v4, %v17334_v14  ;;  %v13567_v32 = vadd.f32 %v6205_v31, %v17336_v57 }
 0x31e   : > { %v6422_v17 = vmax.f32 %v6390_v5, 0.0  ;;  %v6709_v7 = vrot.slane %v6707_v16, 7  ;;  %v7002_v6 = vld [vmem:[#allocation2 + $0x64] sm:$0x1]  ;;  %v12418_v40 = vpack.c.bf16 %v6424_v22, %v6424_v22  ;;  %v6393_v13 = vadd.f32 %v17380_v23, %v6354_v46  ;;  %v7029_v10 = vld [vmem:[#allocation2 + $0x88] sm:$0xf] }
 0x31f   : > { %v6693_v60 = vrot.slane %v6691_v63, 7  ;;  %v6391_v26 = vadd.f32 %v17380_v23, %v6352_v61  ;;  %v17476_v27 = vpop.f32.mrb[20].mxu0  ;;  %v7017_v63 = vld [vmem:[#allocation2 + $0x78] sm:$0xf]  ;;  %v6357_v22 = vmul.f32 %v13566_v37, %v17375_v33  ;;  %v13568_v46 = vadd.f32 %v13457_v47, %v17338_v15  ;;  %v17506_v47 = vld [vmem:[#allocation2 + $0x8] sm:$0xf] }
 0x320   : > { %v12416_v44 = vpack.c.bf16 %v6422_v17, %v6422_v17  ;;  %v6712_v8 = vor.u32 %v6710_v0, %v6709_v7  ;;  %v6713_v24 = vrot.slane %v6709_v7, 4  ;;  %v6731_v38 = vshrl.u32 %v12418_v40, 16  ;;  %v17478_v57 = vpop.f32.mrb[21].mxu0  ;;  %v7032_v0 = vld [vmem:[#allocation2 + $0x8c] sm:$0x1] }
 0x321   : > { %v6696_v48 = vor.u32 %v6694_v59, %v6693_v60  ;;  %v6697_v34 = vrot.slane %v6693_v60, 4  ;;  %v6734_v54 = vshll.u32 %v12418_v40, 16  ;;  %v17488_v5 = vpop.f32.mrb[22].mxu0  ;;  %v6425_v36 = vmax.f32 %v6393_v13, 0.0  ;;  %v7020_v59 = vld [vmem:[#allocation2 + $0x7c] sm:$0x1] }
 0x322   : > { %v6715_v14 = vshrl.u32 %v12416_v44, 16  ;;  %v6718_v4 = vshll.u32 %v12416_v44, 16  ;;  %v7012_v52 = vsel %vm17399_vm8, %v6712_v8, %v7011_v50  ;;  %v7015_v31 = vsel %vm17406_vm9, %v6713_v24, %v7014_v29  ;;  %v17490_v16 = vpop.f32.mrb[23].mxu0 }
 0x323   : > { %v7000_v55 = vsel %vm17399_vm8, %v6696_v48, %v6999_v19  ;;  %v7003_v35 = vsel %vm17406_vm9, %v6697_v34, %v7002_v6  ;;  %7013 = vst [vmem:[#allocation2 + $0x70] sm:$0xf] %v7012_v52  ;;  %7016 = vst [vmem:[#allocation2 + $0x74] sm:$0x1] %v7015_v31  ;;  %v6733_v2 = vrot.slane %v6731_v38, 7  ;;  %v6423_v20 = vmax.f32 %v6391_v26, 0.0 }
 0x324   : > { %7001 = vst [vmem:[#allocation2 + $0x60] sm:$0xf] %v7000_v55  ;;  %7004 = vst [vmem:[#allocation2 + $0x64] sm:$0x1] %v7003_v35  ;;  %v6717_v18 = vrot.slane %v6715_v14, 7  ;;  %v6355_v17 = vmul.f32 %v13567_v32, %v17375_v33  ;;  %v13569_v61 = vadd.f32 %v6208_v49, %v17340_v53  ;;  %v12419_v19 = vpack.c.bf16 %v6425_v36, %v6425_v36 }
 0x325   : > { %v6736_v7 = vor.u32 %v6734_v54, %v6733_v2  ;;  %v6737_v50 = vrot.slane %v6733_v2, 4  ;;  %v12417_v6 = vpack.c.bf16 %v6423_v20, %v6423_v20  ;;  %v6396_v40 = vadd.f32 %v17380_v23, %v6357_v22  ;;  %v17508_v49 = vld [vmem:[#allocation2 + $0xc] sm:$0x1]  ;;  %v7035_v34 = vld [vmem:[#allocation2 + $0x90] sm:$0xf] }
 0x326   : > { %v6720_v60 = vor.u32 %v6718_v4, %v6717_v18  ;;  %v6721_v29 = vrot.slane %v6717_v18, 4  ;;  %v6394_v44 = vadd.f32 %v17380_v23, %v6355_v17  ;;  %v6739_v32 = vshrl.u32 %v12419_v19, 16  ;;  %v7038_v55 = vld [vmem:[#allocation2 + $0x94] sm:$0x1]  ;;  %v7023_v36 = vld [vmem:[#allocation2 + $0x80] sm:$0xf] }
 0x327   : > { %v7030_v13 = vsel %vm17399_vm8, %v6736_v7, %v7029_v10  ;;  %v7033_v37 = vsel %vm17406_vm9, %v6737_v50, %v7032_v0  ;;  %v6742_v26 = vshll.u32 %v12419_v19, 16  ;;  %v6723_v8 = vshrl.u32 %v12417_v6, 16  ;;  %v17510_v24 = vpop.f32.mrb[24].mxu0  ;;  %v7026_v20 = vld [vmem:[#allocation2 + $0x84] sm:$0x1] }
 0x328   : > { %v7018_v15 = vsel %vm17399_vm8, %v6720_v60, %v7017_v63  ;;  %v7021_v53 = vsel %vm17406_vm9, %v6721_v29, %v7020_v59  ;;  %7031 = vst [vmem:[#allocation2 + $0x88] sm:$0xf] %v7030_v13  ;;  %7034 = vst [vmem:[#allocation2 + $0x8c] sm:$0x1] %v7033_v37  ;;  %v7643_v48 = vshrl.u32 %v17388_v25, 16  ;;  %v6428_v38 = vmax.f32 %v6396_v40, 0.0 }
 0x329   : > { %7019 = vst [vmem:[#allocation2 + $0x78] sm:$0xf] %v7018_v15  ;;  %7022 = vst [vmem:[#allocation2 + $0x7c] sm:$0x1] %v7021_v53  ;;  %v6426_v54 = vmax.f32 %v6394_v44, 0.0  ;;  %v6358_v14 = vmul.f32 %v13568_v46, %v17375_v33  ;;  %v6356_v4 = vmul.f32 %v13569_v61, %v17375_v33  ;;  %v17515_v52 = vpop.f32.mrb[25].mxu0  ;;  %v17519_v2 = vcombine.low %v17506_v47, %v17508_v49 }
 0x32a   : > { %v6741_v31 = vrot.slane %v6739_v32, 7  ;;  %v6725_v35 = vrot.slane %v6723_v8, 7  ;;  %v6726_v10 = vshll.u32 %v12417_v6, 16  ;;  %v17521_v18 = vpop.f32.mrb[26].mxu0  ;;  %v12422_v0 = vpack.c.bf16 %v6428_v38, %v6428_v38  ;;  %v7053_v15 = vld [vmem:[#allocation2 + $0xb8] sm:$0xf] }
 0x32b   : > { %v12420_v63 = vpack.c.bf16 %v6426_v54, %v6426_v54  ;;  %v6397_v59 = vadd.f32 %v17380_v23, %v6358_v14  ;;  %v6395_v22 = vadd.f32 %v17380_v23, %v6356_v4  ;;  %v17525_v17 = vpop.f32.mrb[27].mxu0  ;;  %v7056_v53 = vld [vmem:[#allocation2 + $0xbc] sm:$0x1]  ;;  %v7041_v32 = vld [vmem:[#allocation2 + $0xa8] sm:$0xf] }
 0x32c   : > { %v6744_v46 = vor.u32 %v6742_v26, %v6741_v31  ;;  %v6745_v61 = vrot.slane %v6741_v31, 4  ;;  %v6728_v7 = vor.u32 %v6726_v10, %v6725_v35  ;;  %v6729_v50 = vrot.slane %v6725_v35, 4  ;;  %v17535_v26 = vld [vmem:[#allocation2 + $0x10] sm:$0xf]  ;;  %v7171_v14 = vld [vmem:[#allocation2 + $0x14] sm:$0x1] }
 0x32d   : > { %v6763_v60 = vshrl.u32 %v12422_v0, 16  ;;  %v6766_v29 = vshll.u32 %v12422_v0, 16  ;;  %v6747_v19 = vshrl.u32 %v12420_v63, 16  ;;  %v6750_v6 = vshll.u32 %v12420_v63, 16  ;;  %v7044_v4 = vld [vmem:[#allocation2 + $0xac] sm:$0x1] }
 0x32e   : > { %v7036_v40 = vsel %vm17399_vm8, %v6744_v46, %v7035_v34  ;;  %v7039_v44 = vsel %vm17406_vm9, %v6745_v61, %v7038_v55  ;;  %v7024_v13 = vsel %vm17399_vm8, %v6728_v7, %v7023_v36  ;;  %v7027_v37 = vsel %vm17406_vm9, %v6729_v50, %v7026_v20  ;;  %v17549_v50 = vld [vmem:[#allocation2 + $0x18] sm:$0xf] }
 0x32f   : > { %7037 = vst [vmem:[#allocation2 + $0x90] sm:$0xf] %v7036_v40  ;;  %7040 = vst [vmem:[#allocation2 + $0x94] sm:$0x1] %v7039_v44  ;;  %v6765_v8 = vrot.slane %v6763_v60, 7  ;;  %v6749_v34 = vrot.slane %v6747_v19, 7  ;;  %v12158_v35 = vcombine.low %v17369_v1, %v17506_v47  ;;  %v11968_v60 = vcombine.low %v17535_v26, %v7171_v14 }
 0x330   : > { %7025 = vst [vmem:[#allocation2 + $0x80] sm:$0xf] %v7024_v13  ;;  %7028 = vst [vmem:[#allocation2 + $0x84] sm:$0x1] %v7027_v37  ;;  %v6429_v38 = vmax.f32 %v6397_v59, 0.0  ;;  %v6427_v54 = vmax.f32 %v6395_v22, 0.0  ;;  %v13573_v1 = vadd.f32 %v17490_v16, %v17351_v43  ;;  %v12167_v47 = vcombine.low %v17535_v26, %v17549_v50 }
 0x331   : > { %v7594_v31 = vshrl.u32 %v17519_v2, 16  ;;  %v7596_v55 = vshll.u32 %v17519_v2, 16  ;;  %v17541_v10 = vpop.f32.mrb[28].mxu0  ;;  %v17545_v36 = vrot.slane %v7645_v45, 1  ;;  %v6768_v20 = vor.u32 %v6766_v29, %v6765_v8  ;;  %v7172_v2 = vld [vmem:[#allocation2 + $0x1c] sm:$0x1] }
 0x332   : > { %v6769_v0 = vrot.slane %v6765_v8, 4  ;;  %v6752_v63 = vor.u32 %v6750_v6, %v6749_v34  ;;  %v6753_v59 = vrot.slane %v6749_v34, 4  ;;  %v17547_v22 = vpop.f32.mrb[29].mxu0  ;;  %v12423_v46 = vpack.c.bf16 %v6429_v38, %v6429_v38  ;;  %v7062_v38 = vld [vmem:[#allocation2 + $0xc4] sm:$0x1] }
 0x333   : > { %v12421_v61 = vpack.c.bf16 %v6427_v54, %v6427_v54  ;;  %v7598_v7 = vrot.slane %v7596_v55, 1  ;;  %v17552_v19 = vpop.f32.mrb[30].mxu0  ;;  %v7054_v45 = vsel %vm17399_vm8, %v6768_v20, %v7053_v15  ;;  %v7059_v15 = vld [vmem:[#allocation2 + $0xc0] sm:$0xf]  ;;  %v7601_v14 = vshrl.u32 %v11968_v60, 16 }
 0x334   : > { %v7057_v29 = vsel %vm17406_vm9, %v6769_v0, %v7056_v53  ;;  %v7042_v6 = vsel %vm17399_vm8, %v6752_v63, %v7041_v32  ;;  %v7045_v40 = vsel %vm17406_vm9, %v6753_v59, %v7044_v4  ;;  %v17562_v44 = vpop.f32.mrb[31].mxu0  ;;  %7055 = vst [vmem:[#allocation2 + $0xb8] sm:$0xf] %v7054_v45  ;;  %v6771_v13 = vshrl.u32 %v12423_v46, 16  ;;  %v7047_v4 = vld [vmem:[#allocation2 + $0xb0] sm:$0xf] }
 0x335   : > { %7058 = vst [vmem:[#allocation2 + $0xbc] sm:$0x1] %v7057_v29  ;;  %7043 = vst [vmem:[#allocation2 + $0xa8] sm:$0xf] %v7042_v6  ;;  %v6774_v37 = vshll.u32 %v12423_v46, 16  ;;  %v6755_v8 = vshrl.u32 %v12421_v61, 16  ;;  %v7599_v54 = vor.u32 %v7598_v7, %v7594_v31  ;;  %v11969_v53 = vcombine.low %v17549_v50, %v7172_v2 }
 0x336   : > { %7046 = vst [vmem:[#allocation2 + $0xac] sm:$0x1] %v7045_v40  ;;  %v6758_v34 = vshll.u32 %v12421_v61, 16  ;;  %v7603_v32 = vshll.u32 %v11968_v60, 16  ;;  %v6773_v55 = vrot.slane %v6771_v13, 7  ;;  %v13570_v63 = vadd.f32 %v17476_v27, %v17345_v28  ;;  %v13971_v31 = vld [vmem:[%s19647_s4 + $0x80] sm:$0xff]  }
 0x337   : > { %v6757_v20 = vrot.slane %v6755_v8, 7  ;;  %v7050_v0 = vld [vmem:[#allocation2 + $0xb4] sm:$0x1]  ;;  %v13571_v59 = vadd.f32 %v17478_v57, %v17347_v56  ;;  %v12159_v46 = vcombine.low %v17392_v21, %v7599_v54  ;;  %v7608_v7 = vshrl.u32 %v11969_v53, 16  ;;  %v13977_v60 = vld [vmem:[%s19647_s4 + $0xc8] sm:$0xff]  }
 0x338   : > { %v7605_v61 = vrot.slane %v7603_v32, 1  ;;  %v7610_v2 = vshll.u32 %v11969_v53, 16  ;;  %v6776_v45 = vor.u32 %v6774_v37, %v6773_v55  ;;  %v6777_v29 = vrot.slane %v6773_v55, 4  ;;  %v17576_v27 = vld [vmem:[#allocation2 + $0x20] sm:$0xf] }
 0x339   : > { %v6760_v6 = vor.u32 %v6758_v34, %v6757_v20  ;;  %v6761_v28 = vrot.slane %v6757_v20, 4  ;;  %v7173_v56 = vld [vmem:[#allocation2 + $0x24] sm:$0x1]  ;;  %10050 = vmatprep.mubr.bf16.mxu1 %v12159_v46  ;;  %v6361_v40 = vmul.f32 %v13570_v63, %v17375_v33  ;;  %v6359_v13 = vmul.f32 %v13571_v59, %v17375_v33  ;;  %v17580_v8 = vld [vmem:[#allocation2 + $0x28] sm:$0xf] }
 0x33a   : > { %v7606_v21 = vor.u32 %v7605_v61, %v7601_v14  ;;  %v7612_v57 = vrot.slane %v7610_v2, 1  ;;  %v7174_v54 = vld [vmem:[#allocation2 + $0x2c] sm:$0x1]  ;;  %v7060_v53 = vsel %vm17399_vm8, %v6776_v45, %v7059_v15  ;;  %v7063_v37 = vsel %vm17406_vm9, %v6777_v29, %v7062_v38  ;;  %10051 = vmatmul.mubr.bf16.vlgmr.msra.gmra.mrb[16].mxu1 %v12158_v35  ;;  %v13987_v2 = vld [vmem:[%s19647_s4 + $0x90] sm:$0xff]  }
 0x33b   : > { %v7048_v34 = vsel %vm17399_vm8, %v6760_v6, %v7047_v4  ;;  %v7051_v14 = vsel %vm17406_vm9, %v6761_v28, %v7050_v0  ;;  %7061 = vst [vmem:[#allocation2 + $0xc0] sm:$0xf] %v7060_v53  ;;  %7064 = vst [vmem:[#allocation2 + $0xc4] sm:$0x1] %v7063_v37  ;;  %12731 = vmatpush3.bf16.msra.mxu1 %v13971_v31  ;;  %v6400_v15 = vadd.f32 %v17380_v23, %v6361_v40  ;;  %v13979_v20 = vld [vmem:[%s19647_s4 + $0x88] sm:$0xff]   ;;  %v13985_v0 = vld [vmem:[%s19647_s4 + $0xd0] sm:$0xff]  }
 0x33c   : > { %7049 = vst [vmem:[#allocation2 + $0xb0] sm:$0xf] %v7048_v34  ;;  %7052 = vst [vmem:[#allocation2 + $0xb4] sm:$0x1] %v7051_v14  ;;  %v7613_v32 = vor.u32 %v7612_v57, %v7608_v7  ;;  %v6398_v38 = vadd.f32 %v17380_v23, %v6359_v13  ;;  %v13572_v55 = vadd.f32 %v17488_v5, %v17349_v51  ;;  %12732 = vmatprep.subr.bf16.mxu1 %v13977_v60  ;;  %v13993_v28 = vld [vmem:[%s19647_s4 + $0xd8] sm:$0xff]  }
 0x33d   : > { %v11970_v35 = vcombine.low %v17576_v27, %v7173_v56  ;;  %v11971_v4 = vcombine.low %v17580_v8, %v7174_v54  ;;  %v6432_v5 = vmax.f32 %v6400_v15, 0.0  ;;  %v6360_v46 = vmul.f32 %v13573_v1, %v17375_v33  ;;  %v7077_v13 = vld [vmem:[#allocation2 + $0xd8] sm:$0xf]  ;;  %v7065_v15 = vld [vmem:[#allocation2 + $0xc8] sm:$0xf] }
 0x33e   : > { %v12168_v51 = vcombine.low %v7606_v21, %v7613_v32  ;;  %v6430_v63 = vmax.f32 %v6398_v38, 0.0  ;;  %v6362_v59 = vmul.f32 %v13572_v55, %v17375_v33  ;;  %v13574_v29 = vadd.f32 %v17510_v24, %v17353_v30  ;;  %v7080_v30 = vld [vmem:[#allocation2 + $0xdc] sm:$0x1]  ;;  %v7068_v38 = vld [vmem:[#allocation2 + $0xcc] sm:$0x1] }
 0x33f   : > { %v7615_v43 = vshrl.u32 %v11970_v35, 16  ;;  %v7617_v16 = vshll.u32 %v11970_v35, 16  ;;  %v7622_v31 = vshrl.u32 %v11971_v4, 16  ;;  %v12426_v26 = vpack.c.bf16 %v6432_v5, %v6432_v5  ;;  %12733 = vmatpush3.bf16.msra.mxu1 %v13979_v20  ;;  %v13995_v32 = vld [vmem:[%s19647_s4 + $0x98] sm:$0xff]   ;;  %v14001_v35 = vld [vmem:[%s19647_s4 + $0xe0] sm:$0xff]  }
 0x340   : > { %10058 = vmatprep.mubr.bf16.mxu1 %v12168_v51  ;;  %v12424_v50 = vpack.c.bf16 %v6430_v63, %v6430_v63  ;;  %v6401_v61 = vadd.f32 %v17380_v23, %v6362_v59  ;;  %v7624_v7 = vshll.u32 %v11971_v4, 16  ;;  %v6399_v60 = vadd.f32 %v17380_v23, %v6360_v46  ;;  %12734 = vmatprep.subr.bf16.mxu1 %v13985_v0 }
 0x341   : > { %v7619_v45 = vrot.slane %v7617_v16, 1  ;;  %v13575_v6 = vadd.f32 %v17515_v52, %v17355_v62  ;;  %v6795_v56 = vshrl.u32 %v12426_v26, 16  ;;  %v6798_v21 = vshll.u32 %v12426_v26, 16  ;;  %v7083_v26 = vld [vmem:[#allocation2 + $0xe0] sm:$0xf] }
 0x342   : > { %v6779_v57 = vshrl.u32 %v12424_v50, 16  ;;  %v6782_v40 = vshll.u32 %v12424_v50, 16  ;;  %v6433_v54 = vmax.f32 %v6401_v61, 0.0  ;;  %v6431_v53 = vmax.f32 %v6399_v60, 0.0  ;;  %10059 = vmatmul.mubr.bf16.gmra.mrb[20].mxu1 %v12167_v47  ;;  %v7086_v61 = vld [vmem:[#allocation2 + $0xe4] sm:$0x1] }
 0x343   : > { %v7620_v37 = vor.u32 %v7619_v45, %v7615_v43  ;;  %v7626_v34 = vrot.slane %v7624_v7, 1  ;;  %v6797_v14 = vrot.slane %v6795_v56, 7  ;;  %v6365_v62 = vmul.f32 %v13574_v29, %v17375_v33  ;;  %12735 = vmatpush3.bf16.msra.mxu1 %v13987_v2  ;;  %v14003_v45 = vld [vmem:[%s19647_s4 + $0xa0] sm:$0xff]   ;;  %v7071_v29 = vld [vmem:[#allocation2 + $0xd0] sm:$0xf] }
 0x344   : > { %v6781_v24 = vrot.slane %v6779_v57, 7  ;;  %v6363_v52 = vmul.f32 %v13575_v6, %v17375_v33  ;;  %v12427_v55 = vpack.c.bf16 %v6433_v54, %v6433_v54  ;;  %v12425_v20 = vpack.c.bf16 %v6431_v53, %v6431_v53  ;;  %12736 = vmatprep.subr.bf16.mxu1 %v13993_v28  ;;  %v7074_v6 = vld [vmem:[#allocation2 + $0xd4] sm:$0x1] }
 0x345   : > { %v7627_v1 = vor.u32 %v7626_v34, %v7622_v31  ;;  %v13576_v47 = vadd.f32 %v17521_v18, %v17357_v3  ;;  %v6800_v4 = vor.u32 %v6798_v21, %v6797_v14  ;;  %v6801_v0 = vrot.slane %v6797_v14, 4  ;;  %v17654_v34 = vld [vmem:[#allocation2 + $0x38] sm:$0xf]  ;;  %v7176_v14 = vld [vmem:[#allocation2 + $0x3c] sm:$0x1] }
 0x346   : > { %v6784_v51 = vor.u32 %v6782_v40, %v6781_v24  ;;  %v6785_v5 = vrot.slane %v6781_v24, 4  ;;  %v6803_v63 = vshrl.u32 %v12427_v55, 16  ;;  %v6806_v59 = vshll.u32 %v12427_v55, 16  ;;  %v14009_v40 = vld [vmem:[%s19647_s4 + $0xe8] sm:$0xff]  }
 0x347   : > { %v6787_v46 = vshrl.u32 %v12425_v20, 16  ;;  %v6790_v43 = vshll.u32 %v12425_v20, 16  ;;  %v7078_v16 = vsel %vm17399_vm8, %v6800_v4, %v7077_v13  ;;  %v7081_v31 = vsel %vm17406_vm9, %v6801_v0, %v7080_v30  ;;  %12737 = vmatpush3.bf16.msra.mxu1 %v13995_v32 }
 0x348   : > { %v7066_v3 = vsel %vm17399_vm8, %v6784_v51, %v7065_v15  ;;  %v7069_v18 = vsel %vm17406_vm9, %v6785_v5, %v7068_v38  ;;  %7079 = vst [vmem:[#allocation2 + $0xd8] sm:$0xf] %v7078_v16  ;;  %7082 = vst [vmem:[#allocation2 + $0xdc] sm:$0x1] %v7081_v31  ;;  %v6805_v50 = vrot.slane %v6803_v63, 7  ;;  %v12177_v2 = vcombine.low %v7620_v37, %v7627_v1 }
 0x349   : > { %7067 = vst [vmem:[#allocation2 + $0xc8] sm:$0xf] %v7066_v3  ;;  %7070 = vst [vmem:[#allocation2 + $0xcc] sm:$0x1] %v7069_v18  ;;  %v6789_v7 = vrot.slane %v6787_v46, 7  ;;  %v6404_v60 = vadd.f32 %v17380_v23, %v6365_v62  ;;  %12738 = vmatprep.subr.bf16.mxu1 %v14001_v35  ;;  %v6402_v28 = vadd.f32 %v17380_v23, %v6363_v52 }
 0x34a   : > { %v6366_v56 = vmul.f32 %v13576_v47, %v17375_v33  ;;  %v13577_v21 = vadd.f32 %v17525_v17, %v17359_v39  ;;  %v12176_v57 = vcombine.low %v17576_v27, %v17580_v8  ;;  %v6808_v13 = vor.u32 %v6806_v59, %v6805_v50  ;;  %10066 = vmatprep.mubr.bf16.mxu1 %v12177_v2  ;;  %v17658_v17 = vld [vmem:[#allocation2 + $0x30] sm:$0xf]  ;;  %v7175_v27 = vld [vmem:[#allocation2 + $0x34] sm:$0x1]  ;;  %v7101_v46 = vld [vmem:[#allocation2 + $0x108] sm:$0xf] }
 0x34b   : > { %v6809_v54 = vrot.slane %v6805_v50, 4  ;;  %v6792_v53 = vor.u32 %v6790_v43, %v6789_v7  ;;  %v6793_v37 = vrot.slane %v6789_v7, 4  ;;  %v6436_v30 = vmax.f32 %v6404_v60, 0.0  ;;  %12739 = vmatpush3.bf16.msra.mxu1 %v14003_v45  ;;  %v14017_v47 = vld [vmem:[%s19647_s4 + $0xf0] sm:$0xff]   ;;  %v7104_v43 = vld [vmem:[#allocation2 + $0x10c] sm:$0x1] }
 0x34c   : > { %v6434_v24 = vmax.f32 %v6402_v28, 0.0  ;;  %v6405_v62 = vadd.f32 %v17380_v23, %v6366_v56  ;;  %v6364_v39 = vmul.f32 %v13577_v21, %v17375_v33  ;;  %10067 = vmatmul.mubr.bf16.gmra.mrb[24].mxu1 %v12176_v57  ;;  %v7084_v8 = vsel %vm17399_vm8, %v6808_v13, %v7083_v26  ;;  %v14011_v33 = vld [vmem:[%s19647_s4 + $0xa8] sm:$0xff]   ;;  %12740 = vmatprep.subr.bf16.mxu1 %v14009_v40  ;;  %v7089_v16 = vld [vmem:[#allocation2 + $0xf8] sm:$0xf]  ;;  %v14019_v50 = vld [vmem:[%s19647_s4 + $0xb0] sm:$0xff]  }
 0x34d   : > { %v7087_v52 = vsel %vm17406_vm9, %v6809_v54, %v7086_v61  ;;  %v7072_v32 = vsel %vm17399_vm8, %v6792_v53, %v7071_v29  ;;  %v7075_v15 = vsel %vm17406_vm9, %v6793_v37, %v7074_v6  ;;  %7085 = vst [vmem:[#allocation2 + $0xe0] sm:$0xf] %v7084_v8  ;;  %v12430_v38 = vpack.c.bf16 %v6436_v30, %v6436_v30  ;;  %v14025_v61 = vld [vmem:[%s19647_s4 + $0xf8] sm:$0xff]  }
 0x34e   : > { %7088 = vst [vmem:[#allocation2 + $0xe4] sm:$0x1] %v7087_v52  ;;  %7073 = vst [vmem:[#allocation2 + $0xd0] sm:$0xf] %v7072_v32  ;;  %v12428_v55 = vpack.c.bf16 %v6434_v24, %v6434_v24  ;;  %v6437_v20 = vmax.f32 %v6405_v62, 0.0  ;;  %v6403_v1 = vadd.f32 %v17380_v23, %v6364_v39  ;;  %v11972_v35 = vcombine.low %v17658_v17, %v7175_v27  ;;  %v14027_v53 = vld [vmem:[%s19647_s4 + $0xb8] sm:$0xff]  }
 0x34f   : > { %7076 = vst [vmem:[#allocation2 + $0xd4] sm:$0x1] %v7075_v15  ;;  %v17677_v4 = vcombine.low %v17654_v34, %v7176_v14  ;;  %v13578_v0 = vadd.f32 %v17541_v10, %v17361_v41  ;;  %v13579_v51 = vadd.f32 %v17547_v22, %v17363_v12  ;;  %v6827_v5 = vshrl.u32 %v12430_v38, 16  ;;  %12741 = vmatpush3.bf16.msra.mxu1 %v14011_v33  ;;  %v7092_v7 = vld [vmem:[#allocation2 + $0xfc] sm:$0x1]  ;;  %v14034_v27 = vld [vmem:[%s19647_s4 + $0x140] sm:$0xff]  }
 0x350   : > { %v6830_v63 = vshll.u32 %v12430_v38, 16  ;;  %v6811_v59 = vshrl.u32 %v12428_v55, 16  ;;  %v6814_v23 = vshll.u32 %v12428_v55, 16  ;;  %v12431_v31 = vpack.c.bf16 %v6437_v20, %v6437_v20  ;;  %12742 = vmatprep.subr.bf16.mxu1 %v14017_v47  ;;  %v7107_v62 = vld [vmem:[#allocation2 + $0x110] sm:$0xf] }
 0x351   : > { %v6435_v3 = vmax.f32 %v6403_v1, 0.0  ;;  %v7629_v18 = vshrl.u32 %v11972_v35, 16  ;;  %v7631_v26 = vshll.u32 %v11972_v35, 16  ;;  %v6829_v41 = vrot.slane %v6827_v5, 7  ;;  %v7110_v39 = vld [vmem:[#allocation2 + $0x114] sm:$0x1] }
 0x352   : > { %v6813_v10 = vrot.slane %v6811_v59, 7  ;;  %v7636_v12 = vshrl.u32 %v17677_v4, 16  ;;  %v7638_v22 = vshll.u32 %v17677_v4, 16  ;;  %v6835_v2 = vshrl.u32 %v12431_v31, 16  ;;  %v7095_v33 = vld [vmem:[#allocation2 + $0x100] sm:$0xf] }
 0x353   : > { %v6838_v60 = vshll.u32 %v12431_v31, 16  ;;  %v12429_v45 = vpack.c.bf16 %v6435_v3, %v6435_v3  ;;  %v7633_v29 = vrot.slane %v7631_v26, 1  ;;  %v6832_v6 = vor.u32 %v6830_v63, %v6829_v41  ;;  %12743 = vmatpush3.bf16.msra.mxu1 %v14019_v50  ;;  %v7098_v38 = vld [vmem:[#allocation2 + $0x104] sm:$0x1]  ;;  %v14275_v55 = vld [vmem:[%s19645_s2] ss:$0 sm:$0xff] }
 0x354   : > { %v6833_v28 = vrot.slane %v6829_v41, 4  ;;  %v6816_v56 = vor.u32 %v6814_v23, %v6813_v10  ;;  %v6817_v21 = vrot.slane %v6813_v10, 4  ;;  %v6837_v57 = vrot.slane %v6835_v2, 7  ;;  %12744 = vmatprep.subr.bf16.mxu1 %v14025_v61  ;;  %v17716_v23 = vld [vmem:[#allocation2 + $0x58] sm:$0xf] }
 0x355   : > { %v6819_v40 = vshrl.u32 %v12429_v45, 16  ;;  %v6822_v13 = vshll.u32 %v12429_v45, 16  ;;  %v7634_v54 = vor.u32 %v7633_v29, %v7629_v18  ;;  %v7102_v37 = vsel %vm17399_vm8, %v6832_v6, %v7101_v46  ;;  %v17721_v46 = vld [vmem:[#allocation2 + $0x60] sm:$0xf]  ;;  %v17734_v26 = vld [vmem:[#allocation2 + $0x68] sm:$0xf] }
 0x356   : > { %v7105_v14 = vsel %vm17406_vm9, %v6833_v28, %v7104_v43  ;;  %v7090_v30 = vsel %vm17399_vm8, %v6816_v56, %v7089_v16  ;;  %v7093_v24 = vsel %vm17406_vm9, %v6817_v21, %v7092_v7  ;;  %7103 = vst [vmem:[#allocation2 + $0x108] sm:$0xf] %v7102_v37  ;;  %v6840_v8 = vor.u32 %v6838_v60, %v6837_v57  ;;  %v17723_v43 = vld [vmem:[#allocation2 + $0x64] sm:$0x1]  ;;  %v17736_v50 = vld [vmem:[#allocation2 + $0x6c] sm:$0x1] }
 0x357   : > { %7106 = vst [vmem:[#allocation2 + $0x10c] sm:$0x1] %v7105_v14  ;;  %7091 = vst [vmem:[#allocation2 + $0xf8] sm:$0xf] %v7090_v30  ;;  %v6841_v52 = vrot.slane %v6837_v57, 4  ;;  %v6821_v32 = vrot.slane %v6819_v40, 7  ;;  %v6369_v20 = vmul.f32 %v14275_v55, %v13578_v0  ;;  %v6367_v1 = vmul.f32 %v14275_v55, %v13579_v51  ;;  %12745 = vmatpush3.bf16.msra.mxu1 %v14027_v53 }
 0x358   : > { %7094 = vst [vmem:[#allocation2 + $0xfc] sm:$0x1] %v7093_v24  ;;  %v7640_v15 = vrot.slane %v7638_v22, 1  ;;  %v13580_v47 = vadd.f32 %v17552_v19, %v17365_v9  ;;  %v13581_v35 = vadd.f32 %v17562_v44, %v17367_v11  ;;  %v7108_v4 = vsel %vm17399_vm8, %v6840_v8, %v7107_v62  ;;  %v14276_v9 = vld [vmem:[%s19646_s3] ss:$0 sm:$0xff]  ;;  %12842 = vmatprep.subr.bf16.mxu1 %v14034_v27 }
 0x359   : > { %v7111_v5 = vsel %vm17406_vm9, %v6841_v52, %v7110_v39  ;;  %v6824_v63 = vor.u32 %v6822_v13, %v6821_v32  ;;  %v6825_v59 = vrot.slane %v6821_v32, 4  ;;  %7109 = vst [vmem:[#allocation2 + $0x110] sm:$0xf] %v7108_v4  ;;  %v6408_v19 = vadd.f32 %v14276_v9, %v6369_v20  ;;  %v7178_v51 = vld [vmem:[#allocation2 + $0x5c] sm:$0x1] }
 0x35a   : > { %7112 = vst [vmem:[#allocation2 + $0x114] sm:$0x1] %v7111_v5  ;;  %v7641_v0 = vor.u32 %v7640_v15, %v7636_v12  ;;  %v6406_v11 = vadd.f32 %v14276_v9, %v6367_v1  ;;  %v6370_v44 = vmul.f32 %v14275_v55, %v13580_v47  ;;  %v6368_v3 = vmul.f32 %v14275_v55, %v13581_v35  ;;  %v17747_v56 = vld [vmem:[#allocation2 + $0x50] sm:$0xf]  ;;  %v7125_v13 = vld [vmem:[#allocation2 + $0x128] sm:$0xf] }
 0x35b   : > { %v7096_v16 = vsel %vm17399_vm8, %v6824_v63, %v7095_v33  ;;  %v7099_v31 = vsel %vm17406_vm9, %v6825_v59, %v7098_v38  ;;  %v17732_v18 = vor.u32 %v17545_v36, %v7643_v48  ;;  %v6440_v10 = vmax.f32 %v6408_v19, 0.0  ;;  %v7113_v27 = vld [vmem:[#allocation2 + $0x118] sm:$0xf]  ;;  %v7116_v52 = vld [vmem:[#allocation2 + $0x11c] sm:$0x1] }
 0x35c   : > { %7097 = vst [vmem:[#allocation2 + $0x100] sm:$0xf] %v7096_v16  ;;  %7100 = vst [vmem:[#allocation2 + $0x104] sm:$0x1] %v7099_v31  ;;  %v12186_v41 = vcombine.low %v7634_v54, %v7641_v0  ;;  %v6438_v12 = vmax.f32 %v6406_v11, 0.0  ;;  %v6409_v22 = vadd.f32 %v14276_v9, %v6370_v44  ;;  %v6407_v61 = vadd.f32 %v14276_v9, %v6368_v3 }
 0x35d   : > { %v12185_v7 = vcombine.low %v17658_v17, %v17654_v34  ;;  %v11975_v2 = vcombine.low %v17716_v23, %v7178_v51  ;;  %v11976_v25 = vcombine.low %v17721_v46, %v17723_v43  ;;  %v12434_v48 = vpack.c.bf16 %v6440_v10, %v6440_v10  ;;  %v7128_v54 = vld [vmem:[#allocation2 + $0x12c] sm:$0x1]  ;;  %v7131_v35 = vld [vmem:[#allocation2 + $0x130] sm:$0xf]  ;;  %v7134_v4 = vld [vmem:[#allocation2 + $0x134] sm:$0x1] }
 0x35e   : > { %10074 = vmatprep.mubr.bf16.mxu1 %v12186_v41  ;;  %v12432_v36 = vpack.c.bf16 %v6438_v12, %v6438_v12  ;;  %v6441_v60 = vmax.f32 %v6409_v22, 0.0  ;;  %v17745_v45 = vcombine.low %v17734_v26, %v17736_v50  ;;  %v6439_v29 = vmax.f32 %v6407_v61, 0.0  ;;  %v7119_v59 = vld [vmem:[#allocation2 + $0x120] sm:$0xf]  ;;  %v7122_v16 = vld [vmem:[#allocation2 + $0x124] sm:$0x1] }
 0x35f   : > { %10075 = vmatmul.mubr.bf16.gmra.mrb[28].mxu1 %v12185_v7  ;;  %v7650_v6 = vshrl.u32 %v11975_v2, 16  ;;  %v7652_v28 = vshll.u32 %v11975_v2, 16  ;;  %v12194_v34 = vcombine.low %v17747_v56, %v17716_v23  ;;  %v6859_v17 = vshrl.u32 %v12434_v48, 16  ;;  %v17760_v31 = vld [vmem:[#allocation2 + $0x70] sm:$0xf] }
 0x360   : > { %v6862_v21 = vshll.u32 %v12434_v48, 16  ;;  %v6843_v57 = vshrl.u32 %v12432_v36, 16  ;;  %v7657_v40 = vshrl.u32 %v11976_v25, 16  ;;  %v12435_v53 = vpack.c.bf16 %v6441_v60, %v6441_v60  ;;  %v17762_v3 = vld [vmem:[#allocation2 + $0x74] sm:$0x1] }
 0x361   : > { %v12433_v37 = vpack.c.bf16 %v6439_v29, %v6439_v29  ;;  %v7654_v14 = vrot.slane %v7652_v28, 1  ;;  %v7659_v30 = vshll.u32 %v11976_v25, 16  ;;  %v6861_v24 = vrot.slane %v6859_v17, 7  ;;  %v17764_v61 = vld [vmem:[#allocation2 + $0x78] sm:$0xf] }
 0x362   : > { %v6845_v62 = vrot.slane %v6843_v57, 7  ;;  %v6846_v39 = vshll.u32 %v12432_v36, 16  ;;  %v7666_v8 = vshll.u32 %v17745_v45, 16  ;;  %v6867_v32 = vshrl.u32 %v12435_v53, 16  ;;  %v17766_v7 = vld [vmem:[#allocation2 + $0x7c] sm:$0x1] }
 0x363   : > { %v6870_v15 = vshll.u32 %v12435_v53, 16  ;;  %v6851_v33 = vshrl.u32 %v12433_v37, 16  ;;  %v6854_v38 = vshll.u32 %v12433_v37, 16  ;;  %v6864_v55 = vor.u32 %v6862_v21, %v6861_v24  ;;  %v17770_v60 = vld [vmem:[#allocation2 + $0x80] sm:$0xf] }
 0x364   : > { %v6865_v20 = vrot.slane %v6861_v24, 4  ;;  %v6848_v1 = vor.u32 %v6846_v39, %v6845_v62  ;;  %v6849_v47 = vrot.slane %v6845_v62, 4  ;;  %v6869_v5 = vrot.slane %v6867_v32, 7  ;;  %v17772_v29 = vld [vmem:[#allocation2 + $0x84] sm:$0x1] }
 0x365   : > { %v6853_v63 = vrot.slane %v6851_v33, 7  ;;  %v7655_v0 = vor.u32 %v7654_v14, %v7650_v6  ;;  %v7661_v9 = vrot.slane %v7659_v30, 1  ;;  %v7126_v19 = vsel %vm17399_vm8, %v6864_v55, %v7125_v13  ;;  %v17782_v21 = vld [vmem:[#allocation2 + $0x88] sm:$0xf]  ;;  %v17797_v14 = vld [vmem:[#allocation2 + $0xa0] sm:$0xf] }
 0x366   : > { %v7129_v11 = vsel %vm17406_vm9, %v6865_v20, %v7128_v54  ;;  %v7114_v44 = vsel %vm17399_vm8, %v6848_v1, %v7113_v27  ;;  %v7117_v51 = vsel %vm17406_vm9, %v6849_v47, %v7116_v52  ;;  %7127 = vst [vmem:[#allocation2 + $0x128] sm:$0xf] %v7126_v19  ;;  %v6872_v41 = vor.u32 %v6870_v15, %v6869_v5  ;;  %v17799_v62 = vld [vmem:[#allocation2 + $0xa8] sm:$0xf]  ;;  %v7185_v39 = vld [vmem:[#allocation2 + $0xa4] sm:$0x1] }
 0x367   : > { %7130 = vst [vmem:[#allocation2 + $0x12c] sm:$0x1] %v7129_v11  ;;  %7115 = vst [vmem:[#allocation2 + $0x118] sm:$0xf] %v7114_v44  ;;  %v6873_v10 = vrot.slane %v6869_v5, 4  ;;  %v6856_v12 = vor.u32 %v6854_v38, %v6853_v63  ;;  %v6857_v22 = vrot.slane %v6853_v63, 4  ;;  %v12195_v2 = vcombine.low %v17732_v18, %v7655_v0 }
 0x368   : > { %7118 = vst [vmem:[#allocation2 + $0x11c] sm:$0x1] %v7117_v51  ;;  %v7662_v25 = vor.u32 %v7661_v9, %v7657_v40  ;;  %v7664_v48 = vshrl.u32 %v17745_v45, 16  ;;  %v7668_v36 = vrot.slane %v7666_v8, 1  ;;  %v7132_v6 = vsel %vm17399_vm8, %v6872_v41, %v7131_v35  ;;  %v17784_v45 = vld [vmem:[#allocation2 + $0x8c] sm:$0x1] }
 0x369   : > { %v7135_v28 = vsel %vm17406_vm9, %v6873_v10, %v7134_v4  ;;  %v7120_v17 = vsel %vm17399_vm8, %v6856_v12, %v7119_v59  ;;  %v7123_v18 = vsel %vm17406_vm9, %v6857_v22, %v7122_v16  ;;  %7133 = vst [vmem:[#allocation2 + $0x130] sm:$0xf] %v7132_v6  ;;  %10082 = vmatprep.mubr.bf16.mxu1 %v12195_v2  ;;  %v17805_v59 = vld [vmem:[#allocation2 + $0xb0] sm:$0xf]  ;;  %v17807_v0 = vld [vmem:[#allocation2 + $0xb4] sm:$0x1] }
 0x36a   : > { %7136 = vst [vmem:[#allocation2 + $0x134] sm:$0x1] %v7135_v28  ;;  %7121 = vst [vmem:[#allocation2 + $0x120] sm:$0xf] %v7120_v17  ;;  %v7669_v57 = vor.u32 %v7668_v36, %v7664_v48  ;;  %v11978_v40 = vcombine.low %v17760_v31, %v17762_v3  ;;  %v11979_v42 = vcombine.low %v17764_v61, %v17766_v7  ;;  %10083 = vmatmul.mubr.bf16.gmra.mrb[32].mxu1 %v12194_v34  ;;  %v7186_v34 = vld [vmem:[#allocation2 + $0xac] sm:$0x1] }
 0x36b   : > { %7124 = vst [vmem:[#allocation2 + $0x124] sm:$0x1] %v7123_v18  ;;  %v11980_v58 = vcombine.low %v17770_v60, %v17772_v29  ;;  %v11981_v53 = vcombine.low %v17782_v21, %v17784_v45  ;;  %v12203_v52 = vcombine.low %v17721_v46, %v17734_v26  ;;  %v11982_v38 = vcombine.low %v17797_v14, %v7185_v39  ;;  %v17811_v19 = vld [vmem:[#allocation2 + $0xb8] sm:$0xf]  ;;  %v17813_v11 = vld [vmem:[#allocation2 + $0xbc] sm:$0x1] }
 0x36c   : > { %v12204_v13 = vcombine.low %v7662_v25, %v7669_v57  ;;  %v7673_v54 = vshll.u32 %v11978_v40, 16  ;;  %v7680_v37 = vshll.u32 %v11979_v42, 16  ;;  %v7671_v27 = vshrl.u32 %v11978_v40, 16  ;;  %v7201_v10 = vld [vmem:[#allocation2] sm:$0xe] }
 0x36d   : > { %v7687_v24 = vshll.u32 %v11980_v58, 16  ;;  %v7678_v23 = vshrl.u32 %v11979_v42, 16  ;;  %v7694_v8 = vshll.u32 %v11981_v53, 16  ;;  %v11983_v55 = vcombine.low %v17799_v62, %v7186_v34  ;;  %v7202_v12 = vld [vmem:[#allocation2 + $0x8] sm:$0xe] }
 0x36e   : > { %10090 = vmatprep.mubr.bf16.mxu1 %v12204_v13  ;;  %v7675_v30 = vrot.slane %v7673_v54, 1  ;;  %v7682_v56 = vrot.slane %v7680_v37, 1  ;;  %v7685_v1 = vshrl.u32 %v11980_v58, 16  ;;  %v7692_v4 = vshrl.u32 %v11981_v53, 16  ;;  %v14278_v48 = vld [vmem:[#allocation2 + $0x4] sm:$0x1] }
 0x36f   : > { %v7689_v33 = vrot.slane %v7687_v24, 1  ;;  %v7696_v47 = vrot.slane %v7694_v8, 1  ;;  %v7701_v5 = vshll.u32 %v11982_v38, 16  ;;  %v7708_v63 = vshll.u32 %v11983_v55, 16  ;;  %v17820_v28 = vld [vmem:[#allocation2 + $0xc8] sm:$0xf] }
 0x370   : > { %v7676_v32 = vor.u32 %v7675_v30, %v7671_v27  ;;  %v7683_v15 = vor.u32 %v7682_v56, %v7678_v23  ;;  %v12212_v26 = vcombine.low %v17760_v31, %v17764_v61  ;;  %v7699_v9 = vshrl.u32 %v11982_v38, 16  ;;  %v17822_v17 = vld [vmem:[#allocation2 + $0xcc] sm:$0x1]  ;;  %v17826_v40 = vld [vmem:[#allocation2 + $0xc0] sm:$0xf] }
 0x371   : > { %v7690_v35 = vor.u32 %v7689_v33, %v7685_v1  ;;  %v7697_v46 = vor.u32 %v7696_v47, %v7692_v4  ;;  %v7703_v51 = vrot.slane %v7701_v5, 1  ;;  %v7710_v16 = vrot.slane %v7708_v63, 1  ;;  %v17828_v42 = vld [vmem:[#allocation2 + $0xc4] sm:$0x1]  ;;  %v17838_v27 = vld [vmem:[#allocation2 + $0xd0] sm:$0xf] }
 0x372   : > { %10091 = vmatmul.mubr.bf16.gmra.mrb[36].mxu1 %v12203_v52  ;;  %v12213_v20 = vcombine.low %v7676_v32, %v7683_v15  ;;  %v11984_v41 = vcombine.low %v17805_v59, %v17807_v0  ;;  %v7706_v22 = vshrl.u32 %v11983_v55, 16  ;;  %v11985_v2 = vcombine.low %v17811_v19, %v17813_v11  ;;  %v17840_v23 = vld [vmem:[#allocation2 + $0xd4] sm:$0x1]  ;;  %v17846_v32 = vld [vmem:[#allocation2 + $0xd8] sm:$0xf] }
 0x373   : > { %v12222_v44 = vcombine.low %v7690_v35, %v7697_v46  ;;  %v7704_v31 = vor.u32 %v7703_v51, %v7699_v9  ;;  %v11998_v36 = vcombine.low %v7201_v10, %v14278_v48  ;;  %v11999_v6 = vcombine.low %v7202_v12, %v17508_v49  ;;  %v17848_v15 = vld [vmem:[#allocation2 + $0xdc] sm:$0x1]  ;;  %v17854_v1 = vld [vmem:[#allocation2 + $0xf4] sm:$0x1]  ;;  %v17870_v12 = vld [vmem:[#allocation2 + $0x100] sm:$0xf] }
 0x374   : > { %10098 = vmatprep.mubr.bf16.mxu1 %v12213_v20  ;;  %v7711_v61 = vor.u32 %v7710_v16, %v7706_v22  ;;  %v7715_v25 = vshll.u32 %v11984_v41, 16  ;;  %v7722_v18 = vshll.u32 %v11985_v2, 16  ;;  %v12221_v57 = vcombine.low %v17770_v60, %v17782_v21  ;;  %v17852_v20 = vld [vmem:[#allocation2 + $0xf0] sm:$0xf]  ;;  %v17860_v4 = vld [vmem:[#allocation2 + $0xfc] sm:$0x1] }
 0x375   : > { %v11987_v54 = vcombine.low %v17820_v28, %v17822_v17  ;;  %v17832_v53 = vrot.slane %v11998_v36, 1  ;;  %v17834_v49 = vrot.slane %v11999_v6, 1  ;;  %v7713_v37 = vshrl.u32 %v11984_v41, 16  ;;  %v17866_v16 = vld [vmem:[#allocation2 + $0x108] sm:$0xf] }
 0x376   : > { %v12231_v58 = vcombine.low %v7704_v31, %v7711_v61  ;;  %v7717_v13 = vrot.slane %v7715_v25, 1  ;;  %v7724_v30 = vrot.slane %v7722_v18, 1  ;;  %v11986_v60 = vcombine.low %v17826_v40, %v17828_v42  ;;  %v7211_v41 = vld [vmem:[#allocation2 + $0x60] sm:$0xe]  ;;  %v17872_v22 = vld [vmem:[#allocation2 + $0x104] sm:$0x1] }
 0x377   : > { %v7720_v24 = vshrl.u32 %v11985_v2, 16  ;;  %v7736_v39 = vshll.u32 %v11987_v54, 16  ;;  %v12230_v52 = vcombine.low %v17797_v14, %v17799_v62  ;;  %v11988_v55 = vcombine.low %v17838_v27, %v17840_v23  ;;  %v17858_v62 = vld [vmem:[#allocation2 + $0xf8] sm:$0xf]  ;;  %v17874_v2 = vld [vmem:[#allocation2 + $0x10c] sm:$0x1] }
 0x378   : > { %v7718_v21 = vor.u32 %v7717_v13, %v7713_v37  ;;  %v7729_v8 = vshll.u32 %v11986_v60, 16  ;;  %v7734_v35 = vshrl.u32 %v11987_v54, 16  ;;  %v11989_v14 = vcombine.low %v17846_v32, %v17848_v15  ;;  %v7212_v48 = vld [vmem:[#allocation2 + $0x68] sm:$0xe]  ;;  %v7213_v13 = vld [vmem:[#allocation2 + $0x70] sm:$0xe] }
 0x379   : > { %v7725_v34 = vor.u32 %v7724_v30, %v7720_v24  ;;  %v7738_v38 = vrot.slane %v7736_v39, 1  ;;  %v7727_v5 = vshrl.u32 %v11986_v60, 16  ;;  %v7743_v46 = vshll.u32 %v11988_v55, 16  ;;  %v7214_v54 = vld [vmem:[#allocation2 + $0x78] sm:$0xe] }
 0x37a   : > { %10099 = vmatmul.mubr.bf16.gmra.mrb[40].mxu1 %v12212_v26  ;;  %v7731_v47 = vrot.slane %v7729_v8, 1  ;;  %v11990_v26 = vcombine.low %v17852_v20, %v17854_v1  ;;  %v11991_v9 = vcombine.low %v17858_v62, %v17860_v4  ;;  %v7750_v51 = vshll.u32 %v11989_v14, 16  ;;  %v17889_v30 = vld [vmem:[#allocation2 + $0x110] sm:$0xf]  ;;  %v17891_v60 = vld [vmem:[#allocation2 + $0x114] sm:$0x1] }
 0x37b   : > { %10106 = vmatprep.mubr.bf16.mxu1 %v12222_v44  ;;  %v12240_v33 = vcombine.low %v7718_v21, %v7725_v34  ;;  %v7739_v63 = vor.u32 %v7738_v38, %v7734_v35  ;;  %v12239_v10 = vcombine.low %v17805_v59, %v17811_v19  ;;  %v7745_v61 = vrot.slane %v7743_v46, 1  ;;  %v17908_v46 = vld [vmem:[#allocation2 + $0x11c] sm:$0x1] }
 0x37c   : > { %v7732_v44 = vor.u32 %v7731_v47, %v7727_v5  ;;  %v7757_v25 = vshll.u32 %v11990_v26, 16  ;;  %v12248_v36 = vcombine.low %v17826_v40, %v17820_v28  ;;  %v7741_v6 = vshrl.u32 %v11988_v55, 16  ;;  %v7216_v47 = vld [vmem:[#allocation2 + $0x88] sm:$0xe] }
 0x37d   : > { %v7764_v18 = vshll.u32 %v11991_v9, 16  ;;  %v17880_v59 = vcombine.low %v17870_v12, %v17872_v22  ;;  %v17884_v19 = vcombine.low %v17866_v16, %v17874_v2  ;;  %v7748_v37 = vshrl.u32 %v11989_v14, 16 }
 0x37e   : > { %v12249_v31 = vcombine.low %v7732_v44, %v7739_v63  ;;  %v12257_v28 = vcombine.low %v17838_v27, %v17846_v32  ;;  %v7755_v40 = vshrl.u32 %v11990_v26, 16  ;;  %v12009_v21 = vcombine.low %v7212_v48, %v17736_v50  ;;  %v17906_v63 = vld [vmem:[#allocation2 + $0x118] sm:$0xf]  ;;  %v17910_v26 = vld [vmem:[#allocation2 + $0x8] sm:$0xf] }
 0x37f   : > { %v7746_v24 = vor.u32 %v7745_v61, %v7741_v6  ;;  %v7759_v39 = vrot.slane %v7757_v25, 1  ;;  %v7762_v34 = vshrl.u32 %v11991_v9, 16  ;;  %v12010_v38 = vcombine.low %v7213_v13, %v17762_v3  ;;  %v17912_v9 = vld [vmem:[#allocation2 + $0x10] sm:$0xf]  ;;  %v17925_v61 = vld [vmem:[#allocation2 + $0x120] sm:$0xf] }
 0x380   : > { %v12011_v55 = vcombine.low %v7214_v54, %v17766_v7  ;;  %v7771_v14 = vshll.u32 %v17880_v59, 16  ;;  %v7778_v5 = vshll.u32 %v17884_v19, 16  ;;  %v17904_v50 = vcombine.low %v17889_v30, %v17891_v60  ;;  %v17927_v25 = vld [vmem:[#allocation2 + $0x124] sm:$0x1]  ;;  %v7265_v48 = vld [vmem:[#allocation2 + $0xc] sm:$0x1] }
 0x381   : > { %v17916_v7 = vrot.slane %v12010_v38, 1  ;;  %v12013_v6 = vcombine.low %v7216_v47, %v17784_v45  ;;  %v7219_v54 = vld [vmem:[#allocation2 + $0xb0] sm:$0xe]  ;;  %v7220_v45 = vld [vmem:[#allocation2 + $0xb8] sm:$0xe] }
 0x382   : > { %10107 = vmatmul.mubr.bf16.gmra.mrb[44].mxu1 %v12221_v57  ;;  %v7752_v57 = vrot.slane %v7750_v51, 1  ;;  %v17918_v44 = vrot.slane %v12011_v55, 1  ;;  %v12016_v47 = vcombine.low %v7219_v54, %v17807_v0  ;;  %v7224_v55 = vld [vmem:[#allocation2 + $0xd8] sm:$0xe]  ;;  %v17966_v54 = vld [vmem:[#allocation2 + $0x128] sm:$0xf] }
 0x383   : > { %10114 = vmatprep.mubr.bf16.mxu1 %v12231_v58  ;;  %v12008_v58 = vcombine.low %v7211_v41, %v17723_v43  ;;  %v7766_v43 = vrot.slane %v7764_v18, 1  ;;  %v7760_v18 = vor.u32 %v7759_v39, %v7755_v40  ;;  %v7776_v40 = vshrl.u32 %v17884_v19, 16  ;;  %v17994_v32 = vld [vmem:[#allocation2 + $0x18] sm:$0xf] }
 0x384   : > { %v7753_v35 = vor.u32 %v7752_v57, %v7748_v37  ;;  %v7773_v37 = vrot.slane %v7771_v14, 1  ;;  %v7780_v39 = vrot.slane %v7778_v5, 1  ;;  %v7783_v19 = vshrl.u32 %v17904_v50, 16 }
 0x385   : > { %v17894_v8 = vrot.slane %v12008_v58, 1  ;;  %v7767_v57 = vor.u32 %v7766_v43, %v7762_v34  ;;  %v7266_v58 = vld [vmem:[#allocation2 + $0x14] sm:$0x1]  ;;  %v17945_v34 = vcombine.low %v17925_v61, %v17927_v25  ;;  %v17948_v43 = vcombine.low %v17910_v26, %v7265_v48 }
 0x386   : > { %v12258_v41 = vcombine.low %v7746_v24, %v7753_v35  ;;  %v7785_v24 = vshll.u32 %v17904_v50, 16  ;;  %v17951_v38 = vcombine.low %v17912_v9, %v7266_v58  ;;  %v7221_v35 = vld [vmem:[#allocation2 + $0xc0] sm:$0xe] }
 0x387   : > { %v12267_v14 = vcombine.low %v7760_v18, %v7767_v57  ;;  %v17968_v18 = vld [vmem:[#allocation2 + $0x12c] sm:$0x1]  ;;  %v12018_v57 = vcombine.low %v7221_v35, %v17828_v42  ;;  %v7225_v42 = vld [vmem:[#allocation2 + $0xf0] sm:$0xe] }
 0x388   : > { %v17991_v35 = vcombine.low %v17966_v54, %v17968_v18  ;;  %v12022_v56 = vcombine.low %v7225_v42, %v17854_v1  ;;  %v7230_v42 = vld [vmem:[#allocation2 + $0x118] sm:$0xe] }
 0x38a   : > { %10115 = vmatmul.mubr.bf16.gmra.mrb[48].mxu1 %v12230_v52  ;;  %v7215_v52 = vld [vmem:[#allocation2 + $0x80] sm:$0xe] }
 0x38b   : > { %10122 = vmatprep.mubr.bf16.mxu1 %v12240_v33  ;;  %v17896_v33 = vrot.slane %v12009_v21, 1  ;;  %v12012_v51 = vcombine.low %v7215_v52, %v17772_v29  ;;  %v17936_v21 = vcombine.low %v17906_v63, %v17908_v46  ;;  %v17939_v52 = vrot.slane %v12013_v6, 1 }
 0x38c   : > { %v7787_v6 = vrot.slane %v7785_v24, 1  ;;  %v17963_v29 = vrot.slane %v12016_v47, 1  ;;  %v7799_v24 = vshll.u32 %v17945_v34, 16  ;;  %v17982_v47 = vrot.slane %v12018_v57, 1 }
 0x38d   : > { %v17932_v13 = vrot.slane %v12012_v51, 1  ;;  %v12017_v51 = vcombine.low %v7220_v45, %v17813_v11  ;;  %v7790_v58 = vshrl.u32 %v17936_v21, 16  ;;  %v7792_v0 = vshll.u32 %v17936_v21, 16  ;;  %v7268_v21 = vld [vmem:[#allocation2 + $0x24] sm:$0x1] }
 0x38e   : > { %v8101_v45 = vshll.u32 %v17948_v43, 16  ;;  %20207 = vst [vmem:[#allocation44_spill] sm:$0xff] %v17982_v47 }
 0x38f   : > { %v17970_v50 = vrot.slane %v12017_v51, 1  ;;  %v7794_v57 = vrot.slane %v7792_v0, 1  ;;  %v7801_v0 = vrot.slane %v7799_v24, 1 }
 0x391   : > { %20206 = vst [vmem:[#allocation43_spill] sm:$0xff] %v17970_v50  ;;  %v18022_v24 = vor.u32 %v7794_v57, %v7790_v58  ;;  %v7231_v58 = vld [vmem:[#allocation2 + $0x120] sm:$0xe]  ;;  %v18040_v57 = vld [vmem:[#allocation2 + $0x38] sm:$0xf] }
 0x392   : > { %10123 = vmatmul.mubr.bf16.gmra.mrb[52].mxu1 %v12239_v10  ;;  %v12266_v10 = vcombine.low %v17852_v20, %v17858_v62  ;;  %v18055_v62 = vld [vmem:[#allocation2 + $0x40] sm:$0xf]  ;;  %v18276_v50 = vld [vmem:[#allocation2 + $0x24] sm:$0x1] }
 0x393   : > { %10130 = vmatprep.mubr.bf16.mxu1 %v12249_v31 }
 0x39a   : > { %10131 = vmatmul.mubr.bf16.gmra.mrb[56].mxu1 %v12248_v36  ;;  %v7769_v36 = vshrl.u32 %v17880_v59, 16  ;;  %v7222_v59 = vld [vmem:[#allocation2 + $0xc8] sm:$0xe] }
 0x39b   : > { %10138 = vmatprep.mubr.bf16.mxu1 %v12258_v41  ;;  %v7223_v41 = vld [vmem:[#allocation2 + $0xd0] sm:$0xe]  ;;  %v12019_v11 = vcombine.low %v7222_v59, %v17822_v17  ;;  %v12021_v59 = vcombine.low %v7224_v55, %v17848_v15  ;;  %v7228_v55 = vld [vmem:[#allocation2 + $0x108] sm:$0xe] }
 0x39c   : > { %v17960_v48 = vor.u32 %v7773_v37, %v7769_v36  ;;  %v7781_v37 = vor.u32 %v7780_v39, %v7776_v40  ;;  %v8108_v36 = vshll.u32 %v17951_v38, 16  ;;  %v12020_v17 = vcombine.low %v7223_v41, %v17840_v23  ;;  %v7226_v40 = vld [vmem:[#allocation2 + $0xf8] sm:$0xe]  ;;  %v17999_v41 = vld [vmem:[#allocation2 + $0x20] sm:$0xf] }
 0x39d   : > { %v17984_v51 = vrot.slane %v12019_v11, 1  ;;  %v17987_v39 = vor.u32 %v7787_v6, %v7783_v19  ;;  %v7227_v6 = vld [vmem:[#allocation2 + $0x100] sm:$0xe]  ;;  %v18006_v3 = vrot.slane %v12021_v59, 1  ;;  %v12023_v15 = vcombine.low %v7226_v40, %v17860_v4  ;;  %v7229_v4 = vld [vmem:[#allocation2 + $0x110] sm:$0xe] }
 0x39e   : > { %v18003_v19 = vrot.slane %v12020_v17, 1  ;;  %v12276_v11 = vcombine.low %v17960_v48, %v7781_v37  ;;  %v8103_v23 = vrot.slane %v8101_v45, 1  ;;  %v8110_v5 = vrot.slane %v8108_v36, 1  ;;  %v7269_v17 = vld [vmem:[#allocation2 + $0x2c] sm:$0x1] }
 0x39f   : > { %20208 = vst [vmem:[#allocation45_spill] sm:$0xff] %v17984_v51  ;;  %20210 = vst [vmem:[#allocation70_spill] sm:$0xff] %v18006_v3  ;;  %v18017_v37 = vrot.slane %v12022_v56, 1  ;;  %v18019_v59 = vrot.slane %v12023_v15, 1  ;;  %v12024_v1 = vcombine.low %v7227_v6, %v17872_v22  ;;  %v7806_v45 = vshll.u32 %v17991_v35, 16 }
 0x3a0   : > { %20209 = vst [vmem:[#allocation66_spill] sm:$0xff] %v18003_v19  ;;  %v8106_v36 = vshrl.u32 %v17951_v38, 16  ;;  %v18026_v40 = vld [vmem:[#allocation2 + $0x30] sm:$0xf]  ;;  %v12025_v27 = vcombine.low %v7228_v55, %v17874_v2  ;;  %v8099_v56 = vshrl.u32 %v17948_v43, 16  ;;  %v12033_v15 = vcombine.low %v17999_v41, %v7268_v21 }
 0x3a1   : > { %20211 = vst [vmem:[#allocation46_spill] sm:$0xff] %v18017_v37  ;;  %20212 = vst [vmem:[#allocation47_spill] sm:$0xff] %v18019_v59  ;;  %v18033_v6 = vrot.slane %v12024_v1, 1  ;;  %v12026_v2 = vcombine.low %v7229_v4, %v17891_v60  ;;  %v12027_v43 = vcombine.low %v7230_v42, %v17908_v46  ;;  %v7232_v21 = vld [vmem:[#allocation2 + $0x128] sm:$0xe]  ;;  %v7808_v4 = vrot.slane %v7806_v45, 1 }
 0x3a2   : > { %10139 = vmatmul.mubr.bf16.gmra.mrb[60].mxu1 %v12257_v28  ;;  %v7267_v28 = vld [vmem:[#allocation2 + $0x1c] sm:$0x1]  ;;  %v18038_v38 = vor.u32 %v8110_v5, %v8106_v36  ;;  %v18042_v48 = vrot.slane %v12025_v27, 1  ;;  %v18046_v55 = vor.u32 %v8103_v23, %v8099_v56  ;;  %v7272_v5 = vld [vmem:[#allocation2 + $0x44] sm:$0x1]  ;;  %v8122_v42 = vshll.u32 %v12033_v15, 16 }
 0x3a3   : > { %10146 = vmatprep.mubr.bf16.mxu1 %v12267_v14  ;;  %v18011_v31 = vcombine.low %v17994_v32, %v7267_v28  ;;  %v18013_v14 = vld [vmem:[#allocation2 + $0x28] sm:$0xf]  ;;  %v7270_v28 = vld [vmem:[#allocation2 + $0x34] sm:$0x1]  ;;  %20213 = vst [vmem:[#allocation73_spill] sm:$0xff] %v18033_v6  ;;  %v18061_v46 = vrot.slane %v12026_v2, 1  ;;  %v12037_v45 = vcombine.low %v18055_v62, %v7272_v5 }
 0x3a4   : > { %20214 = vst [vmem:[#allocation76_spill] sm:$0xff] %v18038_v38  ;;  %20215 = vst [vmem:[#allocation48_spill] sm:$0xff] %v18042_v48  ;;  %v18050_v22 = vcombine.low %v18013_v14, %v7269_v17  ;;  %v18053_v20 = vcombine.low %v18026_v40, %v7270_v28  ;;  %v18057_v27 = vld [vmem:[#allocation2 + $0x58] sm:$0xf]  ;;  %v18063_v23 = vrot.slane %v12027_v43, 1  ;;  %v7804_v17 = vshrl.u32 %v17991_v35, 16 }
 0x3a5   : > { %20216 = vst [vmem:[#allocation49_spill] sm:$0xff] %v18046_v55  ;;  %v8115_v1 = vshll.u32 %v18011_v31, 16  ;;  %20217 = vst [vmem:[#allocation50_spill] sm:$0xff] %v18061_v46  ;;  %v7273_v36 = vld [vmem:[#allocation2 + $0x5c] sm:$0x1]  ;;  %v12029_v28 = vcombine.low %v7232_v21, %v17968_v18  ;;  %v8113_v59 = vshrl.u32 %v18011_v31, 16  ;;  %v20222_v55 = vcombine.low %v17870_v12, %v17866_v16 }
 0x3a6   : > { %20218 = vst [vmem:[#allocation51_spill] sm:$0xff] %v18063_v23  ;;  %v8129_v35 = vshll.u32 %v18050_v22, 16  ;;  %v18083_v18 = vld [vmem:[#allocation2 + $0x60] sm:$0xf]  ;;  %v7274_v43 = vld [vmem:[#allocation2 + $0x64] sm:$0x1]  ;;  %v18091_v2 = vcombine.low %v18057_v27, %v7273_v36 }
 0x3a7   : > { %v18085_v21 = vrot.slane %v12029_v28, 1  ;;  %v8120_v38 = vshrl.u32 %v12033_v15, 16  ;;  %v8124_v28 = vrot.slane %v8122_v42, 1  ;;  %v18105_v23 = vld [vmem:[#allocation2 + $0x70] sm:$0xf]  ;;  %v8150_v5 = vshll.u32 %v12037_v45, 16 }
 0x3a8   : > { %v7276_v46 = vld [vmem:[#allocation2 + $0x74] sm:$0x1]  ;;  %v18107_v31 = vld [vmem:[#allocation2 + $0x78] sm:$0xf]  ;;  %v8131_v16 = vrot.slane %v8129_v35, 1  ;;  %v8148_v48 = vshrl.u32 %v12037_v45, 16 }
 0x3a9   : > { %20221 = vst [vmem:[#allocation53_spill] sm:$0xff] %v18085_v21  ;;  %v18111_v42 = vor.u32 %v8124_v28, %v8120_v38  ;;  %v7278_v38 = vld [vmem:[#allocation2 + $0x84] sm:$0x1]  ;;  %v8152_v6 = vrot.slane %v8150_v5, 1  ;;  %v18141_v37 = vld [vmem:[#allocation2 + $0x90] sm:$0xf]  ;;  %v20229_v5 = vcombine.low %v17889_v30, %v17906_v63 }
 0x3aa   : > { %10147 = vmatmul.mubr.bf16.gmra.mrb[64].mxu1 %v12266_v10  ;;  %v7271_v10 = vld [vmem:[#allocation2 + $0x3c] sm:$0x1]  ;;  %v7282_v30 = vld [vmem:[#allocation2 + $0xb4] sm:$0x1] }
 0x3ab   : > { %10154 = vmatprep.mubr.bf16.mxu1 %v12276_v11  ;;  %v12028_v11 = vcombine.low %v7231_v58, %v17927_v25  ;;  %v18069_v56 = vcombine.low %v18040_v57, %v7271_v10  ;;  %v20220_v25 = vshrl.u32 %v17945_v34, 16  ;;  %v12285_v10 = vcombine.low %v17987_v39, %v18022_v24  ;;  %v18093_v34 = vld [vmem:[#allocation2 + $0x68] sm:$0xf]  ;;  %20224 = vst [vmem:[#allocation55_spill] sm:$0xff] %v18111_v42  ;;  %v14280_v3 = vld [vmem:[#allocation2 + $0x1c] sm:$0x1] }
 0x3ac   : > { %v7809_v39 = vor.u32 %v7808_v4, %v7804_v17  ;;  %v8127_v17 = vshrl.u32 %v18050_v22, 16  ;;  %v8134_v4 = vshrl.u32 %v18053_v20, 16  ;;  %v8157_v24 = vshll.u32 %v18091_v2, 16  ;;  %v18128_v22 = vld [vmem:[#allocation2 + $0x88] sm:$0xf] }
 0x3ad   : > { %v18073_v60 = vrot.slane %v12028_v11, 1  ;;  %v18079_v58 = vor.u32 %v7801_v0, %v20220_v25  ;;  %v8136_v11 = vshll.u32 %v18053_v20, 16  ;;  %v8117_v0 = vrot.slane %v8115_v1, 1  ;;  %v7275_v25 = vld [vmem:[#allocation2 + $0x6c] sm:$0x1] }
 0x3ae   : > { %v8143_v36 = vshll.u32 %v18069_v56, 16  ;;  %v12039_v1 = vcombine.low %v18083_v18, %v7274_v43  ;;  %v18114_v12 = vcombine.low %v18093_v34, %v7275_v25  ;;  %v18126_v25 = vld [vmem:[#allocation2 + $0x10] sm:$0xe]  ;;  %v18130_v20 = vor.u32 %v8131_v16, %v8127_v17  ;;  %v7280_v16 = vld [vmem:[#allocation2 + $0x94] sm:$0x1] }
 0x3af   : > { %20219 = vst [vmem:[#allocation52_spill] sm:$0xff] %v18073_v60  ;;  %v18109_v15 = vor.u32 %v8117_v0, %v8113_v59  ;;  %v8138_v43 = vrot.slane %v8136_v11, 1  ;;  %v12041_v59 = vcombine.low %v18105_v23, %v7276_v46  ;;  %v18122_v0 = vld [vmem:[#allocation2 + $0x80] sm:$0xf]  ;;  %v7279_v46 = vld [vmem:[#allocation2 + $0x8c] sm:$0x1]  ;;  %v12294_v35 = vcombine.low %v18079_v58, %v7809_v39 }
 0x3b0   : > { %v8164_v28 = vshll.u32 %v12039_v1, 16  ;;  %20225 = vst [vmem:[#allocation57_spill] sm:$0xff] %v18130_v20  ;;  %v8141_v60 = vshrl.u32 %v18069_v56, 16  ;;  %v8171_v42 = vshll.u32 %v18114_v12, 16  ;;  %v18145_v17 = vld [vmem:[#allocation2 + $0x18] sm:$0xe]  ;;  %v18151_v45 = vor.u32 %v8152_v6, %v8148_v48 }
 0x3b1   : > { %20223 = vst [vmem:[#allocation54_spill] sm:$0xff] %v18109_v15  ;;  %v18132_v11 = vor.u32 %v8138_v43, %v8134_v4  ;;  %v12043_v15 = vcombine.low %v18122_v0, %v7278_v38  ;;  %v18147_v4 = vld [vmem:[#allocation2 + $0xa8] sm:$0xf]  ;;  %v8159_v58 = vrot.slane %v8157_v24, 1  ;;  %v18157_v39 = vcombine.low %v18128_v22, %v7279_v46  ;;  %v7281_v43 = vld [vmem:[#allocation2 + $0xac] sm:$0x1] }
 0x3b2   : > { %10155 = vmatmul.mubr.bf16.gmra.mrb[68].mxu1 %v20222_v55  ;;  %v7277_v55 = vld [vmem:[#allocation2 + $0x7c] sm:$0x1]  ;;  %20228 = vst [vmem:[#allocation81_spill] sm:$0xff] %v18151_v45  ;;  %v8155_v38 = vshrl.u32 %v18091_v2, 16  ;;  %v14279_v20 = vld [vmem:[#allocation2 + $0x14] sm:$0x1]  ;;  %v12045_v6 = vcombine.low %v18141_v37, %v7280_v16  ;;  %v12001_v19 = vcombine.low %v18145_v17, %v14280_v3 }
 0x3b3   : > { %10162 = vmatprep.mubr.bf16.mxu1 %v12285_v10  ;;  %20226 = vst [vmem:[#allocation58_spill] sm:$0xff] %v18132_v11  ;;  %v8145_v10 = vrot.slane %v8143_v36, 1  ;;  %v18135_v21 = vcombine.low %v18107_v31, %v7277_v55  ;;  %v8178_v55 = vshll.u32 %v12041_v59, 16  ;;  %v8162_v36 = vshrl.u32 %v12039_v1, 16  ;;  %v18163_v24 = vld [vmem:[#allocation2 + $0xb0] sm:$0xf] }
 0x3b4   : > { %v8166_v11 = vrot.slane %v8164_v28, 1  ;;  %v18167_v46 = vld [vmem:[#allocation2 + $0xb8] sm:$0xf]  ;;  %v18169_v2 = vor.u32 %v8159_v58, %v8155_v38  ;;  %v7283_v28 = vld [vmem:[#allocation2 + $0xbc] sm:$0x1]  ;;  %v8176_v16 = vshrl.u32 %v12041_v59, 16  ;;  %v12047_v45 = vcombine.low %v18163_v24, %v7282_v30 }
 0x3b5   : > { %v18149_v56 = vor.u32 %v8145_v10, %v8141_v60  ;;  %v12000_v60 = vcombine.low %v18126_v25, %v14279_v20  ;;  %v8185_v48 = vshll.u32 %v18135_v21, 16  ;;  %v8192_v10 = vshll.u32 %v12043_v15, 16  ;;  %v18180_v58 = vld [vmem:[#allocation2 + $0xc0] sm:$0xf]  ;;  %v7285_v17 = vld [vmem:[#allocation2 + $0xcc] sm:$0x1] }
 0x3b6   : > { %20230 = vst [vmem:[#allocation60_spill] sm:$0xff] %v18169_v2  ;;  %v18171_v1 = vor.u32 %v8166_v11, %v8162_v36  ;;  %v18174_v25 = vcombine.low %v18147_v4, %v7281_v43  ;;  %v8169_v20 = vshrl.u32 %v18114_v12, 16  ;;  %v8199_v63 = vshll.u32 %v18157_v39, 16  ;;  %v7284_v11 = vld [vmem:[#allocation2 + $0xc4] sm:$0x1] }
 0x3b7   : > { %20227 = vst [vmem:[#allocation77_spill] sm:$0xff] %v18149_v56  ;;  %v8206_v36 = vshll.u32 %v12045_v6, 16  ;;  %v18184_v43 = vld [vmem:[#allocation2 + $0xc8] sm:$0xf]  ;;  %v8187_v59 = vrot.slane %v8185_v48, 1  ;;  %v18191_v3 = vcombine.low %v18167_v46, %v7283_v28  ;;  %v8190_v30 = vshrl.u32 %v12043_v15, 16 }
 0x3b8   : > { %20231 = vst [vmem:[#allocation62_spill] sm:$0xff] %v18171_v1  ;;  %v8194_v56 = vrot.slane %v8192_v10, 1  ;;  %v18194_v51 = vrot.slane %v12000_v60, 1  ;;  %v18198_v1 = vcombine.low %v18180_v58, %v7284_v11  ;;  %v20234_v28 = vcombine.low %v17925_v61, %v17966_v54  ;;  %v18207_v15 = vld [vmem:[#allocation2 + $0xd8] sm:$0xf] }
 0x3b9   : > { %20235 = vst [vmem:[#allocation63_spill] sm:$0xff] %v18207_v15  ;;  %v18217_v11 = vcombine.low %v18184_v43, %v7285_v17  ;;  %v7287_v48 = vld [vmem:[#allocation2 + $0xdc] sm:$0x1]  ;;  %v8204_v61 = vshrl.u32 %v12045_v6, 16  ;;  %v8208_v54 = vrot.slane %v8206_v36, 1 }
 0x3ba   : > { %10163 = vmatmul.mubr.bf16.gmra.mrb[72].mxu1 %v20229_v5  ;;  %v8180_v5 = vrot.slane %v8178_v55, 1  ;;  %v8183_v55 = vshrl.u32 %v18135_v21, 16  ;;  %v8220_v21 = vshll.u32 %v12047_v45, 16  ;;  %v18211_v10 = vor.u32 %v8194_v56, %v8190_v30 }
 0x3bb   : > { %10170 = vmatprep.mubr.bf16.mxu1 %v12294_v35  ;;  %v8173_v35 = vrot.slane %v8171_v42, 1  ;;  %v8213_v42 = vshll.u32 %v18174_v25, 16  ;;  %v8234_v17 = vshll.u32 %v18198_v1, 16  ;;  %v18240_v30 = vcombine.low %v18207_v15, %v7287_v48  ;;  %v7290_v48 = vld [vmem:[#allocation2 + $0x104] sm:$0x1] }
 0x3bc   : > { %v18188_v12 = vor.u32 %v8180_v5, %v8176_v16  ;;  %v18209_v60 = vor.u32 %v8187_v59, %v8183_v55  ;;  %20237 = vst [vmem:[#allocation67_spill] sm:$0xff] %v18211_v10  ;;  %v8201_v16 = vrot.slane %v8199_v63, 1  ;;  %v20238_v5 = vcombine.low %v17910_v26, %v17912_v9  ;;  %v18226_v63 = vld [vmem:[#allocation2 + $0xe0] sm:$0xf]  ;;  %v7288_v55 = vld [vmem:[#allocation2 + $0xe4] sm:$0x1] }
 0x3bd   : > { %v18186_v38 = vor.u32 %v8173_v35, %v8169_v20  ;;  %v18200_v35 = vld [vmem:[#allocation2 + $0xd0] sm:$0xf]  ;;  %v7286_v20 = vld [vmem:[#allocation2 + $0xd4] sm:$0x1]  ;;  %v8227_v59 = vshll.u32 %v18191_v3, 16  ;;  %20239 = vst [vmem:[#allocation69_spill] sm:$0xff] %v18226_v63 }
 0x3be   : > { %20233 = vst [vmem:[#allocation87_spill] sm:$0xff] %v18188_v12  ;;  %20236 = vst [vmem:[#allocation65_spill] sm:$0xff] %v18209_v60  ;;  %v8197_v12 = vshrl.u32 %v18157_v39, 16  ;;  %v18224_v56 = vcombine.low %v18200_v35, %v7286_v20  ;;  %v18230_v9 = vld [vmem:[#allocation2 + $0x20] sm:$0xe]  ;;  %v8215_v36 = vrot.slane %v8213_v42, 1 }
 0x3bf   : > { %20232 = vst [vmem:[#allocation85_spill] sm:$0xff] %v18186_v38  ;;  %v18233_v39 = vld [vmem:[#allocation2 + $0xf8] sm:$0xf]  ;;  %v7289_v20 = vld [vmem:[#allocation2 + $0xfc] sm:$0x1]  ;;  %v8218_v38 = vshrl.u32 %v12047_v45, 16 }
 0x3c0   : > { %v18235_v6 = vor.u32 %v8201_v16, %v8197_v12  ;;  %v8222_v2 = vrot.slane %v8220_v21, 1  ;;  %v14035_v26 = vld [vmem:[%s19647_s4 + $0x100] sm:$0xff]   ;;  %v8241_v12 = vshll.u32 %v18217_v11, 16  ;;  %v18250_v16 = vcombine.low %v18226_v63, %v7288_v55  ;;  %v14044_v45 = vld [vmem:[%s19647_s4 + $0x148] sm:$0xff]  }
 0x3c1   : > { %v18252_v42 = vld [vmem:[#allocation2 + $0x100] sm:$0xf]  ;;  %v18259_v21 = vld [vmem:[#allocation2 + $0x28] sm:$0xe]  ;;  %v8229_v60 = vrot.slane %v8227_v59, 1  ;;  %v18269_v47 = vcombine.low %v18233_v39, %v7289_v20  ;;  %v20245_v63 = vcombine.low %v17832_v53, %v17834_v49  ;;  %v20246_v53 = vcombine.low %v17994_v32, %v17999_v41 }
 0x3c2   : > { %10171 = vmatmul.mubr.bf16.gmra.mrb[76].mxu1 %v20234_v28  ;;  %v18220_v28 = vrot.slane %v12001_v19, 1  ;;  %20240 = vst [vmem:[#allocation71_spill] sm:$0xff] %v18235_v6  ;;  %v18237_v19 = vor.u32 %v8208_v54, %v8204_v61  ;;  %v8248_v61 = vshll.u32 %v18224_v56, 16  ;;  %v18262_v54 = vld [vmem:[#allocation2 + $0x108] sm:$0xf]  ;;  %v18266_v55 = vor.u32 %v8222_v2, %v8218_v38 }
 0x3c3   : > { %10211 = vmatprep.mubr.bf16.mxu1 %v20238_v5  ;;  %v8211_v5 = vshrl.u32 %v18174_v25, 16  ;;  %20242 = vst [vmem:[#allocation75_spill] sm:$0xff] %v18262_v54  ;;  %v7291_v15 = vld [vmem:[#allocation2 + $0x10c] sm:$0x1]  ;;  %v8225_v25 = vshrl.u32 %v18191_v3, 16  ;;  %v8236_v6 = vrot.slane %v8234_v17, 1  ;;  %v18282_v59 = vcombine.low %v18252_v42, %v7290_v48 }
 0x3c4   : > { %20241 = vst [vmem:[#allocation74_spill] sm:$0xff] %v18237_v19  ;;  %20244 = vst [vmem:[#allocation96_spill] sm:$0xff] %v18266_v55  ;;  %v8232_v19 = vshrl.u32 %v18198_v1, 16  ;;  %v8255_v38 = vshll.u32 %v18240_v30, 16  ;;  %v7292_v3 = vld [vmem:[#allocation2 + $0x114] sm:$0x1]  ;;  %v18305_v32 = vcombine.low %v18262_v54, %v7291_v15 }
 0x3c5   : > { %v18264_v10 = vor.u32 %v8215_v36, %v8211_v5  ;;  %v18284_v36 = vld [vmem:[#allocation2 + $0x110] sm:$0xf]  ;;  %v14047_v49 = vld [vmem:[%s19647_s4 + $0x108] sm:$0xff]   ;;  %v18295_v17 = vld [vmem:[#allocation2 + $0x118] sm:$0xf]  ;;  %v18297_v20 = vor.u32 %v8229_v60, %v8225_v25  ;;  %v8243_v48 = vrot.slane %v8241_v12, 1 }
 0x3c6   : > { %20247 = vst [vmem:[#allocation99_spill] sm:$0xff] %v18295_v17  ;;  %v18299_v5 = vor.u32 %v8236_v6, %v8232_v19  ;;  %v7293_v41 = vld [vmem:[#allocation2 + $0x11c] sm:$0x1]  ;;  %v8246_v1 = vshrl.u32 %v18224_v56, 16  ;;  %v8250_v2 = vrot.slane %v8248_v61, 1  ;;  %v8269_v6 = vshll.u32 %v18269_v47, 16 }
 0x3c7   : > { %20243 = vst [vmem:[#allocation79_spill] sm:$0xff] %v18264_v10  ;;  %20248 = vst [vmem:[#allocation100_spill] sm:$0xff] %v18297_v20  ;;  %v14282_v55 = vld [vmem:[#allocation2 + $0x2c] sm:$0x1]  ;;  %v12057_v19 = vcombine.low %v18284_v36, %v7292_v3  ;;  %v18312_v12 = vld [vmem:[#allocation2 + $0x120] sm:$0xf] }
 0x3c8   : > { %20249 = vst [vmem:[#allocation104_spill] sm:$0xff] %v18299_v5  ;;  %v12003_v60 = vcombine.low %v18259_v21, %v14282_v55  ;;  %20250 = vst [vmem:[#allocation80_spill] sm:$0xff] %v18312_v12  ;;  %v7294_v25 = vld [vmem:[#allocation2 + $0x124] sm:$0x1]  ;;  %v18317_v10 = vld [vmem:[#allocation2 + $0x128] sm:$0xf]  ;;  %v18321_v56 = vor.u32 %v8250_v2, %v8246_v1  ;;  %v18327_v55 = vcombine.low %v18295_v17, %v7293_v41 }
 0x3c9   : > { %v8257_v61 = vrot.slane %v8255_v38, 1  ;;  %v14059_v21 = vld [vmem:[%s19647_s4 + $0x110] sm:$0xff]   ;;  %v7295_v3 = vld [vmem:[#allocation2 + $0x12c] sm:$0x1]  ;;  %v8253_v15 = vshrl.u32 %v18240_v30, 16  ;;  %v8260_v5 = vshrl.u32 %v18250_v16, 16  ;;  %v12059_v1 = vcombine.low %v18312_v12, %v7294_v25 }
 0x3ca   : > { %10212 = vmatmul.mubr.bf16.vlgmr.msra.gmra.mrb[80].mxu1 %v20245_v63  ;;  %v8262_v63 = vshll.u32 %v18250_v16, 16  ;;  %v14068_v2 = vld [vmem:[%s19647_s4 + $0x158] sm:$0xff]   ;;  %v8283_v38 = vshll.u32 %v18305_v32, 16  ;;  %v7296_v41 = vld [vmem:[#allocation2 + $0x134] sm:$0x1]  ;;  %v8290_v16 = vshll.u32 %v12057_v19, 16  ;;  %v20252_v12 = vcombine.low %v18013_v14, %v18026_v40 }
 0x3cb   : > { %12843 = vmatpush3.bf16.msra.mxu1 %v14035_v26  ;;  %10219 = vmatprep.mubr.bf16.mxu1 %v20246_v53  ;;  %v14056_v26 = vld [vmem:[%s19647_s4 + $0x150] sm:$0xff]   ;;  %v8239_v53 = vshrl.u32 %v18217_v11, 16  ;;  %v8274_v17 = vshrl.u32 %v18282_v59, 16  ;;  %v7911_v54 = vrot.slane %v12003_v60, 1  ;;  %v14080_v14 = vld [vmem:[%s19647_s4 + $0x160] sm:$0xff]   ;;  %v8304_v40 = vshll.u32 %v12059_v1, 16 }
 0x3cc   : > { %12844 = vmatprep.subr.bf16.mxu1 %v14044_v45  ;;  %v8276_v45 = vshll.u32 %v18282_v59, 16  ;;  %v8264_v20 = vrot.slane %v8262_v63, 1  ;;  %v18342_v63 = vor.u32 %v8257_v61, %v8253_v15  ;;  %v7207_v30 = vld [vmem:[#allocation2 + $0x30] sm:$0xe]  ;;  %v8281_v15 = vshrl.u32 %v18305_v32, 16 }
 0x3cd   : > { %v18319_v11 = vor.u32 %v8243_v48, %v8239_v53  ;;  %v12169_v48 = vcombine.low %v18194_v51, %v18220_v28  ;;  %v8271_v51 = vrot.slane %v8269_v6, 1  ;;  %v12060_v28 = vcombine.low %v18317_v10, %v7295_v3 }
 0x3ce   : > { %v18344_v53 = vor.u32 %v8264_v20, %v8260_v5  ;;  %v8278_v25 = vrot.slane %v8276_v45, 1  ;;  %v14071_v20 = vld [vmem:[%s19647_s4 + $0x118] sm:$0xff]   ;;  %v8297_v5 = vshll.u32 %v18327_v55, 16  ;;  %v8288_v45 = vshrl.u32 %v12057_v19, 16 }
 0x3cf   : > { %12845 = vmatpush3.bf16.msra.mxu1 %v14047_v49  ;;  %v18338_v49 = vld [vmem:[#allocation2 + $0x130] sm:$0xf]  ;;  %v8292_v61 = vrot.slane %v8290_v16, 1 }
 0x3d0   : > { %12846 = vmatprep.subr.bf16.mxu1 %v14056_v26  ;;  %20251 = vst [vmem:[#allocation82_spill] sm:$0xff] %v18344_v53  ;;  %v8267_v26 = vshrl.u32 %v18269_v47, 16  ;;  %v12061_v6 = vcombine.low %v18338_v49, %v7296_v41  ;;  %v18364_v60 = vor.u32 %v8278_v25, %v8274_v17  ;;  %v8311_v41 = vshll.u32 %v12060_v28, 16  ;;  %v7208_v53 = vld [vmem:[#allocation2 + $0x38] sm:$0xe]  ;;  %v14083_v17 = vld [vmem:[%s19647_s4 + $0x120] sm:$0xff]  }
 0x3d1   : > { %v18377_v19 = vor.u32 %v8292_v61, %v8288_v45  ;;  %v8299_v16 = vrot.slane %v8297_v5, 1  ;;  %v12188_v25 = vcombine.low %v18040_v57, %v18055_v62  ;;  %v7209_v45 = vld [vmem:[#allocation2 + $0x50] sm:$0xe]  ;;  %v7210_v61 = vld [vmem:[#allocation2 + $0x58] sm:$0xe] }
 0x3d2   : > { %10220 = vmatmul.mubr.bf16.gmra.mrb[84].mxu1 %v12169_v48  ;;  %v18362_v59 = vor.u32 %v8271_v51, %v8267_v26  ;;  %v14283_v48 = vld [vmem:[#allocation2 + $0x34] sm:$0x1]  ;;  %v8302_v51 = vshrl.u32 %v12059_v1, 16  ;;  %v8306_v26 = vrot.slane %v8304_v40, 1  ;;  %v8309_v1 = vshrl.u32 %v12060_v28, 16 }
 0x3d3   : > { %10227 = vmatprep.mubr.bf16.mxu1 %v20252_v12  ;;  %12847 = vmatpush3.bf16.msra.mxu1 %v14059_v21  ;;  %v8285_v12 = vrot.slane %v8283_v38, 1  ;;  %v20253_v21 = vcombine.low %v18230_v9, %v18276_v50  ;;  %v8318_v38 = vshll.u32 %v12061_v6, 16  ;;  %v14092_v9 = vld [vmem:[%s19647_s4 + $0x168] sm:$0xff]   ;;  %v8316_v57 = vshrl.u32 %v12061_v6, 16 }
 0x3d4   : > { %12848 = vmatprep.subr.bf16.mxu1 %v14068_v2  ;;  %v12004_v2 = vcombine.low %v7207_v30, %v14283_v48  ;;  %v8295_v30 = vshrl.u32 %v18327_v55, 16  ;;  %v14095_v55 = vld [vmem:[%s19647_s4 + $0x128] sm:$0xff]  }
 0x3d5   : > { %v7910_v3 = vrot.slane %v20253_v21, 1  ;;  %v18375_v32 = vor.u32 %v8285_v12, %v8281_v15  ;;  %v14284_v12 = vld [vmem:[#allocation2 + $0x3c] sm:$0x1]  ;;  %v8320_v62 = vrot.slane %v8318_v38, 1  ;;  %v7397_v28 = vld [vmem:[#allocation2 + $0x28] sm:$0xe] }
 0x3d6   : > { %v12005_v15 = vcombine.low %v7208_v53, %v14284_v12  ;;  %v18387_v5 = vor.u32 %v8299_v16, %v8295_v30  ;;  %v7912_v40 = vrot.slane %v12004_v2, 1  ;;  %v14104_v53 = vld [vmem:[%s19647_s4 + $0x170] sm:$0xff]   ;;  %v7396_v16 = vld [vmem:[#allocation2 + $0x20] sm:$0xe]  ;;  %v20275_v21 = vld [vmem:[#allocation69_spill] sm:$0xff] }
 0x3d7   : > { %12849 = vmatpush3.bf16.msra.mxu1 %v14071_v20  ;;  %v12178_v50 = vcombine.low %v7910_v3, %v7911_v54  ;;  %v18389_v54 = vor.u32 %v8306_v26, %v8302_v51  ;;  %v7364_v3 = vld [vmem:[#allocation2 + $0x24] sm:$0x1]  ;;  %v14285_v38 = vld [vmem:[#allocation2 + $0x54] sm:$0x1]  ;;  %v14286_v51 = vld [vmem:[#allocation2 + $0x5c] sm:$0x1] }
 0x3d8   : > { %12850 = vmatprep.subr.bf16.mxu1 %v14080_v14  ;;  %v8313_v14 = vrot.slane %v8311_v41, 1  ;;  %v18401_v41 = vor.u32 %v8320_v62, %v8316_v57  ;;  %v7913_v6 = vrot.slane %v12005_v15, 1  ;;  %v12006_v2 = vcombine.low %v7209_v45, %v14285_v38  ;;  %v14119_v57 = vld [vmem:[%s19647_s4 + $0x138] sm:$0xff]   ;;  %v7369_v62 = vld [vmem:[#allocation2 + $0x4c] sm:$0x1] }
 0x3d9   : > { %v12007_v26 = vcombine.low %v7210_v61, %v14286_v51  ;;  %v12128_v12 = vcombine.low %v7396_v16, %v7364_v3  ;;  %v7401_v3 = vld [vmem:[#allocation2 + $0x48] sm:$0xe]  ;;  %v7404_v51 = vld [vmem:[#allocation2 + $0x70] sm:$0xe] }
 0x3da   : > { %10228 = vmatmul.mubr.bf16.gmra.mrb[88].mxu1 %v12178_v50  ;;  %v18399_v48 = vor.u32 %v8313_v14, %v8309_v1  ;;  %v14107_v50 = vld [vmem:[%s19647_s4 + $0x130] sm:$0xff]   ;;  %v12187_v30 = vcombine.low %v7912_v40, %v7913_v6  ;;  %v12197_v14 = vcombine.low %v18057_v27, %v18083_v18  ;;  %v7368_v1 = vld [vmem:[#allocation2 + $0x44] sm:$0x1]  ;;  %v7400_v40 = vld [vmem:[#allocation2 + $0x40] sm:$0xe]  ;;  %v7914_v61 = vrot.slane %v12006_v2, 1 }
 0x3db   : > { %10235 = vmatprep.mubr.bf16.mxu1 %v12188_v25  ;;  %12851 = vmatpush3.bf16.msra.mxu1 %v14083_v17  ;;  %v7365_v17 = vld [vmem:[#allocation2 + $0x2c] sm:$0x1]  ;;  %v14116_v25 = vld [vmem:[%s19647_s4 + $0x178] sm:$0xff]   ;;  %v18413_v45 = vrot.slane %v12128_v12, 1  ;;  %v14127_v27 = vld [vmem:[%s19647_s4 + $0x1c0] sm:$0xff]   ;;  %v12133_v16 = vcombine.low %v7401_v3, %v7369_v62  ;;  %v12206_v6 = vcombine.low %v18093_v34, %v18105_v23  ;;  %v20260_v34 = vcombine.low %v17894_v8, %v17896_v33 }
 0x3dc   : > { %12852 = vmatprep.subr.bf16.mxu1 %v14092_v9  ;;  %v12129_v15 = vcombine.low %v7397_v28, %v7365_v17  ;;  %v12132_v17 = vcombine.low %v7400_v40, %v7368_v1  ;;  %v7408_v62 = vld [vmem:[#allocation2 + $0x90] sm:$0xe]  ;;  %v7412_v8 = vld [vmem:[#allocation2 + $0xc0] sm:$0xe]  ;;  %v20263_v33 = vcombine.low %v17916_v7, %v17918_v44  ;;  %v7384_v7 = vld [vmem:[#allocation2 + $0xe4] sm:$0x1]  ;;  %v12233_v44 = vcombine.low %v18147_v4, %v18163_v24 }
 0x3dd   : > { %20254 = vst [vmem:[#allocation83_spill] sm:$0xff] %v18413_v45  ;;  %v18429_v2 = vrot.slane %v12133_v16, 1  ;;  %v7380_v16 = vld [vmem:[#allocation2 + $0xc4] sm:$0x1]  ;;  %v7403_v24 = vld [vmem:[#allocation2 + $0x68] sm:$0xe] }
 0x3de   : > { %v18427_v38 = vrot.slane %v12132_v17, 1  ;;  %v7379_v40 = vld [vmem:[#allocation2 + $0xbc] sm:$0x1]  ;;  %v7406_v18 = vld [vmem:[#allocation2 + $0x80] sm:$0xe]  ;;  %v20276_v20 = vld [vmem:[#allocation63_spill] sm:$0xff] }
 0x3df   : > { %12853 = vmatpush3.bf16.msra.mxu1 %v14095_v55  ;;  %v18415_v55 = vrot.slane %v12129_v15, 1  ;;  %20257 = vst [vmem:[#allocation9_spill] sm:$0xff] %v18429_v2  ;;  %v7407_v9 = vld [vmem:[#allocation2 + $0x88] sm:$0xe]  ;;  %v12260_v47 = vcombine.low %v20276_v20, %v20275_v21  ;;  %v7386_v21 = vld [vmem:[#allocation2 + $0x104] sm:$0x1] }
 0x3e0   : > { %12854 = vmatprep.subr.bf16.mxu1 %v14104_v53  ;;  %v7915_v53 = vrot.slane %v12007_v26, 1  ;;  %20256 = vst [vmem:[#allocation8_spill] sm:$0xff] %v18427_v38  ;;  %v7373_v26 = vld [vmem:[#allocation2 + $0x7c] sm:$0x1]  ;;  %v7422_v2 = vld [vmem:[#allocation2 + $0x120] sm:$0xe] }
 0x3e1   : > { %20255 = vst [vmem:[#allocation84_spill] sm:$0xff] %v18415_v55 }
 0x3e2   : > { %10236 = vmatmul.mubr.bf16.gmra.mrb[92].mxu1 %v12187_v30  ;;  %v12196_v28 = vcombine.low %v7914_v61, %v7915_v53  ;;  %v7372_v30 = vld [vmem:[#allocation2 + $0x74] sm:$0x1]  ;;  %v7377_v61 = vld [vmem:[#allocation2 + $0x9c] sm:$0x1]  ;;  %v7409_v53 = vld [vmem:[#allocation2 + $0x98] sm:$0xe] }
 0x3e3   : > { %10243 = vmatprep.mubr.bf16.mxu1 %v12197_v14  ;;  %12855 = vmatpush3.bf16.msra.mxu1 %v14107_v50  ;;  %v12136_v12 = vcombine.low %v7404_v51, %v7372_v30  ;;  %v12215_v14 = vcombine.low %v18107_v31, %v18122_v0  ;;  %v12141_v3 = vcombine.low %v7409_v53, %v7377_v61  ;;  %v7385_v61 = vld [vmem:[#allocation2 + $0xec] sm:$0x1]  ;;  %v7416_v53 = vld [vmem:[#allocation2 + $0xe0] sm:$0xe]  ;;  %v7382_v50 = vld [vmem:[#allocation2 + $0xd4] sm:$0x1] }
 0x3e4   : > { %12856 = vmatprep.subr.bf16.mxu1 %v14116_v25  ;;  %v7405_v25 = vld [vmem:[#allocation2 + $0x78] sm:$0xe]  ;;  %v12224_v31 = vcombine.low %v18128_v22, %v18141_v37  ;;  %v12144_v51 = vcombine.low %v7412_v8, %v7380_v16  ;;  %v14287_v22 = vld [vmem:[#allocation2 + $0xa4] sm:$0x1]  ;;  %v12148_v8 = vcombine.low %v7416_v53, %v7384_v7  ;;  %v7392_v53 = vld [vmem:[#allocation2 + $0x134] sm:$0x1] }
 0x3e5   : > { %v12137_v15 = vcombine.low %v7405_v25, %v7373_v26  ;;  %v18435_v1 = vrot.slane %v12136_v12, 1  ;;  %v18448_v0 = vrot.slane %v12141_v3, 1  ;;  %v7217_v26 = vld [vmem:[#allocation2 + $0xa0] sm:$0xe]  ;;  %v7218_v25 = vld [vmem:[#allocation2 + $0xa8] sm:$0xe]  ;;  %v20266_v3 = vcombine.low %v17932_v13, %v17939_v52 }
 0x3e6   : > { %v7389_v13 = vld [vmem:[#allocation2 + $0x11c] sm:$0x1]  ;;  %v7421_v52 = vld [vmem:[#allocation2 + $0x118] sm:$0xe] }
 0x3e7   : > { %12857 = vmatpush3.bf16.msra.mxu1 %v14119_v57  ;;  %20258 = vst [vmem:[#allocation10_spill] sm:$0xff] %v18435_v1  ;;  %v18437_v23 = vrot.slane %v12137_v15, 1  ;;  %v7376_v57 = vld [vmem:[#allocation2 + $0x94] sm:$0x1]  ;;  %20262 = vst [vmem:[#allocation114_spill] sm:$0xff] %v18448_v0  ;;  %v18455_v15 = vrot.slane %v12144_v51, 1 }
 0x3e8   : > { %12954 = vmatprep.subr.bf16.mxu1 %v14127_v27  ;;  %v12140_v27 = vcombine.low %v7408_v62, %v7376_v57  ;;  %v7388_v51 = vld [vmem:[#allocation2 + $0x114] sm:$0x1] }
 0x3e9   : > { %20259 = vst [vmem:[#allocation11_spill] sm:$0xff] %v18437_v23  ;;  %20264 = vst [vmem:[#allocation123_spill] sm:$0xff] %v18455_v15  ;;  %v7415_v15 = vld [vmem:[#allocation2 + $0xd8] sm:$0xe]  ;;  %v7418_v23 = vld [vmem:[#allocation2 + $0x100] sm:$0xe] }
 0x3ea   : > { %10244 = vmatmul.mubr.bf16.gmra.mrb[96].mxu1 %v12196_v28  ;;  %v18444_v17 = vrot.slane %v12140_v27, 1  ;;  %v7381_v28 = vld [vmem:[#allocation2 + $0xcc] sm:$0x1]  ;;  %v7417_v27 = vld [vmem:[#allocation2 + $0xe8] sm:$0xe] }
 0x3eb   : > { %10251 = vmatprep.mubr.bf16.mxu1 %v12206_v6  ;;  %v7413_v6 = vld [vmem:[#allocation2 + $0xc8] sm:$0xe] }
 0x3ec   : > { %20261 = vst [vmem:[#allocation113_spill] sm:$0xff] %v18444_v17  ;;  %v12145_v12 = vcombine.low %v7413_v6, %v7381_v28  ;;  %v18466_v28 = vrot.slane %v12148_v8, 1 }
 0x3ee   : > { %v18457_v37 = vrot.slane %v12145_v12, 1  ;;  %20267 = vst [vmem:[#allocation88_spill] sm:$0xff] %v18466_v28 }
 0x3f0   : > { %20265 = vst [vmem:[#allocation86_spill] sm:$0xff] %v18457_v37  ;;  %v20281_v37 = vld [vmem:[#allocation45_spill] sm:$0xff] }
 0x3f2   : > { %10252 = vmatmul.mubr.bf16.gmra.mrb[100].mxu1 %v20260_v34  ;;  %v14288_v34 = vld [vmem:[#allocation2 + $0xac] sm:$0x1] }
 0x3f3   : > { %10259 = vmatprep.mubr.bf16.mxu1 %v12215_v14  ;;  %v12014_v14 = vcombine.low %v7217_v26, %v14287_v22  ;;  %v12015_v57 = vcombine.low %v7218_v25, %v14288_v34  ;;  %v7420_v26 = vld [vmem:[#allocation2 + $0x110] sm:$0xe]  ;;  %v12242_v25 = vcombine.low %v18167_v46, %v18180_v58  ;;  %v12153_v22 = vcombine.low %v7421_v52, %v7389_v13  ;;  %v7393_v58 = vld [vmem:[#allocation2 + $0x13c] sm:$0x1]  ;;  %v18493_v13 = vld [vmem:[#allocation2 + $0x34] sm:$0x1] }
 0x3f4   : > { %v12152_v12 = vcombine.low %v7420_v26, %v7388_v51  ;;  %v18489_v51 = vld [vmem:[#allocation2 + $0x14] sm:$0x1]  ;;  %v18491_v26 = vld [vmem:[#allocation2 + $0x1c] sm:$0x1]  ;;  %v7402_v46 = vld [vmem:[#allocation2 + $0x60] sm:$0xe] }
 0x3f5   : > { %v7923_v16 = vrot.slane %v12015_v57, 1  ;;  %v18476_v7 = vrot.slane %v12153_v22, 1  ;;  %v7395_v22 = vld [vmem:[#allocation2 + $0x18] sm:$0xe] }
 0x3f6   : > { %v18474_v57 = vrot.slane %v12152_v12, 1  ;;  %v7394_v12 = vld [vmem:[#allocation2 + $0x10] sm:$0xe] }
 0x3f7   : > { %20270 = vst [vmem:[#allocation12_spill] sm:$0xff] %v18476_v7  ;;  %v7383_v7 = vld [vmem:[#allocation2 + $0xdc] sm:$0x1] }
 0x3f8   : > { %20269 = vst [vmem:[#allocation7_spill] sm:$0xff] %v18474_v57 }
 0x3fa   : > { %10260 = vmatmul.mubr.bf16.gmra.mrb[104].mxu1 %v20263_v33  ;;  %v12149_v33 = vcombine.low %v7417_v27, %v7385_v61  ;;  %v7424_v27 = vld [vmem:[#allocation2 + $0x130] sm:$0xe] }
 0x3fb   : > { %10267 = vmatprep.mubr.bf16.mxu1 %v12224_v31  ;;  %v7922_v31 = vrot.slane %v12014_v14, 1 }
 0x3fc   : > { %v18468_v6 = vrot.slane %v12149_v33, 1  ;;  %v20271_v33 = vld [vmem:[#allocation43_spill] sm:$0xff] }
 0x3fd   : > { %v12232_v4 = vcombine.low %v7922_v31, %v7923_v16  ;;  %v7425_v31 = vld [vmem:[#allocation2 + $0x138] sm:$0xe]  ;;  %v12251_v16 = vcombine.low %v18184_v43, %v18200_v35  ;;  %v18497_v43 = vld [vmem:[#allocation2 + $0x64] sm:$0x1]  ;;  %v7398_v35 = vld [vmem:[#allocation2 + $0x30] sm:$0xe] }
 0x3fe   : > { %20268 = vst [vmem:[#allocation6_spill] sm:$0xff] %v18468_v6  ;;  %v12157_v52 = vcombine.low %v7425_v31, %v7393_v58  ;;  %v12126_v58 = vcombine.low %v7394_v12, %v18489_v51  ;;  %v12127_v31 = vcombine.low %v7395_v22, %v18491_v26 }
 0x400   : > { %v18514_v22 = vrot.slane %v12126_v58, 1  ;;  %v18516_v57 = vrot.slane %v12127_v31, 1  ;;  %v7387_v58 = vld [vmem:[#allocation2 + $0x10c] sm:$0x1]  ;;  %v7419_v31 = vld [vmem:[#allocation2 + $0x108] sm:$0xe] }
 0x402   : > { %10268 = vmatmul.mubr.bf16.gmra.mrb[108].mxu1 %v20266_v3  ;;  %20277 = vst [vmem:[#allocation15_spill] sm:$0xff] %v18514_v22  ;;  %20278 = vst [vmem:[#allocation93_spill] sm:$0xff] %v18516_v57 }
 0x403   : > { %10275 = vmatprep.mubr.bf16.mxu1 %v12233_v44 }
 0x40a   : > { %10276 = vmatmul.mubr.bf16.gmra.mrb[112].mxu1 %v12232_v4  ;;  %v20272_v4 = vcombine.low %v17963_v29, %v20271_v33  ;;  %v7374_v29 = vld [vmem:[#allocation2 + $0x84] sm:$0x1]  ;;  %v18503_v33 = vrot.slane %v12157_v52, 1  ;;  %v12130_v52 = vcombine.low %v7398_v35, %v18493_v13  ;;  %v12134_v35 = vcombine.low %v7402_v46, %v18497_v43 }
 0x40b   : > { %10283 = vmatprep.mubr.bf16.mxu1 %v12242_v25  ;;  %v12156_v25 = vcombine.low %v7424_v27, %v7392_v53  ;;  %v7399_v53 = vld [vmem:[#allocation2 + $0x38] sm:$0xe] }
 0x40c   : > { %20274 = vst [vmem:[#allocation14_spill] sm:$0xff] %v18503_v33  ;;  %v18521_v28 = vrot.slane %v12130_v52, 1  ;;  %v7414_v33 = vld [vmem:[#allocation2 + $0xd0] sm:$0xe]  ;;  %v18532_v46 = vrot.slane %v12134_v35, 1 }
 0x40d   : > { %v12634_v14 = vpop.f32.mrb[16].mxu1  ;;  %v12146_v1 = vcombine.low %v7414_v33, %v7382_v50  ;;  %v12150_v50 = vcombine.low %v7418_v23, %v7386_v21 }
 0x40e   : > { %v12635_v34 = vpop.f32.mrb[17].mxu1  ;;  %20279 = vst [vmem:[#allocation94_spill] sm:$0xff] %v18521_v28  ;;  %20284 = vst [vmem:[#allocation95_spill] sm:$0xff] %v18532_v46 }
 0x40f   : > { %v18478_v44 = vadd.f32 %v12635_v34, %v12634_v14  ;;  %v12637_v61 = vpop.f32.mrb[18].mxu1  ;;  %v18495_v14 = vld [vmem:[#allocation2 + $0x3c] sm:$0x1] }
 0x410   : > { %v12638_v3 = vpop.f32.mrb[19].mxu1  ;;  %v12131_v6 = vcombine.low %v7399_v53, %v18495_v14  ;;  %v7390_v53 = vld [vmem:[#allocation2 + $0x124] sm:$0x1] }
 0x411   : > { %v18484_v8 = vadd.f32 %v12638_v3, %v12637_v61  ;;  %v18499_v61 = vld [vmem:[#allocation2 + $0x6c] sm:$0x1]  ;;  %v18501_v3 = vrot.slane %v12156_v25, 1  ;;  %v7411_v25 = vld [vmem:[#allocation2 + $0xb8] sm:$0xe] }
 0x412   : > { %10284 = vmatmul.mubr.bf16.gmra.mrb[116].mxu1 %v20272_v4  ;;  %v7378_v4 = vld [vmem:[#allocation2 + $0xb4] sm:$0x1]  ;;  %v18530_v52 = vrot.slane %v12131_v6, 1 }
 0x413   : > { %10291 = vmatprep.mubr.bf16.mxu1 %v12251_v16  ;;  %20273 = vst [vmem:[#allocation13_spill] sm:$0xff] %v18501_v3  ;;  %v7375_v16 = vld [vmem:[#allocation2 + $0x8c] sm:$0x1]  ;;  %v20280_v3 = vld [vmem:[#allocation44_spill] sm:$0xff] }
 0x414   : > { %v20282_v20 = vcombine.low %v20280_v3, %v20281_v37  ;;  %20283 = vst [vmem:[#allocation124_spill] sm:$0xff] %v18530_v52  ;;  %v12139_v0 = vcombine.low %v7407_v9, %v7375_v16  ;;  %v7423_v9 = vld [vmem:[#allocation2 + $0x128] sm:$0xe] }
 0x415   : > { %v12640_v34 = vpop.f32.mrb[20].mxu1 }
 0x416   : > { %v12641_v27 = vpop.f32.mrb[21].mxu1 }
 0x417   : > { %v18507_v62 = vadd.f32 %v12641_v27, %v12640_v34  ;;  %v12643_v30 = vpop.f32.mrb[22].mxu1  ;;  %v7410_v34 = vld [vmem:[#allocation2 + $0xb0] sm:$0xe] }
 0x418   : > { %v12644_v12 = vpop.f32.mrb[23].mxu1  ;;  %v12142_v17 = vcombine.low %v7410_v34, %v7378_v4 }
 0x419   : > { %v18518_v27 = vadd.f32 %v12644_v12, %v12643_v30  ;;  %v12135_v30 = vcombine.low %v7403_v24, %v18499_v61  ;;  %v12138_v12 = vcombine.low %v7406_v18, %v7374_v29  ;;  %v7391_v24 = vld [vmem:[#allocation2 + $0x12c] sm:$0x1]  ;;  %v18540_v18 = vrot.slane %v12139_v0, 1 }
 0x41a   : > { %10292 = vmatmul.mubr.bf16.gmra.mrb[120].mxu1 %v20282_v20  ;;  %v12143_v20 = vcombine.low %v7411_v25, %v7379_v40  ;;  %v18542_v6 = vrot.slane %v12142_v17, 1  ;;  %v12147_v29 = vcombine.low %v7415_v15, %v7383_v7  ;;  %v18548_v40 = vrot.slane %v12146_v1, 1 }
 0x41b   : > { %10299 = vmatprep.mubr.bf16.mxu1 %v12260_v47  ;;  %v18534_v37 = vrot.slane %v12135_v30, 1  ;;  %v18536_v3 = vrot.slane %v12138_v12, 1  ;;  %20287 = vst [vmem:[#allocation17_spill] sm:$0xff] %v18540_v18  ;;  %v12151_v0 = vcombine.low %v7419_v31, %v7387_v58  ;;  %v12154_v17 = vcombine.low %v7422_v2, %v7390_v53  ;;  %v20295_v2 = vld [vmem:[#allocation66_spill] sm:$0xff] }
 0x41c   : > { %20288 = vst [vmem:[#allocation18_spill] sm:$0xff] %v18542_v6  ;;  %v18546_v34 = vrot.slane %v12143_v20, 1  ;;  %20290 = vst [vmem:[#allocation98_spill] sm:$0xff] %v18548_v40  ;;  %v18552_v35 = vrot.slane %v12147_v29, 1  ;;  %v18558_v12 = vrot.slane %v12150_v50, 1  ;;  %v12155_v20 = vcombine.low %v7423_v9, %v7391_v24  ;;  %v20296_v31 = vld [vmem:[#allocation70_spill] sm:$0xff] }
 0x41d   : > { %20285 = vst [vmem:[#allocation97_spill] sm:$0xff] %v18534_v37  ;;  %20286 = vst [vmem:[#allocation16_spill] sm:$0xff] %v18536_v3  ;;  %v12269_v1 = vcombine.low %v18233_v39, %v18252_v42  ;;  %v18564_v29 = vrot.slane %v12151_v0, 1  ;;  %v18566_v58 = vrot.slane %v12154_v17, 1  ;;  %v20297_v53 = vcombine.low %v20295_v2, %v20296_v31  ;;  %v20299_v24 = vld [vmem:[#allocation75_spill] sm:$0xff]  ;;  %v20303_v2 = vld [vmem:[#allocation80_spill] sm:$0xff] }
 0x41e   : > { %20289 = vst [vmem:[#allocation23_spill] sm:$0xff] %v18546_v34  ;;  %20291 = vst [vmem:[#allocation101_spill] sm:$0xff] %v18552_v35  ;;  %v18573_v50 = vrot.slane %v12155_v20, 1  ;;  %v12278_v9 = vcombine.low %v20299_v24, %v18284_v36  ;;  %v20301_v0 = vld [vmem:[#allocation47_spill] sm:$0xff]  ;;  %v20305_v31 = vld [vmem:[#allocation73_spill] sm:$0xff] }
 0x41f   : > { %v12646_v16 = vpop.f32.mrb[24].mxu1  ;;  %20292 = vst [vmem:[#allocation102_spill] sm:$0xff] %v18558_v12  ;;  %20293 = vst [vmem:[#allocation103_spill] sm:$0xff] %v18564_v29  ;;  %v7298_v24 = vld [vmem:[#allocation2 + $0x10] sm:$0xe]  ;;  %v20321_v12 = vld [vmem:[#allocation58_spill] sm:$0xff] }
 0x420   : > { %v12647_v33 = vpop.f32.mrb[25].mxu1  ;;  %20294 = vst [vmem:[#allocation24_spill] sm:$0xff] %v18566_v58  ;;  %20298 = vst [vmem:[#allocation25_spill] sm:$0xff] %v18573_v50  ;;  %v7299_v50 = vld [vmem:[#allocation2 + $0x18] sm:$0xe]  ;;  %v20326_v6 = vld [vmem:[#allocation60_spill] sm:$0xff] }
 0x421   : > { %v18554_v30 = vadd.f32 %v12647_v33, %v12646_v16  ;;  %v12649_v15 = vpop.f32.mrb[26].mxu1  ;;  %v20300_v33 = vld [vmem:[#allocation46_spill] sm:$0xff]  ;;  %v20324_v40 = vld [vmem:[#allocation81_spill] sm:$0xff] }
 0x422   : > { %v12650_v23 = vpop.f32.mrb[27].mxu1  ;;  %10300 = vmatmul.mubr.bf16.gmra.mrb[124].mxu1 %v20297_v53  ;;  %v20302_v17 = vcombine.low %v20300_v33, %v20301_v0  ;;  %v7297_v33 = vld [vmem:[#allocation2 + $0x8] sm:$0xe]  ;;  %v14289_v0 = vld [vmem:[#allocation2 + $0x14] sm:$0x1]  ;;  %v20327_v18 = vld [vmem:[#allocation62_spill] sm:$0xff] }
 0x423   : > { %v18571_v16 = vadd.f32 %v12650_v23, %v12649_v15  ;;  %10307 = vmatprep.mubr.bf16.mxu1 %v12269_v1  ;;  %v20304_v15 = vld [vmem:[#allocation99_spill] sm:$0xff]  ;;  %v20306_v1 = vld [vmem:[#allocation48_spill] sm:$0xff]  ;;  %v20328_v3 = vcombine.low %v20326_v6, %v20327_v18  ;;  %v20329_v18 = vld [vmem:[#allocation85_spill] sm:$0xff] }
 0x424   : > { %v12287_v23 = vcombine.low %v20304_v15, %v20303_v2  ;;  %v20307_v53 = vcombine.low %v20305_v31, %v20306_v1  ;;  %v20308_v2 = vld [vmem:[#allocation50_spill] sm:$0xff]  ;;  %v20309_v15 = vld [vmem:[#allocation51_spill] sm:$0xff] }
 0x425   : > { %v20310_v25 = vcombine.low %v20308_v2, %v20309_v15  ;;  %v14290_v31 = vld [vmem:[#allocation2 + $0xc] sm:$0x1]  ;;  %v20311_v2 = vld [vmem:[#allocation52_spill] sm:$0xff] }
 0x42a   : > { %10308 = vmatmul.mubr.bf16.gmra.mrb[128].mxu1 %v20302_v17  ;;  %v12063_v17 = vcombine.low %v7298_v24, %v14289_v0  ;;  %v14291_v24 = vld [vmem:[#allocation2 + $0x24] sm:$0x1] }
 0x42b   : > { %10315 = vmatprep.mubr.bf16.mxu1 %v12278_v9  ;;  %v12296_v9 = vcombine.low %v18317_v10, %v18338_v49 }
 0x432   : > { %v12652_v20 = vpop.f32.mrb[28].mxu1  ;;  %10316 = vmatmul.mubr.bf16.gmra.mrb[132].mxu1 %v20307_v53  ;;  %v7300_v53 = vld [vmem:[#allocation2 + $0x20] sm:$0xe] }
 0x433   : > { %v12653_v39 = vpop.f32.mrb[29].mxu1  ;;  %10323 = vmatprep.mubr.bf16.mxu1 %v12287_v23  ;;  %v12062_v23 = vcombine.low %v7297_v33, %v14290_v31  ;;  %v12065_v0 = vcombine.low %v7300_v53, %v14291_v24  ;;  %v14292_v33 = vld [vmem:[#allocation2 + $0x1c] sm:$0x1]  ;;  %v7301_v53 = vld [vmem:[#allocation2 + $0x28] sm:$0xe] }
 0x434   : > { %v18589_v21 = vadd.f32 %v12653_v39, %v12652_v20  ;;  %v12655_v42 = vpop.f32.mrb[30].mxu1  ;;  %v8419_v20 = vrot.slane %v12063_v17, 1  ;;  %v12064_v17 = vcombine.low %v7299_v50, %v14292_v33  ;;  %v14293_v24 = vld [vmem:[#allocation2 + $0x34] sm:$0x1]  ;;  %v14294_v33 = vld [vmem:[#allocation2 + $0x2c] sm:$0x1] }
 0x435   : > { %v12656_v7 = vpop.f32.mrb[31].mxu1  ;;  %v8418_v4 = vrot.slane %v12062_v23, 1  ;;  %v8421_v31 = vrot.slane %v12065_v0, 1 }
 0x436   : > { %v18591_v36 = vadd.f32 %v12656_v7, %v12655_v42 }
 0x437   : > { %v12163_v49 = vcombine.low %v8418_v4, %v8419_v20  ;;  %v8420_v4 = vrot.slane %v12064_v17, 1  ;;  %v14134_v17 = vld [vmem:[%s19647_s4 + $0x188] sm:$0xff]  }
 0x439   : > { %v12172_v50 = vcombine.low %v8420_v4, %v8421_v31  ;;  %v7304_v4 = vld [vmem:[#allocation2 + $0x40] sm:$0xe] }
 0x43a   : > { %10324 = vmatmul.mubr.bf16.gmra.mrb[136].mxu1 %v20310_v25  ;;  %v20312_v25 = vld [vmem:[#allocation53_spill] sm:$0xff] }
 0x43b   : > { %10331 = vmatprep.mubr.bf16.mxu1 %v12296_v9  ;;  %v20313_v9 = vcombine.low %v20311_v2, %v20312_v25  ;;  %v20314_v2 = vld [vmem:[#allocation49_spill] sm:$0xff]  ;;  %v20315_v25 = vld [vmem:[#allocation76_spill] sm:$0xff] }
 0x43d   : > { %v12658_v39 = vpop.f32.mrb[32].mxu1 }
 0x43e   : > { %v12659_v1 = vpop.f32.mrb[33].mxu1 }
 0x43f   : > { %v18598_v7 = vadd.f32 %v12659_v1, %v12658_v39  ;;  %v12661_v42 = vpop.f32.mrb[34].mxu1  ;;  %v7302_v1 = vld [vmem:[#allocation2 + $0x30] sm:$0xe] }
 0x440   : > { %v12662_v47 = vpop.f32.mrb[35].mxu1  ;;  %v12067_v0 = vcombine.low %v7302_v1, %v14293_v24 }
 0x441   : > { %v18600_v10 = vadd.f32 %v12662_v47, %v12661_v42  ;;  %v14128_v47 = vld [vmem:[%s19647_s4 + $0x180] sm:$0xff]   ;;  %v14133_v42 = vld [vmem:[%s19647_s4 + $0x1c8] sm:$0xff]  }
 0x442   : > { %10332 = vmatmul.mubr.bf16.gmra.mrb[140].mxu1 %v20313_v9  ;;  %v20316_v9 = vcombine.low %v20314_v2, %v20315_v25  ;;  %v7303_v2 = vld [vmem:[#allocation2 + $0x38] sm:$0xe] }
 0x443   : > { %10372 = vmatprep.mubr.bf16.mxu1 %v12163_v49 }
 0x445   : > { %v12664_v15 = vpop.f32.mrb[36].mxu1 }
 0x446   : > { %v12665_v39 = vpop.f32.mrb[37].mxu1 }
 0x447   : > { %v18605_v58 = vadd.f32 %v12665_v39, %v12664_v15  ;;  %v12667_v23 = vpop.f32.mrb[38].mxu1  ;;  %v12066_v15 = vcombine.low %v7301_v53, %v14294_v33  ;;  %v14139_v39 = vld [vmem:[%s19647_s4 + $0x1d0] sm:$0xff]  }
 0x448   : > { %v12668_v20 = vpop.f32.mrb[39].mxu1  ;;  %v14140_v53 = vld [vmem:[%s19647_s4 + $0x190] sm:$0xff]  }
 0x449   : > { %v18613_v49 = vadd.f32 %v12668_v20, %v12667_v23  ;;  %v8423_v23 = vrot.slane %v12067_v0, 1 }
 0x44a   : > { %10373 = vmatmul.mubr.bf16.vlgmr.msra.gmra.mrb[144].mxu1 %v20316_v9  ;;  %v14295_v9 = vld [vmem:[#allocation2 + $0x44] sm:$0x1] }
 0x44b   : > { %12955 = vmatpush3.bf16.msra.mxu1 %v14128_v47  ;;  %10380 = vmatprep.mubr.bf16.mxu1 %v12172_v50  ;;  %v8422_v47 = vrot.slane %v12066_v15, 1  ;;  %v12069_v33 = vcombine.low %v7304_v4, %v14295_v9 }
 0x44c   : > { %12956 = vmatprep.subr.bf16.mxu1 %v14133_v42  ;;  %v14145_v42 = vld [vmem:[%s19647_s4 + $0x1d8] sm:$0xff]  }
 0x44d   : > { %v12670_v31 = vpop.f32.mrb[40].mxu1  ;;  %v12181_v0 = vcombine.low %v8422_v47, %v8423_v23  ;;  %v8425_v47 = vrot.slane %v12069_v33, 1 }
 0x44e   : > { %v12671_v1 = vpop.f32.mrb[41].mxu1 }
 0x44f   : > { %v18624_v20 = vadd.f32 %v12671_v1, %v12670_v31  ;;  %v12673_v24 = vpop.f32.mrb[42].mxu1  ;;  %12957 = vmatpush3.bf16.msra.mxu1 %v14134_v17  ;;  %v20317_v31 = vld [vmem:[#allocation54_spill] sm:$0xff]  ;;  %v20318_v1 = vld [vmem:[#allocation55_spill] sm:$0xff]  ;;  %v14296_v17 = vld [vmem:[#allocation2 + $0x3c] sm:$0x1] }
 0x450   : > { %v12674_v50 = vpop.f32.mrb[43].mxu1  ;;  %12958 = vmatprep.subr.bf16.mxu1 %v14139_v39  ;;  %v20319_v15 = vcombine.low %v20317_v31, %v20318_v1  ;;  %v12068_v29 = vcombine.low %v7303_v2, %v14296_v17  ;;  %v14146_v39 = vld [vmem:[%s19647_s4 + $0x198] sm:$0xff]   ;;  %v14297_v17 = vld [vmem:[#allocation2 + $0x64] sm:$0x1] }
 0x451   : > { %v18632_v25 = vadd.f32 %v12674_v50, %v12673_v24  ;;  %v14151_v24 = vld [vmem:[%s19647_s4 + $0x1e0] sm:$0xff]   ;;  %v7305_v1 = vld [vmem:[#allocation2 + $0x58] sm:$0xe] }
 0x452   : > { %10381 = vmatmul.mubr.bf16.gmra.mrb[148].mxu1 %v20319_v15  ;;  %v7306_v50 = vld [vmem:[#allocation2 + $0x60] sm:$0xe] }
 0x453   : > { %10388 = vmatprep.mubr.bf16.mxu1 %v12181_v0  ;;  %12959 = vmatpush3.bf16.msra.mxu1 %v14140_v53  ;;  %v8424_v0 = vrot.slane %v12068_v29, 1  ;;  %v14152_v53 = vld [vmem:[%s19647_s4 + $0x1a0] sm:$0xff]  }
 0x454   : > { %12960 = vmatprep.subr.bf16.mxu1 %v14145_v42  ;;  %v14157_v42 = vld [vmem:[%s19647_s4 + $0x1e8] sm:$0xff]  }
 0x455   : > { %v12676_v23 = vpop.f32.mrb[44].mxu1  ;;  %v12190_v33 = vcombine.low %v8424_v0, %v8425_v47 }
 0x456   : > { %v12677_v4 = vpop.f32.mrb[45].mxu1 }
 0x457   : > { %v18643_v9 = vadd.f32 %v12677_v4, %v12676_v23  ;;  %v12679_v31 = vpop.f32.mrb[46].mxu1  ;;  %12961 = vmatpush3.bf16.msra.mxu1 %v14146_v39  ;;  %v12071_v23 = vcombine.low %v7306_v50, %v14297_v17  ;;  %v20320_v4 = vld [vmem:[#allocation57_spill] sm:$0xff] }
 0x458   : > { %v12680_v2 = vpop.f32.mrb[47].mxu1  ;;  %12962 = vmatprep.subr.bf16.mxu1 %v14151_v24  ;;  %v20322_v29 = vcombine.low %v20320_v4, %v20321_v12  ;;  %v14298_v39 = vld [vmem:[#allocation2 + $0x5c] sm:$0x1]  ;;  %v14158_v24 = vld [vmem:[%s19647_s4 + $0x1a8] sm:$0xff]  }
 0x459   : > { %v18651_v15 = vadd.f32 %v12680_v2, %v12679_v31  ;;  %v12070_v35 = vcombine.low %v7305_v1, %v14298_v39  ;;  %v14163_v31 = vld [vmem:[%s19647_s4 + $0x1f0] sm:$0xff]   ;;  %v8427_v0 = vrot.slane %v12071_v23, 1  ;;  %v7307_v4 = vld [vmem:[#allocation2 + $0x68] sm:$0xe] }
 0x45a   : > { %10389 = vmatmul.mubr.bf16.gmra.mrb[152].mxu1 %v20322_v29  ;;  %v7308_v2 = vld [vmem:[#allocation2 + $0x70] sm:$0xe]  ;;  %v14299_v39 = vld [vmem:[#allocation2 + $0x74] sm:$0x1] }
 0x45b   : > { %10396 = vmatprep.mubr.bf16.mxu1 %v12190_v33  ;;  %12963 = vmatpush3.bf16.msra.mxu1 %v14152_v53  ;;  %v8426_v33 = vrot.slane %v12070_v35, 1  ;;  %v14164_v53 = vld [vmem:[%s19647_s4 + $0x1b0] sm:$0xff]  }
 0x45c   : > { %12964 = vmatprep.subr.bf16.mxu1 %v14157_v42  ;;  %v14169_v42 = vld [vmem:[%s19647_s4 + $0x1f8] sm:$0xff]  }
 0x45d   : > { %v12682_v47 = vpop.f32.mrb[48].mxu1  ;;  %v12199_v23 = vcombine.low %v8426_v33, %v8427_v0 }
 0x45e   : > { %v12683_v50 = vpop.f32.mrb[49].mxu1 }
 0x45f   : > { %v18662_v17 = vadd.f32 %v12683_v50, %v12682_v47  ;;  %v12685_v12 = vpop.f32.mrb[50].mxu1  ;;  %12965 = vmatpush3.bf16.msra.mxu1 %v14158_v24  ;;  %v12073_v47 = vcombine.low %v7308_v2, %v14299_v39  ;;  %v20323_v50 = vld [vmem:[#allocation77_spill] sm:$0xff]  ;;  %v14300_v24 = vld [vmem:[#allocation2 + $0x6c] sm:$0x1] }
 0x460   : > { %v12686_v1 = vpop.f32.mrb[51].mxu1  ;;  %12966 = vmatprep.subr.bf16.mxu1 %v14163_v31  ;;  %v20325_v35 = vcombine.low %v20323_v50, %v20324_v40  ;;  %v12072_v34 = vcombine.low %v7307_v4, %v14300_v24  ;;  %v14170_v31 = vld [vmem:[%s19647_s4 + $0x1b8] sm:$0xff]  }
 0x461   : > { %v18670_v29 = vadd.f32 %v12686_v1, %v12685_v12  ;;  %v18681_v12 = vld [vmem:[%s19647_s4 + $0x200] sm:$0xff]   ;;  %v8429_v2 = vrot.slane %v12073_v47, 1  ;;  %v7309_v4 = vld [vmem:[#allocation2 + $0x78] sm:$0xe]  ;;  %v14302_v47 = vld [vmem:[#allocation2 + $0x7c] sm:$0x1] }
 0x462   : > { %10397 = vmatmul.mubr.bf16.gmra.mrb[156].mxu1 %v20325_v35  ;;  %v7310_v1 = vld [vmem:[#allocation2 + $0x80] sm:$0xe]  ;;  %v8428_v39 = vrot.slane %v12072_v34, 1  ;;  %v14301_v35 = vld [vmem:[#allocation2 + $0x84] sm:$0x1] }
 0x463   : > { %10404 = vmatprep.mubr.bf16.mxu1 %v12199_v23  ;;  %12967 = vmatpush3.bf16.msra.mxu1 %v14164_v53  ;;  %v12075_v24 = vcombine.low %v7310_v1, %v14301_v35 }
 0x464   : > { %12968 = vmatprep.subr.bf16.mxu1 %v14169_v42  ;;  %v12208_v42 = vcombine.low %v8428_v39, %v8429_v2  ;;  %v14303_v39 = vld [vmem:[#allocation2 + $0x94] sm:$0x1] }
 0x465   : > { %v12688_v0 = vpop.f32.mrb[52].mxu1  ;;  %v8431_v37 = vrot.slane %v12075_v24, 1 }
 0x466   : > { %v12689_v33 = vpop.f32.mrb[53].mxu1 }
 0x467   : > { %v18683_v40 = vadd.f32 %v12689_v33, %v12688_v0  ;;  %v12691_v23 = vpop.f32.mrb[54].mxu1  ;;  %12969 = vmatpush3.bf16.msra.mxu1 %v14170_v31  ;;  %v12074_v0 = vcombine.low %v7309_v4, %v14302_v47  ;;  %v7312_v31 = vld [vmem:[#allocation2 + $0x90] sm:$0xe]  ;;  %v14304_v4 = vld [vmem:[#allocation2 + $0x8c] sm:$0x1] }
 0x468   : > { %v12692_v53 = vpop.f32.mrb[55].mxu1  ;;  %13470 = vmatprep.subr.bf16.mxu1 %v18681_v12  ;;  %v12077_v35 = vcombine.low %v7312_v31, %v14303_v39  ;;  %v14305_v31 = vld [vmem:[#allocation2 + $0xb4] sm:$0x1] }
 0x469   : > { %v18686_v50 = vadd.f32 %v12692_v53, %v12691_v23  ;;  %v8430_v52 = vrot.slane %v12074_v0, 1  ;;  %v7311_v53 = vld [vmem:[#allocation2 + $0x88] sm:$0xe] }
 0x46a   : > { %10405 = vmatmul.mubr.bf16.gmra.mrb[160].mxu1 %v20328_v3  ;;  %v20330_v3 = vld [vmem:[#allocation87_spill] sm:$0xff]  ;;  %v8433_v47 = vrot.slane %v12077_v35, 1 }
 0x46b   : > { %10412 = vmatprep.mubr.bf16.mxu1 %v12208_v42  ;;  %v12217_v1 = vcombine.low %v8430_v52, %v8431_v37  ;;  %v20331_v6 = vcombine.low %v20329_v18, %v20330_v3  ;;  %v12076_v42 = vcombine.low %v7311_v53, %v14304_v4  ;;  %v20332_v18 = vld [vmem:[#allocation65_spill] sm:$0xff]  ;;  %v20333_v3 = vld [vmem:[#allocation67_spill] sm:$0xff] }
 0x46c   : > { %v14306_v53 = vld [vmem:[#allocation2 + $0xac] sm:$0x1] }
 0x46d   : > { %v12694_v33 = vpop.f32.mrb[56].mxu1  ;;  %v8432_v55 = vrot.slane %v12076_v42, 1 }
 0x46e   : > { %v12695_v34 = vpop.f32.mrb[57].mxu1 }
 0x46f   : > { %v18691_v46 = vadd.f32 %v12695_v34, %v12694_v33  ;;  %v12697_v38 = vpop.f32.mrb[58].mxu1  ;;  %v7314_v34 = vld [vmem:[#allocation2 + $0xb0] sm:$0xe]  ;;  %v12226_v37 = vcombine.low %v8432_v55, %v8433_v47 }
 0x470   : > { %v12698_v23 = vpop.f32.mrb[59].mxu1  ;;  %v12079_v39 = vcombine.low %v7314_v34, %v14305_v31  ;;  %v14307_v34 = vld [vmem:[#allocation2 + $0xc4] sm:$0x1] }
 0x471   : > { %v18693_v2 = vadd.f32 %v12698_v23, %v12697_v38  ;;  %v7313_v23 = vld [vmem:[#allocation2 + $0xa8] sm:$0xe] }
 0x472   : > { %10413 = vmatmul.mubr.bf16.gmra.mrb[164].mxu1 %v20331_v6  ;;  %v12078_v35 = vcombine.low %v7313_v23, %v14306_v53  ;;  %v8435_v4 = vrot.slane %v12079_v39, 1  ;;  %v14308_v23 = vld [vmem:[#allocation2 + $0xbc] sm:$0x1] }
 0x473   : > { %10420 = vmatprep.mubr.bf16.mxu1 %v12217_v1  ;;  %v20334_v1 = vcombine.low %v20332_v18, %v20333_v3  ;;  %v20337_v18 = vld [vmem:[#allocation71_spill] sm:$0xff]  ;;  %v20338_v3 = vld [vmem:[#allocation74_spill] sm:$0xff] }
 0x474   : > { %v8434_v57 = vrot.slane %v12078_v35, 1 }
 0x475   : > { %v12700_v24 = vpop.f32.mrb[60].mxu1 }
 0x476   : > { %v12701_v33 = vpop.f32.mrb[61].mxu1  ;;  %v12235_v47 = vcombine.low %v8434_v57, %v8435_v4 }
 0x477   : > { %v18698_v28 = vadd.f32 %v12701_v33, %v12700_v24  ;;  %v12703_v0 = vpop.f32.mrb[62].mxu1  ;;  %v7316_v33 = vld [vmem:[#allocation2 + $0xc0] sm:$0xe] }
 0x478   : > { %v12704_v38 = vpop.f32.mrb[63].mxu1  ;;  %v12081_v31 = vcombine.low %v7316_v33, %v14307_v34  ;;  %v14309_v33 = vld [vmem:[#allocation2 + $0xd4] sm:$0x1] }
 0x479   : > { %v18700_v52 = vadd.f32 %v12704_v38, %v12703_v0  ;;  %v7315_v38 = vld [vmem:[#allocation2 + $0xb8] sm:$0xe] }
 0x47a   : > { %10421 = vmatmul.mubr.bf16.gmra.mrb[168].mxu1 %v20334_v1  ;;  %v12080_v39 = vcombine.low %v7315_v38, %v14308_v23  ;;  %v8437_v53 = vrot.slane %v12081_v31, 1  ;;  %v14310_v38 = vld [vmem:[#allocation2 + $0xcc] sm:$0x1] }
 0x47b   : > { %10428 = vmatprep.mubr.bf16.mxu1 %v12226_v37  ;;  %v20339_v37 = vcombine.low %v20337_v18, %v20338_v3  ;;  %v20342_v18 = vld [vmem:[#allocation79_spill] sm:$0xff]  ;;  %v20343_v3 = vld [vmem:[#allocation96_spill] sm:$0xff] }
 0x47d   : > { %v12706_v6 = vpop.f32.mrb[64].mxu1 }
 0x47e   : > { %v12707_v24 = vpop.f32.mrb[65].mxu1 }
 0x47f   : > { %v18705_v45 = vadd.f32 %v12707_v24, %v12706_v6  ;;  %v12709_v42 = vpop.f32.mrb[66].mxu1  ;;  %v7318_v24 = vld [vmem:[#allocation2 + $0xd0] sm:$0xe] }
 0x480   : > { %v12710_v0 = vpop.f32.mrb[67].mxu1  ;;  %v12083_v34 = vcombine.low %v7318_v24, %v14309_v33 }
 0x481   : > { %20335 = vst [vmem:[#allocation26_spill] sm:$0xff] %v18705_v45  ;;  %v18707_v55 = vadd.f32 %v12710_v0, %v12709_v42  ;;  %v8436_v45 = vrot.slane %v12080_v39, 1  ;;  %v7317_v0 = vld [vmem:[#allocation2 + $0xc8] sm:$0xe] }
 0x482   : > { %10429 = vmatmul.mubr.bf16.gmra.mrb[172].mxu1 %v20339_v37  ;;  %v12082_v31 = vcombine.low %v7317_v0, %v14310_v38  ;;  %v14217_v37 = vld [vmem:[%s19650_s7] sm:$0xff]   ;;  %v8439_v39 = vrot.slane %v12083_v34, 1  ;;  %v14312_v34 = vld [vmem:[#allocation2 + $0xdc] sm:$0x1] }
 0x483   : > { %20336 = vst [vmem:[#allocation27_spill] sm:$0xff] %v18707_v55  ;;  %10436 = vmatprep.mubr.bf16.mxu1 %v12235_v47  ;;  %v12244_v4 = vcombine.low %v8436_v45, %v8437_v53  ;;  %v20344_v47 = vcombine.low %v20342_v18, %v20343_v3  ;;  %13518 = vmatprep.subr.bf16.mxu0 %v14217_v37  ;;  %v14311_v0 = vld [vmem:[#allocation2 + $0xe4] sm:$0x1]  ;;  %v20346_v3 = vld [vmem:[#allocation100_spill] sm:$0xff] }
 0x484   : > { %13519 = vmatpush3.bf16.msra.mxu0 %v14217_v37  ;;  %v8438_v24 = vrot.slane %v12082_v31, 1 }
 0x485   : > { %v12712_v1 = vpop.f32.mrb[68].mxu1 }
 0x486   : > { %v12713_v6 = vpop.f32.mrb[69].mxu1 }
 0x487   : > { %v18712_v22 = vadd.f32 %v12713_v6, %v12712_v1  ;;  %v12715_v35 = vpop.f32.mrb[70].mxu1  ;;  %v7320_v6 = vld [vmem:[#allocation2 + $0xe0] sm:$0xe] }
 0x488   : > { %v12716_v42 = vpop.f32.mrb[71].mxu1  ;;  %v12085_v18 = vcombine.low %v7320_v6, %v14311_v0 }
 0x489   : > { %20340 = vst [vmem:[#allocation125_spill] sm:$0xff] %v18712_v22  ;;  %v18714_v57 = vadd.f32 %v12716_v42, %v12715_v35  ;;  %v7319_v42 = vld [vmem:[#allocation2 + $0xd8] sm:$0xe] }
 0x48a   : > { %10437 = vmatmul.mubr.bf16.gmra.mrb[176].mxu1 %v20344_v47  ;;  %v20347_v47 = vld [vmem:[#allocation104_spill] sm:$0xff]  ;;  %v8441_v37 = vrot.slane %v12085_v18, 1 }
 0x48b   : > { %20341 = vst [vmem:[#allocation105_spill] sm:$0xff] %v18714_v57  ;;  %10444 = vmatprep.mubr.bf16.mxu1 %v12244_v4  ;;  %v12253_v4 = vcombine.low %v8438_v24, %v8439_v39  ;;  %v20348_v38 = vcombine.low %v20346_v3, %v20347_v47  ;;  %v12084_v57 = vcombine.low %v7319_v42, %v14312_v34  ;;  %v14313_v24 = vld [vmem:[#allocation2 + $0x104] sm:$0x1]  ;;  %v14314_v42 = vld [vmem:[#allocation2 + $0xfc] sm:$0x1] }
 0x48d   : > { %v12718_v23 = vpop.f32.mrb[72].mxu1  ;;  %v8440_v55 = vrot.slane %v12084_v57, 1 }
 0x48e   : > { %v12719_v1 = vpop.f32.mrb[73].mxu1 }
 0x48f   : > { %v18722_v45 = vadd.f32 %v12719_v1, %v12718_v23  ;;  %v12721_v53 = vpop.f32.mrb[74].mxu1  ;;  %v7322_v1 = vld [vmem:[#allocation2 + $0x100] sm:$0xe]  ;;  %v12262_v6 = vcombine.low %v8440_v55, %v8441_v37 }
 0x490   : > { %v12722_v35 = vpop.f32.mrb[75].mxu1  ;;  %v12087_v0 = vcombine.low %v7322_v1, %v14313_v24  ;;  %v7323_v1 = vld [vmem:[#allocation2 + $0x108] sm:$0xe] }
 0x491   : > { %20345 = vst [vmem:[#allocation106_spill] sm:$0xff] %v18722_v45  ;;  %v18724_v33 = vadd.f32 %v12722_v35, %v12721_v53  ;;  %v7321_v35 = vld [vmem:[#allocation2 + $0xf8] sm:$0xe] }
 0x492   : > { %10445 = vmatmul.mubr.bf16.gmra.mrb[180].mxu1 %v20348_v38  ;;  %v12086_v18 = vcombine.low %v7321_v35, %v14314_v42  ;;  %v8443_v57 = vrot.slane %v12087_v0, 1  ;;  %v7324_v38 = vld [vmem:[#allocation2 + $0x110] sm:$0xe] }
 0x493   : > { %10452 = vmatprep.mubr.bf16.mxu1 %v12253_v4  ;;  %v20349_v4 = vcombine.low %v18319_v11, %v18321_v56 }
 0x494   : > { %v8442_v37 = vrot.slane %v12086_v18, 1 }
 0x495   : > { %v12724_v22 = vpop.f32.mrb[76].mxu1 }
 0x496   : > { %v12725_v23 = vpop.f32.mrb[77].mxu1 }
 0x497   : > { %v18729_v45 = vadd.f32 %v12725_v23, %v12724_v22  ;;  %v12727_v31 = vpop.f32.mrb[78].mxu1  ;;  %v14227_v22 = vld [vmem:[%s19650_s7 + $0x8] sm:$0xff]  }
 0x498   : > { %v12728_v53 = vpop.f32.mrb[79].mxu1  ;;  %13520 = vmatprep.subr.bf16.mxu0 %v14227_v22 }
 0x499   : > { %v18731_v39 = vadd.f32 %v12728_v53, %v12727_v31  ;;  %13521 = vmatpush3.bf16.msra.mxu0 %v14227_v22  ;;  %v12271_v31 = vcombine.low %v8442_v37, %v8443_v57  ;;  %v14315_v53 = vld [vmem:[#allocation2 + $0x114] sm:$0x1]  ;;  %v7325_v37 = vld [vmem:[#allocation2 + $0x118] sm:$0xe] }
 0x49a   : > { %10453 = vmatmul.mubr.bf16.gmra.mrb[184].mxu1 %v20349_v4  ;;  %v12089_v35 = vcombine.low %v7324_v38, %v14315_v53  ;;  %v14316_v4 = vld [vmem:[#allocation2 + $0x10c] sm:$0x1]  ;;  %v14317_v53 = vld [vmem:[#allocation2 + $0x124] sm:$0x1] }
 0x49b   : > { %10460 = vmatprep.mubr.bf16.mxu1 %v12262_v6  ;;  %v20350_v6 = vld [vmem:[#allocation82_spill] sm:$0xff]  ;;  %v12088_v42 = vcombine.low %v7323_v1, %v14316_v4  ;;  %v7328_v4 = vld [vmem:[#allocation2 + $0x130] sm:$0xe] }
 0x49c   : > { %v20351_v24 = vcombine.low %v18342_v63, %v20350_v6  ;;  %v8445_v22 = vrot.slane %v12089_v35, 1  ;;  %v14238_v6 = vld [vmem:[%s19650_s7 + $0x10] sm:$0xff]  }
 0x49d   : > { %v12746_v3 = vpop.f32.mrb[80].mxu1  ;;  %13522 = vmatprep.subr.bf16.mxu0 %v14238_v6 }
 0x49e   : > { %v12747_v47 = vpop.f32.mrb[81].mxu1  ;;  %13523 = vmatpush3.bf16.msra.mxu0 %v14238_v6 }
 0x49f   : > { %v12748_v55 = vadd.f32 %v12747_v47, %v12746_v3  ;;  %v12749_v34 = vpop.f32.mrb[82].mxu1  ;;  %v7326_v47 = vld [vmem:[#allocation2 + $0x120] sm:$0xe] }
 0x4a0   : > { %v12750_v23 = vpop.f32.mrb[83].mxu1 }
 0x4a1   : > { %v18740_v11 = vadd.f32 %v12748_v55, %v18478_v44  ;;  %v12751_v56 = vadd.f32 %v12750_v23, %v12749_v34  ;;  %v8444_v34 = vrot.slane %v12088_v42, 1 }
 0x4a2   : > { %10461 = vmatmul.mubr.bf16.gmra.mrb[188].mxu1 %v20351_v24 }
 0x4a3   : > { %v18746_v0 = vadd.f32 %v12751_v56, %v18484_v8  ;;  %10468 = vmatprep.mubr.bf16.mxu1 %v12271_v31  ;;  %v12280_v23 = vcombine.low %v8444_v34, %v8445_v22  ;;  %v12091_v8 = vcombine.low %v7326_v47, %v14317_v53  ;;  %v20352_v56 = vcombine.low %v18362_v59, %v18364_v60  ;;  %v14318_v31 = vld [vmem:[#allocation2 + $0x11c] sm:$0x1]  ;;  %v14319_v47 = vld [vmem:[#allocation2 + $0x134] sm:$0x1] }
 0x4a4   : > { %v12090_v35 = vcombine.low %v7325_v37, %v14318_v31 }
 0x4a5   : > { %v12752_v18 = vpop.f32.mrb[84].mxu1  ;;  %v8447_v24 = vrot.slane %v12091_v8, 1  ;;  %v14320_v8 = vld [vmem:[#allocation2 + $0x12c] sm:$0x1] }
 0x4a6   : > { %v12753_v3 = vpop.f32.mrb[85].mxu1  ;;  %v8446_v22 = vrot.slane %v12090_v35, 1 }
 0x4a7   : > { %v12754_v44 = vadd.f32 %v12753_v3, %v12752_v18  ;;  %v12755_v55 = vpop.f32.mrb[86].mxu1  ;;  %v18760_v18 = vld [vmem:[#allocation2 + $0x10] sm:$0xf]  ;;  %v7327_v3 = vld [vmem:[#allocation2 + $0x128] sm:$0xe] }
 0x4a8   : > { %v12756_v57 = vpop.f32.mrb[87].mxu1  ;;  %v12289_v37 = vcombine.low %v8446_v22, %v8447_v24 }
 0x4a9   : > { %v18749_v38 = vadd.f32 %v12754_v44, %v18507_v62  ;;  %v12757_v63 = vadd.f32 %v12756_v57, %v12755_v55  ;;  %v12093_v44 = vcombine.low %v7328_v4, %v14319_v47  ;;  %v18762_v55 = vld [vmem:[#allocation2 + $0x18] sm:$0xf]  ;;  %v20354_v47 = vcombine.low %v18387_v5, %v18389_v54  ;;  %v18795_v54 = vld [vmem:[#allocation2 + $0x30] sm:$0xf] }
 0x4aa   : > { %10469 = vmatmul.mubr.bf16.gmra.mrb[192].mxu1 %v20352_v56  ;;  %v12092_v56 = vcombine.low %v7327_v3, %v14320_v8  ;;  %v12095_v31 = vcombine.low %v18762_v55, %v18491_v26 }
 0x4ab   : > { %v18755_v1 = vadd.f32 %v12757_v63, %v18518_v27  ;;  %10476 = vmatprep.mubr.bf16.mxu1 %v12280_v23  ;;  %v12094_v63 = vcombine.low %v18760_v18, %v18489_v51  ;;  %v20353_v23 = vcombine.low %v18375_v32, %v18377_v19  ;;  %v8449_v35 = vrot.slane %v12093_v44, 1 }
 0x4ac   : > { %v8620_v32 = vshll.u32 %v12095_v31, 16 }
 0x4ad   : > { %v12758_v62 = vpop.f32.mrb[88].mxu1  ;;  %v8613_v6 = vshll.u32 %v12094_v63, 16 }
 0x4ae   : > { %v12759_v42 = vpop.f32.mrb[89].mxu1 }
 0x4af   : > { %v12760_v59 = vadd.f32 %v12759_v42, %v12758_v62  ;;  %v12761_v60 = vpop.f32.mrb[90].mxu1  ;;  %v18777_v62 = vld [vmem:[#allocation2 + $0x28] sm:$0xf]  ;;  %v8448_v42 = vrot.slane %v12092_v56, 1  ;;  %v8615_v3 = vrot.slane %v8613_v6, 1  ;;  %v8618_v6 = vshrl.u32 %v12095_v31, 16 }
 0x4b0   : > { %v12762_v27 = vpop.f32.mrb[91].mxu1  ;;  %v12098_v31 = vcombine.low %v18795_v54, %v18493_v13  ;;  %v18816_v13 = vld [vmem:[#allocation2 + $0x40] sm:$0xf] }
 0x4b1   : > { %v18765_v34 = vadd.f32 %v12760_v59, %v18554_v30  ;;  %v12763_v57 = vadd.f32 %v12762_v27, %v12761_v60  ;;  %v18779_v59 = vld [vmem:[#allocation2 + $0x20] sm:$0xf]  ;;  %v12298_v27 = vcombine.low %v8448_v42, %v8449_v35 }
 0x4b2   : > { %10477 = vmatmul.mubr.bf16.gmra.mrb[196].mxu1 %v20353_v23  ;;  %v14322_v23 = vld [vmem:[#allocation2 + $0x24] sm:$0x1] }
 0x4b3   : > { %v18773_v53 = vadd.f32 %v12763_v57, %v18571_v16  ;;  %10484 = vmatprep.mubr.bf16.mxu1 %v12289_v37  ;;  %v14321_v16 = vld [vmem:[#allocation2 + $0x2c] sm:$0x1]  ;;  %v8611_v57 = vshrl.u32 %v12094_v63, 16  ;;  %v8622_v37 = vrot.slane %v8620_v32, 1  ;;  %v12096_v8 = vcombine.low %v18779_v59, %v14322_v23  ;;  %v18797_v32 = vld [vmem:[#allocation2 + $0x38] sm:$0xf] }
 0x4b4   : > { %v12097_v60 = vcombine.low %v18777_v62, %v14321_v16  ;;  %v12099_v23 = vcombine.low %v18797_v32, %v18495_v14  ;;  %v14184_v14 = vld [vmem:[%s19647_s4 + $0x208] sm:$0xff]  }
 0x4b5   : > { %v12764_v30 = vpop.f32.mrb[92].mxu1  ;;  %v8616_v35 = vor.u32 %v8615_v3, %v8611_v57  ;;  %v8623_v63 = vor.u32 %v8622_v37, %v8618_v6  ;;  %v20356_v3 = vcombine.low %v18399_v48, %v18401_v41  ;;  %v18818_v48 = vld [vmem:[#allocation2 + $0x48] sm:$0xf] }
 0x4b6   : > { %v12765_v24 = vpop.f32.mrb[93].mxu1  ;;  %v8634_v56 = vshll.u32 %v12097_v60, 16  ;;  %v8632_v37 = vshrl.u32 %v12097_v60, 16  ;;  %v12164_v60 = vcombine.low %v18760_v18, %v18762_v55  ;;  %v20359_v18 = vld [vmem:[#allocation68_spill] sm:$0xff] }
 0x4b7   : > { %v12766_v51 = vadd.f32 %v12765_v24, %v12764_v30  ;;  %v12767_v4 = vpop.f32.mrb[94].mxu1 }
 0x4b8   : > { %v12768_v19 = vpop.f32.mrb[95].mxu1  ;;  %v8636_v42 = vrot.slane %v8634_v56, 1  ;;  %v8625_v56 = vshrl.u32 %v12096_v8, 16 }
 0x4b9   : > { %v18783_v22 = vadd.f32 %v12766_v51, %v18589_v21  ;;  %v12769_v26 = vadd.f32 %v12768_v19, %v12767_v4  ;;  %v14248_v21 = vld [vmem:[%s19650_s7 + $0x18] sm:$0xff]   ;;  %v8627_v51 = vshll.u32 %v12096_v8, 16 }
 0x4ba   : > { %10485 = vmatmul.mubr.bf16.gmra.mrb[200].mxu1 %v20354_v47  ;;  %13524 = vmatprep.subr.bf16.mxu0 %v14248_v21  ;;  %v20357_v47 = vld [vmem:[#allocation61_spill] sm:$0xff] }
 0x4bb   : > { %v18789_v44 = vadd.f32 %v12769_v26, %v18591_v36  ;;  %10492 = vmatprep.mubr.bf16.mxu1 %v12298_v27  ;;  %13525 = vmatpush3.bf16.msra.mxu0 %v14248_v21  ;;  %v12165_v26 = vcombine.low %v8616_v35, %v8623_v63  ;;  %v20355_v27 = vld [vmem:[#allocation59_spill] sm:$0xff]  ;;  %v8641_v35 = vshll.u32 %v12098_v31, 16  ;;  %v14323_v63 = vld [vmem:[#allocation2 + $0x44] sm:$0x1] }
 0x4bc   : > { %v12100_v8 = vcombine.low %v18816_v13, %v14323_v63 }
 0x4bd   : > { %v12770_v30 = vpop.f32.mrb[96].mxu1 }
 0x4be   : > { %v12771_v5 = vpop.f32.mrb[97].mxu1  ;;  %13527 = vmatmul.mubr.msk.bf16.vlgmr.msra.gmra.mrb[32].mxu0 %vm1746_vm2, %v20355_v27  ;;  %v8643_v27 = vrot.slane %v8641_v35, 1  ;;  %v8646_v35 = vshrl.u32 %v12099_v23, 16 }
 0x4bf   : > { %v12772_v36 = vadd.f32 %v12771_v5, %v12770_v30  ;;  %v12773_v24 = vpop.f32.mrb[98].mxu1  ;;  %13530 = vmatprep.mubr.msk.bf16.mxu0 %vm1746_vm2, %v20357_v47  ;;  %v8637_v30 = vor.u32 %v8636_v42, %v8632_v37  ;;  %v8639_v47 = vshrl.u32 %v12098_v31, 16 }
 0x4c0   : > { %v12774_v4 = vpop.f32.mrb[99].mxu1 }
 0x4c1   : > { %v18800_v19 = vadd.f32 %v12772_v36, %v18598_v7  ;;  %v12775_v16 = vadd.f32 %v12774_v4, %v12773_v24  ;;  %v8629_v7 = vrot.slane %v8627_v51, 1  ;;  %v14324_v51 = vld [vmem:[#allocation2 + $0x4c] sm:$0x1] }
 0x4c2   : > { %10493 = vmatmul.mubr.bf16.gmra.mrb[204].mxu1 %v20356_v3  ;;  %v12101_v4 = vcombine.low %v18818_v48, %v14324_v51  ;;  %v20358_v3 = vld [vmem:[#allocation64_spill] sm:$0xff] }
 0x4c3   : > { %v18812_v57 = vadd.f32 %v12775_v16, %v18600_v10  ;;  %10533 = vmatprep.mubr.bf16.mxu1 %v12165_v26  ;;  %v8630_v36 = vor.u32 %v8629_v7, %v8625_v56  ;;  %v8648_v10 = vshll.u32 %v12099_v23, 16  ;;  %v14202_v23 = vld [vmem:[%s19647_s4 + $0x218] sm:$0xff]  }
 0x4c4   : > { %v8662_v37 = vshll.u32 %v12101_v4, 16 }
 0x4c5   : > { %v12776_v21 = vpop.f32.mrb[100].mxu1  ;;  %v12174_v26 = vcombine.low %v8630_v36, %v8637_v30  ;;  %v8650_v7 = vrot.slane %v8648_v10, 1  ;;  %v8644_v30 = vor.u32 %v8643_v27, %v8639_v47  ;;  %v12173_v10 = vcombine.low %v18779_v59, %v18777_v62  ;;  %v20360_v27 = vld [vmem:[#allocation72_spill] sm:$0xff]  ;;  %v20361_v62 = vld [vmem:[#allocation78_spill] sm:$0xff] }
 0x4c6   : > { %v12777_v41 = vpop.f32.mrb[101].mxu1  ;;  %13531 = vmatmul.mubr.msk.bf16.gmra.mrb[36].mxu0 %vm1746_vm2, %v20358_v3  ;;  %v8664_v63 = vrot.slane %v8662_v37, 1 }
 0x4c7   : > { %v12778_v6 = vadd.f32 %v12777_v41, %v12776_v21  ;;  %v12779_v5 = vpop.f32.mrb[102].mxu1  ;;  %13534 = vmatprep.mubr.msk.bf16.mxu0 %vm1746_vm2, %v20359_v18  ;;  %v14193_v21 = vld [vmem:[%s19647_s4 + $0x210] sm:$0xff]   ;;  %v8651_v36 = vor.u32 %v8650_v7, %v8646_v35  ;;  %v14325_v35 = vld [vmem:[#allocation2 + $0x7c] sm:$0x1] }
 0x4c8   : > { %v12780_v24 = vpop.f32.mrb[103].mxu1 }
 0x4c9   : > { %v18828_v42 = vadd.f32 %v12778_v6, %v18605_v58  ;;  %v12781_v16 = vadd.f32 %v12780_v24, %v12779_v5  ;;  %v8655_v58 = vshll.u32 %v12100_v8, 16  ;;  %v18841_v6 = vld [vmem:[#allocation2 + $0x60] sm:$0xf] }
 0x4ca   : > { %10534 = vmatmul.mubr.bf16.vlgmr.msra.gmra.mrb[208].mxu1 %v12164_v60  ;;  %v8660_v60 = vshrl.u32 %v12101_v4, 16  ;;  %v8653_v4 = vshrl.u32 %v12100_v8, 16 }
 0x4cb   : > { %v18835_v55 = vadd.f32 %v12781_v16, %v18613_v49  ;;  %13471 = vmatpush3.bf16.msra.mxu1 %v18681_v12  ;;  %10541 = vmatprep.mubr.bf16.mxu1 %v12174_v26  ;;  %v18843_v12 = vld [vmem:[#allocation2 + $0x68] sm:$0xf]  ;;  %v8657_v24 = vrot.slane %v8655_v58, 1  ;;  %v12183_v26 = vcombine.low %v8644_v30, %v8651_v36  ;;  %v18867_v58 = vld [vmem:[#allocation2 + $0x78] sm:$0xf] }
 0x4cc   : > { %13472 = vmatprep.subr.bf16.mxu1 %v14184_v14  ;;  %v8665_v47 = vor.u32 %v8664_v63, %v8660_v60 }
 0x4cd   : > { %v12782_v56 = vpop.f32.mrb[104].mxu1  ;;  %v8658_v18 = vor.u32 %v8657_v24, %v8653_v4  ;;  %v20362_v24 = vld [vmem:[#allocation89_spill] sm:$0xff] }
 0x4ce   : > { %v12783_v41 = vpop.f32.mrb[105].mxu1  ;;  %13535 = vmatmul.mubr.msk.bf16.gmra.mrb[40].mxu0 %vm1746_vm2, %v20360_v27 }
 0x4cf   : > { %v12784_v49 = vadd.f32 %v12783_v41, %v12782_v56  ;;  %v12785_v5 = vpop.f32.mrb[106].mxu1  ;;  %13473 = vmatpush3.bf16.msra.mxu1 %v14184_v14  ;;  %v12102_v14 = vcombine.low %v18841_v6, %v18497_v43  ;;  %13538 = vmatprep.mubr.msk.bf16.mxu0 %vm1746_vm2, %v20361_v62  ;;  %v14211_v43 = vld [vmem:[%s19647_s4 + $0x220] sm:$0xff]   ;;  %v12105_v41 = vcombine.low %v18867_v58, %v14325_v35 }
 0x4d0   : > { %v12786_v31 = vpop.f32.mrb[107].mxu1  ;;  %13474 = vmatprep.subr.bf16.mxu1 %v14193_v21  ;;  %v14327_v35 = vld [vmem:[#allocation2 + $0x84] sm:$0x1] }
 0x4d1   : > { %v18851_v51 = vadd.f32 %v12784_v49, %v18624_v20  ;;  %v12787_v16 = vadd.f32 %v12786_v31, %v12785_v5  ;;  %v12103_v20 = vcombine.low %v18843_v12, %v18499_v61  ;;  %v8669_v7 = vshll.u32 %v12102_v14, 16  ;;  %v14221_v49 = vld [vmem:[%s19647_s4 + $0x228] sm:$0xff]  }
 0x4d2   : > { %10542 = vmatmul.mubr.bf16.gmra.mrb[212].mxu1 %v12173_v10  ;;  %v12182_v61 = vcombine.low %v18795_v54, %v18797_v32  ;;  %v12192_v31 = vcombine.low %v8658_v18, %v8665_v47  ;;  %v20363_v54 = vld [vmem:[#allocation90_spill] sm:$0xff]  ;;  %v8667_v60 = vshrl.u32 %v12102_v14, 16 }
 0x4d3   : > { %v18860_v59 = vadd.f32 %v12787_v16, %v18632_v25  ;;  %10549 = vmatprep.mubr.bf16.mxu1 %v12183_v26  ;;  %13475 = vmatpush3.bf16.msra.mxu1 %v14193_v21  ;;  %v8676_v30 = vshll.u32 %v12103_v20, 16  ;;  %v18871_v21 = vld [vmem:[#allocation2 + $0x70] sm:$0xf]  ;;  %v8671_v10 = vrot.slane %v8669_v7, 1  ;;  %v8690_v16 = vshll.u32 %v12105_v41, 16 }
 0x4d4   : > { %13476 = vmatprep.subr.bf16.mxu1 %v14202_v23  ;;  %v14232_v26 = vld [vmem:[%s19647_s4 + $0x230] sm:$0xff]   ;;  %v8674_v4 = vshrl.u32 %v12103_v20, 16  ;;  %v18891_v18 = vld [vmem:[#allocation2 + $0x80] sm:$0xf]  ;;  %v14242_v20 = vld [vmem:[%s19647_s4 + $0x238] sm:$0xff]  }
 0x4d5   : > { %v12788_v3 = vpop.f32.mrb[108].mxu1  ;;  %v8678_v63 = vrot.slane %v8676_v30, 1  ;;  %v8672_v62 = vor.u32 %v8671_v10, %v8667_v60  ;;  %v8688_v10 = vshrl.u32 %v12105_v41, 16 }
 0x4d6   : > { %v12789_v37 = vpop.f32.mrb[109].mxu1  ;;  %13539 = vmatmul.mubr.msk.bf16.gmra.mrb[44].mxu0 %vm1746_vm2, %v20362_v24 }
 0x4d7   : > { %v12790_v25 = vadd.f32 %v12789_v37, %v12788_v3  ;;  %v12791_v56 = vpop.f32.mrb[110].mxu1  ;;  %13477 = vmatpush3.bf16.msra.mxu1 %v14202_v23  ;;  %13542 = vmatprep.mubr.msk.bf16.mxu0 %vm1746_vm2, %v20363_v54  ;;  %v14326_v23 = vld [vmem:[#allocation2 + $0x74] sm:$0x1]  ;;  %v8679_v14 = vor.u32 %v8678_v63, %v8674_v4  ;;  %v18912_v54 = vld [vmem:[#allocation2 + $0x90] sm:$0xf] }
 0x4d8   : > { %v12792_v8 = vpop.f32.mrb[111].mxu1  ;;  %13478 = vmatprep.subr.bf16.mxu1 %v14211_v43 }
 0x4d9   : > { %v18878_v5 = vadd.f32 %v12790_v25, %v18643_v9  ;;  %v12793_v36 = vadd.f32 %v12792_v8, %v12791_v56  ;;  %v12104_v9 = vcombine.low %v18871_v21, %v14326_v23  ;;  %v8692_v25 = vrot.slane %v8690_v16, 1  ;;  %v18895_v56 = vld [vmem:[#allocation2 + $0x88] sm:$0xf] }
 0x4da   : > { %10550 = vmatmul.mubr.bf16.gmra.mrb[216].mxu1 %v12182_v61  ;;  %v12201_v61 = vcombine.low %v8672_v62, %v8679_v14 }
 0x4db   : > { %v18885_v32 = vadd.f32 %v12793_v36, %v18651_v15  ;;  %10557 = vmatprep.mubr.bf16.mxu1 %v12192_v31  ;;  %13479 = vmatpush3.bf16.msra.mxu1 %v14211_v43  ;;  %v8683_v7 = vshll.u32 %v12104_v9, 16  ;;  %v12191_v43 = vcombine.low %v18816_v13, %v18818_v48  ;;  %v20364_v36 = vld [vmem:[#allocation91_spill] sm:$0xff]  ;;  %v20365_v13 = vld [vmem:[#allocation92_spill] sm:$0xff]  ;;  %v8681_v63 = vshrl.u32 %v12104_v9, 16 }
 0x4dc   : > { %13480 = vmatprep.subr.bf16.mxu1 %v14221_v49  ;;  %v8693_v23 = vor.u32 %v8692_v25, %v8688_v10 }
 0x4dd   : > { %v12794_v27 = vpop.f32.mrb[112].mxu1  ;;  %v8685_v31 = vrot.slane %v8683_v7, 1  ;;  %v14330_v7 = vld [vmem:[#allocation2 + $0x9c] sm:$0x1] }
 0x4de   : > { %v12795_v3 = vpop.f32.mrb[113].mxu1  ;;  %13543 = vmatmul.mubr.msk.bf16.gmra.mrb[48].mxu0 %vm1746_vm2, %v20364_v36 }
 0x4df   : > { %v12796_v15 = vadd.f32 %v12795_v3, %v12794_v27  ;;  %v12797_v47 = vpop.f32.mrb[114].mxu1  ;;  %13481 = vmatpush3.bf16.msra.mxu1 %v14221_v49  ;;  %v12106_v49 = vcombine.low %v18891_v18, %v14327_v35  ;;  %13546 = vmatprep.mubr.msk.bf16.mxu0 %vm1746_vm2, %v20365_v13  ;;  %v18914_v27 = vld [vmem:[#allocation2 + $0x98] sm:$0xf]  ;;  %v8686_v3 = vor.u32 %v8685_v31, %v8681_v63 }
 0x4e0   : > { %v12798_v37 = vpop.f32.mrb[115].mxu1  ;;  %13482 = vmatprep.subr.bf16.mxu1 %v14232_v26  ;;  %v12109_v9 = vcombine.low %v18914_v27, %v14330_v7  ;;  %v20368_v7 = vld [vmem:[#allocation21_spill] sm:$0xff] }
 0x4e1   : > { %v18901_v30 = vadd.f32 %v12796_v15, %v18662_v17  ;;  %v12799_v8 = vadd.f32 %v12798_v37, %v12797_v47  ;;  %v14328_v17 = vld [vmem:[#allocation2 + $0x8c] sm:$0x1]  ;;  %v8697_v16 = vshll.u32 %v12106_v49, 16  ;;  %v12200_v47 = vcombine.low %v18841_v6, %v18843_v12 }
 0x4e2   : > { %10558 = vmatmul.mubr.bf16.gmra.mrb[220].mxu1 %v12191_v43  ;;  %v12107_v24 = vcombine.low %v18895_v56, %v14328_v17  ;;  %v12210_v25 = vcombine.low %v8686_v3, %v8693_v23  ;;  %v8695_v12 = vshrl.u32 %v12106_v49, 16  ;;  %v8718_v13 = vshll.u32 %v12109_v9, 16  ;;  %v18934_v49 = vld [vmem:[#allocation2 + $0xb8] sm:$0xf] }
 0x4e3   : > { %v18909_v48 = vadd.f32 %v12799_v8, %v18670_v29  ;;  %10565 = vmatprep.mubr.bf16.mxu1 %v12201_v61  ;;  %13483 = vmatpush3.bf16.msra.mxu1 %v14232_v26  ;;  %v14329_v26 = vld [vmem:[#allocation2 + $0x94] sm:$0x1]  ;;  %v8699_v8 = vrot.slane %v8697_v16, 1  ;;  %v20366_v61 = vld [vmem:[#allocation19_spill] sm:$0xff] }
 0x4e4   : > { %13484 = vmatprep.subr.bf16.mxu1 %v14242_v20  ;;  %v8704_v15 = vshll.u32 %v12107_v24, 16  ;;  %v12108_v14 = vcombine.low %v18912_v54, %v14329_v26  ;;  %v8702_v10 = vshrl.u32 %v12107_v24, 16  ;;  %v8720_v3 = vrot.slane %v8718_v13, 1 }
 0x4e5   : > { %v12800_v60 = vpop.f32.mrb[116].mxu1  ;;  %v8700_v31 = vor.u32 %v8699_v8, %v8695_v12  ;;  %v18948_v12 = vld [vmem:[#allocation2 + $0xc8] sm:$0xf] }
 0x4e6   : > { %v12801_v62 = vpop.f32.mrb[117].mxu1  ;;  %13547 = vmatmul.mubr.msk.bf16.gmra.mrb[52].mxu0 %vm1746_vm2, %v20366_v61  ;;  %v8706_v35 = vrot.slane %v8704_v15, 1  ;;  %v8711_v36 = vshll.u32 %v12108_v14, 16 }
 0x4e7   : > { %v12802_v4 = vadd.f32 %v12801_v62, %v12800_v60  ;;  %v12803_v29 = vpop.f32.mrb[118].mxu1  ;;  %13485 = vmatpush3.bf16.msra.mxu1 %v14242_v20  ;;  %v20367_v20 = vld [vmem:[#allocation20_spill] sm:$0xff] }
 0x4e8   : > { %v12804_v41 = vpop.f32.mrb[119].mxu1  ;;  %13550 = vmatprep.mubr.msk.bf16.mxu0 %vm1746_vm2, %v20367_v20  ;;  %v18930_v60 = vld [vmem:[#allocation2 + $0xb0] sm:$0xf]  ;;  %v8707_v16 = vor.u32 %v8706_v35, %v8702_v10  ;;  %v18952_v10 = vld [vmem:[#allocation2 + $0xc0] sm:$0xf] }
 0x4e9   : > { %v18921_v37 = vadd.f32 %v12802_v4, %v18683_v40  ;;  %v12805_v43 = vadd.f32 %v12804_v41, %v12803_v29  ;;  %v12209_v4 = vcombine.low %v18871_v21, %v18867_v58  ;;  %v8716_v29 = vshrl.u32 %v12109_v9, 16  ;;  %v14332_v9 = vld [vmem:[#allocation2 + $0xbc] sm:$0x1] }
 0x4ea   : > { %10566 = vmatmul.mubr.bf16.gmra.mrb[224].mxu1 %v12200_v47  ;;  %v12219_v24 = vcombine.low %v8700_v31, %v8707_v16  ;;  %v14331_v47 = vld [vmem:[#allocation2 + $0xb4] sm:$0x1]  ;;  %v8709_v21 = vshrl.u32 %v12108_v14, 16  ;;  %v14333_v14 = vld [vmem:[#allocation2 + $0xcc] sm:$0x1] }
 0x4eb   : > { %v18928_v6 = vadd.f32 %v12805_v43, %v18686_v50  ;;  %10573 = vmatprep.mubr.bf16.mxu1 %v12210_v25  ;;  %v8713_v50 = vrot.slane %v8711_v36, 1  ;;  %v12110_v26 = vcombine.low %v18930_v60, %v14331_v47  ;;  %v20369_v43 = vld [vmem:[#allocation22_spill] sm:$0xff]  ;;  %v8721_v61 = vor.u32 %v8720_v3, %v8716_v29 }
 0x4ec   : > { %v14334_v29 = vld [vmem:[#allocation2 + $0xc4] sm:$0x1] }
 0x4ed   : > { %v12806_v40 = vpop.f32.mrb[120].mxu1  ;;  %v8714_v8 = vor.u32 %v8713_v50, %v8709_v21  ;;  %v8725_v20 = vshll.u32 %v12110_v26, 16  ;;  %v12112_v3 = vcombine.low %v18952_v10, %v14334_v29 }
 0x4ee   : > { %v12807_v17 = vpop.f32.mrb[121].mxu1  ;;  %13551 = vmatmul.mubr.msk.bf16.gmra.mrb[56].mxu0 %vm1746_vm2, %v20368_v7 }
 0x4ef   : > { %v12808_v63 = vadd.f32 %v12807_v17, %v12806_v40  ;;  %v12809_v23 = vpop.f32.mrb[122].mxu1  ;;  %13554 = vmatprep.mubr.msk.bf16.mxu0 %vm1746_vm2, %v20369_v43  ;;  %v12113_v17 = vcombine.low %v18948_v12, %v14333_v14  ;;  %v12228_v16 = vcombine.low %v8714_v8, %v8721_v61  ;;  %v18964_v43 = vld [vmem:[#allocation2 + $0xd0] sm:$0xf]  ;;  %v8739_v8 = vshll.u32 %v12112_v3, 16 }
 0x4f0   : > { %v12810_v62 = vpop.f32.mrb[123].mxu1 }
 0x4f1   : > { %v18937_v15 = vadd.f32 %v12808_v63, %v18691_v46  ;;  %v12811_v41 = vadd.f32 %v12810_v62, %v12809_v23  ;;  %v12111_v46 = vcombine.low %v18934_v49, %v14332_v9  ;;  %v8727_v62 = vrot.slane %v8725_v20, 1  ;;  %v18968_v20 = vld [vmem:[#allocation2 + $0xd8] sm:$0xf] }
 0x4f2   : > { %10574 = vmatmul.mubr.bf16.gmra.mrb[228].mxu1 %v12209_v4  ;;  %v20370_v4 = vld [vmem:[#allocation34_spill] sm:$0xff] }
 0x4f3   : > { %v18945_v58 = vadd.f32 %v12811_v41, %v18693_v2  ;;  %10581 = vmatprep.mubr.bf16.mxu1 %v12219_v24  ;;  %v8732_v40 = vshll.u32 %v12111_v46, 16  ;;  %v12218_v2 = vcombine.low %v18891_v18, %v18895_v56  ;;  %v8723_v18 = vshrl.u32 %v12110_v26, 16 }
 0x4f4   : > { %v8746_v41 = vshll.u32 %v12113_v17, 16  ;;  %v8730_v47 = vshrl.u32 %v12111_v46, 16  ;;  %v14335_v46 = vld [vmem:[#allocation2 + $0xd4] sm:$0x1] }
 0x4f5   : > { %v12812_v25 = vpop.f32.mrb[124].mxu1  ;;  %v8734_v56 = vrot.slane %v8732_v40, 1 }
 0x4f6   : > { %v12813_v35 = vpop.f32.mrb[125].mxu1  ;;  %13555 = vmatmul.mubr.msk.bf16.gmra.mrb[60].mxu0 %vm1746_vm2, %v20370_v4  ;;  %v8748_v26 = vrot.slane %v8746_v41, 1  ;;  %v18980_v41 = vld [vmem:[#allocation2 + $0xe8] sm:$0xf] }
 0x4f7   : > { %v12814_v36 = vadd.f32 %v12813_v35, %v12812_v25  ;;  %v12815_v13 = vpop.f32.mrb[126].mxu1  ;;  %v8735_v25 = vor.u32 %v8734_v56, %v8730_v47  ;;  %v20371_v35 = vld [vmem:[#allocation26_spill] sm:$0xff] }
 0x4f8   : > { %v12816_v31 = vpop.f32.mrb[127].mxu1 }
 0x4f9   : > { %v18956_v63 = vadd.f32 %v12814_v36, %v18698_v28  ;;  %v12817_v23 = vadd.f32 %v12816_v31, %v12815_v13  ;;  %v8728_v28 = vor.u32 %v8727_v62, %v8723_v18  ;;  %v12114_v31 = vcombine.low %v18964_v43, %v14335_v46  ;;  %v14336_v62 = vld [vmem:[#allocation2 + $0xdc] sm:$0x1] }
 0x4fa   : > { %10582 = vmatmul.mubr.bf16.gmra.mrb[232].mxu1 %v12218_v2  ;;  %v20372_v2 = vld [vmem:[#allocation27_spill] sm:$0xff]  ;;  %v8737_v18 = vshrl.u32 %v12112_v3, 16  ;;  %v20373_v3 = vld [vmem:[#allocation125_spill] sm:$0xff] }
 0x4fb   : > { %v18961_v50 = vadd.f32 %v12817_v23, %v18700_v52  ;;  %10589 = vmatprep.mubr.bf16.mxu1 %v12228_v16  ;;  %v12227_v52 = vcombine.low %v18912_v54, %v18914_v27  ;;  %v12237_v40 = vcombine.low %v8728_v28, %v8735_v25  ;;  %v8741_v23 = vrot.slane %v8739_v8, 1  ;;  %v18978_v27 = vld [vmem:[#allocation2 + $0xe0] sm:$0xf]  ;;  %v14337_v25 = vld [vmem:[#allocation2 + $0xe4] sm:$0x1]  ;;  %v20374_v46 = vld [vmem:[#allocation105_spill] sm:$0xff] }
 0x4fc   : > { %v8744_v16 = vshrl.u32 %v12113_v17, 16  ;;  %v12115_v54 = vcombine.low %v18968_v20, %v14336_v62  ;;  %v8753_v29 = vshll.u32 %v12114_v31, 16  ;;  %v12236_v17 = vcombine.low %v18930_v60, %v18934_v49 }
 0x4fd   : > { %v12818_v24 = vpop.f32.mrb[128].mxu1  ;;  %v12116_v8 = vcombine.low %v18978_v27, %v14337_v25  ;;  %v18992_v25 = vld [vmem:[#allocation2 + $0x100] sm:$0xf] }
 0x4fe   : > { %v12819_v7 = vpop.f32.mrb[129].mxu1  ;;  %v8749_v56 = vor.u32 %v8748_v26, %v8744_v16 }
 0x4ff   : > { %v12820_v21 = vadd.f32 %v12819_v7, %v12818_v24  ;;  %v12821_v9 = vpop.f32.mrb[130].mxu1  ;;  %v8742_v7 = vor.u32 %v8741_v23, %v8737_v18  ;;  %v8751_v23 = vshrl.u32 %v12114_v31, 16  ;;  %v8767_v60 = vshll.u32 %v12116_v8, 16  ;;  %v18996_v31 = vld [vmem:[#allocation2 + $0x108] sm:$0xf] }
 0x500   : > { %v12822_v61 = vpop.f32.mrb[131].mxu1  ;;  %v8758_v18 = vshrl.u32 %v12115_v54, 16 }
 0x501   : > { %v18971_v36 = vadd.f32 %v12820_v21, %v20371_v35  ;;  %v12823_v13 = vadd.f32 %v12822_v61, %v12821_v9  ;;  %v8760_v21 = vshll.u32 %v12115_v54, 16  ;;  %v14338_v61 = vld [vmem:[#allocation2 + $0xec] sm:$0x1] }
 0x502   : > { %10590 = vmatmul.mubr.bf16.gmra.mrb[236].mxu1 %v12227_v52  ;;  %v12117_v52 = vcombine.low %v18980_v41, %v14338_v61 }
 0x503   : > { %v18975_v14 = vadd.f32 %v12823_v13, %v20372_v2  ;;  %10597 = vmatprep.mubr.bf16.mxu1 %v12237_v40  ;;  %v12246_v13 = vcombine.low %v8742_v7, %v8749_v56  ;;  %v8755_v40 = vrot.slane %v8753_v29, 1  ;;  %v8762_v16 = vrot.slane %v8760_v21, 1  ;;  %v20375_v21 = vld [vmem:[#allocation106_spill] sm:$0xff] }
 0x504   : > { %v8774_v49 = vshll.u32 %v12117_v52, 16  ;;  %v12245_v29 = vcombine.low %v18952_v10, %v18948_v12  ;;  %v8769_v7 = vrot.slane %v8767_v60, 1  ;;  %v14340_v12 = vld [vmem:[#allocation2 + $0x10c] sm:$0x1] }
 0x505   : > { %v12824_v4 = vpop.f32.mrb[132].mxu1  ;;  %v12119_v10 = vcombine.low %v18996_v31, %v14340_v12 }
 0x506   : > { %v12825_v24 = vpop.f32.mrb[133].mxu1 }
 0x507   : > { %v12826_v28 = vadd.f32 %v12825_v24, %v12824_v4  ;;  %v12827_v47 = vpop.f32.mrb[134].mxu1  ;;  %v8756_v4 = vor.u32 %v8755_v40, %v8751_v23  ;;  %v8765_v23 = vshrl.u32 %v12116_v8, 16  ;;  %v14341_v8 = vld [vmem:[#allocation2 + $0x11c] sm:$0x1] }
 0x508   : > { %v12828_v9 = vpop.f32.mrb[135].mxu1 }
 0x509   : > { %v18987_v26 = vadd.f32 %v12826_v28, %v20373_v3  ;;  %v12829_v35 = vadd.f32 %v12828_v9, %v12827_v47  ;;  %v8763_v47 = vor.u32 %v8762_v16, %v8758_v18  ;;  %v8772_v9 = vshrl.u32 %v12117_v52, 16 }
 0x50a   : > { %10598 = vmatmul.mubr.bf16.gmra.mrb[240].mxu1 %v12236_v17  ;;  %v8776_v17 = vrot.slane %v8774_v49, 1  ;;  %v8770_v16 = vor.u32 %v8769_v7, %v8765_v23 }
 0x50b   : > { %v18990_v2 = vadd.f32 %v12829_v35, %v20374_v46  ;;  %10605 = vmatprep.mubr.bf16.mxu1 %v12246_v13  ;;  %v12255_v54 = vcombine.low %v8756_v4, %v8763_v47  ;;  %v14339_v13 = vld [vmem:[#allocation2 + $0x104] sm:$0x1] }
 0x50c   : > { %v12118_v40 = vcombine.low %v18992_v25, %v14339_v13  ;;  %v8777_v60 = vor.u32 %v8776_v17, %v8772_v9 }
 0x50d   : > { %v12830_v62 = vpop.f32.mrb[136].mxu1 }
 0x50e   : > { %v12831_v24 = vpop.f32.mrb[137].mxu1  ;;  %v8781_v49 = vshll.u32 %v12118_v40, 16  ;;  %v12264_v9 = vcombine.low %v8770_v16, %v8777_v60  ;;  %v8779_v13 = vshrl.u32 %v12118_v40, 16 }
 0x50f   : > { %v12832_v28 = vadd.f32 %v12831_v24, %v12830_v62  ;;  %v12833_v61 = vpop.f32.mrb[138].mxu1  ;;  %v19006_v62 = vld [vmem:[#allocation2 + $0x118] sm:$0xf] }
 0x510   : > { %v12834_v56 = vpop.f32.mrb[139].mxu1  ;;  %v8783_v17 = vrot.slane %v8781_v49, 1 }
 0x511   : > { %v18999_v3 = vadd.f32 %v12832_v28, %v20375_v21  ;;  %v12835_v35 = vadd.f32 %v12834_v56, %v12833_v61  ;;  %v8788_v28 = vshll.u32 %v12119_v10, 16  ;;  %v19008_v61 = vld [vmem:[#allocation2 + $0x110] sm:$0xf]  ;;  %v12121_v56 = vcombine.low %v19006_v62, %v14341_v8  ;;  %v14342_v21 = vld [vmem:[#allocation2 + $0x114] sm:$0x1] }
 0x512   : > { %10606 = vmatmul.mubr.bf16.gmra.mrb[244].mxu1 %v12245_v29  ;;  %v8784_v12 = vor.u32 %v8783_v17, %v8779_v13  ;;  %v14344_v13 = vld [vmem:[#allocation2 + $0x12c] sm:$0x1] }
 0x513   : > { %v19003_v46 = vadd.f32 %v12835_v35, %v18724_v33  ;;  %10613 = vmatprep.mubr.bf16.mxu1 %v12255_v54  ;;  %v12254_v33 = vcombine.low %v18964_v43, %v18968_v20  ;;  %v12120_v35 = vcombine.low %v19008_v61, %v14342_v21  ;;  %v8790_v23 = vrot.slane %v8788_v28, 1 }
 0x514   : > { %v8802_v43 = vshll.u32 %v12121_v56, 16  ;;  %v8800_v17 = vshrl.u32 %v12121_v56, 16 }
 0x515   : > { %v12836_v52 = vpop.f32.mrb[140].mxu1 }
 0x516   : > { %v12837_v18 = vpop.f32.mrb[141].mxu1 }
 0x517   : > { %v12838_v4 = vadd.f32 %v12837_v18, %v12836_v52  ;;  %v12839_v24 = vpop.f32.mrb[142].mxu1  ;;  %v8786_v52 = vshrl.u32 %v12119_v10, 16  ;;  %v14343_v10 = vld [vmem:[#allocation2 + $0x124] sm:$0x1] }
 0x518   : > { %v12840_v47 = vpop.f32.mrb[143].mxu1 }
 0x519   : > { %v19014_v29 = vadd.f32 %v12838_v4, %v18729_v45  ;;  %v12841_v7 = vadd.f32 %v12840_v47, %v12839_v24  ;;  %v8795_v45 = vshll.u32 %v12120_v35, 16  ;;  %v19020_v4 = vld [vmem:[#allocation2 + $0x120] sm:$0xf]  ;;  %v8791_v49 = vor.u32 %v8790_v23, %v8786_v52 }
 0x51a   : > { %10614 = vmatmul.mubr.bf16.gmra.mrb[248].mxu1 %v12254_v33  ;;  %v12263_v47 = vcombine.low %v18978_v27, %v18980_v41  ;;  %v19024_v33 = vld [vmem:[#allocation2 + $0x128] sm:$0xf]  ;;  %v8793_v41 = vshrl.u32 %v12120_v35, 16 }
 0x51b   : > { %v19018_v54 = vadd.f32 %v12841_v7, %v18731_v39  ;;  %10621 = vmatprep.mubr.bf16.mxu1 %v12264_v9  ;;  %v8804_v39 = vrot.slane %v8802_v43, 1  ;;  %v12273_v8 = vcombine.low %v8784_v12, %v8791_v49  ;;  %v12122_v7 = vcombine.low %v19020_v4, %v14343_v10 }
 0x51c   : > { %v8797_v9 = vrot.slane %v8795_v45, 1  ;;  %v12123_v27 = vcombine.low %v19024_v33, %v14344_v13 }
 0x51d   : > { %v12858_v20 = vpop.f32.mrb[144].mxu1  ;;  %v8805_v23 = vor.u32 %v8804_v39, %v8800_v17  ;;  %v8807_v17 = vshrl.u32 %v12122_v7, 16 }
 0x51e   : > { %v12859_v18 = vpop.f32.mrb[145].mxu1  ;;  %v8798_v52 = vor.u32 %v8797_v9, %v8793_v41  ;;  %v8816_v45 = vshll.u32 %v12123_v27, 16 }
 0x51f   : > { %v12860_v16 = vadd.f32 %v12859_v18, %v12858_v20  ;;  %v12861_v60 = vpop.f32.mrb[146].mxu1  ;;  %v19034_v20 = vld [vmem:[#allocation2 + $0x130] sm:$0xf]  ;;  %v7361_v18 = vld [vmem:[#allocation2 + $0x138] sm:$0xf] }
 0x520   : > { %v12862_v24 = vpop.f32.mrb[147].mxu1  ;;  %v12282_v49 = vcombine.low %v8798_v52, %v8805_v23  ;;  %v8818_v13 = vrot.slane %v8816_v45, 1  ;;  %v8814_v23 = vshrl.u32 %v12123_v27, 16 }
 0x521   : > { %v19027_v40 = vadd.f32 %v12860_v16, %v18740_v11  ;;  %v12863_v28 = vadd.f32 %v12862_v24, %v12861_v60  ;;  %v8809_v11 = vshll.u32 %v12122_v7, 16  ;;  %v14345_v24 = vld [vmem:[#allocation2 + $0x134] sm:$0x1] }
 0x522   : > { %10622 = vmatmul.mubr.bf16.gmra.mrb[252].mxu1 %v12263_v47  ;;  %v12124_v47 = vcombine.low %v19034_v20, %v14345_v24 }
 0x523   : > { %v19031_v21 = vadd.f32 %v12863_v28, %v18746_v0  ;;  %10629 = vmatprep.mubr.bf16.mxu1 %v12273_v8  ;;  %v12272_v0 = vcombine.low %v18992_v25, %v18996_v31  ;;  %v8811_v28 = vrot.slane %v8809_v11, 1  ;;  %v14346_v8 = vld [vmem:[#allocation2 + $0x13c] sm:$0x1]  ;;  %v12281_v11 = vcombine.low %v19008_v61, %v19006_v62 }
 0x524   : > { %v12125_v10 = vcombine.low %v7361_v18, %v14346_v8  ;;  %v8823_v25 = vshll.u32 %v12124_v47, 16  ;;  %v8821_v24 = vshrl.u32 %v12124_v47, 16 }
 0x525   : > { %v12864_v43 = vpop.f32.mrb[148].mxu1  ;;  %v8812_v41 = vor.u32 %v8811_v28, %v8807_v17 }
 0x526   : > { %v12865_v12 = vpop.f32.mrb[149].mxu1 }
 0x527   : > { %v12866_v16 = vadd.f32 %v12865_v12, %v12864_v43  ;;  %v12867_v60 = vpop.f32.mrb[150].mxu1  ;;  %v8830_v43 = vshll.u32 %v12125_v10, 16 }
 0x528   : > { %v12868_v56 = vpop.f32.mrb[151].mxu1 }
 0x529   : > { %v19040_v35 = vadd.f32 %v12866_v16, %v18749_v38  ;;  %v12869_v39 = vadd.f32 %v12868_v56, %v12867_v60  ;;  %v8819_v16 = vor.u32 %v8818_v13, %v8814_v23  ;;  %v8828_v56 = vshrl.u32 %v12125_v10, 16 }
 0x52a   : > { %10630 = vmatmul.mubr.bf16.gmra.mrb[0].mxu1 %v12272_v0  ;;  %v8825_v0 = vrot.slane %v8823_v25, 1  ;;  %v12290_v10 = vcombine.low %v19020_v4, %v19024_v33 }
 0x52b   : > { %v19043_v9 = vadd.f32 %v12869_v39, %v18755_v1  ;;  %10637 = vmatprep.mubr.bf16.mxu1 %v12282_v49  ;;  %v12291_v45 = vcombine.low %v8812_v41, %v8819_v16  ;;  %v8832_v49 = vrot.slane %v8830_v43, 1  ;;  %v20377_v16 = vld [vmem:[#allocation93_spill] sm:$0xff] }
 0x52c   : > { %v8826_v28 = vor.u32 %v8825_v0, %v8821_v24  ;;  %v20382_v24 = vld [vmem:[#allocation94_spill] sm:$0xff] }
 0x52d   : > { %v12870_v31 = vpop.f32.mrb[152].mxu1  ;;  %v8833_v8 = vor.u32 %v8832_v49, %v8828_v56 }
 0x52e   : > { %v12871_v12 = vpop.f32.mrb[153].mxu1 }
 0x52f   : > { %v12872_v52 = vadd.f32 %v12871_v12, %v12870_v31  ;;  %v12873_v38 = vpop.f32.mrb[154].mxu1  ;;  %v12300_v31 = vcombine.low %v8826_v28, %v8833_v8  ;;  %v12299_v12 = vcombine.low %v19034_v20, %v7361_v18 }
 0x530   : > { %v12874_v60 = vpop.f32.mrb[155].mxu1 }
 0x531   : > { %v19048_v1 = vadd.f32 %v12872_v52, %v18765_v34  ;;  %v12875_v7 = vadd.f32 %v12874_v60, %v12873_v38  ;;  %v20376_v38 = vld [vmem:[#allocation15_spill] sm:$0xff] }
 0x532   : > { %10638 = vmatmul.mubr.bf16.gmra.mrb[4].mxu1 %v12281_v11 }
 0x533   : > { %v19051_v27 = vadd.f32 %v12875_v7, %v18773_v53  ;;  %10645 = vmatprep.mubr.bf16.mxu1 %v12291_v45  ;;  %v20380_v45 = vld [vmem:[#allocation84_spill] sm:$0xff] }
 0x535   : > { %v12876_v39 = vpop.f32.mrb[156].mxu1 }
 0x536   : > { %v12877_v17 = vpop.f32.mrb[157].mxu1 }
 0x537   : > { %v12878_v62 = vadd.f32 %v12877_v17, %v12876_v39  ;;  %v12879_v61 = vpop.f32.mrb[158].mxu1  ;;  %v20383_v39 = vld [vmem:[#allocation124_spill] sm:$0xff] }
 0x538   : > { %v12880_v34 = vpop.f32.mrb[159].mxu1  ;;  %v20384_v28 = vcombine.low %v20382_v24, %v20383_v39 }
 0x539   : > { %v19056_v13 = vadd.f32 %v12878_v62, %v18783_v22  ;;  %v12881_v25 = vadd.f32 %v12880_v34, %v12879_v61 }
 0x53a   : > { %10646 = vmatmul.mubr.bf16.gmra.mrb[8].mxu1 %v12290_v10 }
 0x53b   : > { %v19059_v53 = vadd.f32 %v12881_v25, %v18789_v44  ;;  %10653 = vmatprep.mubr.bf16.mxu1 %v12300_v31  ;;  %v20378_v44 = vcombine.low %v20376_v38, %v20377_v16  ;;  %v20385_v25 = vld [vmem:[#allocation8_spill] sm:$0xff]  ;;  %v20386_v31 = vld [vmem:[#allocation9_spill] sm:$0xff] }
 0x53d   : > { %v12882_v47 = vpop.f32.mrb[160].mxu1 }
 0x53e   : > { %v12883_v41 = vpop.f32.mrb[161].mxu1 }
 0x53f   : > { %v12884_v23 = vadd.f32 %v12883_v41, %v12882_v47  ;;  %v12885_v43 = vpop.f32.mrb[162].mxu1  ;;  %v20387_v47 = vcombine.low %v20385_v25, %v20386_v31  ;;  %v20388_v41 = vld [vmem:[#allocation95_spill] sm:$0xff] }
 0x540   : > { %v12886_v52 = vpop.f32.mrb[163].mxu1 }
 0x541   : > { %v19063_v4 = vadd.f32 %v12884_v23, %v18800_v19  ;;  %v12887_v33 = vadd.f32 %v12886_v52, %v12885_v43  ;;  %v20379_v19 = vld [vmem:[#allocation83_spill] sm:$0xff]  ;;  %v20389_v23 = vld [vmem:[#allocation97_spill] sm:$0xff] }
 0x542   : > { %10654 = vmatmul.mubr.bf16.gmra.mrb[12].mxu1 %v12299_v12  ;;  %v20381_v49 = vcombine.low %v20379_v19, %v20380_v45  ;;  %v20390_v43 = vcombine.low %v20388_v41, %v20389_v23 }
 0x543   : > { %v19066_v22 = vadd.f32 %v12887_v33, %v18812_v57  ;;  %13486 = vmatprep.mubr.bf16.mxu1 %v20378_v44 }
 0x545   : > { %v12888_v11 = vpop.f32.mrb[164].mxu1 }
 0x546   : > { %v12889_v60 = vpop.f32.mrb[165].mxu1 }
 0x547   : > { %v12890_v0 = vadd.f32 %v12889_v60, %v12888_v11  ;;  %v12891_v56 = vpop.f32.mrb[166].mxu1  ;;  %v20391_v11 = vld [vmem:[#allocation10_spill] sm:$0xff]  ;;  %v20392_v60 = vld [vmem:[#allocation11_spill] sm:$0xff] }
 0x548   : > { %v12892_v7 = vpop.f32.mrb[167].mxu1 }
 0x549   : > { %v19072_v20 = vadd.f32 %v12890_v0, %v18828_v42  ;;  %v12893_v18 = vadd.f32 %v12892_v7, %v12891_v56  ;;  %v20393_v0 = vcombine.low %v20391_v11, %v20392_v60  ;;  %v20394_v56 = vld [vmem:[#allocation16_spill] sm:$0xff]  ;;  %v20395_v7 = vld [vmem:[#allocation17_spill] sm:$0xff] }
 0x54a   : > { %13487 = vmatmul.mubr.bf16.vlgmr.msra.gmra.mrb[16].mxu1 %v20381_v49 }
 0x54b   : > { %v19078_v57 = vadd.f32 %v12893_v18, %v18835_v55  ;;  %13490 = vmatprep.mubr.bf16.mxu1 %v20384_v28  ;;  %v20396_v18 = vcombine.low %v20394_v56, %v20395_v7 }
 0x54d   : > { %v12894_v8 = vpop.f32.mrb[168].mxu1 }
 0x54e   : > { %v12895_v17 = vpop.f32.mrb[169].mxu1 }
 0x54f   : > { %v12896_v62 = vadd.f32 %v12895_v17, %v12894_v8  ;;  %v12897_v61 = vpop.f32.mrb[170].mxu1  ;;  %v20397_v8 = vld [vmem:[#allocation113_spill] sm:$0xff]  ;;  %v20398_v17 = vld [vmem:[#allocation114_spill] sm:$0xff] }
 0x550   : > { %v12898_v10 = vpop.f32.mrb[171].mxu1 }
 0x551   : > { %v19084_v42 = vadd.f32 %v12896_v62, %v18851_v51  ;;  %v12899_v34 = vadd.f32 %v12898_v10, %v12897_v61  ;;  %v20399_v62 = vcombine.low %v20397_v8, %v20398_v17  ;;  %v20400_v61 = vld [vmem:[#allocation18_spill] sm:$0xff]  ;;  %v20401_v10 = vld [vmem:[#allocation23_spill] sm:$0xff] }
 0x552   : > { %13491 = vmatmul.mubr.bf16.gmra.mrb[20].mxu1 %v20387_v47 }
 0x553   : > { %v19090_v55 = vadd.f32 %v12899_v34, %v18860_v59  ;;  %13494 = vmatprep.mubr.bf16.mxu1 %v20390_v43  ;;  %v20402_v34 = vcombine.low %v20400_v61, %v20401_v10 }
 0x555   : > { %v12900_v12 = vpop.f32.mrb[172].mxu1 }
 0x556   : > { %v12901_v52 = vpop.f32.mrb[173].mxu1 }
 0x557   : > { %v12902_v33 = vadd.f32 %v12901_v52, %v12900_v12  ;;  %v12903_v38 = vpop.f32.mrb[174].mxu1  ;;  %v20403_v12 = vld [vmem:[#allocation123_spill] sm:$0xff]  ;;  %v20404_v52 = vld [vmem:[#allocation86_spill] sm:$0xff] }
 0x558   : > { %v12904_v16 = vpop.f32.mrb[175].mxu1 }
 0x559   : > { %v19096_v51 = vadd.f32 %v12902_v33, %v18878_v5  ;;  %v12905_v44 = vadd.f32 %v12904_v16, %v12903_v38  ;;  %v20405_v33 = vcombine.low %v20403_v12, %v20404_v52  ;;  %v20406_v38 = vld [vmem:[#allocation98_spill] sm:$0xff]  ;;  %v20407_v16 = vld [vmem:[#allocation101_spill] sm:$0xff] }
 0x55a   : > { %13495 = vmatmul.mubr.bf16.gmra.mrb[24].mxu1 %v20393_v0 }
 0x55b   : > { %v19102_v59 = vadd.f32 %v12905_v44, %v18885_v32  ;;  %13498 = vmatprep.mubr.bf16.mxu1 %v20396_v18  ;;  %v20408_v44 = vcombine.low %v20406_v38, %v20407_v16 }
 0x55d   : > { %v12906_v19 = vpop.f32.mrb[176].mxu1 }
 0x55e   : > { %v12907_v45 = vpop.f32.mrb[177].mxu1 }
 0x55f   : > { %v12908_v49 = vadd.f32 %v12907_v45, %v12906_v19  ;;  %v12909_v24 = vpop.f32.mrb[178].mxu1  ;;  %v20409_v19 = vld [vmem:[#allocation88_spill] sm:$0xff]  ;;  %v20410_v45 = vld [vmem:[#allocation6_spill] sm:$0xff] }
 0x560   : > { %v12910_v39 = vpop.f32.mrb[179].mxu1 }
 0x561   : > { %v19108_v5 = vadd.f32 %v12908_v49, %v18901_v30  ;;  %v12911_v28 = vadd.f32 %v12910_v39, %v12909_v24  ;;  %v20411_v49 = vcombine.low %v20409_v19, %v20410_v45  ;;  %v20412_v24 = vld [vmem:[#allocation102_spill] sm:$0xff]  ;;  %v20413_v39 = vld [vmem:[#allocation103_spill] sm:$0xff] }
 0x562   : > { %13499 = vmatmul.mubr.bf16.gmra.mrb[28].mxu1 %v20399_v62 }
 0x563   : > { %v19114_v32 = vadd.f32 %v12911_v28, %v18909_v48  ;;  %13502 = vmatprep.mubr.bf16.mxu1 %v20402_v34  ;;  %v20414_v28 = vcombine.low %v20412_v24, %v20413_v39 }
 0x565   : > { %v12912_v25 = vpop.f32.mrb[180].mxu1 }
 0x566   : > { %v12913_v31 = vpop.f32.mrb[181].mxu1 }
 0x567   : > { %v12914_v47 = vadd.f32 %v12913_v31, %v12912_v25  ;;  %v12915_v41 = vpop.f32.mrb[182].mxu1  ;;  %v20415_v25 = vld [vmem:[#allocation7_spill] sm:$0xff]  ;;  %v20416_v31 = vld [vmem:[#allocation12_spill] sm:$0xff] }
 0x568   : > { %v12916_v23 = vpop.f32.mrb[183].mxu1 }
 0x569   : > { %v19120_v30 = vadd.f32 %v12914_v47, %v18921_v37  ;;  %v12917_v43 = vadd.f32 %v12916_v23, %v12915_v41  ;;  %v20417_v47 = vcombine.low %v20415_v25, %v20416_v31  ;;  %v20418_v41 = vld [vmem:[#allocation24_spill] sm:$0xff]  ;;  %v20419_v23 = vld [vmem:[#allocation25_spill] sm:$0xff] }
 0x56a   : > { %13503 = vmatmul.mubr.bf16.gmra.mrb[32].mxu1 %v20405_v33 }
 0x56b   : > { %v19126_v48 = vadd.f32 %v12917_v43, %v18928_v6  ;;  %13506 = vmatprep.mubr.bf16.mxu1 %v20408_v44  ;;  %v20420_v43 = vcombine.low %v20418_v41, %v20419_v23 }
 0x56d   : > { %v12918_v11 = vpop.f32.mrb[184].mxu1 }
 0x56e   : > { %v12919_v60 = vpop.f32.mrb[185].mxu1 }
 0x56f   : > { %v12920_v0 = vadd.f32 %v12919_v60, %v12918_v11  ;;  %v12921_v56 = vpop.f32.mrb[186].mxu1  ;;  %v20421_v11 = vld [vmem:[#allocation13_spill] sm:$0xff]  ;;  %v20422_v60 = vld [vmem:[#allocation14_spill] sm:$0xff] }
 0x570   : > { %v12922_v7 = vpop.f32.mrb[187].mxu1 }
 0x571   : > { %v19132_v37 = vadd.f32 %v12920_v0, %v18937_v15  ;;  %v12923_v18 = vadd.f32 %v12922_v7, %v12921_v56  ;;  %v20423_v0 = vcombine.low %v20421_v11, %v20422_v60 }
 0x572   : > { %13507 = vmatmul.mubr.bf16.gmra.mrb[36].mxu1 %v20411_v49 }
 0x573   : > { %v19138_v6 = vadd.f32 %v12923_v18, %v18945_v58  ;;  %13510 = vmatprep.mubr.bf16.mxu1 %v20414_v28 }
 0x575   : > { %v12924_v8 = vpop.f32.mrb[188].mxu1 }
 0x576   : > { %v12925_v17 = vpop.f32.mrb[189].mxu1 }
 0x577   : > { %v12926_v62 = vadd.f32 %v12925_v17, %v12924_v8  ;;  %v12927_v61 = vpop.f32.mrb[190].mxu1 }
 0x578   : > { %v12928_v10 = vpop.f32.mrb[191].mxu1 }
 0x579   : > { %v19144_v15 = vadd.f32 %v12926_v62, %v18956_v63  ;;  %v12929_v34 = vadd.f32 %v12928_v10, %v12927_v61 }
 0x57a   : > { %13511 = vmatmul.mubr.bf16.gmra.mrb[40].mxu1 %v20417_v47 }
 0x57b   : > { %v19150_v58 = vadd.f32 %v12929_v34, %v18961_v50  ;;  %13514 = vmatprep.mubr.bf16.mxu1 %v20420_v43 }
 0x57d   : > { %v12930_v12 = vpop.f32.mrb[192].mxu1 }
 0x57e   : > { %v12931_v52 = vpop.f32.mrb[193].mxu1 }
 0x57f   : > { %v12932_v33 = vadd.f32 %v12931_v52, %v12930_v12  ;;  %v12933_v38 = vpop.f32.mrb[194].mxu1 }
 0x580   : > { %v12934_v16 = vpop.f32.mrb[195].mxu1 }
 0x581   : > { %v19156_v63 = vadd.f32 %v12932_v33, %v18971_v36  ;;  %v12935_v44 = vadd.f32 %v12934_v16, %v12933_v38 }
 0x582   : > { %13515 = vmatmul.mubr.bf16.gmra.mrb[44].mxu1 %v20423_v0 }
 0x583   : > { %v19162_v50 = vadd.f32 %v12935_v44, %v18975_v14 }
 0x585   : > { %v12936_v56 = vpop.f32.mrb[196].mxu1 }
 0x586   : > { %v12937_v7 = vpop.f32.mrb[197].mxu1 }
 0x587   : > { %v12938_v18 = vadd.f32 %v12937_v7, %v12936_v56  ;;  %v12939_v19 = vpop.f32.mrb[198].mxu1 }
 0x588   : > { %v12940_v45 = vpop.f32.mrb[199].mxu1 }
 0x589   : > { %v19165_v49 = vadd.f32 %v12938_v18, %v18987_v26  ;;  %v12941_v24 = vadd.f32 %v12940_v45, %v12939_v19 }
 0x58b   : > { %v19168_v36 = vadd.f32 %v12941_v24, %v18990_v2 }
 0x58d   : > { %v12942_v39 = vpop.f32.mrb[200].mxu1 }
 0x58e   : > { %v12943_v28 = vpop.f32.mrb[201].mxu1 }
 0x58f   : > { %v12944_v8 = vadd.f32 %v12943_v28, %v12942_v39  ;;  %v12945_v17 = vpop.f32.mrb[202].mxu1 }
 0x590   : > { %v12946_v62 = vpop.f32.mrb[203].mxu1 }
 0x591   : > { %v19171_v14 = vadd.f32 %v12944_v8, %v18999_v3  ;;  %v12947_v61 = vadd.f32 %v12946_v62, %v12945_v17  ;;  %v19179_v23 = vpop.f32.mrb[32].mxu0 }
 0x592   : > { %v19184_v56 = vpop.f32.mrb[33].mxu0 }
 0x593   : > { %v19174_v10 = vadd.f32 %v12947_v61, %v19003_v46  ;;  %v19192_v18 = vpop.f32.mrb[34].mxu0 }
 0x594   : > { %v19194_v19 = vpop.f32.mrb[35].mxu0 }
 0x595   : > { %v12948_v34 = vpop.f32.mrb[204].mxu1 }
 0x596   : > { %v12949_v25 = vpop.f32.mrb[205].mxu1 }
 0x597   : > { %v12950_v26 = vadd.f32 %v12949_v25, %v12948_v34  ;;  %v12951_v31 = vpop.f32.mrb[206].mxu1 }
 0x598   : > { %v12952_v47 = vpop.f32.mrb[207].mxu1 }
 0x599   : > { %v19177_v2 = vadd.f32 %v12950_v26, %v19014_v29  ;;  %v12953_v41 = vadd.f32 %v12952_v47, %v12951_v31  ;;  %v19202_v39 = vpop.f32.mrb[36].mxu0 }
 0x59a   : > { %v19204_v61 = vpop.f32.mrb[37].mxu0 }
 0x59b   : > { %v19182_v43 = vadd.f32 %v12953_v41, %v19018_v54  ;;  %v19209_v25 = vpop.f32.mrb[38].mxu0 }
 0x59d   : > { %v12970_v3 = vpop.f32.mrb[208].mxu1 }
 0x59e   : > { %v12971_v12 = vpop.f32.mrb[209].mxu1 }
 0x59f   : > { %v12972_v52 = vadd.f32 %v12971_v12, %v12970_v3  ;;  %v12973_v33 = vpop.f32.mrb[210].mxu1 }
 0x5a0   : > { %v12974_v46 = vpop.f32.mrb[211].mxu1 }
 0x5a1   : > { %v12975_v38 = vadd.f32 %v12974_v46, %v12973_v33  ;;  %v19187_v29 = vadd.f32 %v12972_v52, %v19027_v40 }
 0x5a3   : > { %v19197_v45 = vadd.f32 %v12975_v38, %v19031_v21  ;;  %v19211_v21 = vpop.f32.mrb[39].mxu0 }
 0x5a4   : > { %v19216_v26 = vpop.f32.mrb[40].mxu0 }
 0x5a5   : > { %v12976_v16 = vpop.f32.mrb[212].mxu1  ;;  %v19218_v52 = vpop.f32.mrb[41].mxu0 }
 0x5a6   : > { %v12977_v44 = vpop.f32.mrb[213].mxu1  ;;  %v19223_v46 = vpop.f32.mrb[42].mxu0 }
 0x5a7   : > { %v12978_v11 = vadd.f32 %v12977_v44, %v12976_v16  ;;  %v12979_v60 = vpop.f32.mrb[214].mxu1  ;;  %v19225_v38 = vpop.f32.mrb[43].mxu0 }
 0x5a8   : > { %v12980_v0 = vpop.f32.mrb[215].mxu1 }
 0x5a9   : > { %v12981_v7 = vadd.f32 %v12980_v0, %v12979_v60  ;;  %v19190_v54 = vadd.f32 %v12978_v11, %v19040_v35  ;;  %v19230_v16 = vpop.f32.mrb[44].mxu0 }
 0x5ab   : > { %v19200_v24 = vadd.f32 %v12981_v7, %v19043_v9 }
 0x5ad   : > { %v12982_v28 = vpop.f32.mrb[216].mxu1 }
 0x5ae   : > { %v12983_v8 = vpop.f32.mrb[217].mxu1 }
 0x5af   : > { %v12984_v40 = vadd.f32 %v12983_v8, %v12982_v28  ;;  %v12985_v17 = vpop.f32.mrb[218].mxu1  ;;  %v19232_v28 = vpop.f32.mrb[45].mxu0 }
 0x5b0   : > { %v12986_v62 = vpop.f32.mrb[219].mxu1 }
 0x5b1   : > { %v12987_v35 = vadd.f32 %v12986_v62, %v12985_v17  ;;  %v19207_v34 = vadd.f32 %v12984_v40, %v19048_v1  ;;  %v19237_v40 = vpop.f32.mrb[46].mxu0 }
 0x5b2   : > { %v19239_v17 = vpop.f32.mrb[47].mxu0 }
 0x5b3   : > { %v19214_v9 = vadd.f32 %v12987_v35, %v19051_v27  ;;  %v19244_v62 = vpop.f32.mrb[48].mxu0 }
 0x5b4   : > { %20424 = vst [vmem:[#allocation107_spill] sm:$0xff] %v19244_v62 }
 0x5b5   : > { %v12988_v31 = vpop.f32.mrb[220].mxu1 }
 0x5b6   : > { %v12989_v47 = vpop.f32.mrb[221].mxu1 }
 0x5b7   : > { %v12990_v41 = vadd.f32 %v12989_v47, %v12988_v31  ;;  %v12991_v3 = vpop.f32.mrb[222].mxu1 }
 0x5b8   : > { %v12992_v12 = vpop.f32.mrb[223].mxu1 }
 0x5b9   : > { %v12993_v33 = vadd.f32 %v12992_v12, %v12991_v3  ;;  %v19221_v1 = vadd.f32 %v12990_v41, %v19056_v13  ;;  %v19246_v12 = vpop.f32.mrb[49].mxu0 }
 0x5ba   : > { %20425 = vst [vmem:[#allocation108_spill] sm:$0xff] %v19246_v12 }
 0x5bb   : > { %v19228_v27 = vadd.f32 %v12993_v33, %v19059_v53 }
 0x5bd   : > { %v12994_v44 = vpop.f32.mrb[224].mxu1 }
 0x5be   : > { %v12995_v11 = vpop.f32.mrb[225].mxu1 }
 0x5bf   : > { %v12996_v60 = vadd.f32 %v12995_v11, %v12994_v44  ;;  %v12997_v0 = vpop.f32.mrb[226].mxu1  ;;  %v19251_v44 = vpop.f32.mrb[50].mxu0 }
 0x5c0   : > { %v12998_v7 = vpop.f32.mrb[227].mxu1  ;;  %20426 = vst [vmem:[#allocation28_spill] sm:$0xff] %v19251_v44  ;;  %v19253_v11 = vpop.f32.mrb[51].mxu0 }
 0x5c1   : > { %v12999_v8 = vadd.f32 %v12998_v7, %v12997_v0  ;;  %v19235_v13 = vadd.f32 %v12996_v60, %v19063_v4  ;;  %20427 = vst [vmem:[#allocation29_spill] sm:$0xff] %v19253_v11  ;;  %v19258_v60 = vpop.f32.mrb[52].mxu0 }
 0x5c2   : > { %20428 = vst [vmem:[#allocation30_spill] sm:$0xff] %v19258_v60  ;;  %v19260_v62 = vpop.f32.mrb[53].mxu0 }
 0x5c3   : > { %v19242_v53 = vadd.f32 %v12999_v8, %v19066_v22  ;;  %20429 = vst [vmem:[#allocation31_spill] sm:$0xff] %v19260_v62 }
 0x5c5   : > { %v13000_v35 = vpop.f32.mrb[228].mxu1 }
 0x5c6   : > { %v13001_v31 = vpop.f32.mrb[229].mxu1 }
 0x5c7   : > { %v13002_v47 = vadd.f32 %v13001_v31, %v13000_v35  ;;  %v13003_v41 = vpop.f32.mrb[230].mxu1 }
 0x5c8   : > { %v13004_v3 = vpop.f32.mrb[231].mxu1 }
 0x5c9   : > { %v13005_v33 = vadd.f32 %v13004_v3, %v13003_v41  ;;  %v19249_v4 = vadd.f32 %v13002_v47, %v19072_v20  ;;  %v19265_v47 = vpop.f32.mrb[54].mxu0 }
 0x5ca   : > { %20430 = vst [vmem:[#allocation109_spill] sm:$0xff] %v19265_v47  ;;  %v19267_v3 = vpop.f32.mrb[55].mxu0 }
 0x5cb   : > { %v19256_v22 = vadd.f32 %v13005_v33, %v19078_v57  ;;  %20431 = vst [vmem:[#allocation110_spill] sm:$0xff] %v19267_v3  ;;  %v19272_v33 = vpop.f32.mrb[56].mxu0 }
 0x5cc   : > { %20432 = vst [vmem:[#allocation111_spill] sm:$0xff] %v19272_v33  ;;  %v19274_v12 = vpop.f32.mrb[57].mxu0 }
 0x5cd   : > { %v13006_v0 = vpop.f32.mrb[232].mxu1  ;;  %20433 = vst [vmem:[#allocation112_spill] sm:$0xff] %v19274_v12 }
 0x5ce   : > { %v13007_v7 = vpop.f32.mrb[233].mxu1 }
 0x5cf   : > { %v13008_v8 = vadd.f32 %v13007_v7, %v13006_v0  ;;  %v13009_v35 = vpop.f32.mrb[234].mxu1 }
 0x5d0   : > { %v13010_v31 = vpop.f32.mrb[235].mxu1 }
 0x5d1   : > { %v13011_v41 = vadd.f32 %v13010_v31, %v13009_v35  ;;  %v19263_v20 = vadd.f32 %v13008_v8, %v19084_v42  ;;  %v19279_v8 = vpop.f32.mrb[58].mxu0 }
 0x5d2   : > { %20434 = vst [vmem:[#allocation32_spill] sm:$0xff] %v19279_v8  ;;  %v19281_v31 = vpop.f32.mrb[59].mxu0 }
 0x5d3   : > { %v19270_v57 = vadd.f32 %v13011_v41, %v19090_v55  ;;  %20435 = vst [vmem:[#allocation33_spill] sm:$0xff] %v19281_v31  ;;  %v19286_v41 = vpop.f32.mrb[60].mxu0 }
 0x5d4   : > { %20436 = vst [vmem:[#allocation35_spill] sm:$0xff] %v19286_v41  ;;  %v19288_v62 = vpop.f32.mrb[61].mxu0 }
 0x5d5   : > { %v13012_v60 = vpop.f32.mrb[236].mxu1  ;;  %20437 = vst [vmem:[#allocation36_spill] sm:$0xff] %v19288_v62 }
 0x5d6   : > { %v13013_v11 = vpop.f32.mrb[237].mxu1 }
 0x5d7   : > { %v13014_v0 = vadd.f32 %v13013_v11, %v13012_v60  ;;  %v13015_v7 = vpop.f32.mrb[238].mxu1 }
 0x5d8   : > { %v13016_v44 = vpop.f32.mrb[239].mxu1 }
 0x5d9   : > { %v13017_v35 = vadd.f32 %v13016_v44, %v13015_v7  ;;  %v19277_v42 = vadd.f32 %v13014_v0, %v19096_v51  ;;  %v19293_v0 = vpop.f32.mrb[62].mxu0 }
 0x5da   : > { %20438 = vst [vmem:[#allocation115_spill] sm:$0xff] %v19293_v0  ;;  %v19295_v7 = vpop.f32.mrb[63].mxu0 }
 0x5db   : > { %v19284_v55 = vadd.f32 %v13017_v35, %v19102_v59  ;;  %20439 = vst [vmem:[#allocation116_spill] sm:$0xff] %v19295_v7 }
 0x5dd   : > { %v13018_v33 = vpop.f32.mrb[240].mxu1 }
 0x5de   : > { %v13019_v3 = vpop.f32.mrb[241].mxu1 }
 0x5df   : > { %v13020_v11 = vadd.f32 %v13019_v3, %v13018_v33  ;;  %v13021_v60 = vpop.f32.mrb[242].mxu1 }
 0x5e0   : > { %v13022_v47 = vpop.f32.mrb[243].mxu1 }
 0x5e1   : > { %v13023_v44 = vadd.f32 %v13022_v47, %v13021_v60  ;;  %v19291_v51 = vadd.f32 %v13020_v11, %v19108_v5 }
 0x5e3   : > { %v19298_v59 = vadd.f32 %v13023_v44, %v19114_v32 }
 0x5e5   : > { %v13024_v35 = vpop.f32.mrb[244].mxu1 }
 0x5e6   : > { %v13025_v41 = vpop.f32.mrb[245].mxu1 }
 0x5e7   : > { %v13026_v31 = vadd.f32 %v13025_v41, %v13024_v35  ;;  %v13027_v8 = vpop.f32.mrb[246].mxu1 }
 0x5e8   : > { %v13028_v3 = vpop.f32.mrb[247].mxu1 }
 0x5e9   : > { %v13029_v33 = vadd.f32 %v13028_v3, %v13027_v8  ;;  %v19301_v12 = vadd.f32 %v13026_v31, %v19120_v30 }
 0x5eb   : > { %v19304_v47 = vadd.f32 %v13029_v33, %v19126_v48 }
 0x5ed   : > { %v13030_v5 = vpop.f32.mrb[248].mxu1 }
 0x5ee   : > { %v13031_v11 = vpop.f32.mrb[249].mxu1 }
 0x5ef   : > { %v13032_v60 = vadd.f32 %v13031_v11, %v13030_v5  ;;  %v13033_v0 = vpop.f32.mrb[250].mxu1 }
 0x5f0   : > { %v13034_v7 = vpop.f32.mrb[251].mxu1 }
 0x5f1   : > { %v13035_v62 = vadd.f32 %v13034_v7, %v13033_v0  ;;  %v19307_v32 = vadd.f32 %v13032_v60, %v19132_v37 }
 0x5f3   : > { %v19310_v41 = vadd.f32 %v13035_v62, %v19138_v6 }
 0x5f5   : > { %v13036_v44 = vpop.f32.mrb[252].mxu1 }
 0x5f6   : > { %v13037_v8 = vpop.f32.mrb[253].mxu1 }
 0x5f7   : > { %v13038_v35 = vadd.f32 %v13037_v8, %v13036_v44  ;;  %v13039_v30 = vpop.f32.mrb[254].mxu1 }
 0x5f8   : > { %v13040_v31 = vpop.f32.mrb[255].mxu1 }
 0x5f9   : > { %v13041_v3 = vadd.f32 %v13040_v31, %v13039_v30  ;;  %v19313_v48 = vadd.f32 %v13038_v35, %v19144_v15 }
 0x5fb   : > { %v19316_v33 = vadd.f32 %v13041_v3, %v19150_v58 }
 0x5fd   : > { %v13042_v5 = vpop.f32.mrb[0].mxu1 }
 0x5fe   : > { %v13043_v0 = vpop.f32.mrb[1].mxu1 }
 0x5ff   : > { %v13044_v7 = vadd.f32 %v13043_v0, %v13042_v5  ;;  %v13045_v37 = vpop.f32.mrb[2].mxu1 }
 0x600   : > { %v13046_v11 = vpop.f32.mrb[3].mxu1 }
 0x601   : > { %v13047_v60 = vadd.f32 %v13046_v11, %v13045_v37  ;;  %v19319_v6 = vadd.f32 %v13044_v7, %v19156_v63 }
 0x603   : > { %v19322_v62 = vadd.f32 %v13047_v60, %v19162_v50 }
 0x605   : > { %v13048_v44 = vpop.f32.mrb[4].mxu1 }
 0x606   : > { %v13049_v8 = vpop.f32.mrb[5].mxu1 }
 0x607   : > { %v13050_v30 = vadd.f32 %v13049_v8, %v13048_v44  ;;  %v13051_v15 = vpop.f32.mrb[6].mxu1 }
 0x608   : > { %v13052_v35 = vpop.f32.mrb[7].mxu1 }
 0x609   : > { %v13053_v31 = vadd.f32 %v13052_v35, %v13051_v15  ;;  %v19325_v58 = vadd.f32 %v13050_v30, %v19165_v49  ;;  %v19339_v35 = vld [vmem:[%s19651_s8] ss:$0 sm:$0xff] }
 0x60b   : > { %v19328_v3 = vadd.f32 %v13053_v31, %v19168_v36 }
 0x60d   : > { %v13054_v5 = vpop.f32.mrb[8].mxu1 }
 0x60e   : > { %v13055_v0 = vpop.f32.mrb[9].mxu1 }
 0x60f   : > { %v13056_v37 = vadd.f32 %v13055_v0, %v13054_v5  ;;  %v13057_v63 = vpop.f32.mrb[10].mxu1  ;;  %v19352_v5 = vld [vmem:[%s19652_s9] ss:$0 sm:$0xff] }
 0x610   : > { %v13058_v7 = vpop.f32.mrb[11].mxu1 }
 0x611   : > { %v13059_v11 = vadd.f32 %v13058_v7, %v13057_v63  ;;  %v19331_v50 = vadd.f32 %v13056_v37, %v19171_v14  ;;  %v19357_v37 = vld [vmem:[%s19648_s5] ss:$0 sm:$0xff] }
 0x613   : > { %v19334_v60 = vadd.f32 %v13059_v11, %v19174_v10  ;;  %v11103_v10 = vmul.f32 %v19179_v23, %v19339_v35  ;;  %v19366_v23 = vld [vmem:[%s19649_s6] ss:$0 sm:$0xff] }
 0x615   : > { %v13060_v44 = vpop.f32.mrb[12].mxu1 }
 0x616   : > { %v13061_v8 = vpop.f32.mrb[13].mxu1 }
 0x617   : > { %v13062_v49 = vadd.f32 %v13061_v8, %v13060_v44  ;;  %v13063_v30 = vpop.f32.mrb[14].mxu1  ;;  %v11142_v44 = vadd.f32 %v19352_v5, %v11103_v10 }
 0x618   : > { %v13064_v15 = vpop.f32.mrb[15].mxu1 }
 0x619   : > { %v13065_v36 = vadd.f32 %v13064_v15, %v13063_v30  ;;  %v19342_v31 = vadd.f32 %v13062_v49, %v19177_v2  ;;  %v11101_v2 = vmul.f32 %v19339_v35, %v19184_v56  ;;  %v11104_v56 = vmul.f32 %v19192_v18, %v19339_v35 }
 0x61a   : > { %v11107_v18 = vmul.f32 %v19202_v39, %v19339_v35 }
 0x61b   : > { %v19345_v14 = vadd.f32 %v13065_v36, %v19182_v43  ;;  %v11140_v30 = vadd.f32 %v19352_v5, %v11101_v2  ;;  %v11102_v36 = vmul.f32 %v19339_v35, %v19194_v19 }
 0x61d   : > { %v13488_v0 = vpop.f32.mrb[16].mxu1 }
 0x61e   : > { %v10705_v43 = vadd.f32 %v13488_v0, %v19190_v54  ;;  %v10696_v63 = vpop.f32.mrb[17].mxu1 }
 0x61f   : > { %v10697_v7 = vadd.f32 %v10696_v63, %v19187_v29  ;;  %v13489_v11 = vpop.f32.mrb[18].mxu1  ;;  %v11143_v63 = vadd.f32 %v19352_v5, %v11104_v56 }
 0x620   : > { %v10832_v8 = vmul.f32 %v19357_v37, %v10705_v43  ;;  %v10708_v49 = vadd.f32 %v13489_v11, %v19200_v24  ;;  %v10699_v54 = vpop.f32.mrb[19].mxu1  ;;  %v11141_v11 = vadd.f32 %v19352_v5, %v11102_v36 }
 0x621   : > { %v10830_v15 = vmul.f32 %v19357_v37, %v10697_v7  ;;  %v10700_v29 = vadd.f32 %v10699_v54, %v19197_v45  ;;  %v11105_v45 = vmul.f32 %v19339_v35, %v19204_v61  ;;  %v11108_v61 = vmul.f32 %v19209_v25, %v19339_v35 }
 0x622   : > { %v10871_v10 = vadd.f32 %v19366_v23, %v10832_v8  ;;  %v10833_v0 = vmul.f32 %v19357_v37, %v10708_v49 }
 0x623   : > { %v10869_v24 = vadd.f32 %v19366_v23, %v10830_v15  ;;  %v10831_v2 = vmul.f32 %v19357_v37, %v10700_v29  ;;  %v11146_v15 = vadd.f32 %v19352_v5, %v11107_v18 }
 0x624   : > { %v11174_v43 = vadd.f32 %v11142_v44, %v10871_v10  ;;  %v10872_v19 = vadd.f32 %v19366_v23, %v10833_v0 }
 0x625   : > { %v11172_v7 = vadd.f32 %v11140_v30, %v10869_v24  ;;  %v10870_v8 = vadd.f32 %v19366_v23, %v10831_v2  ;;  %v13492_v49 = vpop.f32.mrb[20].mxu1 }
 0x626   : > { %v11206_v54 = vmax.f32 %v11174_v43, 0.0  ;;  %v11175_v39 = vadd.f32 %v11143_v63, %v10872_v19  ;;  %v10721_v29 = vadd.f32 %v13492_v49, %v19221_v1  ;;  %v10712_v44 = vpop.f32.mrb[21].mxu1  ;;  %v11144_v1 = vadd.f32 %v19352_v5, %v11105_v45 }
 0x627   : > { %v11204_v10 = vmax.f32 %v11172_v7, 0.0  ;;  %v11173_v56 = vadd.f32 %v11141_v11, %v10870_v8  ;;  %v10713_v0 = vadd.f32 %v10712_v44, %v19207_v34  ;;  %v13493_v30 = vpop.f32.mrb[22].mxu1  ;;  %v11106_v43 = vmul.f32 %v19339_v35, %v19211_v21 }
 0x628   : > { %11238 = vst [vmem:[%s19398_s21 + $0x10] sm:$0xff] %v11206_v54  ;;  %v11207_v36 = vmax.f32 %v11175_v39, 0.0  ;;  %v10836_v18 = vmul.f32 %v19357_v37, %v10721_v29  ;;  %v10724_v24 = vadd.f32 %v13493_v30, %v19228_v27  ;;  %v10715_v2 = vpop.f32.mrb[23].mxu1  ;;  %v11111_v45 = vmul.f32 %v19216_v26, %v19339_v35 }
 0x629   : > { %11236 = vst [vmem:[%s19398_s21] sm:$0xff] %v11204_v10  ;;  %v11205_v34 = vmax.f32 %v11173_v56, 0.0  ;;  %v10834_v25 = vmul.f32 %v19357_v37, %v10713_v0  ;;  %v10716_v63 = vadd.f32 %v10715_v2, %v19214_v9  ;;  %v11147_v49 = vadd.f32 %v19352_v5, %v11108_v61 }
 0x62a   : > { %11239 = vst [vmem:[%s19398_s21 + $0x18] sm:$0xff] %v11207_v36  ;;  %v10875_v19 = vadd.f32 %v19366_v23, %v10836_v18  ;;  %v10837_v7 = vmul.f32 %v19357_v37, %v10724_v24  ;;  %v11109_v9 = vmul.f32 %v19339_v35, %v19218_v52  ;;  %v11145_v39 = vadd.f32 %v19352_v5, %v11106_v43 }
 0x62b   : > { %11237 = vst [vmem:[%s19398_s21 + $0x8] sm:$0xff] %v11205_v34  ;;  %v10873_v27 = vadd.f32 %v19366_v23, %v10834_v25  ;;  %v10835_v11 = vmul.f32 %v19357_v37, %v10716_v63  ;;  %v11150_v56 = vadd.f32 %v19352_v5, %v11111_v45  ;;  %v11112_v52 = vmul.f32 %v19223_v46, %v19339_v35 }
 0x62c   : > { %v11178_v8 = vadd.f32 %v11146_v15, %v10875_v19  ;;  %v10876_v21 = vadd.f32 %v19366_v23, %v10837_v7  ;;  %v11148_v2 = vadd.f32 %v19352_v5, %v11109_v9  ;;  %v11115_v7 = vmul.f32 %v19230_v16, %v19339_v35 }
 0x62d   : > { %v11176_v54 = vadd.f32 %v11144_v1, %v10873_v27  ;;  %v10874_v29 = vadd.f32 %v19366_v23, %v10835_v11  ;;  %v13496_v26 = vpop.f32.mrb[24].mxu1  ;;  %v11151_v11 = vadd.f32 %v19352_v5, %v11112_v52 }
 0x62e   : > { %v11210_v44 = vmax.f32 %v11178_v8, 0.0  ;;  %v11179_v10 = vadd.f32 %v11147_v49, %v10876_v21  ;;  %v10737_v15 = vadd.f32 %v13496_v26, %v19249_v4  ;;  %v10728_v0 = vpop.f32.mrb[25].mxu1 }
 0x62f   : > { %v11208_v61 = vmax.f32 %v11176_v54, 0.0  ;;  %v11177_v30 = vadd.f32 %v11145_v39, %v10874_v29  ;;  %v10729_v36 = vadd.f32 %v10728_v0, %v19235_v13  ;;  %v13497_v18 = vpop.f32.mrb[26].mxu1  ;;  %v11110_v13 = vmul.f32 %v19339_v35, %v19225_v38 }
 0x630   : > { %11242 = vst [vmem:[%s19398_s21 + $0x30] sm:$0xff] %v11210_v44  ;;  %v11211_v1 = vmax.f32 %v11179_v10, 0.0  ;;  %v10840_v24 = vmul.f32 %v19357_v37, %v10737_v15  ;;  %v10740_v34 = vadd.f32 %v13497_v18, %v19256_v22  ;;  %v10731_v4 = vpop.f32.mrb[27].mxu1  ;;  %v11154_v39 = vadd.f32 %v19352_v5, %v11115_v7 }
 0x631   : > { %11240 = vst [vmem:[%s19398_s21 + $0x20] sm:$0xff] %v11208_v61  ;;  %v11209_v25 = vmax.f32 %v11177_v30, 0.0  ;;  %v10838_v43 = vmul.f32 %v19357_v37, %v10729_v36  ;;  %v10732_v46 = vadd.f32 %v10731_v4, %v19242_v53  ;;  %v11113_v53 = vmul.f32 %v19339_v35, %v19232_v28 }
 0x632   : > { %11243 = vst [vmem:[%s19398_s21 + $0x38] sm:$0xff] %v11211_v1  ;;  %v10879_v63 = vadd.f32 %v19366_v23, %v10840_v24  ;;  %v10841_v19 = vmul.f32 %v19357_v37, %v10740_v34  ;;  %v11149_v49 = vadd.f32 %v19352_v5, %v11110_v13  ;;  %v11116_v28 = vmul.f32 %v19237_v40, %v19339_v35  ;;  %v20441_v13 = vld [vmem:[#allocation108_spill] sm:$0xff] }
 0x633   : > { %11241 = vst [vmem:[%s19398_s21 + $0x28] sm:$0xff] %v11209_v25  ;;  %v10877_v22 = vadd.f32 %v19366_v23, %v10838_v43  ;;  %v10839_v45 = vmul.f32 %v19357_v37, %v10732_v46  ;;  %v11152_v30 = vadd.f32 %v19352_v5, %v11113_v53 }
 0x634   : > { %v11182_v27 = vadd.f32 %v11150_v56, %v10879_v63  ;;  %v10880_v38 = vadd.f32 %v19366_v23, %v10841_v19  ;;  %v11155_v43 = vadd.f32 %v19352_v5, %v11116_v28 }
 0x635   : > { %v11180_v8 = vadd.f32 %v11148_v2, %v10877_v22  ;;  %v10878_v21 = vadd.f32 %v19366_v23, %v10839_v45  ;;  %v13500_v16 = vpop.f32.mrb[28].mxu1  ;;  %v20440_v2 = vld [vmem:[#allocation107_spill] sm:$0xff] }
 0x636   : > { %v11214_v9 = vmax.f32 %v11182_v27, 0.0  ;;  %v11183_v54 = vadd.f32 %v11151_v11, %v10880_v38  ;;  %v10753_v29 = vadd.f32 %v13500_v16, %v19277_v42  ;;  %v10744_v26 = vpop.f32.mrb[29].mxu1  ;;  %v11119_v34 = vmul.f32 %v20440_v2, %v19339_v35 }
 0x637   : > { %v11212_v44 = vmax.f32 %v11180_v8, 0.0  ;;  %v11181_v10 = vadd.f32 %v11149_v49, %v10878_v21  ;;  %v10745_v56 = vadd.f32 %v10744_v26, %v19263_v20  ;;  %v13501_v15 = vpop.f32.mrb[30].mxu1  ;;  %v11114_v20 = vmul.f32 %v19339_v35, %v19239_v17  ;;  %v20442_v21 = vld [vmem:[#allocation28_spill] sm:$0xff] }
 0x638   : > { %11246 = vst [vmem:[%s19398_s21 + $0x50] sm:$0xff] %v11214_v9  ;;  %v11215_v0 = vmax.f32 %v11183_v54, 0.0  ;;  %v10844_v61 = vmul.f32 %v19357_v37, %v10753_v29  ;;  %v10756_v36 = vadd.f32 %v13501_v15, %v19284_v55  ;;  %v10747_v42 = vpop.f32.mrb[31].mxu1  ;;  %v11158_v27 = vadd.f32 %v19352_v5, %v11119_v34 }
 0x639   : > { %11244 = vst [vmem:[%s19398_s21 + $0x40] sm:$0xff] %v11212_v44  ;;  %v11213_v52 = vmax.f32 %v11181_v10, 0.0  ;;  %v10842_v18 = vmul.f32 %v19357_v37, %v10745_v56  ;;  %v10748_v40 = vadd.f32 %v10747_v42, %v19270_v57  ;;  %v11117_v57 = vmul.f32 %v19339_v35, %v20441_v13  ;;  %v20443_v56 = vld [vmem:[#allocation29_spill] sm:$0xff] }
 0x63a   : > { %11247 = vst [vmem:[%s19398_s21 + $0x58] sm:$0xff] %v11215_v0  ;;  %v10883_v1 = vadd.f32 %v19366_v23, %v10844_v61  ;;  %v10845_v24 = vmul.f32 %v19357_v37, %v10756_v36  ;;  %v11153_v63 = vadd.f32 %v19352_v5, %v11114_v20  ;;  %v11120_v16 = vmul.f32 %v20442_v21, %v19339_v35  ;;  %v20444_v61 = vld [vmem:[#allocation30_spill] sm:$0xff]  ;;  %v20445_v20 = vld [vmem:[#allocation31_spill] sm:$0xff] }
 0x63b   : > { %11245 = vst [vmem:[%s19398_s21 + $0x48] sm:$0xff] %v11213_v52  ;;  %v10881_v55 = vadd.f32 %v19366_v23, %v10842_v18  ;;  %v10843_v4 = vmul.f32 %v19357_v37, %v10748_v40  ;;  %v11156_v29 = vadd.f32 %v19352_v5, %v11117_v57 }
 0x63c   : > { %v11186_v25 = vadd.f32 %v11154_v39, %v10883_v1  ;;  %v10884_v17 = vadd.f32 %v19366_v23, %v10845_v24  ;;  %v11159_v52 = vadd.f32 %v19352_v5, %v11120_v16  ;;  %v20448_v16 = vld [vmem:[#allocation111_spill] sm:$0xff] }
 0x63d   : > { %v11184_v46 = vadd.f32 %v11152_v30, %v10881_v55  ;;  %v10882_v19 = vadd.f32 %v19366_v23, %v10843_v4  ;;  %v13504_v7 = vpop.f32.mrb[32].mxu1  ;;  %v11123_v30 = vmul.f32 %v20444_v61, %v19339_v35 }
 0x63e   : > { %v11218_v22 = vmax.f32 %v11186_v25, 0.0  ;;  %v11187_v45 = vadd.f32 %v11155_v43, %v10884_v17  ;;  %v10769_v11 = vadd.f32 %v13504_v7, %v19301_v12  ;;  %v10760_v38 = vpop.f32.mrb[33].mxu1 }
 0x63f   : > { %v11216_v53 = vmax.f32 %v11184_v46, 0.0  ;;  %v11185_v8 = vadd.f32 %v11153_v63, %v10882_v19  ;;  %v10761_v49 = vadd.f32 %v10760_v38, %v19291_v51  ;;  %v13505_v9 = vpop.f32.mrb[34].mxu1  ;;  %v11118_v51 = vmul.f32 %v19339_v35, %v20443_v56  ;;  %v20446_v46 = vld [vmem:[#allocation109_spill] sm:$0xff] }
 0x640   : > { %11250 = vst [vmem:[%s19398_s21 + $0x70] sm:$0xff] %v11218_v22  ;;  %v11219_v54 = vmax.f32 %v11187_v45, 0.0  ;;  %v10848_v39 = vmul.f32 %v19357_v37, %v10769_v11  ;;  %v10772_v26 = vadd.f32 %v13505_v9, %v19304_v47  ;;  %v10763_v12 = vpop.f32.mrb[35].mxu1  ;;  %v11162_v4 = vadd.f32 %v19352_v5, %v11123_v30 }
 0x641   : > { %11248 = vst [vmem:[%s19398_s21 + $0x60] sm:$0xff] %v11216_v53  ;;  %v11217_v44 = vmax.f32 %v11185_v8, 0.0  ;;  %v10846_v10 = vmul.f32 %v19357_v37, %v10761_v49  ;;  %v10764_v28 = vadd.f32 %v10763_v12, %v19298_v59  ;;  %v11121_v59 = vmul.f32 %v19339_v35, %v20445_v20  ;;  %v20447_v53 = vld [vmem:[#allocation110_spill] sm:$0xff]  ;;  %v20449_v12 = vld [vmem:[#allocation112_spill] sm:$0xff] }
 0x642   : > { %11251 = vst [vmem:[%s19398_s21 + $0x78] sm:$0xff] %v11219_v54  ;;  %v10887_v15 = vadd.f32 %v19366_v23, %v10848_v39  ;;  %v10849_v0 = vmul.f32 %v19357_v37, %v10772_v26  ;;  %v11157_v1 = vadd.f32 %v19352_v5, %v11118_v51  ;;  %v11124_v63 = vmul.f32 %v20446_v46, %v19339_v35 }
 0x643   : > { %11249 = vst [vmem:[%s19398_s21 + $0x68] sm:$0xff] %v11217_v44  ;;  %v10885_v47 = vadd.f32 %v19366_v23, %v10846_v10  ;;  %v10847_v36 = vmul.f32 %v19357_v37, %v10764_v28  ;;  %v11160_v45 = vadd.f32 %v19352_v5, %v11121_v59  ;;  %v11127_v9 = vmul.f32 %v20448_v16, %v19339_v35 }
 0x644   : > { %v11190_v42 = vadd.f32 %v11158_v27, %v10887_v15  ;;  %v10888_v18 = vadd.f32 %v19366_v23, %v10849_v0 }
 0x645   : > { %v11188_v40 = vadd.f32 %v11156_v29, %v10885_v47  ;;  %v10886_v24 = vadd.f32 %v19366_v23, %v10847_v36  ;;  %v13508_v2 = vpop.f32.mrb[36].mxu1  ;;  %v11163_v29 = vadd.f32 %v19352_v5, %v11124_v63  ;;  %v11166_v0 = vadd.f32 %v19352_v5, %v11127_v9  ;;  %v20454_v9 = vld [vmem:[#allocation115_spill] sm:$0xff] }
 0x646   : > { %v11222_v34 = vmax.f32 %v11190_v42, 0.0  ;;  %v11191_v55 = vadd.f32 %v11159_v52, %v10888_v18  ;;  %v10785_v25 = vadd.f32 %v13508_v2, %v19313_v48  ;;  %v10776_v43 = vpop.f32.mrb[37].mxu1  ;;  %v20450_v52 = vld [vmem:[#allocation32_spill] sm:$0xff] }
 0x647   : > { %v11220_v17 = vmax.f32 %v11188_v40, 0.0  ;;  %v11189_v13 = vadd.f32 %v11157_v1, %v10886_v24  ;;  %v10777_v57 = vadd.f32 %v10776_v43, %v19307_v32  ;;  %v13509_v19 = vpop.f32.mrb[38].mxu1  ;;  %v11122_v32 = vmul.f32 %v19339_v35, %v20447_v53 }
 0x648   : > { %11254 = vst [vmem:[%s19398_s21 + $0x90] sm:$0xff] %v11222_v34  ;;  %v11223_v7 = vmax.f32 %v11191_v55, 0.0  ;;  %v10852_v22 = vmul.f32 %v19357_v37, %v10785_v25  ;;  %v10788_v27 = vadd.f32 %v13509_v19, %v19316_v33  ;;  %v10779_v48 = vpop.f32.mrb[39].mxu1  ;;  %v11128_v18 = vmul.f32 %v20450_v52, %v19339_v35  ;;  %v20451_v55 = vld [vmem:[#allocation33_spill] sm:$0xff] }
 0x649   : > { %11252 = vst [vmem:[%s19398_s21 + $0x80] sm:$0xff] %v11220_v17  ;;  %v11221_v11 = vmax.f32 %v11189_v13, 0.0  ;;  %v10850_v38 = vmul.f32 %v19357_v37, %v10777_v57  ;;  %v10780_v8 = vadd.f32 %v10779_v48, %v19310_v41  ;;  %v11125_v41 = vmul.f32 %v19339_v35, %v20449_v12  ;;  %v20452_v17 = vld [vmem:[#allocation35_spill] sm:$0xff] }
 0x64a   : > { %11255 = vst [vmem:[%s19398_s21 + $0x98] sm:$0xff] %v11223_v7  ;;  %v10891_v49 = vadd.f32 %v19366_v23, %v10852_v22  ;;  %v10853_v21 = vmul.f32 %v19357_v37, %v10788_v27  ;;  %v11161_v10 = vadd.f32 %v19352_v5, %v11122_v32  ;;  %v11131_v13 = vmul.f32 %v20452_v17, %v19339_v35  ;;  %v20453_v7 = vld [vmem:[#allocation36_spill] sm:$0xff] }
 0x64b   : > { %11253 = vst [vmem:[%s19398_s21 + $0x88] sm:$0xff] %v11221_v11  ;;  %v10889_v33 = vadd.f32 %v19366_v23, %v10850_v38  ;;  %v10851_v54 = vmul.f32 %v19357_v37, %v10780_v8  ;;  %v11164_v1 = vadd.f32 %v19352_v5, %v11125_v41  ;;  %v11167_v63 = vadd.f32 %v19352_v5, %v11128_v18 }
 0x64c   : > { %v11194_v39 = vadd.f32 %v11162_v4, %v10891_v49  ;;  %v10892_v26 = vadd.f32 %v19366_v23, %v10853_v21  ;;  %v11170_v53 = vadd.f32 %v19352_v5, %v11131_v13 }
 0x64d   : > { %v11192_v44 = vadd.f32 %v11160_v45, %v10889_v33  ;;  %v10890_v56 = vadd.f32 %v19366_v23, %v10851_v54  ;;  %v13512_v51 = vpop.f32.mrb[40].mxu1  ;;  %v11132_v33 = vmul.f32 %v20454_v9, %v19339_v35 }
 0x64e   : > { %v11226_v28 = vmax.f32 %v11194_v39, 0.0  ;;  %v11195_v15 = vadd.f32 %v11163_v29, %v10892_v26  ;;  %v10801_v61 = vadd.f32 %v13512_v51, %v19325_v58  ;;  %v10792_v30 = vpop.f32.mrb[41].mxu1 }
 0x64f   : > { %v11224_v47 = vmax.f32 %v11192_v44, 0.0  ;;  %v11193_v36 = vadd.f32 %v11161_v10, %v10890_v56  ;;  %v10793_v42 = vadd.f32 %v10792_v30, %v19319_v6  ;;  %v13513_v20 = vpop.f32.mrb[42].mxu1  ;;  %v11126_v6 = vmul.f32 %v19339_v35, %v20451_v55 }
 0x650   : > { %11258 = vst [vmem:[%s19398_s21 + $0xb0] sm:$0xff] %v11226_v28  ;;  %v11227_v59 = vmax.f32 %v11195_v15, 0.0  ;;  %v10856_v40 = vmul.f32 %v19357_v37, %v10801_v61  ;;  %v10804_v24 = vadd.f32 %v13513_v20, %v19328_v3  ;;  %v10795_v58 = vpop.f32.mrb[43].mxu1  ;;  %v11171_v61 = vadd.f32 %v19352_v5, %v11132_v33 }
 0x651   : > { %11256 = vst [vmem:[%s19398_s21 + $0xa0] sm:$0xff] %v11224_v47  ;;  %v11225_v2 = vmax.f32 %v11193_v36, 0.0  ;;  %v10854_v34 = vmul.f32 %v19357_v37, %v10793_v42  ;;  %v10796_v4 = vadd.f32 %v10795_v58, %v19322_v62  ;;  %v11129_v62 = vmul.f32 %v19339_v35, %v20453_v7 }
 0x652   : > { %11259 = vst [vmem:[%s19398_s21 + $0xb8] sm:$0xff] %v11227_v59  ;;  %v10895_v25 = vadd.f32 %v19366_v23, %v10856_v40  ;;  %v10857_v43 = vmul.f32 %v19357_v37, %v10804_v24  ;;  %v11165_v45 = vadd.f32 %v19352_v5, %v11126_v6 }
 0x653   : > { %11257 = vst [vmem:[%s19398_s21 + $0xa8] sm:$0xff] %v11225_v2  ;;  %v10893_v3 = vadd.f32 %v19366_v23, %v10854_v34  ;;  %v10855_v57 = vmul.f32 %v19357_v37, %v10796_v4  ;;  %v11168_v26 = vadd.f32 %v19352_v5, %v11129_v62 }
 0x654   : > { %v11198_v46 = vadd.f32 %v11166_v0, %v10895_v25  ;;  %v10896_v19 = vadd.f32 %v19366_v23, %v10857_v43 }
 0x655   : > { %v11196_v22 = vadd.f32 %v11164_v1, %v10893_v3  ;;  %v10894_v27 = vadd.f32 %v19366_v23, %v10855_v57  ;;  %v13516_v48 = vpop.f32.mrb[44].mxu1 }
 0x656   : > { %v11230_v11 = vmax.f32 %v11198_v46, 0.0  ;;  %v11199_v38 = vadd.f32 %v11167_v63, %v10896_v19  ;;  %v10817_v32 = vadd.f32 %v13516_v48, %v19342_v31  ;;  %v10808_v8 = vpop.f32.mrb[45].mxu1 }
 0x657   : > { %v11228_v49 = vmax.f32 %v11196_v22, 0.0  ;;  %v11197_v21 = vadd.f32 %v11165_v45, %v10894_v27  ;;  %v10809_v16 = vadd.f32 %v10808_v8, %v19331_v50  ;;  %v13517_v54 = vpop.f32.mrb[46].mxu1  ;;  %v20455_v50 = vld [vmem:[#allocation116_spill] sm:$0xff] }
 0x658   : > { %11262 = vst [vmem:[%s19398_s21 + $0xd0] sm:$0xff] %v11230_v11  ;;  %v11231_v39 = vmax.f32 %v11199_v38, 0.0  ;;  %v10860_v29 = vmul.f32 %v19357_v37, %v10817_v32  ;;  %v10820_v12 = vadd.f32 %v13517_v54, %v19345_v14  ;;  %v10811_v31 = vpop.f32.mrb[47].mxu1  ;;  %v11130_v10 = vmul.f32 %v19339_v35, %v20455_v50 }
 0x659   : > { %11260 = vst [vmem:[%s19398_s21 + $0xc0] sm:$0xff] %v11228_v49  ;;  %v11229_v41 = vmax.f32 %v11197_v21, 0.0  ;;  %v10858_v44 = vmul.f32 %v19357_v37, %v10809_v16  ;;  %v10812_v56 = vadd.f32 %v10811_v31, %v19334_v60 }
 0x65a   : > { %11263 = vst [vmem:[%s19398_s21 + $0xd8] sm:$0xff] %v11231_v39  ;;  %v10899_v51 = vadd.f32 %v19366_v23, %v10860_v29  ;;  %v10861_v28 = vmul.f32 %v19357_v37, %v10820_v12  ;;  %v11169_v60 = vadd.f32 %v19352_v5, %v11130_v10 }
 0x65b   : > { %11261 = vst [vmem:[%s19398_s21 + $0xc8] sm:$0xff] %v11229_v41  ;;  %v10897_v14 = vadd.f32 %v19366_v23, %v10858_v44  ;;  %v10859_v15 = vmul.f32 %v19357_v37, %v10812_v56 }
 0x65c   : > { %v11202_v0 = vadd.f32 %v11170_v53, %v10899_v51  ;;  %v10900_v30 = vadd.f32 %v19366_v23, %v10861_v28 }
 0x65d   : > { %v11200_v35 = vadd.f32 %v11168_v26, %v10897_v14  ;;  %v10898_v47 = vadd.f32 %v19366_v23, %v10859_v15 }
 0x65e   : > { %v11234_v36 = vmax.f32 %v11202_v0, 0.0  ;;  %v11203_v42 = vadd.f32 %v11171_v61, %v10900_v30 }
 0x65f   : > { %v11232_v37 = vmax.f32 %v11200_v35, 0.0  ;;  %v11201_v52 = vadd.f32 %v11169_v60, %v10898_v47 }
 0x660   : > { %11266 = vst [vmem:[%s19398_s21 + $0xf0] sm:$0xff] %v11234_v36  ;;  %v11235_v18 = vmax.f32 %v11203_v42, 0.0 }
 0x661   : > { %11264 = vst [vmem:[%s19398_s21 + $0xe0] sm:$0xff] %v11232_v37  ;;  %v11233_v5 = vmax.f32 %v11201_v52, 0.0 }
 0x662   : > { %11267 = vst [vmem:[%s19398_s21 + $0xf8] sm:$0xff] %v11235_v18 }
 0x663   : > { %11265 = vst [vmem:[%s19398_s21 + $0xe8] sm:$0xff] %v11233_v5 }
 0x664   : > { %14360 = shalt.err (!%p14357_p3)
}
 0x665   : > { %s14361_s11 = scalar_lea.hbm %s19593_s30, 4096  ;;  %s14365_s28 = scalar_lea.hbm %s19653_s10, 8192 }
 0x666   : > { %p14362_p4 = scmp.ne.s32.totalorder %s19593_s30, %s14361_s11  ;;  %p14366_p9 = scmp.lt.u32.totalorder %s19593_s30, %s19653_s10 }
 0x667   : > { %p14367_p10 = scmp.lt.u32.totalorder %s14365_s28, %s14361_s11  ;;  %p14369_p12 = scmp.lt.u32.totalorder %s14361_s11, %s19593_s30 }
 0x668   : > { %p14363_p7 = pnand %p14362_p4, %p14508_p5 }
 0x669   : > { %p14368_p11 = por %p14367_p10, %p14366_p9 }
 0x66a   : > { %p14364_p8 = pneg %p14363_p7 }
 0x66b   : > { %p14370_p13 = por %p14369_p12, %p14368_p11 }
 0x66d   : > { %p14371_p0 = pnand %p14370_p13, %p14364_p8 }
 0x66f   : > { %14374 = shalt.err (!%p14371_p0)
}
 0x670   : > { %s14413_s26 = smov 128   ;;  %s14414_s18 = smov 8  }
 0x671   : > { %13823 = dma.vmem_to_hbm [thread:$0]  (%p14508_p5), %s19595_s27, 4096, %s19593_s30, %s19602_s17, %s14413_s26, %s14413_s26, %s14414_s18  }
 0x672 PF: > { %p13829_p1 = scmp.ge.s32.totalorder %s14409_s16, 2  ;;  %s11298_s20 = sand.u32 1, %s14397_s13  }
 0x673   : > { %s11299_s11 = scalar_lea.sflag [#allocation4], %s11298_s20 }
 0x674   : > { %p13826_p2 = pnand %p13829_p1, %p14512_p6 }
 0x676   : > { %14392 = dma.done.wait (!%p13826_p2), %s11299_s11, 4096  }
 0x677   : > { %14394 = vsyncadd (!%p13826_p2), %s11299_s11, 4294963200  ;;  %p20_p3 = scmp.ge.s32.totalorder %s14495_s19, 4   ;;  %s20456_s13 = smov %s14401_s14 }
 0x678   : > { %s20457_s14 = smov %s14405_s15  ;;  %s20458_s15 = smov %s14506_s22 }
 0x679   : > { %s20459_s16 = smov %s14495_s19  ;;  %22 = sbr.rel (!%p20_p3) target bundleno = 3 (0x3), region = 99 }
 0x680   :  { %11304 = vsyncpa [#allocation4], 1 }
 0x681   :  { %11306 = vsyncpa [#allocation4 + $0x1], 1 }

</bundles_post_ra>
